<compile_context>
chip_gen: v5e
topology: v5e:2x2
jax: 0.10.0
libtpu: 0.0.40
codegen_flags: <defaults>
</compile_context>

<pallas_src>
import numpy as np
import jax
import jax.numpy as jnp
from jax.experimental import pallas as pl
from jax.experimental.pallas import tpu as pltpu

TINY_NUMBER = 1e-6
HUGE_NUMBER = 1e10

# ------------------------- synthetic "args" config --------------------------
MAX_FREQ_LOG2 = 6            # N_freqs for position embedder
MAX_FREQ_LOG2_VIEWDIRS = 4   # N_freqs for view-dir embedder
NETDEPTH = 4                 # args.netdepth
NETWIDTH = 128               # args.netwidth
WITH_BG = True
USE_SHADOWS = True
USE_SHADOW_JITTER = False    # keep deterministic

TILE_M = 1024                # rows per Pallas grid step (sweep 512-1024)
PACK_IN = 128                # lane width of embedded input / output slab
RAW_IN = 16                  # raw per-point channels fed to the kernel
VMEM_LIMIT_BYTES = 40 * 1024 * 1024   # explicit; keeps v7x (64 MiB VMEM) safe

C_POS_FG = 3 * (2 * MAX_FREQ_LOG2 + 1)        # 39
C_POS_BG = 4 * (2 * MAX_FREQ_LOG2 + 1)        # 52
C_VD = 3 * (2 * MAX_FREQ_LOG2_VIEWDIRS + 1)   # 27

# Output lane layout of the kernel's [tile, 128] slab.
COL_SIGMA = 0
COL_RGB0 = 1       # rgb occupies lanes 1..3
COL_SHADOW = 4
COL_GRAD0 = 5      # d(sigma)/d(pts) occupies lanes 5..7 (fg network only)


# ------------------------------ plain-JAX glue -------------------------------
def illuminate_vec(n, env):
    """SH-9 irradiance from normal n [...,3] and env coefficients [9,3]."""
    x, y, z = n[..., 0], n[..., 1], n[..., 2]
    sh = jnp.stack(
        [
            jnp.full_like(x, 0.282095),
            0.488603 * y,
            0.488603 * z,
            0.488603 * x,
            1.092548 * x * y,
            1.092548 * y * z,
            0.315392 * (3.0 * z * z - 1.0),
            1.092548 * x * z,
            0.546274 * (x * x - y * y),
        ],
        axis=-1,
    )  # [..., 9]
    return sh @ env  # [..., 3]


def depth2pts_outside(ray_o, ray_d, depth):
    d1 = -jnp.sum(ray_d * ray_o, axis=-1) / jnp.sum(ray_d * ray_d, axis=-1)
    p_mid = ray_o + d1[..., None] * ray_d
    p_mid_norm = jnp.linalg.norm(p_mid, axis=-1)
    ray_d_cos = 1.0 / jnp.linalg.norm(ray_d, axis=-1)
    d2 = jnp.sqrt(1.0 - p_mid_norm * p_mid_norm) * ray_d_cos
    p_sphere = ray_o + (d1 + d2)[..., None] * ray_d
    rot_axis = jnp.cross(ray_o, p_sphere, axis=-1)
    rot_axis = rot_axis / jnp.linalg.norm(rot_axis, axis=-1, keepdims=True)
    phi = jnp.arcsin(p_mid_norm)
    theta = jnp.arcsin(p_mid_norm * depth)
    rot_angle = (phi - theta)[..., None]
    p_sphere_new = (
        p_sphere * jnp.cos(rot_angle)
        + jnp.cross(rot_axis, p_sphere, axis=-1) * jnp.sin(rot_angle)
        + rot_axis
        * jnp.sum(rot_axis * p_sphere, axis=-1, keepdims=True)
        * (1.0 - jnp.cos(rot_angle))
    )
    p_sphere_new = p_sphere_new / jnp.linalg.norm(p_sphere_new, axis=-1, keepdims=True)
    pts = jnp.concatenate([p_sphere_new, depth[..., None]], axis=-1)
    depth_real = 1.0 / (depth + TINY_NUMBER) * jnp.cos(theta) * ray_d_cos + d1
    return pts, depth_real


# --------------------------- Pallas MLP hot path -----------------------------
def make_mlp_kernel(D, W, compute_grad):
    """Per-point MLP: in-kernel positional encoding + trunk + fused heads.

    Ref order:
      raw[tile,16]f32, sel[16,128]f32, ltype[1,128]f32,
      trunk_w[D,128,128]bf16, trunk_b[D,1,128]f32,
      (trunk_wT[D,128,128]bf16)?,
      remap_w[128,128]bf16, remap_b[1,128]f32,
      sig_w[1,128]f32, sig_b[1,1]f32,
      h1_w[256,128]bf16, h1_b[1,128]f32,
      head_w[{256|128},128]bf16, head_b[1,128]f32,
      out[tile,128]f32

    out lanes: 0 sigma, 1..3 rgb, 4 shadow, 5..7 d(sigma)/d(pts) (grad only),
    rest unused garbage.
    """

    def kernel(*refs):
        it = iter(refs)
        raw_ref = next(it)
        sel_ref = next(it)
        lt_ref = next(it)
        tw_ref = next(it)
        tb_ref = next(it)
        if compute_grad:
            twt_ref = next(it)
        rw_ref = next(it)
        rb_ref = next(it)
        sgw_ref = next(it)
        sgb_ref = next(it)
        h1w_ref = next(it)
        h1b_ref = next(it)
        hdw_ref = next(it)
        hdb_ref = next(it)
        out_ref = next(it)

        f32 = jnp.float32
        bf16 = jnp.bfloat16

        # ---- in-kernel positional encoding (EUP sin/cos is nearly free) ----
        raw = raw_ref[...]                                          # [tile,16] f32
        rep = jnp.dot(raw, sel_ref[...], preferred_element_type=f32)  # [tile,128]
        sn = jnp.sin(rep)
        cs = jnp.cos(rep)
        lt = lt_ref[...]                                            # 0=id,1=sin,2=cos
        emb = jnp.where(lt == 1.0, sn, jnp.where(lt == 2.0, cs, rep))
        x = emb.astype(bf16)                                        # packed input

        # ---- trunk: D ReLU layers, bf16 MXU operands, f32 accumulation ----
        h = x
        acts = []                                                   # bf16 (less spill)
        for l in range(D):
            pre = jnp.dot(h, tw_ref[l], preferred_element_type=f32) + tb_ref[l]
            h = jnp.maximum(pre, 0.0).astype(bf16)
            acts.append(h)

        # ---- sigma head: VPU multiply + XLU lane reduce (no MXU pass) ----
        sigma_pre = jnp.sum(h * sgw_ref[...], axis=-1, keepdims=True) + sgb_ref[...]
        sigma = jnp.abs(sigma_pre)                                  # [tile,1]

        # ---- remap + fused K=256 rgb/shadow hidden layer ----
        remap = jnp.dot(h, rw_ref[...], preferred_element_type=f32) + rb_ref[...]
        h1_in = jnp.concatenate([remap.astype(bf16), x], axis=-1)   # [tile,256]
        h1 = jnp.maximum(
            jnp.dot(h1_in, h1w_ref[...], preferred_element_type=f32) + h1b_ref[...],
            0.0,
        )

        # ---- d(sigma)/d(pts): in-kernel trunk backward + embedding chain ----
        if compute_grad:
            g = jnp.where(sigma_pre >= 0.0, 1.0, -1.0) * sgw_ref[...]   # [tile,128]
            for l in range(D - 1, -1, -1):
                g = jnp.where(acts[l] > 0, g, 0.0)
                g = jnp.dot(g.astype(bf16), twt_ref[l],
                            preferred_element_type=f32)
            demb = jnp.where(lt == 1.0, cs, jnp.where(lt == 2.0, -sn, 1.0))
            gmask = (g * demb).astype(bf16)                         # [tile,128]
            head_in = jnp.concatenate([h1.astype(bf16), gmask], axis=-1)  # K=256
        else:
            head_in = h1.astype(bf16)                               # K=128

        # ---- fused output head: rgb->1..3, shadow->4, grad->5..7 ----
        z = jnp.dot(head_in, hdw_ref[...], preferred_element_type=f32) + hdb_ref[...]
        sig_act = pl.reciprocal(1.0 + jnp.exp(-z), approx=True)     # sigmoid via EUP
        lane = jax.lax.broadcasted_iota(jnp.int32, z.shape, 1)
        res = jnp.where(lane == COL_SIGMA, sigma, sig_act)
        if compute_grad:
            res = jnp.where((lane >= COL_GRAD0) & (lane < COL_GRAD0 + 3), z, res)
        out_ref[...] = res                                          # single unmasked store

    return kernel


# ----------------------- embedding constants (host-side) ---------------------
def build_embed_constants(pos_dim, n_pos_freq, n_vd_freq, use_sph):
    """Frequency-selection matrix + lane-type vector for in-kernel embedding.

    Raw channel layout (RAW_IN=16): [pos(pos_dim) | viewdir(3) | sph(9)? | pad]
    Packed lane layout matches the weight packing:
      [embed(pos) | sph? | embed(viewdir) | zero-pad]
    """
    sel = np.zeros((RAW_IN, PACK_IN), np.float32)
    ltype = np.zeros((1, PACK_IN), np.float32)     # 0=identity, 1=sin, 2=cos
    pos_ch = list(range(pos_dim))
    vd_ch = list(range(pos_dim, pos_dim + 3))
    sph_ch = list(range(pos_dim + 3, pos_dim + 12)) if use_sph else []
    lane = [0]

    def put(chans, freq, t):
        for c in chans:
            sel[c, lane[0]] = freq
            ltype[0, lane[0]] = t
            lane[0] += 1

    put(pos_ch, 1.0, 0.0)
    for k in range(n_pos_freq):
        put(pos_ch, 2.0 ** k, 1.0)
        put(pos_ch, 2.0 ** k, 2.0)
    if use_sph:
        put(sph_ch, 1.0, 0.0)
    put(vd_ch, 1.0, 0.0)
    for k in range(n_vd_freq):
        put(vd_ch, 2.0 ** k, 1.0)
        put(vd_ch, 2.0 ** k, 2.0)
    assert lane[0] <= PACK_IN
    return jnp.asarray(sel), jnp.asarray(ltype)


# ------------------------------ parameter init -------------------------------
def _linear(key, fan_in, fan_out):
    w = jax.random.normal(key, (fan_in, fan_out), dtype=jnp.float32) * (fan_in ** -0.5)
    b = jnp.zeros((1, fan_out), dtype=jnp.float32)
    return w, b


def init_mlp_params(key, D, W, c_pos, c_vd, use_shadow):
    keys = jax.random.split(key, D + 8)
    params = []
    dim = c_pos
    for l in range(D):
        w, b = _linear(keys[l], dim, W)
        params += [w, b]
        dim = W
    sw, sb = _linear(keys[D], W, 1); params += [sw, sb]
    rw, rb = _linear(keys[D + 1], W, W); params += [rw, rb]
    wa, _ = _linear(keys[D + 2], W, W // 2)
    wv, b1 = _linear(keys[D + 3], c_vd, W // 2)
    w2, b2 = _linear(keys[D + 4], W // 2, 3)
    params += [wa, wv, b1, w2, b2]
    if use_shadow:
        swa, _ = _linear(keys[D + 5], W, W // 2)
        sws, shb1 = _linear(keys[D + 6], 9, W // 2)
        sw2, shb2 = _linear(keys[D + 7], W // 2, 1)
        params += [swa, sws, shb1, sw2, shb2]
    return params


def pack_mlp_params(params, D, W, pos_dim, use_shadow, compute_grad):
    """Pack raw f32 params + embedding constants into lane-dense kernel slabs.

    Called ONCE, outside the jitted forward (pure constant work per model).
    """
    assert W == NETWIDTH == PACK_IN
    H = W // 2
    c_pos = pos_dim * (2 * MAX_FREQ_LOG2 + 1)
    c_vd = C_VD
    sel, ltype = build_embed_constants(pos_dim, MAX_FREQ_LOG2,
                                       MAX_FREQ_LOG2_VIEWDIRS, use_shadow)
    idx = 0
    trunk_w, trunk_b, trunk_wT = [], [], []
    for l in range(D):
        w, b = params[idx], params[idx + 1]; idx += 2
        if l == 0:
            # trunk consumes only the positional-embedding lanes
            w = jnp.pad(w, ((0, PACK_IN - c_pos), (0, 0)))
        trunk_w.append(w); trunk_b.append(b); trunk_wT.append(w.T)
    sw, sb = params[idx], params[idx + 1]; idx += 2           # sigma head
    rw, rb = params[idx], params[idx + 1]; idx += 2           # remap
    wa, wv, b1, w2, b2 = params[idx:idx + 5]; idx += 5

    vd_off = c_pos + (9 if use_shadow else 0)
    haw = jnp.zeros((W, W), jnp.float32).at[:, :H].set(wa)                  # remap -> hidden
    hbw = jnp.zeros((PACK_IN, W), jnp.float32).at[vd_off:vd_off + c_vd, :H].set(wv)
    h1b = jnp.zeros((1, W), jnp.float32).at[:, :H].set(b1)
    h2w = jnp.zeros((W, W), jnp.float32).at[:H, COL_RGB0:COL_RGB0 + 3].set(w2)
    h2b = jnp.zeros((1, W), jnp.float32).at[:, COL_RGB0:COL_RGB0 + 3].set(b2)
    if use_shadow:
        swa, sws, shb1, sw2, shb2 = params[idx:idx + 5]; idx += 5
        haw = haw.at[:, H:].set(swa)
        hbw = hbw.at[c_pos:c_pos + 9, H:].set(sws)
        h1b = h1b.at[:, H:].set(shb1)
        h2w = h2w.at[H:, COL_SHADOW:COL_SHADOW + 1].set(sw2)
        h2b = h2b.at[:, COL_SHADOW:COL_SHADOW + 1].set(shb2)

    # K=256 fusion of the two h1 dots: rows 0..127 remap weights, 128..255 packed-x weights
    h1_w = jnp.concatenate([haw, hbw], axis=0)               # [256,128]

    # final head: rows 0..127 map hidden -> rgb/shadow lanes; when grad is needed,
    # rows 128..255 project the masked embedding-grad onto d(sigma)/d(pts) lanes.
    if compute_grad:
        gsel = jnp.zeros((PACK_IN, W), jnp.float32)
        gsel = gsel.at[:, COL_GRAD0:COL_GRAD0 + 3].set(sel[:3, :].T)
        head_w = jnp.concatenate([h2w, gsel], axis=0)        # [256,128]
    else:
        head_w = h2w                                          # [128,128]

    bf = jnp.bfloat16
    packed = dict(
        sel=sel, ltype=ltype,
        trunk_w=jnp.stack(trunk_w).astype(bf),                # [D,128,128]
        trunk_b=jnp.stack(trunk_b),                           # [D,1,128] f32
        remap_w=rw.astype(bf), remap_b=rb,
        sig_w=sw.reshape(1, W), sig_b=sb.reshape(1, 1),
        h1_w=h1_w.astype(bf), h1_b=h1b,
        head_w=head_w.astype(bf), head_b=h2b,
    )
    if compute_grad:
        packed["trunk_wT"] = jnp.stack(trunk_wT).astype(bf)   # [D,128,128]
    return packed


# -------------------------------- MLP wrapper --------------------------------
def _param_order(compute_grad):
    return (("sel", "ltype", "trunk_w", "trunk_b")
            + (("trunk_wT",) if compute_grad else ())
            + ("remap_w", "remap_b", "sig_w", "sig_b",
               "h1_w", "h1_b", "head_w", "head_b"))


def _round_up(x, m):
    return ((x + m - 1) // m) * m


def run_mlp(packed, raw, *, D, compute_grad, tile_m=TILE_M):
    """Run the Pallas MLP over M raw points [M,16] f32. Returns [M,128] f32."""
    M = raw.shape[0]
    # Adaptive tile: big tiles for big batches, but always >=2 grid steps when
    # possible so both v7x TensorCores get work; rows kept a multiple of 16.
    half = max((M + 1) // 2, 8)
    tile_m_eff = min(tile_m, _round_up(half, 16))
    Mp = _round_up(M, tile_m_eff)
    if Mp != M:
        raw = jnp.pad(raw, ((0, Mp - M), (0, 0)))

    order = _param_order(compute_grad)
    param_list = [packed[k] for k in order]

    row_spec = pl.BlockSpec((tile_m_eff, RAW_IN), lambda g: (g, 0))
    in_specs = [row_spec] + [
        pl.BlockSpec(p.shape, lambda g, n=p.ndim: (0,) * n) for p in param_list
    ]
    out_spec = pl.BlockSpec((tile_m_eff, PACK_IN), lambda g: (g, 0))

    out = pl.pallas_call(
        make_mlp_kernel(D, NETWIDTH, compute_grad),
        out_shape=jax.ShapeDtypeStruct((Mp, PACK_IN), jnp.float32),
        grid=(Mp // tile_m_eff,),
        in_specs=in_specs,
        out_specs=out_spec,
        compiler_params=pltpu.CompilerParams(
            dimension_semantics=("parallel",),
            vmem_limit_bytes=VMEM_LIMIT_BYTES),
    )(raw, *param_list)
    return out[:M]


def pack_raw_inputs(*parts):
    """Pack raw per-point channels into a single [M, 16] f32 slab."""
    x = jnp.concatenate([p.astype(jnp.float32) for p in parts], axis=-1)
    assert x.shape[-1] <= RAW_IN
    return jnp.pad(x, ((0, 0), (0, RAW_IN - x.shape[-1])))


# -------------------------------- NerfNet fwd --------------------------------
def nerf_net_forward(fg_packed, bg_packed, ray_o, ray_d, fg_z_max, fg_z_vals,
                     bg_z_vals, env, iteration):
    del iteration  # TODO(synk): frequency annealing (use_annealing) omitted; weights == 1.
    dots = ray_d.shape[:-1]

    ray_d_norm = jnp.linalg.norm(ray_d, axis=-1, keepdims=True)
    viewdirs = ray_d / ray_d_norm

    # ---------------- foreground ----------------
    Nf = fg_z_vals.shape[-1]
    fg_ray_o = jnp.broadcast_to(ray_o[..., None, :], dots + (Nf, 3))
    fg_ray_d = jnp.broadcast_to(ray_d[..., None, :], dots + (Nf, 3))
    fg_viewdirs = jnp.broadcast_to(viewdirs[..., None, :], dots + (Nf, 3))
    env_gray = env[..., 0] * 0.2126 + env[..., 1] * 0.7152 + env[..., 2] * 0.0722
    fg_sph = jnp.broadcast_to(env_gray.reshape(9), dots + (Nf, 9))
    # TODO(synk): use_shadow_jitter randn noise omitted (flag set False).

    fg_pts = fg_ray_o + fg_z_vals[..., None] * fg_ray_d

    fg_raw_in = pack_raw_inputs(fg_pts.reshape(-1, 3),
                                fg_viewdirs.reshape(-1, 3),
                                fg_sph.reshape(-1, 9))
    fg_out = run_mlp(fg_packed, fg_raw_in, D=NETDEPTH, compute_grad=True)
    fg_sigma = fg_out[:, COL_SIGMA].reshape(dots + (Nf,))
    fg_rgb = fg_out[:, COL_RGB0:COL_RGB0 + 3].reshape(dots + (Nf, 3))
    fg_shadow = fg_out[:, COL_SHADOW:COL_SHADOW + 1].reshape(dots + (Nf, 1))
    # normal map = d(sigma)/d(fg_pts): trunk backward + embedding chain rule
    # were both done inside the Pallas kernel (lanes 5..7 of the out slab).
    fg_normal = fg_out[:, COL_GRAD0:COL_GRAD0 + 3].reshape(dots + (Nf, 3))

    fg_dists = fg_z_vals[..., 1:] - fg_z_vals[..., :-1]
    fg_dists = ray_d_norm * jnp.concatenate(
        [fg_dists, fg_z_max[..., None] - fg_z_vals[..., -1:]], axis=-1)
    fg_alpha = 1.0 - jnp.exp(-fg_sigma * fg_dists)
    T = jnp.cumprod(1.0 - fg_alpha + TINY_NUMBER, axis=-1)
    bg_lambda = T[..., -1]
    T = jnp.concatenate([jnp.ones_like(T[..., 0:1]), T[..., :-1]], axis=-1)
    fg_weights = fg_alpha * T
    fg_albedo_map = jnp.sum(fg_weights[..., None] * fg_rgb, axis=-2)
    fg_shadow_map = jnp.sum(fg_weights[..., None] * fg_shadow, axis=-2)
    if not USE_SHADOWS:
        fg_shadow_map = fg_shadow_map * 0 + 1
    fg_depth_map = jnp.sum(fg_weights * fg_z_vals, axis=-1)
    fg_normal_map = jnp.mean(fg_normal * fg_weights[..., None], axis=-2)
    fg_normal_map = fg_normal_map / jnp.maximum(
        jnp.linalg.norm(fg_normal_map, axis=-1, keepdims=True), 1e-12)
    irradiance = illuminate_vec(fg_normal_map, env)
    irradiance = jnp.maximum(irradiance, 0.0)
    irradiance = irradiance ** (1.0 / 2.2)
    fg_pure_rgb_map = irradiance * fg_albedo_map
    fg_rgb_map = fg_pure_rgb_map * fg_shadow_map

    # ---------------- background (NeRF++ inverted sphere) ----------------
    Nb = bg_z_vals.shape[-1]
    bg_ray_o = jnp.broadcast_to(ray_o[..., None, :], dots + (Nb, 3))
    bg_ray_d = jnp.broadcast_to(ray_d[..., None, :], dots + (Nb, 3))
    bg_viewdirs = jnp.broadcast_to(viewdirs[..., None, :], dots + (Nb, 3))
    bg_pts, _ = depth2pts_outside(bg_ray_o, bg_ray_d, bg_z_vals)
    # torch.flip(input, dims=[-2]) on the embedded input == flipping the raw
    # per-sample inputs before the (pointwise) network.
    bg_pts = jnp.flip(bg_pts, axis=-2)
    bg_viewdirs_f = jnp.flip(bg_viewdirs, axis=-2)
    bg_z_vals = jnp.flip(bg_z_vals, axis=-1)
    bg_dists = bg_z_vals[..., :-1] - bg_z_vals[..., 1:]
    bg_dists = jnp.concatenate(
        [bg_dists, HUGE_NUMBER * jnp.ones_like(bg_dists[..., 0:1])], axis=-1)

    bg_raw_in = pack_raw_inputs(bg_pts.reshape(-1, 4),
                                bg_viewdirs_f.reshape(-1, 3))
    bg_out = run_mlp(bg_packed, bg_raw_in, D=NETDEPTH, compute_grad=False)
    bg_sigma = bg_out[:, COL_SIGMA].reshape(dots + (Nb,))
    bg_rgb = bg_out[:, COL_RGB0:COL_RGB0 + 3].reshape(dots + (Nb, 3))

    bg_alpha = 1.0 - jnp.exp(-bg_sigma * bg_dists)
    T = jnp.cumprod(1.0 - bg_alpha + TINY_NUMBER, axis=-1)[..., :-1]
    T = jnp.concatenate([jnp.ones_like(T[..., 0:1]), T], axis=-1)
    bg_weights = bg_alpha * T
    bg_rgb_map = jnp.sum(bg_weights[..., None] * bg_rgb, axis=-2)
    bg_depth_map = jnp.sum(bg_weights * bg_z_vals, axis=-1)
    bg_rgb_map = bg_lambda[..., None] * bg_rgb_map
    bg_depth_map = bg_lambda * bg_depth_map

    if WITH_BG:
        pure_rgb_map = fg_pure_rgb_map + bg_rgb_map
        rgb_map = fg_rgb_map + bg_rgb_map
    else:
        pure_rgb_map = fg_pure_rgb_map + bg_rgb_map * 0
        rgb_map = fg_rgb_map + bg_rgb_map * 0
    shadow_map = fg_shadow_map

    return {
        "rgb": rgb_map,
        "pure_rgb": pure_rgb_map,
        "shadow": shadow_map,
        "fg_weights": fg_weights,
        "bg_weights": bg_weights,
        "fg_rgb": fg_rgb_map,
        "fg_albedo": fg_albedo_map,
        "fg_shadow": fg_shadow_map,
        "fg_depth": fg_depth_map,
        "fg_normal": fg_normal_map,
        "irradiance": irradiance,
        "bg_rgb": bg_rgb_map,
        "bg_depth": bg_depth_map,
        "bg_lambda": bg_lambda,
        "viewdir": viewdirs,
    }


# ----------------------------------- main ------------------------------------
if __name__ == "__main__":
    key = jax.random.PRNGKey(0)
    k1, k2, k3, k4, k5 = jax.random.split(key, 5)

    R, Nf, Nb = 8, 16, 16
    ray_o = 0.1 * jax.random.normal(k1, (R, 3), dtype=jnp.float32)   # inside unit sphere
    ray_d = jax.random.normal(k2, (R, 3), dtype=jnp.float32)
    fg_z_vals = jnp.broadcast_to(
        jnp.linspace(0.05, 1.0, Nf, dtype=jnp.float32), (R, Nf))
    fg_z_max = fg_z_vals[..., -1] + 0.1
    bg_z_vals = jnp.broadcast_to(
        jnp.linspace(0.05, 0.95, Nb, dtype=jnp.float32), (R, Nb))    # inverse depth
    env = 0.1 + 0.5 * jax.random.uniform(k3, (9, 3), dtype=jnp.float32)

    fg_params = init_mlp_params(k4, NETDEPTH, NETWIDTH, C_POS_FG, C_VD, use_shadow=True)
    bg_params = init_mlp_params(k5, NETDEPTH, NETWIDTH, C_POS_BG, C_VD, use_shadow=False)

    # Pack weights (pads / transposes / bf16 casts / embedding constants) ONCE,
    # outside the jitted forward.
    fg_packed = pack_mlp_params(fg_params, NETDEPTH, NETWIDTH, pos_dim=3,
                                use_shadow=True, compute_grad=True)
    bg_packed = pack_mlp_params(bg_params, NETDEPTH, NETWIDTH, pos_dim=4,
                                use_shadow=False, compute_grad=False)

    forward = jax.jit(nerf_net_forward)
    out = forward(fg_packed, bg_packed, ray_o, ray_d, fg_z_max,
                  fg_z_vals, bg_z_vals, env, 0)
    jax.block_until_ready(out)

    assert out["rgb"].shape == (R, 3)
    assert out["pure_rgb"].shape == (R, 3)
    assert out["fg_weights"].shape == (R, Nf)
    assert out["bg_weights"].shape == (R, Nb)
    assert out["shadow"].shape == (R, 1)
    assert out["fg_normal"].shape == (R, 3)
    assert bool(jnp.all(jnp.isfinite(out["rgb"])))
    print("KERNEL_OK")
</pallas_src>

<mosaic_0001>
module attributes {stable_mosaic.version = 11 : i64} {
  func.func @kernel(%arg0: i32, %arg1: memref<64x16xf32, #tpu.memory_space<vmem>>, %arg2: memref<16x128xf32, #tpu.memory_space<vmem>>, %arg3: memref<1x128xf32, #tpu.memory_space<vmem>>, %arg4: memref<4x128x128xbf16, #tpu.memory_space<vmem>>, %arg5: memref<4x1x128xf32, #tpu.memory_space<vmem>>, %arg6: memref<4x128x128xbf16, #tpu.memory_space<vmem>>, %arg7: memref<128x128xbf16, #tpu.memory_space<vmem>>, %arg8: memref<1x128xf32, #tpu.memory_space<vmem>>, %arg9: memref<1x128xf32, #tpu.memory_space<vmem>>, %arg10: memref<1x1xf32, #tpu.memory_space<vmem>>, %arg11: memref<256x128xbf16, #tpu.memory_space<vmem>>, %arg12: memref<1x128xf32, #tpu.memory_space<vmem>>, %arg13: memref<256x128xbf16, #tpu.memory_space<vmem>>, %arg14: memref<1x128xf32, #tpu.memory_space<vmem>>, %arg15: memref<64x128xf32, #tpu.memory_space<vmem>>) attributes {dimension_semantics = [#tpu.dimension_semantics<parallel>], iteration_bounds = array<i64: 2>, scalar_prefetch = 0 : i64, scratch_operands = 0 : i64, tpu.core_type = #tpu.core_type<tc>, window_params = [{transform_indices = @transform_0, window_bounds = array<i64: 64, 16>}, {pipeline_mode = #tpu.pipeline_mode<synchronous>, transform_indices = @transform_1, window_bounds = array<i64: 16, 128>}, {pipeline_mode = #tpu.pipeline_mode<synchronous>, transform_indices = @transform_2, window_bounds = array<i64: 1, 128>}, {pipeline_mode = #tpu.pipeline_mode<synchronous>, transform_indices = @transform_3, window_bounds = array<i64: 4, 128, 128>}, {pipeline_mode = #tpu.pipeline_mode<synchronous>, transform_indices = @transform_4, window_bounds = array<i64: 4, 1, 128>}, {pipeline_mode = #tpu.pipeline_mode<synchronous>, transform_indices = @transform_5, window_bounds = array<i64: 4, 128, 128>}, {pipeline_mode = #tpu.pipeline_mode<synchronous>, transform_indices = @transform_6, window_bounds = array<i64: 128, 128>}, {pipeline_mode = #tpu.pipeline_mode<synchronous>, transform_indices = @transform_7, window_bounds = array<i64: 1, 128>}, {pipeline_mode = #tpu.pipeline_mode<synchronous>, transform_indices = @transform_8, window_bounds = array<i64: 1, 128>}, {pipeline_mode = #tpu.pipeline_mode<synchronous>, transform_indices = @transform_9, window_bounds = array<i64: 1, 1>}, {pipeline_mode = #tpu.pipeline_mode<synchronous>, transform_indices = @transform_10, window_bounds = array<i64: 256, 128>}, {pipeline_mode = #tpu.pipeline_mode<synchronous>, transform_indices = @transform_11, window_bounds = array<i64: 1, 128>}, {pipeline_mode = #tpu.pipeline_mode<synchronous>, transform_indices = @transform_12, window_bounds = array<i64: 256, 128>}, {pipeline_mode = #tpu.pipeline_mode<synchronous>, transform_indices = @transform_13, window_bounds = array<i64: 1, 128>}, {transform_indices = @transform_14, window_bounds = array<i64: 64, 128>}]} {
    %c0 = arith.constant 0 : index
    %c0_0 = arith.constant 0 : index
    %0 = vector.load %arg1[%c0, %c0_0] : memref<64x16xf32, #tpu.memory_space<vmem>>, vector<64x16xf32>
    %c0_1 = arith.constant 0 : index
    %c0_2 = arith.constant 0 : index
    %1 = vector.load %arg2[%c0_1, %c0_2] : memref<16x128xf32, #tpu.memory_space<vmem>>, vector<16x128xf32>
    %cst = arith.constant dense<0.000000e+00> : vector<64x128xf32>
    %2 = tpu.matmul %0, %1, %cst {dimension_numbers = #tpu.dot_dimension_numbers<[1], [0], [0], [1], [0, 0, 1, 1], [], []>} : vector<64x16xf32>, vector<16x128xf32>, vector<64x128xf32> -> vector<64x128xf32>
    %3 = math.sin %2 : vector<64x128xf32>
    %4 = math.cos %2 : vector<64x128xf32>
    %c0_3 = arith.constant 0 : index
    %c0_4 = arith.constant 0 : index
    %5 = vector.load %arg3[%c0_3, %c0_4] : memref<1x128xf32, #tpu.memory_space<vmem>>, vector<1x128xf32>
    %cst_5 = arith.constant 1.000000e+00 : f32
    %6 = vector.broadcast %cst_5 : f32 to vector<1x128xf32>
    %7 = arith.cmpf oeq, %5, %6 : vector<1x128xf32>
    %cst_6 = arith.constant 2.000000e+00 : f32
    %8 = vector.broadcast %cst_6 : f32 to vector<1x128xf32>
    %9 = arith.cmpf oeq, %5, %8 : vector<1x128xf32>
    %10 = vector.shape_cast %9 : vector<1x128xi1> to vector<1x128xi1>
    %11 = vector.broadcast %10 : vector<1x128xi1> to vector<64x128xi1>
    %12 = arith.select %11, %4, %2 : vector<64x128xi1>, vector<64x128xf32>
    %13 = vector.shape_cast %7 : vector<1x128xi1> to vector<1x128xi1>
    %14 = vector.broadcast %13 : vector<1x128xi1> to vector<64x128xi1>
    %15 = arith.select %14, %3, %12 : vector<64x128xi1>, vector<64x128xf32>
    %16 = arith.truncf %15 : vector<64x128xf32> to vector<64x128xbf16>
    %c0_7 = arith.constant 0 : index
    %c0_8 = arith.constant 0 : index
    %c0_9 = arith.constant 0 : index
    %17 = vector.load %arg4[%c0_7, %c0_8, %c0_9] : memref<4x128x128xbf16, #tpu.memory_space<vmem>>, vector<1x128x128xbf16>
    %18 = vector.shape_cast %17 : vector<1x128x128xbf16> to vector<128x128xbf16>
    %cst_10 = arith.constant dense<0.000000e+00> : vector<64x128xf32>
    %19 = tpu.matmul %16, %18, %cst_10 {dimension_numbers = #tpu.dot_dimension_numbers<[1], [0], [0], [1], [0, 0, 1, 1], [], []>} : vector<64x128xbf16>, vector<128x128xbf16>, vector<64x128xf32> -> vector<64x128xf32>
    %c0_11 = arith.constant 0 : index
    %c0_12 = arith.constant 0 : index
    %c0_13 = arith.constant 0 : index
    %20 = vector.load %arg5[%c0_11, %c0_12, %c0_13] : memref<4x1x128xf32, #tpu.memory_space<vmem>>, vector<1x1x128xf32>
    %21 = vector.shape_cast %20 : vector<1x1x128xf32> to vector<1x128xf32>
    %22 = vector.broadcast %21 : vector<1x128xf32> to vector<64x128xf32>
    %23 = arith.addf %19, %22 : vector<64x128xf32>
    %cst_14 = arith.constant 0.000000e+00 : f32
    %24 = vector.broadcast %cst_14 : f32 to vector<64x128xf32>
    %25 = arith.maximumf %23, %24 : vector<64x128xf32>
    %26 = arith.truncf %25 : vector<64x128xf32> to vector<64x128xbf16>
    %c1 = arith.constant 1 : index
    %c0_15 = arith.constant 0 : index
    %c0_16 = arith.constant 0 : index
    %27 = vector.load %arg4[%c1, %c0_15, %c0_16] : memref<4x128x128xbf16, #tpu.memory_space<vmem>>, vector<1x128x128xbf16>
    %28 = vector.shape_cast %27 : vector<1x128x128xbf16> to vector<128x128xbf16>
    %cst_17 = arith.constant dense<0.000000e+00> : vector<64x128xf32>
    %29 = tpu.matmul %26, %28, %cst_17 {dimension_numbers = #tpu.dot_dimension_numbers<[1], [0], [0], [1], [0, 0, 1, 1], [], []>} : vector<64x128xbf16>, vector<128x128xbf16>, vector<64x128xf32> -> vector<64x128xf32>
    %c1_18 = arith.constant 1 : index
    %c0_19 = arith.constant 0 : index
    %c0_20 = arith.constant 0 : index
    %30 = vector.load %arg5[%c1_18, %c0_19, %c0_20] : memref<4x1x128xf32, #tpu.memory_space<vmem>>, vector<1x1x128xf32>
    %31 = vector.shape_cast %30 : vector<1x1x128xf32> to vector<1x128xf32>
    %32 = vector.broadcast %31 : vector<1x128xf32> to vector<64x128xf32>
    %33 = arith.addf %29, %32 : vector<64x128xf32>
    %cst_21 = arith.constant 0.000000e+00 : f32
    %34 = vector.broadcast %cst_21 : f32 to vector<64x128xf32>
    %35 = arith.maximumf %33, %34 : vector<64x128xf32>
    %36 = arith.truncf %35 : vector<64x128xf32> to vector<64x128xbf16>
    %c2 = arith.constant 2 : index
    %c0_22 = arith.constant 0 : index
    %c0_23 = arith.constant 0 : index
    %37 = vector.load %arg4[%c2, %c0_22, %c0_23] : memref<4x128x128xbf16, #tpu.memory_space<vmem>>, vector<1x128x128xbf16>
    %38 = vector.shape_cast %37 : vector<1x128x128xbf16> to vector<128x128xbf16>
    %cst_24 = arith.constant dense<0.000000e+00> : vector<64x128xf32>
    %39 = tpu.matmul %36, %38, %cst_24 {dimension_numbers = #tpu.dot_dimension_numbers<[1], [0], [0], [1], [0, 0, 1, 1], [], []>} : vector<64x128xbf16>, vector<128x128xbf16>, vector<64x128xf32> -> vector<64x128xf32>
    %c2_25 = arith.constant 2 : index
    %c0_26 = arith.constant 0 : index
    %c0_27 = arith.constant 0 : index
    %40 = vector.load %arg5[%c2_25, %c0_26, %c0_27] : memref<4x1x128xf32, #tpu.memory_space<vmem>>, vector<1x1x128xf32>
    %41 = vector.shape_cast %40 : vector<1x1x128xf32> to vector<1x128xf32>
    %42 = vector.broadcast %41 : vector<1x128xf32> to vector<64x128xf32>
    %43 = arith.addf %39, %42 : vector<64x128xf32>
    %cst_28 = arith.constant 0.000000e+00 : f32
    %44 = vector.broadcast %cst_28 : f32 to vector<64x128xf32>
    %45 = arith.maximumf %43, %44 : vector<64x128xf32>
    %46 = arith.truncf %45 : vector<64x128xf32> to vector<64x128xbf16>
    %c3 = arith.constant 3 : index
    %c0_29 = arith.constant 0 : index
    %c0_30 = arith.constant 0 : index
    %47 = vector.load %arg4[%c3, %c0_29, %c0_30] : memref<4x128x128xbf16, #tpu.memory_space<vmem>>, vector<1x128x128xbf16>
    %48 = vector.shape_cast %47 : vector<1x128x128xbf16> to vector<128x128xbf16>
    %cst_31 = arith.constant dense<0.000000e+00> : vector<64x128xf32>
    %49 = tpu.matmul %46, %48, %cst_31 {dimension_numbers = #tpu.dot_dimension_numbers<[1], [0], [0], [1], [0, 0, 1, 1], [], []>} : vector<64x128xbf16>, vector<128x128xbf16>, vector<64x128xf32> -> vector<64x128xf32>
    %c3_32 = arith.constant 3 : index
    %c0_33 = arith.constant 0 : index
    %c0_34 = arith.constant 0 : index
    %50 = vector.load %arg5[%c3_32, %c0_33, %c0_34] : memref<4x1x128xf32, #tpu.memory_space<vmem>>, vector<1x1x128xf32>
    %51 = vector.shape_cast %50 : vector<1x1x128xf32> to vector<1x128xf32>
    %52 = vector.broadcast %51 : vector<1x128xf32> to vector<64x128xf32>
    %53 = arith.addf %49, %52 : vector<64x128xf32>
    %cst_35 = arith.constant 0.000000e+00 : f32
    %54 = vector.broadcast %cst_35 : f32 to vector<64x128xf32>
    %55 = arith.maximumf %53, %54 : vector<64x128xf32>
    %56 = arith.truncf %55 : vector<64x128xf32> to vector<64x128xbf16>
    %c0_36 = arith.constant 0 : index
    %c0_37 = arith.constant 0 : index
    %57 = vector.load %arg9[%c0_36, %c0_37] : memref<1x128xf32, #tpu.memory_space<vmem>>, vector<1x128xf32>
    %58 = arith.extf %56 : vector<64x128xbf16> to vector<64x128xf32>
    %59 = vector.broadcast %57 : vector<1x128xf32> to vector<64x128xf32>
    %60 = arith.mulf %58, %59 : vector<64x128xf32>
    %cst_38 = arith.constant dense<0.000000e+00> : vector<64xf32>
    %61 = vector.multi_reduction <add>, %60, %cst_38 [1] : vector<64x128xf32> to vector<64xf32>
    %62 = vector.shape_cast %61 : vector<64xf32> to vector<64x1xf32>
    %c0_39 = arith.constant 0 : index
    %c0_40 = arith.constant 0 : index
    %63 = vector.load %arg10[%c0_39, %c0_40] : memref<1x1xf32, #tpu.memory_space<vmem>>, vector<1x1xf32>
    %64 = vector.broadcast %63 : vector<1x1xf32> to vector<64x1xf32>
    %65 = arith.addf %62, %64 : vector<64x1xf32>
    %66 = math.absf %65 : vector<64x1xf32>
    %c0_41 = arith.constant 0 : index
    %c0_42 = arith.constant 0 : index
    %67 = vector.load %arg7[%c0_41, %c0_42] : memref<128x128xbf16, #tpu.memory_space<vmem>>, vector<128x128xbf16>
    %cst_43 = arith.constant dense<0.000000e+00> : vector<64x128xf32>
    %68 = tpu.matmul %56, %67, %cst_43 {dimension_numbers = #tpu.dot_dimension_numbers<[1], [0], [0], [1], [0, 0, 1, 1], [], []>} : vector<64x128xbf16>, vector<128x128xbf16>, vector<64x128xf32> -> vector<64x128xf32>
    %c0_44 = arith.constant 0 : index
    %c0_45 = arith.constant 0 : index
    %69 = vector.load %arg8[%c0_44, %c0_45] : memref<1x128xf32, #tpu.memory_space<vmem>>, vector<1x128xf32>
    %70 = vector.broadcast %69 : vector<1x128xf32> to vector<64x128xf32>
    %71 = arith.addf %68, %70 : vector<64x128xf32>
    %72 = arith.truncf %71 : vector<64x128xf32> to vector<64x128xbf16>
    %73 = tpu.concatenate %72, %16 in 1 : vector<64x128xbf16>, vector<64x128xbf16> -> vector<64x256xbf16>
    %c0_46 = arith.constant 0 : index
    %c0_47 = arith.constant 0 : index
    %74 = vector.load %arg11[%c0_46, %c0_47] : memref<256x128xbf16, #tpu.memory_space<vmem>>, vector<256x128xbf16>
    %cst_48 = arith.constant dense<0.000000e+00> : vector<64x128xf32>
    %75 = tpu.matmul %73, %74, %cst_48 {dimension_numbers = #tpu.dot_dimension_numbers<[1], [0], [0], [1], [0, 0, 1, 1], [], []>} : vector<64x256xbf16>, vector<256x128xbf16>, vector<64x128xf32> -> vector<64x128xf32>
    %c0_49 = arith.constant 0 : index
    %c0_50 = arith.constant 0 : index
    %76 = vector.load %arg12[%c0_49, %c0_50] : memref<1x128xf32, #tpu.memory_space<vmem>>, vector<1x128xf32>
    %77 = vector.broadcast %76 : vector<1x128xf32> to vector<64x128xf32>
    %78 = arith.addf %75, %77 : vector<64x128xf32>
    %cst_51 = arith.constant 0.000000e+00 : f32
    %79 = vector.broadcast %cst_51 : f32 to vector<64x128xf32>
    %80 = arith.maximumf %78, %79 : vector<64x128xf32>
    %cst_52 = arith.constant 0.000000e+00 : f32
    %81 = vector.broadcast %cst_52 : f32 to vector<64x1xf32>
    %82 = arith.cmpf oge, %65, %81 : vector<64x1xf32>
    %cst_53 = arith.constant 1.000000e+00 : f32
    %cst_54 = arith.constant -1.000000e+00 : f32
    %83 = vector.broadcast %cst_53 : f32 to vector<64x1xf32>
    %84 = vector.broadcast %cst_54 : f32 to vector<64x1xf32>
    %85 = arith.select %82, %83, %84 : vector<64x1xi1>, vector<64x1xf32>
    %c0_55 = arith.constant 0 : index
    %c0_56 = arith.constant 0 : index
    %86 = vector.load %arg9[%c0_55, %c0_56] : memref<1x128xf32, #tpu.memory_space<vmem>>, vector<1x128xf32>
    %87 = vector.broadcast %85 : vector<64x1xf32> to vector<64x128xf32>
    %88 = vector.broadcast %86 : vector<1x128xf32> to vector<64x128xf32>
    %89 = arith.mulf %87, %88 : vector<64x128xf32>
    %cst_57 = arith.constant 0.000000e+00 : bf16
    %90 = vector.broadcast %cst_57 : bf16 to vector<64x128xbf16>
    %91 = arith.cmpf ogt, %56, %90 : vector<64x128xbf16>
    %cst_58 = arith.constant 0.000000e+00 : f32
    %92 = vector.broadcast %cst_58 : f32 to vector<64x128xf32>
    %93 = arith.select %91, %89, %92 : vector<64x128xi1>, vector<64x128xf32>
    %94 = arith.truncf %93 : vector<64x128xf32> to vector<64x128xbf16>
    %c3_59 = arith.constant 3 : index
    %c0_60 = arith.constant 0 : index
    %c0_61 = arith.constant 0 : index
    %95 = vector.load %arg6[%c3_59, %c0_60, %c0_61] : memref<4x128x128xbf16, #tpu.memory_space<vmem>>, vector<1x128x128xbf16>
    %96 = vector.shape_cast %95 : vector<1x128x128xbf16> to vector<128x128xbf16>
    %cst_62 = arith.constant dense<0.000000e+00> : vector<64x128xf32>
    %97 = tpu.matmul %94, %96, %cst_62 {dimension_numbers = #tpu.dot_dimension_numbers<[1], [0], [0], [1], [0, 0, 1, 1], [], []>} : vector<64x128xbf16>, vector<128x128xbf16>, vector<64x128xf32> -> vector<64x128xf32>
    %cst_63 = arith.constant 0.000000e+00 : bf16
    %98 = vector.broadcast %cst_63 : bf16 to vector<64x128xbf16>
    %99 = arith.cmpf ogt, %46, %98 : vector<64x128xbf16>
    %cst_64 = arith.constant 0.000000e+00 : f32
    %100 = vector.broadcast %cst_64 : f32 to vector<64x128xf32>
    %101 = arith.select %99, %97, %100 : vector<64x128xi1>, vector<64x128xf32>
    %102 = arith.truncf %101 : vector<64x128xf32> to vector<64x128xbf16>
    %c2_65 = arith.constant 2 : index
    %c0_66 = arith.constant 0 : index
    %c0_67 = arith.constant 0 : index
    %103 = vector.load %arg6[%c2_65, %c0_66, %c0_67] : memref<4x128x128xbf16, #tpu.memory_space<vmem>>, vector<1x128x128xbf16>
    %104 = vector.shape_cast %103 : vector<1x128x128xbf16> to vector<128x128xbf16>
    %cst_68 = arith.constant dense<0.000000e+00> : vector<64x128xf32>
    %105 = tpu.matmul %102, %104, %cst_68 {dimension_numbers = #tpu.dot_dimension_numbers<[1], [0], [0], [1], [0, 0, 1, 1], [], []>} : vector<64x128xbf16>, vector<128x128xbf16>, vector<64x128xf32> -> vector<64x128xf32>
    %cst_69 = arith.constant 0.000000e+00 : bf16
    %106 = vector.broadcast %cst_69 : bf16 to vector<64x128xbf16>
    %107 = arith.cmpf ogt, %36, %106 : vector<64x128xbf16>
    %cst_70 = arith.constant 0.000000e+00 : f32
    %108 = vector.broadcast %cst_70 : f32 to vector<64x128xf32>
    %109 = arith.select %107, %105, %108 : vector<64x128xi1>, vector<64x128xf32>
    %110 = arith.truncf %109 : vector<64x128xf32> to vector<64x128xbf16>
    %c1_71 = arith.constant 1 : index
    %c0_72 = arith.constant 0 : index
    %c0_73 = arith.constant 0 : index
    %111 = vector.load %arg6[%c1_71, %c0_72, %c0_73] : memref<4x128x128xbf16, #tpu.memory_space<vmem>>, vector<1x128x128xbf16>
    %112 = vector.shape_cast %111 : vector<1x128x128xbf16> to vector<128x128xbf16>
    %cst_74 = arith.constant dense<0.000000e+00> : vector<64x128xf32>
    %113 = tpu.matmul %110, %112, %cst_74 {dimension_numbers = #tpu.dot_dimension_numbers<[1], [0], [0], [1], [0, 0, 1, 1], [], []>} : vector<64x128xbf16>, vector<128x128xbf16>, vector<64x128xf32> -> vector<64x128xf32>
    %cst_75 = arith.constant 0.000000e+00 : bf16
    %114 = vector.broadcast %cst_75 : bf16 to vector<64x128xbf16>
    %115 = arith.cmpf ogt, %26, %114 : vector<64x128xbf16>
    %cst_76 = arith.constant 0.000000e+00 : f32
    %116 = vector.broadcast %cst_76 : f32 to vector<64x128xf32>
    %117 = arith.select %115, %113, %116 : vector<64x128xi1>, vector<64x128xf32>
    %118 = arith.truncf %117 : vector<64x128xf32> to vector<64x128xbf16>
    %c0_77 = arith.constant 0 : index
    %c0_78 = arith.constant 0 : index
    %c0_79 = arith.constant 0 : index
    %119 = vector.load %arg6[%c0_77, %c0_78, %c0_79] : memref<4x128x128xbf16, #tpu.memory_space<vmem>>, vector<1x128x128xbf16>
    %120 = vector.shape_cast %119 : vector<1x128x128xbf16> to vector<128x128xbf16>
    %cst_80 = arith.constant dense<0.000000e+00> : vector<64x128xf32>
    %121 = tpu.matmul %118, %120, %cst_80 {dimension_numbers = #tpu.dot_dimension_numbers<[1], [0], [0], [1], [0, 0, 1, 1], [], []>} : vector<64x128xbf16>, vector<128x128xbf16>, vector<64x128xf32> -> vector<64x128xf32>
    %cst_81 = arith.constant 1.000000e+00 : f32
    %122 = vector.broadcast %cst_81 : f32 to vector<1x128xf32>
    %123 = arith.cmpf oeq, %5, %122 : vector<1x128xf32>
    %cst_82 = arith.constant 2.000000e+00 : f32
    %124 = vector.broadcast %cst_82 : f32 to vector<1x128xf32>
    %125 = arith.cmpf oeq, %5, %124 : vector<1x128xf32>
    %cst_83 = arith.constant 0.000000e+00 : f32
    %126 = vector.broadcast %cst_83 : f32 to vector<64x128xf32>
    %127 = arith.subf %126, %3 : vector<64x128xf32>
    %cst_84 = arith.constant 1.000000e+00 : f32
    %128 = vector.shape_cast %125 : vector<1x128xi1> to vector<1x128xi1>
    %129 = vector.broadcast %128 : vector<1x128xi1> to vector<64x128xi1>
    %130 = vector.broadcast %cst_84 : f32 to vector<64x128xf32>
    %131 = arith.select %129, %127, %130 : vector<64x128xi1>, vector<64x128xf32>
    %132 = vector.shape_cast %123 : vector<1x128xi1> to vector<1x128xi1>
    %133 = vector.broadcast %132 : vector<1x128xi1> to vector<64x128xi1>
    %134 = arith.select %133, %4, %131 : vector<64x128xi1>, vector<64x128xf32>
    %135 = arith.mulf %121, %134 : vector<64x128xf32>
    %136 = arith.truncf %135 : vector<64x128xf32> to vector<64x128xbf16>
    %137 = arith.truncf %80 : vector<64x128xf32> to vector<64x128xbf16>
    %138 = tpu.concatenate %137, %136 in 1 : vector<64x128xbf16>, vector<64x128xbf16> -> vector<64x256xbf16>
    %c0_85 = arith.constant 0 : index
    %c0_86 = arith.constant 0 : index
    %139 = vector.load %arg13[%c0_85, %c0_86] : memref<256x128xbf16, #tpu.memory_space<vmem>>, vector<256x128xbf16>
    %cst_87 = arith.constant dense<0.000000e+00> : vector<64x128xf32>
    %140 = tpu.matmul %138, %139, %cst_87 {dimension_numbers = #tpu.dot_dimension_numbers<[1], [0], [0], [1], [0, 0, 1, 1], [], []>} : vector<64x256xbf16>, vector<256x128xbf16>, vector<64x128xf32> -> vector<64x128xf32>
    %c0_88 = arith.constant 0 : index
    %c0_89 = arith.constant 0 : index
    %141 = vector.load %arg14[%c0_88, %c0_89] : memref<1x128xf32, #tpu.memory_space<vmem>>, vector<1x128xf32>
    %142 = vector.broadcast %141 : vector<1x128xf32> to vector<64x128xf32>
    %143 = arith.addf %140, %142 : vector<64x128xf32>
    %cst_90 = arith.constant 0.000000e+00 : f32
    %144 = vector.broadcast %cst_90 : f32 to vector<64x128xf32>
    %145 = arith.subf %144, %143 : vector<64x128xf32>
    %146 = math.exp %145 : vector<64x128xf32>
    %cst_91 = arith.constant 1.000000e+00 : f32
    %147 = vector.broadcast %cst_91 : f32 to vector<64x128xf32>
    %148 = arith.addf %147, %146 : vector<64x128xf32>
    %149 = tpu.reciprocal %148 {approx = true} : vector<64x128xf32> -> vector<64x128xf32>
    %150 = tpu.iota {dimensions = array<i32: 1>} : vector<64x128xi32>
    %c0_i32 = arith.constant 0 : i32
    %151 = vector.broadcast %c0_i32 : i32 to vector<64x128xi32>
    %152 = arith.cmpi eq, %150, %151 : vector<64x128xi32>
    %153 = vector.shape_cast %66 : vector<64x1xf32> to vector<64x1xf32>
    %154 = vector.broadcast %153 : vector<64x1xf32> to vector<64x128xf32>
    %155 = arith.select %152, %154, %149 : vector<64x128xi1>, vector<64x128xf32>
    %c5_i32 = arith.constant 5 : i32
    %156 = vector.broadcast %c5_i32 : i32 to vector<64x128xi32>
    %157 = arith.cmpi sge, %150, %156 : vector<64x128xi32>
    %c8_i32 = arith.constant 8 : i32
    %158 = vector.broadcast %c8_i32 : i32 to vector<64x128xi32>
    %159 = arith.cmpi slt, %150, %158 : vector<64x128xi32>
    %160 = arith.andi %157, %159 : vector<64x128xi1>
    %161 = arith.select %160, %143, %155 : vector<64x128xi1>, vector<64x128xf32>
    %c0_92 = arith.constant 0 : index
    %c0_93 = arith.constant 0 : index
    %162 = vector.load %arg15[%c0_92, %c0_93] : memref<64x128xf32, #tpu.memory_space<vmem>>, vector<64x128xf32>
    tpu.vector_store %arg15[%c0_92, %c0_93], %161 {strides = array<i32>} : memref<64x128xf32, #tpu.memory_space<vmem>>, vector<64x128xf32>,
    return
  }
  func.func @transform_0(%arg0: i32) -> (i32, i32) {
    %c0_i32 = arith.constant 0 : i32
    %c0_i32_0 = arith.constant 0 : i32
    return %arg0, %c0_i32 : i32, i32
  }
  func.func @transform_1(%arg0: i32) -> (i32, i32) {
    %c0_i32 = arith.constant 0 : i32
    %c0_i32_0 = arith.constant 0 : i32
    %c0_i32_1 = arith.constant 0 : i32
    return %c0_i32, %c0_i32_0 : i32, i32
  }
  func.func @transform_2(%arg0: i32) -> (i32, i32) {
    %c0_i32 = arith.constant 0 : i32
    %c0_i32_0 = arith.constant 0 : i32
    %c0_i32_1 = arith.constant 0 : i32
    return %c0_i32, %c0_i32_0 : i32, i32
  }
  func.func @transform_3(%arg0: i32) -> (i32, i32, i32) {
    %c0_i32 = arith.constant 0 : i32
    %c0_i32_0 = arith.constant 0 : i32
    %c0_i32_1 = arith.constant 0 : i32
    %c0_i32_2 = arith.constant 0 : i32
    return %c0_i32, %c0_i32_0, %c0_i32_1 : i32, i32, i32
  }
  func.func @transform_4(%arg0: i32) -> (i32, i32, i32) {
    %c0_i32 = arith.constant 0 : i32
    %c0_i32_0 = arith.constant 0 : i32
    %c0_i32_1 = arith.constant 0 : i32
    %c0_i32_2 = arith.constant 0 : i32
    return %c0_i32, %c0_i32_0, %c0_i32_1 : i32, i32, i32
  }
  func.func @transform_5(%arg0: i32) -> (i32, i32, i32) {
    %c0_i32 = arith.constant 0 : i32
    %c0_i32_0 = arith.constant 0 : i32
    %c0_i32_1 = arith.constant 0 : i32
    %c0_i32_2 = arith.constant 0 : i32
    return %c0_i32, %c0_i32_0, %c0_i32_1 : i32, i32, i32
  }
  func.func @transform_6(%arg0: i32) -> (i32, i32) {
    %c0_i32 = arith.constant 0 : i32
    %c0_i32_0 = arith.constant 0 : i32
    %c0_i32_1 = arith.constant 0 : i32
    return %c0_i32, %c0_i32_0 : i32, i32
  }
  func.func @transform_7(%arg0: i32) -> (i32, i32) {
    %c0_i32 = arith.constant 0 : i32
    %c0_i32_0 = arith.constant 0 : i32
    %c0_i32_1 = arith.constant 0 : i32
    return %c0_i32, %c0_i32_0 : i32, i32
  }
  func.func @transform_8(%arg0: i32) -> (i32, i32) {
    %c0_i32 = arith.constant 0 : i32
    %c0_i32_0 = arith.constant 0 : i32
    %c0_i32_1 = arith.constant 0 : i32
    return %c0_i32, %c0_i32_0 : i32, i32
  }
  func.func @transform_9(%arg0: i32) -> (i32, i32) {
    %c0_i32 = arith.constant 0 : i32
    %c0_i32_0 = arith.constant 0 : i32
    %c0_i32_1 = arith.constant 0 : i32
    return %c0_i32, %c0_i32_0 : i32, i32
  }
  func.func @transform_10(%arg0: i32) -> (i32, i32) {
    %c0_i32 = arith.constant 0 : i32
    %c0_i32_0 = arith.constant 0 : i32
    %c0_i32_1 = arith.constant 0 : i32
    return %c0_i32, %c0_i32_0 : i32, i32
  }
  func.func @transform_11(%arg0: i32) -> (i32, i32) {
    %c0_i32 = arith.constant 0 : i32
    %c0_i32_0 = arith.constant 0 : i32
    %c0_i32_1 = arith.constant 0 : i32
    return %c0_i32, %c0_i32_0 : i32, i32
  }
  func.func @transform_12(%arg0: i32) -> (i32, i32) {
    %c0_i32 = arith.constant 0 : i32
    %c0_i32_0 = arith.constant 0 : i32
    %c0_i32_1 = arith.constant 0 : i32
    return %c0_i32, %c0_i32_0 : i32, i32
  }
  func.func @transform_13(%arg0: i32) -> (i32, i32) {
    %c0_i32 = arith.constant 0 : i32
    %c0_i32_0 = arith.constant 0 : i32
    %c0_i32_1 = arith.constant 0 : i32
    return %c0_i32, %c0_i32_0 : i32, i32
  }
  func.func @transform_14(%arg0: i32) -> (i32, i32) {
    %c0_i32 = arith.constant 0 : i32
    %c0_i32_0 = arith.constant 0 : i32
    return %arg0, %c0_i32 : i32, i32
  }
}

module attributes {stable_mosaic.version = 11 : i64} {
  func.func @kernel(%arg0: i32, %arg1: memref<64x16xf32, #tpu.memory_space<vmem>>, %arg2: memref<16x128xf32, #tpu.memory_space<vmem>>, %arg3: memref<1x128xf32, #tpu.memory_space<vmem>>, %arg4: memref<4x128x128xbf16, #tpu.memory_space<vmem>>, %arg5: memref<4x1x128xf32, #tpu.memory_space<vmem>>, %arg6: memref<128x128xbf16, #tpu.memory_space<vmem>>, %arg7: memref<1x128xf32, #tpu.memory_space<vmem>>, %arg8: memref<1x128xf32, #tpu.memory_space<vmem>>, %arg9: memref<1x1xf32, #tpu.memory_space<vmem>>, %arg10: memref<256x128xbf16, #tpu.memory_space<vmem>>, %arg11: memref<1x128xf32, #tpu.memory_space<vmem>>, %arg12: memref<128x128xbf16, #tpu.memory_space<vmem>>, %arg13: memref<1x128xf32, #tpu.memory_space<vmem>>, %arg14: memref<64x128xf32, #tpu.memory_space<vmem>>) attributes {dimension_semantics = [#tpu.dimension_semantics<parallel>], iteration_bounds = array<i64: 2>, scalar_prefetch = 0 : i64, scratch_operands = 0 : i64, tpu.core_type = #tpu.core_type<tc>, window_params = [{transform_indices = @transform_0, window_bounds = array<i64: 64, 16>}, {pipeline_mode = #tpu.pipeline_mode<synchronous>, transform_indices = @transform_1, window_bounds = array<i64: 16, 128>}, {pipeline_mode = #tpu.pipeline_mode<synchronous>, transform_indices = @transform_2, window_bounds = array<i64: 1, 128>}, {pipeline_mode = #tpu.pipeline_mode<synchronous>, transform_indices = @transform_3, window_bounds = array<i64: 4, 128, 128>}, {pipeline_mode = #tpu.pipeline_mode<synchronous>, transform_indices = @transform_4, window_bounds = array<i64: 4, 1, 128>}, {pipeline_mode = #tpu.pipeline_mode<synchronous>, transform_indices = @transform_5, window_bounds = array<i64: 128, 128>}, {pipeline_mode = #tpu.pipeline_mode<synchronous>, transform_indices = @transform_6, window_bounds = array<i64: 1, 128>}, {pipeline_mode = #tpu.pipeline_mode<synchronous>, transform_indices = @transform_7, window_bounds = array<i64: 1, 128>}, {pipeline_mode = #tpu.pipeline_mode<synchronous>, transform_indices = @transform_8, window_bounds = array<i64: 1, 1>}, {pipeline_mode = #tpu.pipeline_mode<synchronous>, transform_indices = @transform_9, window_bounds = array<i64: 256, 128>}, {pipeline_mode = #tpu.pipeline_mode<synchronous>, transform_indices = @transform_10, window_bounds = array<i64: 1, 128>}, {pipeline_mode = #tpu.pipeline_mode<synchronous>, transform_indices = @transform_11, window_bounds = array<i64: 128, 128>}, {pipeline_mode = #tpu.pipeline_mode<synchronous>, transform_indices = @transform_12, window_bounds = array<i64: 1, 128>}, {transform_indices = @transform_13, window_bounds = array<i64: 64, 128>}]} {
    %c0 = arith.constant 0 : index
    %c0_0 = arith.constant 0 : index
    %0 = vector.load %arg1[%c0, %c0_0] : memref<64x16xf32, #tpu.memory_space<vmem>>, vector<64x16xf32>
    %c0_1 = arith.constant 0 : index
    %c0_2 = arith.constant 0 : index
    %1 = vector.load %arg2[%c0_1, %c0_2] : memref<16x128xf32, #tpu.memory_space<vmem>>, vector<16x128xf32>
    %cst = arith.constant dense<0.000000e+00> : vector<64x128xf32>
    %2 = tpu.matmul %0, %1, %cst {dimension_numbers = #tpu.dot_dimension_numbers<[1], [0], [0], [1], [0, 0, 1, 1], [], []>} : vector<64x16xf32>, vector<16x128xf32>, vector<64x128xf32> -> vector<64x128xf32>
    %3 = math.sin %2 : vector<64x128xf32>
    %4 = math.cos %2 : vector<64x128xf32>
    %c0_3 = arith.constant 0 : index
    %c0_4 = arith.constant 0 : index
    %5 = vector.load %arg3[%c0_3, %c0_4] : memref<1x128xf32, #tpu.memory_space<vmem>>, vector<1x128xf32>
    %cst_5 = arith.constant 1.000000e+00 : f32
    %6 = vector.broadcast %cst_5 : f32 to vector<1x128xf32>
    %7 = arith.cmpf oeq, %5, %6 : vector<1x128xf32>
    %cst_6 = arith.constant 2.000000e+00 : f32
    %8 = vector.broadcast %cst_6 : f32 to vector<1x128xf32>
    %9 = arith.cmpf oeq, %5, %8 : vector<1x128xf32>
    %10 = vector.shape_cast %9 : vector<1x128xi1> to vector<1x128xi1>
    %11 = vector.broadcast %10 : vector<1x128xi1> to vector<64x128xi1>
    %12 = arith.select %11, %4, %2 : vector<64x128xi1>, vector<64x128xf32>
    %13 = vector.shape_cast %7 : vector<1x128xi1> to vector<1x128xi1>
    %14 = vector.broadcast %13 : vector<1x128xi1> to vector<64x128xi1>
    %15 = arith.select %14, %3, %12 : vector<64x128xi1>, vector<64x128xf32>
    %16 = arith.truncf %15 : vector<64x128xf32> to vector<64x128xbf16>
    %c0_7 = arith.constant 0 : index
    %c0_8 = arith.constant 0 : index
    %c0_9 = arith.constant 0 : index
    %17 = vector.load %arg4[%c0_7, %c0_8, %c0_9] : memref<4x128x128xbf16, #tpu.memory_space<vmem>>, vector<1x128x128xbf16>
    %18 = vector.shape_cast %17 : vector<1x128x128xbf16> to vector<128x128xbf16>
    %cst_10 = arith.constant dense<0.000000e+00> : vector<64x128xf32>
    %19 = tpu.matmul %16, %18, %cst_10 {dimension_numbers = #tpu.dot_dimension_numbers<[1], [0], [0], [1], [0, 0, 1, 1], [], []>} : vector<64x128xbf16>, vector<128x128xbf16>, vector<64x128xf32> -> vector<64x128xf32>
    %c0_11 = arith.constant 0 : index
    %c0_12 = arith.constant 0 : index
    %c0_13 = arith.constant 0 : index
    %20 = vector.load %arg5[%c0_11, %c0_12, %c0_13] : memref<4x1x128xf32, #tpu.memory_space<vmem>>, vector<1x1x128xf32>
    %21 = vector.shape_cast %20 : vector<1x1x128xf32> to vector<1x128xf32>
    %22 = vector.broadcast %21 : vector<1x128xf32> to vector<64x128xf32>
    %23 = arith.addf %19, %22 : vector<64x128xf32>
    %cst_14 = arith.constant 0.000000e+00 : f32
    %24 = vector.broadcast %cst_14 : f32 to vector<64x128xf32>
    %25 = arith.maximumf %23, %24 : vector<64x128xf32>
    %26 = arith.truncf %25 : vector<64x128xf32> to vector<64x128xbf16>
    %c1 = arith.constant 1 : index
    %c0_15 = arith.constant 0 : index
    %c0_16 = arith.constant 0 : index
    %27 = vector.load %arg4[%c1, %c0_15, %c0_16] : memref<4x128x128xbf16, #tpu.memory_space<vmem>>, vector<1x128x128xbf16>
    %28 = vector.shape_cast %27 : vector<1x128x128xbf16> to vector<128x128xbf16>
    %cst_17 = arith.constant dense<0.000000e+00> : vector<64x128xf32>
    %29 = tpu.matmul %26, %28, %cst_17 {dimension_numbers = #tpu.dot_dimension_numbers<[1], [0], [0], [1], [0, 0, 1, 1], [], []>} : vector<64x128xbf16>, vector<128x128xbf16>, vector<64x128xf32> -> vector<64x128xf32>
    %c1_18 = arith.constant 1 : index
    %c0_19 = arith.constant 0 : index
    %c0_20 = arith.constant 0 : index
    %30 = vector.load %arg5[%c1_18, %c0_19, %c0_20] : memref<4x1x128xf32, #tpu.memory_space<vmem>>, vector<1x1x128xf32>
    %31 = vector.shape_cast %30 : vector<1x1x128xf32> to vector<1x128xf32>
    %32 = vector.broadcast %31 : vector<1x128xf32> to vector<64x128xf32>
    %33 = arith.addf %29, %32 : vector<64x128xf32>
    %cst_21 = arith.constant 0.000000e+00 : f32
    %34 = vector.broadcast %cst_21 : f32 to vector<64x128xf32>
    %35 = arith.maximumf %33, %34 : vector<64x128xf32>
    %36 = arith.truncf %35 : vector<64x128xf32> to vector<64x128xbf16>
    %c2 = arith.constant 2 : index
    %c0_22 = arith.constant 0 : index
    %c0_23 = arith.constant 0 : index
    %37 = vector.load %arg4[%c2, %c0_22, %c0_23] : memref<4x128x128xbf16, #tpu.memory_space<vmem>>, vector<1x128x128xbf16>
    %38 = vector.shape_cast %37 : vector<1x128x128xbf16> to vector<128x128xbf16>
    %cst_24 = arith.constant dense<0.000000e+00> : vector<64x128xf32>
    %39 = tpu.matmul %36, %38, %cst_24 {dimension_numbers = #tpu.dot_dimension_numbers<[1], [0], [0], [1], [0, 0, 1, 1], [], []>} : vector<64x128xbf16>, vector<128x128xbf16>, vector<64x128xf32> -> vector<64x128xf32>
    %c2_25 = arith.constant 2 : index
    %c0_26 = arith.constant 0 : index
    %c0_27 = arith.constant 0 : index
    %40 = vector.load %arg5[%c2_25, %c0_26, %c0_27] : memref<4x1x128xf32, #tpu.memory_space<vmem>>, vector<1x1x128xf32>
    %41 = vector.shape_cast %40 : vector<1x1x128xf32> to vector<1x128xf32>
    %42 = vector.broadcast %41 : vector<1x128xf32> to vector<64x128xf32>
    %43 = arith.addf %39, %42 : vector<64x128xf32>
    %cst_28 = arith.constant 0.000000e+00 : f32
    %44 = vector.broadcast %cst_28 : f32 to vector<64x128xf32>
    %45 = arith.maximumf %43, %44 : vector<64x128xf32>
    %46 = arith.truncf %45 : vector<64x128xf32> to vector<64x128xbf16>
    %c3 = arith.constant 3 : index
    %c0_29 = arith.constant 0 : index
    %c0_30 = arith.constant 0 : index
    %47 = vector.load %arg4[%c3, %c0_29, %c0_30] : memref<4x128x128xbf16, #tpu.memory_space<vmem>>, vector<1x128x128xbf16>
    %48 = vector.shape_cast %47 : vector<1x128x128xbf16> to vector<128x128xbf16>
    %cst_31 = arith.constant dense<0.000000e+00> : vector<64x128xf32>
    %49 = tpu.matmul %46, %48, %cst_31 {dimension_numbers = #tpu.dot_dimension_numbers<[1], [0], [0], [1], [0, 0, 1, 1], [], []>} : vector<64x128xbf16>, vector<128x128xbf16>, vector<64x128xf32> -> vector<64x128xf32>
    %c3_32 = arith.constant 3 : index
    %c0_33 = arith.constant 0 : index
    %c0_34 = arith.constant 0 : index
    %50 = vector.load %arg5[%c3_32, %c0_33, %c0_34] : memref<4x1x128xf32, #tpu.memory_space<vmem>>, vector<1x1x128xf32>
    %51 = vector.shape_cast %50 : vector<1x1x128xf32> to vector<1x128xf32>
    %52 = vector.broadcast %51 : vector<1x128xf32> to vector<64x128xf32>
    %53 = arith.addf %49, %52 : vector<64x128xf32>
    %cst_35 = arith.constant 0.000000e+00 : f32
    %54 = vector.broadcast %cst_35 : f32 to vector<64x128xf32>
    %55 = arith.maximumf %53, %54 : vector<64x128xf32>
    %56 = arith.truncf %55 : vector<64x128xf32> to vector<64x128xbf16>
    %c0_36 = arith.constant 0 : index
    %c0_37 = arith.constant 0 : index
    %57 = vector.load %arg8[%c0_36, %c0_37] : memref<1x128xf32, #tpu.memory_space<vmem>>, vector<1x128xf32>
    %58 = arith.extf %56 : vector<64x128xbf16> to vector<64x128xf32>
    %59 = vector.broadcast %57 : vector<1x128xf32> to vector<64x128xf32>
    %60 = arith.mulf %58, %59 : vector<64x128xf32>
    %cst_38 = arith.constant dense<0.000000e+00> : vector<64xf32>
    %61 = vector.multi_reduction <add>, %60, %cst_38 [1] : vector<64x128xf32> to vector<64xf32>
    %62 = vector.shape_cast %61 : vector<64xf32> to vector<64x1xf32>
    %c0_39 = arith.constant 0 : index
    %c0_40 = arith.constant 0 : index
    %63 = vector.load %arg9[%c0_39, %c0_40] : memref<1x1xf32, #tpu.memory_space<vmem>>, vector<1x1xf32>
    %64 = vector.broadcast %63 : vector<1x1xf32> to vector<64x1xf32>
    %65 = arith.addf %62, %64 : vector<64x1xf32>
    %66 = math.absf %65 : vector<64x1xf32>
    %c0_41 = arith.constant 0 : index
    %c0_42 = arith.constant 0 : index
    %67 = vector.load %arg6[%c0_41, %c0_42] : memref<128x128xbf16, #tpu.memory_space<vmem>>, vector<128x128xbf16>
    %cst_43 = arith.constant dense<0.000000e+00> : vector<64x128xf32>
    %68 = tpu.matmul %56, %67, %cst_43 {dimension_numbers = #tpu.dot_dimension_numbers<[1], [0], [0], [1], [0, 0, 1, 1], [], []>} : vector<64x128xbf16>, vector<128x128xbf16>, vector<64x128xf32> -> vector<64x128xf32>
    %c0_44 = arith.constant 0 : index
    %c0_45 = arith.constant 0 : index
    %69 = vector.load %arg7[%c0_44, %c0_45] : memref<1x128xf32, #tpu.memory_space<vmem>>, vector<1x128xf32>
    %70 = vector.broadcast %69 : vector<1x128xf32> to vector<64x128xf32>
    %71 = arith.addf %68, %70 : vector<64x128xf32>
    %72 = arith.truncf %71 : vector<64x128xf32> to vector<64x128xbf16>
    %73 = tpu.concatenate %72, %16 in 1 : vector<64x128xbf16>, vector<64x128xbf16> -> vector<64x256xbf16>
    %c0_46 = arith.constant 0 : index
    %c0_47 = arith.constant 0 : index
    %74 = vector.load %arg10[%c0_46, %c0_47] : memref<256x128xbf16, #tpu.memory_space<vmem>>, vector<256x128xbf16>
    %cst_48 = arith.constant dense<0.000000e+00> : vector<64x128xf32>
    %75 = tpu.matmul %73, %74, %cst_48 {dimension_numbers = #tpu.dot_dimension_numbers<[1], [0], [0], [1], [0, 0, 1, 1], [], []>} : vector<64x256xbf16>, vector<256x128xbf16>, vector<64x128xf32> -> vector<64x128xf32>
    %c0_49 = arith.constant 0 : index
    %c0_50 = arith.constant 0 : index
    %76 = vector.load %arg11[%c0_49, %c0_50] : memref<1x128xf32, #tpu.memory_space<vmem>>, vector<1x128xf32>
    %77 = vector.broadcast %76 : vector<1x128xf32> to vector<64x128xf32>
    %78 = arith.addf %75, %77 : vector<64x128xf32>
    %cst_51 = arith.constant 0.000000e+00 : f32
    %79 = vector.broadcast %cst_51 : f32 to vector<64x128xf32>
    %80 = arith.maximumf %78, %79 : vector<64x128xf32>
    %81 = arith.truncf %80 : vector<64x128xf32> to vector<64x128xbf16>
    %c0_52 = arith.constant 0 : index
    %c0_53 = arith.constant 0 : index
    %82 = vector.load %arg12[%c0_52, %c0_53] : memref<128x128xbf16, #tpu.memory_space<vmem>>, vector<128x128xbf16>
    %cst_54 = arith.constant dense<0.000000e+00> : vector<64x128xf32>
    %83 = tpu.matmul %81, %82, %cst_54 {dimension_numbers = #tpu.dot_dimension_numbers<[1], [0], [0], [1], [0, 0, 1, 1], [], []>} : vector<64x128xbf16>, vector<128x128xbf16>, vector<64x128xf32> -> vector<64x128xf32>
    %c0_55 = arith.constant 0 : index
    %c0_56 = arith.constant 0 : index
    %84 = vector.load %arg13[%c0_55, %c0_56] : memref<1x128xf32, #tpu.memory_space<vmem>>, vector<1x128xf32>
    %85 = vector.broadcast %84 : vector<1x128xf32> to vector<64x128xf32>
    %86 = arith.addf %83, %85 : vector<64x128xf32>
    %cst_57 = arith.constant 0.000000e+00 : f32
    %87 = vector.broadcast %cst_57 : f32 to vector<64x128xf32>
    %88 = arith.subf %87, %86 : vector<64x128xf32>
    %89 = math.exp %88 : vector<64x128xf32>
    %cst_58 = arith.constant 1.000000e+00 : f32
    %90 = vector.broadcast %cst_58 : f32 to vector<64x128xf32>
    %91 = arith.addf %90, %89 : vector<64x128xf32>
    %92 = tpu.reciprocal %91 {approx = true} : vector<64x128xf32> -> vector<64x128xf32>
    %93 = tpu.iota {dimensions = array<i32: 1>} : vector<64x128xi32>
    %c0_i32 = arith.constant 0 : i32
    %94 = vector.broadcast %c0_i32 : i32 to vector<64x128xi32>
    %95 = arith.cmpi eq, %93, %94 : vector<64x128xi32>
    %96 = vector.shape_cast %66 : vector<64x1xf32> to vector<64x1xf32>
    %97 = vector.broadcast %96 : vector<64x1xf32> to vector<64x128xf32>
    %98 = arith.select %95, %97, %92 : vector<64x128xi1>, vector<64x128xf32>
    %c0_59 = arith.constant 0 : index
    %c0_60 = arith.constant 0 : index
    %99 = vector.load %arg14[%c0_59, %c0_60] : memref<64x128xf32, #tpu.memory_space<vmem>>, vector<64x128xf32>
    tpu.vector_store %arg14[%c0_59, %c0_60], %98 {strides = array<i32>} : memref<64x128xf32, #tpu.memory_space<vmem>>, vector<64x128xf32>,
    return
  }
  func.func @transform_0(%arg0: i32) -> (i32, i32) {
    %c0_i32 = arith.constant 0 : i32
    %c0_i32_0 = arith.constant 0 : i32
    return %arg0, %c0_i32 : i32, i32
  }
  func.func @transform_1(%arg0: i32) -> (i32, i32) {
    %c0_i32 = arith.constant 0 : i32
    %c0_i32_0 = arith.constant 0 : i32
    %c0_i32_1 = arith.constant 0 : i32
    return %c0_i32, %c0_i32_0 : i32, i32
  }
  func.func @transform_2(%arg0: i32) -> (i32, i32) {
    %c0_i32 = arith.constant 0 : i32
    %c0_i32_0 = arith.constant 0 : i32
    %c0_i32_1 = arith.constant 0 : i32
    return %c0_i32, %c0_i32_0 : i32, i32
  }
  func.func @transform_3(%arg0: i32) -> (i32, i32, i32) {
    %c0_i32 = arith.constant 0 : i32
    %c0_i32_0 = arith.constant 0 : i32
    %c0_i32_1 = arith.constant 0 : i32
    %c0_i32_2 = arith.constant 0 : i32
    return %c0_i32, %c0_i32_0, %c0_i32_1 : i32, i32, i32
  }
  func.func @transform_4(%arg0: i32) -> (i32, i32, i32) {
    %c0_i32 = arith.constant 0 : i32
    %c0_i32_0 = arith.constant 0 : i32
    %c0_i32_1 = arith.constant 0 : i32
    %c0_i32_2 = arith.constant 0 : i32
    return %c0_i32, %c0_i32_0, %c0_i32_1 : i32, i32, i32
  }
  func.func @transform_5(%arg0: i32) -> (i32, i32) {
    %c0_i32 = arith.constant 0 : i32
    %c0_i32_0 = arith.constant 0 : i32
    %c0_i32_1 = arith.constant 0 : i32
    return %c0_i32, %c0_i32_0 : i32, i32
  }
  func.func @transform_6(%arg0: i32) -> (i32, i32) {
    %c0_i32 = arith.constant 0 : i32
    %c0_i32_0 = arith.constant 0 : i32
    %c0_i32_1 = arith.constant 0 : i32
    return %c0_i32, %c0_i32_0 : i32, i32
  }
  func.func @transform_7(%arg0: i32) -> (i32, i32) {
    %c0_i32 = arith.constant 0 : i32
    %c0_i32_0 = arith.constant 0 : i32
    %c0_i32_1 = arith.constant 0 : i32
    return %c0_i32, %c0_i32_0 : i32, i32
  }
  func.func @transform_8(%arg0: i32) -> (i32, i32) {
    %c0_i32 = arith.constant 0 : i32
    %c0_i32_0 = arith.constant 0 : i32
    %c0_i32_1 = arith.constant 0 : i32
    return %c0_i32, %c0_i32_0 : i32, i32
  }
  func.func @transform_9(%arg0: i32) -> (i32, i32) {
    %c0_i32 = arith.constant 0 : i32
    %c0_i32_0 = arith.constant 0 : i32
    %c0_i32_1 = arith.constant 0 : i32
    return %c0_i32, %c0_i32_0 : i32, i32
  }
  func.func @transform_10(%arg0: i32) -> (i32, i32) {
    %c0_i32 = arith.constant 0 : i32
    %c0_i32_0 = arith.constant 0 : i32
    %c0_i32_1 = arith.constant 0 : i32
    return %c0_i32, %c0_i32_0 : i32, i32
  }
  func.func @transform_11(%arg0: i32) -> (i32, i32) {
    %c0_i32 = arith.constant 0 : i32
    %c0_i32_0 = arith.constant 0 : i32
    %c0_i32_1 = arith.constant 0 : i32
    return %c0_i32, %c0_i32_0 : i32, i32
  }
  func.func @transform_12(%arg0: i32) -> (i32, i32) {
    %c0_i32 = arith.constant 0 : i32
    %c0_i32_0 = arith.constant 0 : i32
    %c0_i32_1 = arith.constant 0 : i32
    return %c0_i32, %c0_i32_0 : i32, i32
  }
  func.func @transform_13(%arg0: i32) -> (i32, i32) {
    %c0_i32 = arith.constant 0 : i32
    %c0_i32_0 = arith.constant 0 : i32
    return %arg0, %c0_i32 : i32, i32
  }
}

</mosaic_0001>

<bundles_post_ra>
// kernel: reverse.1
= control target key start
LH: loop header
LB: loop body
LE: loop exit
PB: predicated region body
PF: predicated region fallthrough
CT: control target
= control target key end

     0   :  { %v2_v0 = vlaneseq  ;;  %s99_s0 = inlined_call_operand.vmem [shape: f32[8,15], index: 0, kind: input, shape index: {}]   ;;  %s100_s1 = inlined_call_operand.vmem [shape: f32[8,15], index: 1, kind: output, shape index: {}]  }
   0x1   :  { %v33_v2 = vld [vmem:[%s99_s0] sm:$0xff] }
   0x2   :  { %v3_v1 = vsub.s32 14, %v2_v0 }
   0x4   :  { %4 = vset.pattern.permute.xlu0 %v3_v1 }
   0x5   :  { %39 = vperm.xlu0 %4, %v33_v2  }
  0x77   :  { %v40_v3 = vpop.permute.xlu0 %39 }
  0x78   :  { %71 = vst [vmem:[%s100_s1] sm:$0xff] %v40_v3 }

// kernel: sub.29
= control target key start
LH: loop header
LB: loop body
LE: loop exit
PB: predicated region body
PF: predicated region fallthrough
CT: control target
= control target key end

     0   :  { %s34_s0 = inlined_call_operand.vmem [shape: f32[8,15], index: 0, kind: input, shape index: {}]   ;;  %s35_s1 = inlined_call_operand.vmem [shape: f32[8,15], index: 1, kind: input, shape index: {}]   ;;  %s36_s2 = inlined_call_operand.vmem [shape: f32[8,15], index: 2, kind: output, shape index: {}]  }
   0x1   :  { %v3_v0 = vld [vmem:[%s34_s0] sm:$0xff] }
   0x2   :  { %v4_v1 = vld [vmem:[%s35_s1] sm:$0xff] }
   0x3   :  { %v7_v2 = vsub.f32 %v3_v0, %v4_v1 }
   0x5   :  { %9 = vst [vmem:[%s36_s2] sm:$0xff] %v7_v2 }

// kernel: mul.189
= control target key start
LH: loop header
LB: loop body
LE: loop exit
PB: predicated region body
PF: predicated region fallthrough
CT: control target
= control target key end

     0   :  { %3 = vsyncpa [#allocation1], 0  ;;  %s50_s13 = smov [#allocation0]   ;;  %s75_s0 = inlined_call_operand.vmem [shape: f32[8], index: 0, kind: input, shape index: {}]   ;;  %s76_s1 = inlined_call_operand.vmem [shape: f32[8], index: 1, kind: input, shape index: {}]   ;;  %s77_s2 = inlined_call_operand.hbm [shape: f32[8], index: 2, kind: output, shape index: {}]  }
   0x1   :  { %v4_v0 = vld [vmem:[%s75_s0] sm:$0x1]  ;;  %s16_s2 = sshll.u32 %s77_s2, 4  ;;  %s14_s14 = sshll.u32 %s50_s13, 4  ;;  %s17_s2 = int_to_ptr.hbm [resolvable:$true] %s16_s2  ;;  %s15_s14 = int_to_ptr.vmem [resolvable:$true] %s14_s14 }
   0x2   :  { %v5_v1 = vld [vmem:[%s76_s1] sm:$0x1] }
   0x3   :  { %v8_v2 = vmul.f32 %v5_v1, %v4_v0 }
   0x5   :  { %10 = vst [vmem:[#allocation0] sm:$0x1] %v8_v2 }
   0x6   :  { %19 = dma.vmem_to_hbm [thread:$0]  %s15_s14, 16, %s17_s2, [#allocation1]  }
   0x7   :  { %48 = dma.done.wait [#allocation1], 16  }
   0x8   :  { %49 = vsyncadd [#allocation1], 4294967280 }
   0x9   :  { %22 = vsyncpa [#allocation1], 1 }

// kernel: nerf_net_forward.3
= control target key start
LH: loop header
LB: loop body
LE: loop exit
PB: predicated region body
PF: predicated region fallthrough
CT: control target
= control target key end

     0   :  { %s4747_s27 = smov 0   ;;  %s6357_s0 = inlined_call_operand.vmem [shape: f32[128,16], index: 0, kind: input, shape index: {}]   ;;  %s6358_s1 = inlined_call_operand.vmem [shape: f32[16,128], index: 1, kind: input, shape index: {}]   ;;  %s6359_s2 = inlined_call_operand.vmem [shape: f32[1,128], index: 2, kind: input, shape index: {}]   ;;  %s6360_s3 = inlined_call_operand.vmem [shape: bf16[4,128,128], index: 3, kind: input, shape index: {}]   ;;  %s6361_s4 = inlined_call_operand.vmem [shape: f32[4,1,128], index: 4, kind: input, shape index: {}]   ;;  %s6362_s5 = inlined_call_operand.vmem [shape: bf16[128,128], index: 5, kind: input, shape index: {}]   ;;  %s6363_s6 = inlined_call_operand.vmem [shape: f32[1,128], index: 6, kind: input, shape index: {}]   ;;  %s6364_s7 = inlined_call_operand.vmem [shape: f32[1,128], index: 7, kind: input, shape index: {}]   ;;  %s6365_s8 = inlined_call_operand.<no memory space> [shape: f32[1,1], index: 8, kind: input, shape index: {}]   ;;  %s6366_s9 = inlined_call_operand.vmem [shape: bf16[256,128], index: 9, kind: input, shape index: {}]   ;;  %s6367_s10 = inlined_call_operand.vmem [shape: f32[1,128], index: 10, kind: input, shape index: {}]   ;;  %s6368_s11 = inlined_call_operand.vmem [shape: bf16[128,128], index: 11, kind: input, shape index: {}]   ;;  %s6369_s12 = inlined_call_operand.vmem [shape: f32[1,128], index: 12, kind: input, shape index: {}]   ;;  %s6370_s13 = inlined_call_operand.vmem [shape: f32[128,128], index: 13, kind: output, shape index: {}]  }
   0x1   :  { %v18_v0 = vstv %s6365_s8 }
   0x2   :  { %19 = vst [vmem:[#allocation2] sm:$0x1] %v18_v0 }
   0x3 LB: > { %s4160_s28 = sadd.s32 4294967295, %s4665_s27   ;;  %p4164_p0 = scmp.ge.s32.totalorder %s4665_s27, 1  ;;  %s4665_s27 = sphi %s4747_s27, %s25_s27  }
   0x4   : > { %p390_p1 = scmp.lt.s32.totalorder %s4665_s27, 3 }
   0x6   : > { %p391_p2 = pnand %p4164_p0, %p390_p1 }
   0x8   : > { %394 = sbr.rel (%p391_p2) target bundleno = 1516 (0x5ec), region = 72 }
   0xd   : > { %v455_v1 = vld [vmem:[%s6358_s1 + $0x8] sm:$0xff]  ;;  %v454_v2 = vld [vmem:[%s6358_s1] sm:$0xff]  ;;  %s4165_s15 = sshll.u32 %s4160_s28, 3  ;;  %vm456_vm0 = vcmask 130048   ;;  %v6390_v11 = vmov 0  }
   0xe   : > { %495 = vmatpush.msra.mxu0 %v455_v1  ;;  %4598 = vmatpush.msra.mxu1 %v455_v1  ;;  %p435_p3 = scmp.lt.s32.totalorder %s4165_s15, 15  ;;  %v6385_v39 = vmov 683565275   ;;  %v6383_v41 = vmov 2475754826  }
   0xf   : > { %4615 = vset.pattern.permute.xlu2 %v6390_v11  ;;  %4616 = vset.pattern.permute.xlu0 %v6390_v11  ;;  %v6381_v45 = vmov 2131351028   ;;  %v6379_v48 = vmov 2102212464   ;;  %v6376_v51 = vmov 920167782  }
  0x10   : > { %496 = vmatpush.msra.mxu0 %v454_v2  ;;  %4599 = vmatpush.msra.mxu1 %v454_v2  ;;  %s6454_s15 = smov (!%p435_p3, %s4165_s15), 15  ;;  %v6374_v54 = vmov 1326507024  }
  0x11   : > { %s4166_s16 = sshll.u32 %s6454_s15, 3  ;;  %4617 = vset.pattern.permute.xlu1 %v6390_v11 }
  0x12   : > { %s438_s19 = scalar_lea.vmem %s6357_s0, %s4166_s16  ;;  %s6323_s18 = scalar_lea.vmem %s6370_s13, %s4166_s16 }
  0x13   : > { %v446_v3 = vld [vmem:[%s438_s19] sm:$0xff]  ;;  %v447_v5 = vld [vmem:[%s438_s19 + $0x8] sm:$0xff]  ;;  %v448_v7 = vld [vmem:[%s438_s19 + $0x10] sm:$0xff] }
  0x14   : > { %v450_v4 = vld [vmem:[%s438_s19 + $0x20] sm:$0xff]  ;;  %4169 = vmatmul.msk.f32.vlgmr.msra.gmra.mxu0 %vm456_vm0, %v446_v3  ;;  %v451_v6 = vld [vmem:[%s438_s19 + $0x28] sm:$0xff]  ;;  %v452_v8 = vld [vmem:[%s438_s19 + $0x30] sm:$0xff] }
  0x15   : > { %4173 = vmatmul.msk.f32.vlgmr.msra.gmra.mxu1 %vm456_vm0, %v450_v4  ;;  %v449_v9 = vld [vmem:[%s438_s19 + $0x18] sm:$0xff] }
  0x16   : > { %v453_v10 = vld [vmem:[%s438_s19 + $0x38] sm:$0xff] }
  0x1c   : > { %4170 = vmatmul.msk.f32.gmra.mxu0 %vm456_vm0, %v447_v5 }
  0x1d   : > { %4174 = vmatmul.msk.f32.gmra.mxu1 %vm456_vm0, %v451_v6 }
  0x24   : > { %4171 = vmatmul.msk.f32.gmra.mxu0 %vm456_vm0, %v448_v7 }
  0x25   : > { %4175 = vmatmul.msk.f32.gmra.mxu1 %vm456_vm0, %v452_v8 }
  0x2c   : > { %4172 = vmatmul.msk.f32.gmra.mxu0 %vm456_vm0, %v449_v9 }
  0x2d   : > { %4176 = vmatmul.msk.f32.gmra.mxu1 %vm456_vm0, %v453_v10 }
  0x91   : > { %v4780_v12 = vpop.f32.mrf.mxu0 }
  0x92   : > { %v4782_v13 = vpop.f32.mrf.mxu1  ;;  %v522_v14 = vand.u32 2147483647, %v4780_v12  ;;  %v525_v15 = vand.u32 2139095040, %v4780_v12 }
  0x93   : > { %6399 = vst [vmem:[#allocation3_spill] sm:$0xff] %v4782_v13  ;;  %v1142_v16 = vand.u32 2147483647, %v4782_v13  ;;  %v1145_v17 = vand.u32 2139095040, %v4782_v13 }
  0x94   : > { %v526_v18 = vshrl.u32 %v525_v15, 23  ;;  %v529_v19 = vand.u32 8388607, %v522_v14 }
  0x95   : > { %v1146_v20 = vshrl.u32 %v1145_v17, 23  ;;  %v1149_v21 = vand.u32 8388607, %v1142_v16 }
  0x96   : > { %v4177_v22 = vadd.s32 4294967169, %v526_v18  ;;  %v530_v23 = vor.u32 8388608, %v529_v19 }
  0x97   : > { %v4189_v24 = vadd.s32 4294967169, %v1146_v20  ;;  %v1150_v25 = vor.u32 8388608, %v1149_v21 }
  0x98   : > { %v532_v26 = vadd.s32 1, %v4177_v22  ;;  %v4792_v27 = vshll.u32 %v530_v23, 8 }
  0x99   : > { %v1152_v28 = vadd.s32 1, %v4189_v24  ;;  %v4794_v29 = vshll.u32 %v1150_v25, 8 }
  0x9a   : > { %vm533_vm1 = vcmp.gt.s32.totalorder %v532_v26, 0  ;;  %v4797_v33 = vand.u32 65535, %v4792_v27  ;;  %v4800_v35 = vshrl.u32 %v4792_v27, 16 }
  0x9b   : > { %v534_v30 = vsel %vm533_vm1, %v532_v26, 0  ;;  %vm1153_vm2 = vcmp.gt.s32.totalorder %v1152_v28, 0  ;;  %v4805_v37 = vand.u32 65535, %v4794_v29  ;;  %v4812_v43 = vshrl.u32 %v4794_v29, 16 }
  0x9c   : > { %v536_v31 = vand.u32 31, %v534_v30  ;;  %v1154_v32 = vsel %vm1153_vm2, %v1152_v28, 0  ;;  %v4807_v38 = vshrl.u32 %v534_v30, 5 }
  0x9d   : > { %v4802_v36 = vand.u32 31, %v1154_v32  ;;  %v4854_v23 = vshrl.u32 %v1154_v32, 5 }
  0x9e   : > { %v537_v34 = vsub.s32 32, %v536_v31  ;;  %v539_v40 = vshll.u32 %v6385_v39, %v536_v31  ;;  %v542_v42 = vshll.u32 %v6383_v41, %v536_v31  ;;  %v545_v47 = vshll.u32 %v6381_v45, %v536_v31 }
  0x9f   : > { %v548_v50 = vshll.u32 %v6379_v48, %v536_v31  ;;  %v551_v53 = vshll.u32 %v6376_v51, %v536_v31  ;;  %v4823_v59 = vsub.s32 32, %v4802_v36  ;;  %vm554_vm3 = vcmp.lt.s32.totalorder %v4807_v38, 1 }
  0xa0   : > { %v540_v44 = vshrl.u32 %v6383_v41, %v537_v34  ;;  %v543_v46 = vshrl.u32 %v6381_v45, %v537_v34  ;;  %v546_v49 = vshrl.u32 %v6379_v48, %v537_v34  ;;  %v549_v52 = vshrl.u32 %v6376_v51, %v537_v34 }
  0xa1   : > { %v552_v55 = vshrl.u32 %v6374_v54, %v537_v34  ;;  %vm555_vm4 = vcmp.lt.s32.totalorder %v4807_v38, 2  ;;  %vm556_vm5 = vcmp.lt.s32.totalorder %v4807_v38, 3  ;;  %vm557_vm6 = vcmp.lt.s32.totalorder %v4807_v38, 4 }
  0xa2   : > { %v541_v56 = vor.u32 %v540_v44, %v539_v40  ;;  %v544_v57 = vor.u32 %v543_v46, %v542_v42  ;;  %v547_v58 = vor.u32 %v546_v49, %v545_v47  ;;  %v550_v60 = vor.u32 %v549_v52, %v548_v50 }
  0xa3   : > { %v553_v61 = vor.u32 %v552_v55, %v551_v53  ;;  %v1159_v2 = vshll.u32 %v6385_v39, %v4802_v36  ;;  %v1162_v3 = vshll.u32 %v6383_v41, %v4802_v36  ;;  %v1160_v7 = vshrl.u32 %v6383_v41, %v4823_v59 }
  0xa4   : > { %v562_v62 = vsel %vm554_vm3, %v541_v56, %v544_v57  ;;  %v566_v63 = vsel %vm554_vm3, %v544_v57, %v547_v58  ;;  %v563_v0 = vsel %vm557_vm6, %v550_v60, 920167782  ;;  %v559_v4 = vsel %vm557_vm6, %v547_v58, 2102212464 }
  0xa5   : > { %v567_v1 = vsel %vm557_vm6, %v553_v61, 1326507024  ;;  %v564_v5 = vsel %vm556_vm5, %v547_v58, %v563_v0  ;;  %v538_v8 = vshrl.u32 %v6385_v39, %v537_v34  ;;  %v1163_v15 = vshrl.u32 %v6381_v45, %v4823_v59 }
  0xa6   : > { %v568_v6 = vsel %vm556_vm5, %v550_v60, %v567_v1  ;;  %v565_v9 = vsel %vm555_vm4, %v562_v62, %v564_v5  ;;  %v560_v22 = vsel %vm556_vm5, %v544_v57, %v559_v4  ;;  %v4856_v24 = vor.u32 %v1160_v7, %v1159_v2 }
  0xa7   : > { %v569_v10 = vsel %vm555_vm4, %v566_v63, %v568_v6  ;;  %v595_v19 = vand.u32 65535, %v565_v9  ;;  %v596_v20 = vshrl.u32 %v565_v9, 16  ;;  %v558_v21 = vsel %vm554_vm3, %v538_v8, %v541_v56 }
  0xa8   : > { %v573_v17 = vand.u32 65535, %v569_v10  ;;  %v574_v18 = vshrl.u32 %v569_v10, 16  ;;  %v4860_v28 = vor.u32 %v1163_v15, %v1162_v3  ;;  %v1165_v30 = vshll.u32 %v6381_v45, %v4802_v36 }
  0xa9   : > { %v598_v34 = vmul.u32 %v596_v20, %v4797_v33  ;;  %v599_v40 = vmul.u32 %v595_v19, %v4800_v35  ;;  %v1166_v32 = vshrl.u32 %v6379_v48, %v4823_v59  ;;  %v597_v46 = vmul.u32 %v595_v19, %v4797_v33 }
  0xaa   : > { %v576_v25 = vmul.u32 %v574_v18, %v4797_v33  ;;  %v577_v26 = vmul.u32 %v573_v17, %v4800_v35  ;;  %v575_v31 = vmul.u32 %v573_v17, %v4797_v33  ;;  %v578_v42 = vmul.u32 %v574_v18, %v4800_v35 }
  0xab   : > { %v600_v47 = vmul.u32 %v596_v20, %v4800_v35  ;;  %v601_v53 = vshll.u32 %v598_v34, 16  ;;  %v603_v56 = vshll.u32 %v599_v40, 16  ;;  %v1168_v57 = vshll.u32 %v6379_v48, %v4802_v36 }
  0xac   : > { %v579_v44 = vshll.u32 %v576_v25, 16  ;;  %v580_v49 = vshrl.u32 %v576_v25, 16  ;;  %v581_v50 = vshll.u32 %v577_v26, 16  ;;  %v582_v52 = vshrl.u32 %v577_v26, 16 }
  0xad   : > { %vm605_vm8 = vc.u32 %v597_v46, %v601_v53  ;;  %v607_v60 = vadd.s32 %v601_v53, %v597_v46  ;;  %v1169_v61 = vshrl.u32 %v6376_v51, %v4823_v59  ;;  %v1171_v62 = vshll.u32 %v6376_v51, %v4802_v36 }
  0xae   : > { %vm583_vm7 = vc.u32 %v575_v31, %v579_v44  ;;  %v585_v55 = vadd.s32 %v579_v44, %v575_v31  ;;  %v606_v35 = vsel %vm605_vm8, 1, %v6390_v11  ;;  %v1167_v1 = vor.u32 %v1166_v32, %v1165_v30 }
  0xaf   : > { %v584_v58 = vsel %vm583_vm7, 1, %v6390_v11  ;;  %v608_v0 = vadd.s32 %v606_v35, %v600_v47  ;;  %vm609_vm10 = vc.u32 %v607_v60, %v603_v56  ;;  %v1170_v4 = vor.u32 %v1169_v61, %v1168_v57 }
  0xb0   : > { %v586_v33 = vadd.s32 %v584_v58, %v578_v42  ;;  %vm587_vm9 = vc.u32 %v585_v55, %v581_v50  ;;  %v610_v3 = vsel %vm609_vm10, 1, %v6390_v11  ;;  %v1172_v5 = vshrl.u32 %v6374_v54, %v4823_v59  ;;  %v4913_v42 = vpop.f32.mrf.mxu0 }
  0xb1   : > { %v588_v63 = vsel %vm587_vm9, 1, %v6390_v11  ;;  %v602_v6 = vshrl.u32 %v598_v34, 16  ;;  %v612_v7 = vadd.s32 %v610_v3, %v608_v0  ;;  %vm1174_vm11 = vcmp.lt.s32.totalorder %v4854_v23, 1  ;;  %6400 = vst [vmem:[#allocation4_spill] sm:$0xff] %v4913_v42 }
  0xb2   : > { %v590_v2 = vadd.s32 %v588_v63, %v586_v33  ;;  %vm1176_vm12 = vcmp.lt.s32.totalorder %v4854_v23, 3  ;;  %v1173_v36 = vor.u32 %v1172_v5, %v1171_v62  ;;  %vm1175_vm13 = vcmp.lt.s32.totalorder %v4854_v23, 2 }
  0xb3   : > { %vm1177_vm14 = vcmp.lt.s32.totalorder %v4854_v23, 4  ;;  %v604_v9 = vshrl.u32 %v599_v40, 16  ;;  %v613_v10 = vadd.s32 %v612_v7, %v602_v6  ;;  %v1182_v15 = vsel %vm1174_vm11, %v4856_v24, %v4860_v28 }
  0xb4   : > { %v591_v8 = vadd.s32 %v590_v2, %v580_v49  ;;  %v1183_v17 = vsel %vm1177_vm14, %v1170_v4, 920167782  ;;  %v4896_v19 = vadd.s32 %v607_v60, %v603_v56  ;;  %v1186_v25 = vsel %vm1174_vm11, %v4860_v28, %v1167_v1 }
  0xb5   : > { %v1184_v20 = vsel %vm1176_vm12, %v1167_v1, %v1183_v17  ;;  %v561_v26 = vsel %vm555_vm4, %v558_v21, %v560_v22  ;;  %v614_v30 = vadd.s32 %v613_v10, %v604_v9  ;;  %v1187_v34 = vsel %vm1177_vm14, %v1173_v36, 1326507024 }
  0xb6   : > { %v4894_v18 = vadd.s32 %v591_v8, %v582_v52  ;;  %v1185_v31 = vsel %vm1175_vm13, %v1182_v15, %v1184_v20  ;;  %v1188_v40 = vsel %vm1176_vm12, %v1170_v4, %v1187_v34  ;;  %v615_v22 = vmul.u32 %v4792_v27, %v561_v26 }
  0xb7   : > { %v1215_v32 = vand.u32 65535, %v1185_v31  ;;  %v618_v44 = vadd.s32 1, %v614_v30  ;;  %v1189_v38 = vsel %vm1175_vm13, %v1186_v25, %v1188_v40  ;;  %v1216_v21 = vshrl.u32 %v1185_v31, 16 }
  0xb8   : > { %vm617_vm15 = vc.u32 %v4894_v18, %v4896_v19  ;;  %v1193_v46 = vand.u32 65535, %v1189_v38  ;;  %v1194_v47 = vshrl.u32 %v1189_v38, 16  ;;  %v680_v55 = vand.u32 2139095040, %v4913_v42 }
  0xb9   : > { %v1219_v49 = vmul.u32 %v1215_v32, %v4812_v43  ;;  %v619_v50 = vsel %vm617_vm15, %v618_v44, %v614_v30  ;;  %v1217_v52 = vmul.u32 %v1215_v32, %v4805_v37  ;;  %v1218_v53 = vmul.u32 %v1216_v21, %v4805_v37 }
  0xba   : > { %v620_v56 = vadd.s32 %v619_v50, %v615_v22  ;;  %v1195_v57 = vmul.u32 %v1193_v46, %v4805_v37  ;;  %v1196_v58 = vmul.u32 %v1194_v47, %v4805_v37  ;;  %v1197_v60 = vmul.u32 %v1193_v46, %v4812_v43 }
  0xbb   : > { %v1220_v27 = vmul.u32 %v1216_v21, %v4812_v43  ;;  %v1221_v61 = vshll.u32 %v1218_v53, 16  ;;  %v1223_v33 = vshll.u32 %v1219_v49, 16  ;;  %v1198_v62 = vmul.u32 %v1194_v47, %v4812_v43 }
  0xbc   : > { %v621_v35 = vadd.s32 536870912, %v620_v56  ;;  %v1199_v63 = vshll.u32 %v1196_v58, 16  ;;  %v1201_v0 = vshll.u32 %v1197_v60, 16  ;;  %v681_v3 = vshrl.u32 %v680_v55, 23 }
  0xbd   : > { %vm1225_vm0 = vc.u32 %v1217_v52, %v1221_v61  ;;  %v1227_v2 = vadd.s32 %v1221_v61, %v1217_v52  ;;  %v1158_v4 = vshrl.u32 %v6385_v39, %v4823_v59  ;;  %v1179_v6 = vsel %vm1177_vm14, %v1167_v1, 2102212464 }
  0xbe   : > { %vm1203_vm1 = vc.u32 %v1195_v57, %v1199_v63  ;;  %v1205_v5 = vadd.s32 %v1199_v63, %v1195_v57  ;;  %v1226_v37 = vsel %vm1225_vm0, 1, %v6390_v11  ;;  %v4933_v43 = vshrl.u32 %v621_v35, 30 }
  0xbf   : > { %v1204_v7 = vsel %vm1203_vm1, 1, %v6390_v11  ;;  %v1228_v8 = vadd.s32 %v1226_v37, %v1220_v27  ;;  %vm1229_vm2 = vc.u32 %v1227_v2, %v1223_v33  ;;  %v1222_v9 = vshrl.u32 %v1218_v53, 16 }
  0xc0   : > { %v1206_v36 = vadd.s32 %v1204_v7, %v1198_v62  ;;  %vm1207_vm3 = vc.u32 %v1205_v5, %v1201_v0  ;;  %v1200_v10 = vshrl.u32 %v1196_v58, 16  ;;  %v1230_v59 = vsel %vm1229_vm2, 1, %v6390_v11 }
  0xc1   : > { %v1208_v15 = vsel %vm1207_vm3, 1, %v6390_v11  ;;  %v4180_v17 = vadd.s32 4294967169, %v681_v3  ;;  %v1232_v25 = vadd.s32 %v1230_v59, %v1228_v8  ;;  %v1202_v26 = vshrl.u32 %v1197_v60, 16 }
  0xc2   : > { %v1210_v20 = vadd.s32 %v1208_v15, %v1206_v36  ;;  %v1224_v30 = vshrl.u32 %v1219_v49, 16  ;;  %v623_v31 = vshll.u32 %v4933_v43, 30  ;;  %v1178_v34 = vsel %vm1174_vm11, %v1158_v4, %v4856_v24 }
  0xc3   : > { %v687_v1 = vadd.s32 1, %v4180_v17  ;;  %v1180_v40 = vsel %vm1176_vm12, %v4860_v28, %v1179_v6  ;;  %v4944_v44 = vadd.s32 %v1227_v2, %v1223_v33  ;;  %v1233_v38 = vadd.s32 %v1232_v25, %v1222_v9 }
  0xc4   : > { %v1211_v32 = vadd.s32 %v1210_v20, %v1200_v10  ;;  %v1181_v22 = vsel %vm1175_vm13, %v1178_v34, %v1180_v40  ;;  %v4950_v49 = vsub.s32 %v620_v56, %v623_v31  ;;  %v677_v28 = vand.u32 2147483647, %v4913_v42 }
  0xc5   : > { %vm688_vm4 = vcmp.gt.s32.totalorder %v687_v1, 0  ;;  %v1234_v47 = vadd.s32 %v1233_v38, %v1224_v30  ;;  %v1235_v52 = vmul.u32 %v4794_v29, %v1181_v22  ;;  %vm524_vm3 = vcmp.lt.s32.totalorder %v4780_v12, 0 }
  0xc6   : > { %v689_v21 = vsel %vm688_vm4, %v687_v1, 0  ;;  %v4948_v46 = vadd.s32 %v1211_v32, %v1202_v26  ;;  %v626_v23 = vsub.s32 0, %v4950_v49  ;;  %vm625_vm6 = vcmp.lt.s32.totalorder %v4950_v49, 0 }
  0xc7   : > { %v691_v50 = vand.u32 31, %v689_v21  ;;  %v1238_v24 = vadd.s32 1, %v1234_v47  ;;  %v684_v56 = vand.u32 8388607, %v677_v28  ;;  %v4972_v35 = vshrl.u32 %v689_v21, 5 }
  0xc8   : > { %vm1237_vm5 = vc.u32 %v4948_v46, %v4944_v44  ;;  %v627_v0 = vsel %vm625_vm6, %v626_v23, %v4950_v49 }
  0xc9   : > { %v4956_v53 = vsub.s32 32, %v691_v50  ;;  %v1239_v55 = vsel %vm1237_vm5, %v1238_v24, %v1234_v47  ;;  %v694_v58 = vshll.u32 %v6385_v39, %v691_v50  ;;  %v697_v29 = vshll.u32 %v6383_v41, %v691_v50 }
  0xca   : > { %v1240_v27 = vadd.s32 %v1239_v55, %v1235_v52  ;;  %v703_v62 = vshll.u32 %v6379_v48, %v691_v50  ;;  %v700_v4 = vshll.u32 %v6381_v45, %v691_v50  ;;  %v685_v5 = vor.u32 8388608, %v684_v56 }
  0xcb   : > { %v695_v57 = vshrl.u32 %v6383_v41, %v4956_v53  ;;  %v698_v60 = vshrl.u32 %v6381_v45, %v4956_v53  ;;  %v701_v61 = vshrl.u32 %v6379_v48, %v4956_v53  ;;  %v704_v33 = vshrl.u32 %v6376_v51, %v4956_v53 }
  0xcc   : > { %v707_v63 = vshrl.u32 %v6374_v54, %v4956_v53  ;;  %v706_v6 = vshll.u32 %v6376_v51, %v691_v50  ;;  %v1241_v7 = vadd.s32 536870912, %v1240_v27  ;;  %v628_v36 = vclz %v627_v0  ;;  %v5014_v50 = vpop.f32.mrf.mxu1 }
  0xcd   : > { %v4978_v2 = vor.u32 %v695_v57, %v694_v58  ;;  %v4980_v3 = vor.u32 %v698_v60, %v697_v29  ;;  %v705_v37 = vor.u32 %v704_v33, %v703_v62  ;;  %v702_v8 = vor.u32 %v701_v61, %v700_v4 }
  0xce   : > { %v708_v9 = vor.u32 %v707_v63, %v706_v6  ;;  %vm709_vm7 = vcmp.lt.s32.totalorder %v4972_v35, 1  ;;  %vm712_vm8 = vcmp.lt.s32.totalorder %v4972_v35, 4  ;;  %vm711_vm9 = vcmp.lt.s32.totalorder %v4972_v35, 3 }
  0xcf   : > { %v717_v10 = vsel %vm709_vm7, %v4978_v2, %v4980_v3  ;;  %v718_v15 = vsel %vm712_vm8, %v705_v37, 920167782  ;;  %v4993_v59 = vshll.u32 %v685_v5, 8  ;;  %v4995_v17 = vshrl.u32 %v1241_v7, 30 }
  0xd0   : > { %vm710_vm10 = vcmp.lt.s32.totalorder %v4972_v35, 2  ;;  %v719_v20 = vsel %vm711_vm9, %v702_v8, %v718_v15  ;;  %v4178_v25 = vadd.s32 4294967294, %v628_v36  ;;  %v721_v30 = vsel %vm709_vm7, %v4980_v3, %v702_v8 }
  0xd1   : > { %v720_v26 = vsel %vm710_vm10, %v717_v10, %v719_v20  ;;  %v722_v1 = vsel %vm712_vm8, %v708_v9, 1326507024  ;;  %v726_v32 = vand.u32 65535, %v4993_v59  ;;  %v1243_v38 = vshll.u32 %v4995_v17, 30 }
  0xd2   : > { %v723_v31 = vsel %vm711_vm9, %v705_v37, %v722_v1  ;;  %v751_v34 = vshrl.u32 %v720_v26, 16  ;;  %v727_v21 = vshrl.u32 %v4993_v59, 16  ;;  %vm4179_vm11 = vcmp.lt.s32.totalorder %v4178_v25, 0 }
  0xd3   : > { %v724_v40 = vsel %vm710_vm10, %v721_v30, %v723_v31  ;;  %v750_v24 = vand.u32 65535, %v720_v26  ;;  %v1300_v57 = vand.u32 2139095040, %v5014_v50  ;;  %v5017_v56 = vsel %vm4179_vm11, 0, %v4178_v25 }
  0xd4   : > { %v728_v22 = vand.u32 65535, %v724_v40  ;;  %v729_v47 = vshrl.u32 %v724_v40, 16  ;;  %v753_v23 = vmul.u32 %v751_v34, %v726_v32  ;;  %v5019_v58 = vsub.s32 %v1240_v27, %v1243_v38 }
  0xd5   : > { %v754_v33 = vmul.u32 %v750_v24, %v727_v21  ;;  %v636_v4 = vsub.s32 4294967266, %v5017_v56  ;;  %v1301_v37 = vshrl.u32 %v1300_v57, 23  ;;  %v752_v36 = vmul.u32 %v750_v24, %v726_v32 }
  0xd6   : > { %v731_v52 = vmul.u32 %v729_v47, %v726_v32  ;;  %v732_v55 = vmul.u32 %v728_v22, %v727_v21  ;;  %v730_v60 = vmul.u32 %v728_v22, %v726_v32  ;;  %v733_v61 = vmul.u32 %v729_v47, %v727_v21 }
  0xd7   : > { %v756_v0 = vshll.u32 %v753_v23, 16  ;;  %v1246_v6 = vsub.s32 0, %v5019_v58  ;;  %vm1245_vm14 = vcmp.lt.s32.totalorder %v5019_v58, 0  ;;  %v755_v10 = vmul.u32 %v751_v34, %v727_v21 }
  0xd8   : > { %v734_v29 = vshll.u32 %v731_v52, 16  ;;  %v736_v62 = vshll.u32 %v732_v55, 16  ;;  %v735_v27 = vshrl.u32 %v731_v52, 16  ;;  %v758_v20 = vshll.u32 %v754_v33, 16 }
  0xd9   : > { %vm760_vm15 = vc.u32 %v752_v36, %v756_v0  ;;  %v762_v25 = vadd.s32 %v756_v0, %v752_v36  ;;  %v714_v26 = vsel %vm712_vm8, %v702_v8, 2102212464  ;;  %v1247_v1 = vsel %vm1245_vm14, %v1246_v6, %v5019_v58 }
  0xda   : > { %vm738_vm12 = vc.u32 %v730_v60, %v734_v29  ;;  %v740_v63 = vadd.s32 %v734_v29, %v730_v60  ;;  %v761_v30 = vsel %vm760_vm15, 1, %v6390_v11  ;;  %v693_v32 = vshrl.u32 %v6385_v39, %v4956_v53 }
  0xdb   : > { %v739_v5 = vsel %vm738_vm12, 1, %v6390_v11  ;;  %v763_v40 = vadd.s32 %v761_v30, %v755_v10  ;;  %vm764_vm0 = vc.u32 %v762_v25, %v758_v20  ;;  %v737_v38 = vshrl.u32 %v732_v55, 16 }
  0xdc   : > { %v741_v7 = vadd.s32 %v739_v5, %v733_v61  ;;  %vm742_vm13 = vc.u32 %v740_v63, %v736_v62  ;;  %v765_v34 = vsel %vm764_vm0, 1, %v6390_v11  ;;  %v637_v21 = vadd.s32 127, %v636_v4 }
  0xdd   : > { %v743_v9 = vsel %vm742_vm13, 1, %v6390_v11  ;;  %v757_v22 = vshrl.u32 %v753_v23, 16  ;;  %v767_v47 = vadd.s32 %v765_v34, %v763_v40  ;;  %v4192_v24 = vadd.s32 4294967169, %v1301_v37 }
  0xde   : > { %v745_v15 = vadd.s32 %v743_v9, %v741_v7  ;;  %v1248_v52 = vclz %v1247_v1  ;;  %v713_v8 = vsel %vm709_vm7, %v693_v32, %v4978_v2  ;;  %v715_v57 = vsel %vm711_vm9, %v4980_v3, %v714_v26 }
  0xdf   : > { %v759_v29 = vshrl.u32 %v754_v33, 16  ;;  %v768_v53 = vadd.s32 %v767_v47, %v757_v22  ;;  %v646_v55 = vsub.s32 4, %v4933_v43  ;;  %v5042_v61 = vadd.s32 %v762_v25, %v758_v20 }
  0xe0   : > { %v746_v31 = vadd.s32 %v745_v15, %v735_v27  ;;  %v1307_v23 = vadd.s32 1, %v4192_v24  ;;  %v632_v62 = vsub.s32 32, %v5017_v56  ;;  %v638_v63 = vshll.u32 %v637_v21, 23 }
  0xe1   : > { %v716_v0 = vsel %vm710_vm10, %v713_v8, %v715_v57  ;;  %v769_v2 = vadd.s32 %v768_v53, %v759_v29  ;;  %v4190_v4 = vadd.s32 4294967294, %v1248_v52  ;;  %v6373_v3 = vand.u32 2147483647, %v5014_v50 }
  0xe2   : > { %v5039_v60 = vadd.s32 %v746_v31, %v737_v38  ;;  %vm1308_vm2 = vcmp.gt.s32.totalorder %v1307_v23, 0  ;;  %v616_v33 = vadd.s32 %v4896_v19, %v4894_v18  ;;  %v647_v35 = vsel %vm524_vm3, %v646_v55, %v4933_v43 }
  0xe3   : > { %v773_v5 = vadd.s32 1, %v769_v2  ;;  %v1309_v37 = vsel %vm1308_vm2, %v1307_v23, 0  ;;  %v770_v6 = vmul.u32 %v4993_v59, %v716_v0  ;;  %v633_v36 = vshll.u32 %v4950_v49, %v5017_v56 }
  0xe4   : > { %vm772_vm1 = vc.u32 %v5039_v60, %v5042_v61  ;;  %v1311_v7 = vand.u32 31, %v1309_v37  ;;  %v634_v27 = vshrl.u32 %v616_v33, %v632_v62  ;;  %v639_v9 = vor.u32 4788187, %v638_v63 }
  0xe5   : > { %v774_v10 = vsel %vm772_vm1, %v773_v5, %v769_v2  ;;  %vm4191_vm4 = vcmp.lt.s32.totalorder %v4190_v4, 0  ;;  %v1304_v18 = vand.u32 8388607, %v6373_v3  ;;  %v5061_v20 = vshrl.u32 %v1309_v37, 5 }
  0xe6   : > { %v775_v15 = vadd.s32 %v774_v10, %v770_v6  ;;  %v1312_v19 = vsub.s32 32, %v1311_v7  ;;  %v1314_v25 = vshll.u32 %v6385_v39, %v1311_v7  ;;  %v1317_v43 = vshll.u32 %v6383_v41, %v1311_v7 }
  0xe7   : > { %v1323_v59 = vshll.u32 %v6379_v48, %v1311_v7  ;;  %v1320_v56 = vshll.u32 %v6381_v45, %v1311_v7  ;;  %v1326_v30 = vshll.u32 %v6376_v51, %v1311_v7  ;;  %v635_v38 = vor.u32 %v634_v27, %v633_v36 }
  0xe8   : > { %v776_v26 = vadd.s32 536870912, %v775_v15  ;;  %v1315_v49 = vshrl.u32 %v6383_v41, %v1312_v19  ;;  %v1318_v1 = vshrl.u32 %v6381_v45, %v1312_v19  ;;  %v1321_v31 = vshrl.u32 %v6379_v48, %v1312_v19 }
  0xe9   : > { %v1324_v40 = vshrl.u32 %v6376_v51, %v1312_v19  ;;  %v1327_v32 = vshrl.u32 %v6374_v54, %v1312_v19  ;;  %v5074_v34 = vsel %vm4191_vm4, 0, %v4190_v4  ;;  %v1305_v22 = vor.u32 8388608, %v1304_v18 }
  0xea   : > { %v5076_v21 = vshrl.u32 %v776_v26, 30  ;;  %vm5080_vm5 = vcmp.le.f32.partialorder %v522_v14, 0.7853982  ;;  %v1316_v24 = vor.u32 %v1315_v49, %v1314_v25  ;;  %v5084_v52 = vor.u32 %v1318_v1, %v1317_v43  ;;  %v5092_v14 = vpop.f32.mrf.mxu0 }
  0xeb   : > { %v1325_v8 = vor.u32 %v1324_v40, %v1323_v59  ;;  %v640_v57 = vand.u32 2147483647, %v639_v9  ;;  %v649_v29 = vsel %vm5080_vm5, 0, %v647_v35  ;;  %vm1329_vm6 = vcmp.lt.s32.totalorder %v5061_v20, 1 }
  0xec   : > { %v778_v53 = vshll.u32 %v5076_v21, 30  ;;  %v1256_v55 = vsub.s32 4294967266, %v5074_v34  ;;  %v1322_v23 = vor.u32 %v1321_v31, %v1320_v56  ;;  %v1328_v62 = vor.u32 %v1327_v32, %v1326_v30 }
  0xed   : > { %vm1332_vm7 = vcmp.lt.s32.totalorder %v5061_v20, 4  ;;  %v642_v63 = vcvt.s32.f32 %v635_v38  ;;  %vm1331_vm8 = vcmp.lt.s32.totalorder %v5061_v20, 3  ;;  %v5095_v0 = vshll.u32 %v1305_v22, 8 }
  0xee   : > { %v5097_v2 = vadd.s32 3, %v649_v29  ;;  %vm1330_vm9 = vcmp.lt.s32.totalorder %v5061_v20, 2  ;;  %v1337_v4 = vsel %vm1329_vm6, %v1316_v24, %v5084_v52  ;;  %v1338_v33 = vsel %vm1332_vm7, %v1325_v8, 920167782 }
  0xef   : > { %v5105_v5 = vmul.f32 %v642_v63, %v640_v57  ;;  %v5107_v37 = vand.u32 3, %v649_v29  ;;  %v5109_v35 = vsub.s32 %v775_v15, %v778_v53  ;;  %v835_v6 = vand.u32 2139095040, %v5092_v14 }
  0xf0   : > { %v1257_v7 = vadd.s32 127, %v1256_v55  ;;  %v1339_v36 = vsel %vm1331_vm8, %v1322_v23, %v1338_v33  ;;  %v1341_v27 = vsel %vm1329_vm6, %v5084_v52, %v1322_v23  ;;  %v1342_v9 = vsel %vm1332_vm7, %v1328_v62, 1326507024 }
  0xf1   : > { %6403 = vst [vmem:[#allocation5_spill] sm:$0xff] %v5107_v37  ;;  %v1236_v10 = vadd.s32 %v4944_v44, %v4948_v46  ;;  %v1340_v15 = vsel %vm1330_vm9, %v1337_v4, %v1339_v36  ;;  %v1346_v18 = vand.u32 65535, %v5095_v0  ;;  %v1347_v25 = vshrl.u32 %v5095_v0, 16 }
  0xf2   : > { %v1252_v43 = vsub.s32 32, %v5074_v34  ;;  %v1343_v59 = vsel %vm1331_vm8, %v1325_v8, %v1342_v9  ;;  %v1370_v26 = vand.u32 65535, %v1340_v15  ;;  %v1371_v49 = vshrl.u32 %v1340_v15, 16 }
  0xf3   : > { %v644_v56 = vxor.u32 2147483648, %v5105_v5  ;;  %v781_v30 = vsub.s32 0, %v5109_v35  ;;  %v1344_v44 = vsel %vm1330_vm9, %v1341_v27, %v1343_v59  ;;  %v836_v46 = vshrl.u32 %v835_v6, 23 }
  0xf4   : > { %v1258_v1 = vshll.u32 %v1257_v7, 23  ;;  %vm780_vm10 = vcmp.lt.s32.totalorder %v5109_v35, 0  ;;  %v1348_v31 = vand.u32 65535, %v1344_v44  ;;  %v1349_v40 = vshrl.u32 %v1344_v44, 16 }
  0xf5   : > { %v1253_v32 = vshll.u32 %v5019_v58, %v5074_v34  ;;  %v1313_v38 = vshrl.u32 %v6385_v39, %v1312_v19  ;;  %v1373_v22 = vmul.u32 %v1371_v49, %v1346_v18  ;;  %v1374_v8 = vmul.u32 %v1370_v26, %v1347_v25 }
  0xf6   : > { %v1254_v57 = vshrl.u32 %v1236_v10, %v1252_v43  ;;  %v1350_v29 = vmul.u32 %v1348_v31, %v1346_v18  ;;  %v1351_v53 = vmul.u32 %v1349_v40, %v1346_v18  ;;  %v1352_v55 = vmul.u32 %v1348_v31, %v1347_v25 }
  0xf7   : > { %v782_v62 = vsel %vm780_vm10, %v781_v30, %v5109_v35  ;;  %v1372_v63 = vmul.u32 %v1370_v26, %v1346_v18  ;;  %v1376_v4 = vshll.u32 %v1373_v22, 16  ;;  %v4183_v33 = vadd.s32 4294967169, %v836_v46 }
  0xf8   : > { %v5137_v6 = vor.u32 4788187, %v1258_v1  ;;  %v1353_v7 = vmul.u32 %v1349_v40, %v1347_v25  ;;  %v1354_v36 = vshll.u32 %v1351_v53, 16  ;;  %v6372_v27 = vand.u32 2147483647, %v5092_v14 }
  0xf9   : > { %v1333_v58 = vsel %vm1329_vm6, %v1313_v38, %v1316_v24  ;;  %v1334_v19 = vsel %vm1332_vm7, %v1322_v23, 2102212464  ;;  %v1356_v34 = vshll.u32 %v1352_v55, 16  ;;  %v1378_v9 = vshll.u32 %v1374_v8, 16 }
  0xfa   : > { %v783_v10 = vclz %v782_v62  ;;  %vm1358_vm11 = vc.u32 %v1350_v29, %v1354_v36  ;;  %v1360_v15 = vadd.s32 %v1354_v36, %v1350_v29  ;;  %v1375_v18 = vmul.u32 %v1371_v49, %v1347_v25 }
  0xfb   : > { %v1359_v43 = vsel %vm1358_vm11, 1, %v6390_v11  ;;  %vm1380_vm12 = vc.u32 %v1372_v63, %v1376_v4  ;;  %v1382_v59 = vadd.s32 %v1376_v4, %v1372_v63  ;;  %v842_v26 = vadd.s32 1, %v4183_v33 }
  0xfc   : > { %v1335_v30 = vsel %vm1331_vm8, %v5084_v52, %v1334_v19  ;;  %v1355_v44 = vshrl.u32 %v1351_v53, 16  ;;  %v1361_v24 = vadd.s32 %v1359_v43, %v1353_v7  ;;  %vm1362_vm13 = vc.u32 %v1360_v15, %v1356_v34 }
  0xfd   : > { %v1363_v23 = vsel %vm1362_vm13, 1, %v6390_v11  ;;  %v1381_v46 = vsel %vm1380_vm12, 1, %v6390_v11  ;;  %vm1384_vm14 = vc.u32 %v1382_v59, %v1378_v9  ;;  %v839_v25 = vand.u32 8388607, %v6372_v27 }
  0xfe   : > { %vm1144_vm15 = vcmp.lt.s32.totalorder %v4782_v13, 0  ;;  %v1357_v49 = vshrl.u32 %v1352_v55, 16  ;;  %v1365_v1 = vadd.s32 %v1363_v23, %v1361_v24  ;;  %v1377_v31 = vshrl.u32 %v1373_v22, 16 }
  0xff   : > { %v1383_v40 = vadd.s32 %v1381_v46, %v1375_v18  ;;  %v4181_v38 = vadd.s32 4294967294, %v783_v10  ;;  %v1336_v52 = vsel %vm1330_vm9, %v1333_v58, %v1335_v30  ;;  %v1385_v29 = vsel %vm1384_vm14, 1, %v6390_v11 }
 0x100   : > { %vm843_vm0 = vcmp.gt.s32.totalorder %v842_v26, 0  ;;  %v1366_v53 = vadd.s32 %v1365_v1, %v1355_v44  ;;  %v1379_v62 = vshrl.u32 %v1374_v8, 16  ;;  %v645_v33 = vsel %vm524_vm3, %v644_v56, %v5105_v5 }
 0x101   : > { %v1387_v63 = vadd.s32 %v1385_v29, %v1383_v40  ;;  %v844_v4 = vsel %vm843_vm0, %v842_v26, 0  ;;  %v1266_v55 = vsub.s32 4, %v4995_v17  ;;  %v5160_v7 = vadd.s32 %v1382_v59, %v1378_v9 }
 0x102   : > { %v846_v22 = vand.u32 31, %v844_v4  ;;  %v1255_v36 = vor.u32 %v1254_v57, %v1253_v32  ;;  %v1260_v20 = vand.u32 2147483647, %v5137_v6  ;;  %v5163_v58 = vadd.s32 %v1366_v53, %v1357_v49 }
 0x103   : > { %v1388_v19 = vadd.s32 %v1387_v63, %v1377_v31  ;;  %vm4182_vm1 = vcmp.lt.s32.totalorder %v4181_v38, 0  ;;  %v1390_v8 = vmul.u32 %v5095_v0, %v1336_v52  ;;  %v840_v34 = vor.u32 8388608, %v839_v25 }
 0x104   : > { %v5166_v10 = vsub.s32 32, %v846_v22  ;;  %v5168_v18 = vshrl.u32 %v844_v4, 5  ;;  %v849_v5 = vshll.u32 %v6385_v39, %v846_v22  ;;  %v852_v56 = vshll.u32 %v6383_v41, %v846_v22 }
 0x105   : > { %v1389_v15 = vadd.s32 %v1388_v19, %v1379_v62  ;;  %vm1392_vm2 = vc.u32 %v5163_v58, %v5160_v7  ;;  %v855_v9 = vshll.u32 %v6381_v45, %v846_v22  ;;  %v858_v43 = vshll.u32 %v6379_v48, %v846_v22 }
 0x106   : > { %v850_v32 = vshrl.u32 %v6383_v41, %v5166_v10  ;;  %v853_v57 = vshrl.u32 %v6381_v45, %v5166_v10  ;;  %v856_v0 = vshrl.u32 %v6379_v48, %v5166_v10  ;;  %v859_v59 = vshrl.u32 %v6376_v51, %v5166_v10 }
 0x107   : > { %v1393_v6 = vadd.s32 1, %v1389_v15  ;;  %v5187_v26 = vsel %vm5080_vm5, %v4780_v12, %v645_v33  ;;  %v1267_v30 = vsel %vm1144_vm15, %v1266_v55, %v4995_v17  ;;  %v1262_v23 = vcvt.s32.f32 %v1255_v36  ;;  %v5230_v55 = vpop.f32.mrf.mxu1 }
 0x108   : > { %v5192_v44 = vor.u32 %v850_v32, %v849_v5  ;;  %v5194_v24 = vor.u32 %v853_v57, %v852_v56  ;;  %v5196_v25 = vor.u32 %v856_v0, %v855_v9  ;;  %v860_v49 = vor.u32 %v859_v59, %v858_v43 }
 0x109   : > { %v1394_v46 = vsel %vm1392_vm2, %v1393_v6, %v1389_v15  ;;  %vm5200_vm3 = vcmp.le.f32.partialorder %v1142_v16, 0.7853982  ;;  %v5205_v47 = vsel %vm4182_vm1, 0, %v4181_v38  ;;  %v861_v17 = vshll.u32 %v6376_v51, %v846_v22 }
 0x10a   : > { %v1395_v31 = vadd.s32 %v1394_v46, %v1390_v8  ;;  %v862_v40 = vshrl.u32 %v6374_v54, %v5166_v10  ;;  %v5212_v52 = vmul.f32 %v5187_v26, %v5187_v26  ;;  %v1263_v29 = vmul.f32 %v1262_v23, %v1260_v20 }
 0x10b   : > { %vm864_vm4 = vcmp.lt.s32.totalorder %v5168_v18, 1  ;;  %v5215_v16 = vshll.u32 %v840_v34, 8  ;;  %vm867_vm5 = vcmp.lt.s32.totalorder %v5168_v18, 4  ;;  %v791_v63 = vsub.s32 4294967266, %v5205_v47 }
 0x10c   : > { %v1396_v53 = vadd.s32 536870912, %v1395_v31  ;;  %v863_v62 = vor.u32 %v862_v40, %v861_v17  ;;  %v872_v38 = vsel %vm864_vm4, %v5192_v44, %v5194_v24  ;;  %vm866_vm6 = vcmp.lt.s32.totalorder %v5168_v18, 3 }
 0x10d   : > { %v873_v4 = vsel %vm867_vm5, %v860_v49, 920167782  ;;  %v876_v33 = vsel %vm864_vm4, %v5194_v24, %v5196_v25  ;;  %vm865_vm7 = vcmp.lt.s32.totalorder %v5168_v18, 2  ;;  %v658_v19 = vmul.f32 -0.00019511016, %v5212_v52 }
 0x10e   : > { %v5232_v22 = vshrl.u32 %v1396_v53, 30  ;;  %v874_v36 = vsel %vm866_vm6, %v5196_v25, %v873_v4  ;;  %v877_v20 = vsel %vm867_vm5, %v863_v62, 1326507024  ;;  %v1264_v8 = vxor.u32 2147483648, %v1263_v29 }
 0x10f   : > { %v875_v34 = vsel %vm865_vm7, %v872_v38, %v874_v36  ;;  %v878_v15 = vsel %vm866_vm6, %v860_v49, %v877_v20  ;;  %v787_v5 = vsub.s32 32, %v5205_v47  ;;  %v1455_v57 = vand.u32 2139095040, %v5230_v55 }
 0x110   : > { %v1398_v56 = vshll.u32 %v5232_v22, 30  ;;  %v879_v32 = vsel %vm865_vm7, %v876_v33, %v878_v15  ;;  %v792_v0 = vadd.s32 127, %v791_v63  ;;  %v881_v6 = vand.u32 65535, %v5215_v16 }
 0x111   : > { %v883_v9 = vand.u32 65535, %v879_v32  ;;  %v884_v43 = vshrl.u32 %v879_v32, 16  ;;  %v882_v23 = vshrl.u32 %v5215_v16, 16  ;;  %v905_v46 = vand.u32 65535, %v875_v34 }
 0x112   : > { %v5251_v59 = vsub.s32 %v1395_v31, %v1398_v56  ;;  %v906_v49 = vshrl.u32 %v875_v34, 16  ;;  %v659_v17 = vadd.f32 0.008332121, %v658_v19  ;;  %v5256_v40 = vsel %vm5200_vm3, 0, %v1267_v30 }
 0x113   : > { %v771_v53 = vadd.s32 %v5042_v61, %v5039_v60  ;;  %v886_v62 = vmul.u32 %v884_v43, %v881_v6  ;;  %v1265_v38 = vsel %vm1144_vm15, %v1264_v8, %v1263_v29  ;;  %v788_v31 = vshll.u32 %v5109_v35, %v5205_v47 }
 0x114   : > { %v887_v63 = vmul.u32 %v883_v9, %v882_v23  ;;  %v1456_v4 = vshrl.u32 %v1455_v57, 23  ;;  %v1401_v36 = vsub.s32 0, %v5251_v59  ;;  %v885_v20 = vmul.u32 %v883_v9, %v881_v6 }
 0x115   : > { %v789_v33 = vshrl.u32 %v771_v53, %v787_v5  ;;  %v889_v19 = vshll.u32 %v886_v62, 16  ;;  %v793_v34 = vshll.u32 %v792_v0, 23  ;;  %vm1400_vm8 = vcmp.lt.s32.totalorder %v5251_v59, 0 }
 0x116   : > { %v908_v30 = vmul.u32 %v906_v49, %v881_v6  ;;  %v909_v15 = vmul.u32 %v905_v46, %v882_v23  ;;  %v888_v60 = vmul.u32 %v884_v43, %v882_v23  ;;  %v891_v61 = vshll.u32 %v887_v63, 16 }
 0x117   : > { %vm893_vm9 = vc.u32 %v885_v20, %v889_v19  ;;  %v895_v56 = vadd.s32 %v889_v19, %v885_v20  ;;  %v907_v8 = vmul.u32 %v905_v46, %v881_v6  ;;  %v4195_v47 = vadd.s32 4294967169, %v1456_v4 }
 0x118   : > { %v894_v29 = vsel %vm893_vm9, 1, %v6390_v11  ;;  %v911_v35 = vshll.u32 %v908_v30, 16  ;;  %v1402_v5 = vsel %vm1400_vm8, %v1401_v36, %v5251_v59  ;;  %v910_v57 = vmul.u32 %v906_v49, %v882_v23 }
 0x119   : > { %v896_v32 = vadd.s32 %v894_v29, %v888_v60  ;;  %vm897_vm10 = vc.u32 %v895_v56, %v891_v61  ;;  %v913_v9 = vshll.u32 %v909_v15, 16  ;;  %v5272_v43 = vsel %vm5200_vm3, %v4782_v13, %v1265_v38 }
 0x11a   : > { %v898_v0 = vsel %vm897_vm10, 1, %v6390_v11  ;;  %vm915_vm11 = vc.u32 %v907_v8, %v911_v35  ;;  %v917_v53 = vadd.s32 %v911_v35, %v907_v8  ;;  %v890_v20 = vshrl.u32 %v886_v62, 16 }
 0x11b   : > { %v900_v19 = vadd.s32 %v898_v0, %v896_v32  ;;  %v916_v6 = vsel %vm915_vm11, 1, %v6390_v11  ;;  %v790_v46 = vor.u32 %v789_v33, %v788_v31  ;;  %v869_v4 = vsel %vm867_vm5, %v5196_v25, 2102212464 }
 0x11c   : > { %v918_v23 = vadd.s32 %v916_v6, %v910_v57  ;;  %vm919_vm12 = vc.u32 %v917_v53, %v913_v9  ;;  %v794_v49 = vor.u32 4788187, %v793_v34  ;;  %v1403_v36 = vclz %v1402_v5 }
 0x11d   : > { %v848_v60 = vshrl.u32 %v6385_v39, %v5166_v10  ;;  %v901_v61 = vadd.s32 %v900_v19, %v890_v20  ;;  %v892_v1 = vshrl.u32 %v887_v63, 16  ;;  %v920_v38 = vsel %vm919_vm12, 1, %v6390_v11 }
 0x11e   : > { %v6371_v62 = vand.u32 2147483647, %v5230_v55  ;;  %v1462_v56 = vadd.s32 1, %v4195_v47  ;;  %v870_v25 = vsel %vm866_vm6, %v5194_v24, %v869_v4  ;;  %v912_v33 = vshrl.u32 %v908_v30, 16 }
 0x11f   : > { %v868_v31 = vsel %vm864_vm4, %v848_v60, %v5192_v44  ;;  %v922_v34 = vadd.s32 %v920_v38, %v918_v23  ;;  %v660_v29 = vmul.f32 %v659_v17, %v5212_v52  ;;  %v5291_v10 = vmul.f32 %v5272_v43, %v5272_v43 }
 0x120   : > { %v5293_v63 = vadd.s32 %v901_v61, %v892_v1  ;;  %vm1463_vm13 = vcmp.gt.s32.totalorder %v1462_v56, 0  ;;  %v795_v8 = vand.u32 2147483647, %v794_v49  ;;  %v4193_v35 = vadd.s32 4294967294, %v1403_v36 }
 0x121   : > { %v914_v47 = vshrl.u32 %v909_v15, 16  ;;  %v923_v5 = vadd.s32 %v922_v34, %v912_v33  ;;  %v5296_v44 = vand.u32 3, %v5097_v2  ;;  %v871_v24 = vsel %vm865_vm7, %v868_v31, %v870_v25 }
 0x122   : > { %v5300_v30 = vadd.s32 %v917_v53, %v913_v9  ;;  %v1464_v17 = vsel %vm1463_vm13, %v1462_v56, 0  ;;  %v5303_v32 = vand.u32 3, %v5256_v40  ;;  %v797_v57 = vcvt.s32.f32 %v790_v46 }
 0x123   : > { %v924_v0 = vadd.s32 %v923_v5, %v914_v47  ;;  %v1459_v20 = vand.u32 8388607, %v6371_v62  ;;  %v661_v19 = vadd.f32 -0.16666654, %v660_v29  ;;  %v1278_v15 = vmul.f32 -0.00019511016, %v5291_v10 }
 0x124   : > { %6406 = vst [vmem:[#allocation6_spill] sm:$0xff] %v5303_v32  ;;  %vm927_vm14 = vc.u32 %v5293_v63, %v5300_v30  ;;  %v1466_v2 = vand.u32 31, %v1464_v17  ;;  %v798_v18 = vmul.f32 %v797_v57, %v795_v8  ;;  %vm4194_vm15 = vcmp.lt.s32.totalorder %v4193_v35, 0 }
 0x125   : > { %v925_v9 = vmul.u32 %v5215_v16, %v871_v24  ;;  %v928_v53 = vadd.s32 1, %v924_v0  ;;  %v5311_v6 = vshrl.u32 %v1464_v17, 5  ;;  %v1460_v36 = vor.u32 8388608, %v1459_v20 }
 0x126   : > { %v5313_v4 = vsub.s32 32, %v1466_v2  ;;  %v1469_v46 = vshll.u32 %v6385_v39, %v1466_v2  ;;  %v1472_v23 = vshll.u32 %v6383_v41, %v1466_v2  ;;  %v1475_v60 = vshll.u32 %v6381_v45, %v1466_v2 }
 0x127   : > { %v929_v49 = vsel %vm927_vm14, %v928_v53, %v924_v0  ;;  %v1478_v61 = vshll.u32 %v6379_v48, %v1466_v2  ;;  %v1481_v56 = vshll.u32 %v6376_v51, %v1466_v2  ;;  %v1406_v31 = vsel %vm4194_vm15, 0, %v4193_v35 }
 0x128   : > { %v930_v1 = vadd.s32 %v929_v49, %v925_v9  ;;  %v1470_v38 = vshrl.u32 %v6383_v41, %v5313_v4  ;;  %v1473_v16 = vshrl.u32 %v6381_v45, %v5313_v4  ;;  %v1476_v25 = vshrl.u32 %v6379_v48, %v5313_v4 }
 0x129   : > { %v1479_v33 = vshrl.u32 %v6376_v51, %v5313_v4  ;;  %v1482_v34 = vshrl.u32 %v6374_v54, %v5313_v4  ;;  %vm1484_vm0 = vcmp.lt.s32.totalorder %v5311_v6, 1  ;;  %vm679_vm1 = vcmp.lt.s32.totalorder %v4913_v42, 0 }
 0x12a   : > { %v931_v29 = vadd.s32 536870912, %v930_v1  ;;  %v5330_v8 = vor.u32 %v1470_v38, %v1469_v46  ;;  %v5332_v47 = vor.u32 %v1473_v16, %v1472_v23  ;;  %v1477_v5 = vor.u32 %v1476_v25, %v1475_v60 }
 0x12b   : > { %v1480_v35 = vor.u32 %v1479_v33, %v1478_v61  ;;  %vm1486_vm2 = vcmp.lt.s32.totalorder %v5311_v6, 3  ;;  %v5337_v24 = vshll.u32 %v1460_v36, 8  ;;  %v1483_v57 = vor.u32 %v1482_v34, %v1481_v56 }
 0x12c   : > { %v5339_v17 = vshrl.u32 %v931_v29, 30  ;;  %vm1485_vm3 = vcmp.lt.s32.totalorder %v5311_v6, 2  ;;  %vm1487_vm4 = vcmp.lt.s32.totalorder %v5311_v6, 4  ;;  %v1279_v0 = vadd.f32 0.008332121, %v1278_v15 }
 0x12d   : > { %v1407_v20 = vsub.s32 32, %v1406_v31  ;;  %v1492_v2 = vsel %vm1484_vm0, %v5330_v8, %v5332_v47  ;;  %v1493_v9 = vsel %vm1487_vm4, %v1480_v35, 920167782  ;;  %v799_v53 = vxor.u32 2147483648, %v798_v18 }
 0x12e   : > { %v1411_v46 = vsub.s32 4294967266, %v1406_v31  ;;  %v933_v23 = vshll.u32 %v5339_v17, 30  ;;  %v1494_v49 = vsel %vm1486_vm2, %v1477_v5, %v1493_v9  ;;  %v1391_v36 = vadd.s32 %v5160_v7, %v5163_v58 }
 0x12f   : > { %v1495_v15 = vsel %vm1485_vm3, %v1492_v2, %v1494_v49  ;;  %v1496_v60 = vsel %vm1484_vm0, %v5332_v47, %v1477_v5  ;;  %v1501_v61 = vand.u32 65535, %v5337_v24  ;;  %v1497_v16 = vsel %vm1487_vm4, %v1483_v57, 1326507024 }
 0x130   : > { %v5360_v38 = vsub.s32 %v930_v1, %v933_v23  ;;  %v1502_v56 = vshrl.u32 %v5337_v24, 16  ;;  %v1525_v25 = vand.u32 65535, %v1495_v15  ;;  %v5366_v33 = vmul.f32 %v661_v19, %v5212_v52 }
 0x131   : > { %v1409_v7 = vshrl.u32 %v1391_v36, %v1407_v20  ;;  %v1498_v58 = vsel %vm1486_vm2, %v1480_v35, %v1497_v16  ;;  %v1526_v34 = vshrl.u32 %v1495_v15, 16  ;;  %v1412_v29 = vadd.s32 127, %v1411_v46  ;;  %v5379_v36 = vpop.f32.mrf.mxu0 }
 0x132   : > { %vm935_vm5 = vcmp.lt.s32.totalorder %v5360_v38, 0  ;;  %v936_v1 = vsub.s32 0, %v5360_v38  ;;  %v1499_v2 = vsel %vm1485_vm3, %v1496_v60, %v1498_v58  ;;  %v1280_v57 = vmul.f32 %v1279_v0, %v5291_v10 }
 0x133   : > { %v1408_v9 = vshll.u32 %v5251_v59, %v1406_v31  ;;  %v1503_v23 = vand.u32 65535, %v1499_v2  ;;  %v1504_v19 = vshrl.u32 %v1499_v2, 16  ;;  %v800_v20 = vsel %vm679_vm1, %v799_v53, %v798_v18 }
 0x134   : > { %v937_v35 = vsel %vm935_vm5, %v936_v1, %v5360_v38  ;;  %v1528_v49 = vmul.u32 %v1526_v34, %v1501_v61  ;;  %v1529_v46 = vmul.u32 %v1525_v25, %v1502_v56  ;;  %v1413_v58 = vshll.u32 %v1412_v29, 23 }
 0x135   : > { %v5381_v15 = vor.u32 %v1409_v7, %v1408_v9  ;;  %v938_v16 = vclz %v937_v35  ;;  %v1505_v62 = vmul.u32 %v1503_v23, %v1501_v61  ;;  %v1506_v60 = vmul.u32 %v1504_v19, %v1501_v61 }
 0x136   : > { %v1507_v0 = vmul.u32 %v1503_v23, %v1502_v56  ;;  %v1527_v27 = vmul.u32 %v1525_v25, %v1501_v61  ;;  %v1531_v59 = vshll.u32 %v1528_v49, 16  ;;  %v1468_v2 = vshrl.u32 %v6385_v39, %v5313_v4 }
 0x137   : > { %v4184_v31 = vadd.s32 4294967294, %v938_v16  ;;  %v1509_v18 = vshll.u32 %v1506_v60, 16  ;;  %v990_v53 = vand.u32 2139095040, %v5379_v36  ;;  %v1489_v1 = vsel %vm1487_vm4, %v1477_v5, 2102212464 }
 0x138   : > { %v1508_v3 = vmul.u32 %v1504_v19, %v1502_v56  ;;  %v1511_v7 = vshll.u32 %v1507_v0, 16  ;;  %v1533_v9 = vshll.u32 %v1529_v46, 16  ;;  %vm5390_vm6 = vcmp.le.f32.partialorder %v677_v28, 0.7853982 }
 0x139   : > { %vm4185_vm7 = vcmp.lt.s32.totalorder %v4184_v31, 0  ;;  %vm1513_vm8 = vc.u32 %v1505_v62, %v1509_v18  ;;  %v1515_v61 = vadd.s32 %v1509_v18, %v1505_v62  ;;  %v1530_v25 = vmul.u32 %v1526_v34, %v1502_v56 }
 0x13a   : > { %v5394_v4 = vsel %vm4185_vm7, 0, %v4184_v31  ;;  %v1514_v23 = vsel %vm1513_vm8, 1, %v6390_v11  ;;  %vm1535_vm9 = vc.u32 %v1527_v27, %v1531_v59  ;;  %v1537_v35 = vadd.s32 %v1531_v59, %v1527_v27 }
 0x13b   : > { %v946_v5 = vsub.s32 4294967266, %v5394_v4  ;;  %v1488_v19 = vsel %vm1484_vm0, %v1468_v2, %v5330_v8  ;;  %v1510_v28 = vshrl.u32 %v1506_v60, 16  ;;  %v991_v16 = vshrl.u32 %v990_v53, 23 }
 0x13c   : > { %v1516_v54 = vadd.s32 %v1514_v23, %v1508_v3  ;;  %vm1517_vm10 = vc.u32 %v1515_v61, %v1511_v7  ;;  %v1536_v51 = vsel %vm1535_vm9, 1, %v6390_v11  ;;  %vm1539_vm11 = vc.u32 %v1537_v35, %v1533_v9 }
 0x13d   : > { %v1490_v62 = vsel %vm1486_vm2, %v5332_v47, %v1489_v1  ;;  %v1518_v56 = vsel %vm1517_vm10, 1, %v6390_v11  ;;  %v1532_v27 = vshrl.u32 %v1528_v49, 16  ;;  %v1538_v34 = vadd.s32 %v1536_v51, %v1530_v25 }
 0x13e   : > { %v1414_v59 = vor.u32 4788187, %v1413_v58  ;;  %v1512_v31 = vshrl.u32 %v1507_v0, 16  ;;  %v1520_v18 = vadd.s32 %v1518_v56, %v1516_v54  ;;  %v1540_v8 = vsel %vm1539_vm11, 1, %v6390_v11 }
 0x13f   : > { %v1534_v60 = vshrl.u32 %v1529_v46, 16  ;;  %v1542_v2 = vadd.s32 %v1540_v8, %v1538_v34  ;;  %v6378_v3 = vand.u32 2147483647, %v5379_v36  ;;  %v4186_v53 = vadd.s32 4294967169, %v991_v16 }
 0x140   : > { %v947_v7 = vadd.s32 127, %v946_v5  ;;  %v1491_v61 = vsel %vm1485_vm3, %v1488_v19, %v1490_v62  ;;  %v1521_v23 = vadd.s32 %v1520_v18, %v1510_v28  ;;  %v5410_v47 = vadd.s32 %v1537_v35, %v1533_v9 }
 0x141   : > { %v1281_v1 = vadd.f32 -0.16666654, %v1280_v57  ;;  %v801_v51 = vsub.s32 4, %v5076_v21  ;;  %v1543_v49 = vadd.s32 %v1542_v2, %v1532_v27  ;;  %v997_v58 = vadd.s32 1, %v4186_v53 }
 0x142   : > { %v5416_v54 = vsel %vm5390_vm6, %v4913_v42, %v800_v20  ;;  %v1415_v46 = vand.u32 2147483647, %v1414_v59  ;;  %v1417_v0 = vcvt.s32.f32 %v5381_v15  ;;  %v5419_v25 = vadd.s32 %v1521_v23, %v1512_v31 }
 0x143   : > { %v942_v6 = vsub.s32 32, %v5394_v4  ;;  %v1544_v5 = vadd.s32 %v1543_v49, %v1534_v60  ;;  %v1545_v9 = vmul.u32 %v5337_v24, %v1491_v61  ;;  %vm998_vm12 = vcmp.gt.s32.totalorder %v997_v58, 0 }
 0x144   : > { %v948_v57 = vshll.u32 %v947_v7, 23  ;;  %vm1547_vm13 = vc.u32 %v5419_v25, %v5410_v47  ;;  %v994_v35 = vand.u32 8388607, %v6378_v3  ;;  %v999_v20 = vsel %vm998_vm12, %v997_v58, 0  ;;  %v5454_v7 = vpop.f32.mrf.mxu1 }
 0x145   : > { %v5428_v19 = vadd.f32 1.0, %v5366_v33  ;;  %v926_v15 = vadd.s32 %v5300_v30, %v5293_v63  ;;  %v1548_v28 = vadd.s32 1, %v1544_v5  ;;  %v1001_v16 = vand.u32 31, %v999_v20  ;;  %6409 = vst [vmem:[#allocation7_spill] sm:$0xff] %v5454_v7 }
 0x146   : > { %v5433_v62 = vmul.f32 %v1281_v1, %v5291_v10  ;;  %v5438_v24 = vsel %vm679_vm1, %v801_v51, %v5076_v21  ;;  %v5442_v56 = vmul.f32 %v5416_v54, %v5416_v54  ;;  %v5444_v27 = vmul.f32 %v1417_v0, %v1415_v46 }
 0x147   : > { %v943_v33 = vshll.u32 %v5360_v38, %v5394_v4  ;;  %v944_v63 = vshrl.u32 %v926_v15, %v942_v6  ;;  %v1549_v30 = vsel %vm1547_vm13, %v1548_v28, %v1544_v5  ;;  %v1002_v34 = vsub.s32 32, %v1001_v16 }
 0x148   : > { %v949_v59 = vor.u32 4788187, %v948_v57  ;;  %v1550_v31 = vadd.s32 %v1549_v30, %v1545_v9  ;;  %v995_v18 = vor.u32 8388608, %v994_v35  ;;  %v5448_v8 = vshrl.u32 %v999_v20, 5 }
 0x149   : > { %v1004_v21 = vshll.u32 %v6385_v39, %v1001_v16  ;;  %v1005_v60 = vshrl.u32 %v6383_v41, %v1002_v34  ;;  %v1007_v2 = vshll.u32 %v6383_v41, %v1001_v16  ;;  %v1008_v53 = vshrl.u32 %v6381_v45, %v1002_v34 }
 0x14a   : > { %v1551_v61 = vadd.s32 536870912, %v1550_v31  ;;  %v1011_v38 = vshrl.u32 %v6379_v48, %v1002_v34  ;;  %v1013_v4 = vshll.u32 %v6379_v48, %v1001_v16  ;;  %v6410_v23 = vmov 920167782  }
 0x14b   : > { %v1014_v1 = vshrl.u32 %v6410_v23, %v1002_v34  ;;  %v945_v51 = vor.u32 %v944_v63, %v943_v33  ;;  %v1006_v49 = vor.u32 %v1005_v60, %v1004_v21  ;;  %v1009_v58 = vor.u32 %v1008_v53, %v1007_v2 }
 0x14c   : > { %v1010_v46 = vshll.u32 %v6381_v45, %v1001_v16  ;;  %v5460_v0 = vshrl.u32 %v1551_v61, 30  ;;  %v6411_v5 = vmov 1326507024   ;;  %v1610_v57 = vand.u32 2139095040, %v5454_v7 }
 0x14d   : > { %v1015_v6 = vor.u32 %v1014_v1, %v1013_v4  ;;  %v1017_v9 = vshrl.u32 %v6411_v5, %v1002_v34  ;;  %v950_v35 = vand.u32 2147483647, %v949_v59  ;;  %v1016_v15 = vshll.u32 %v6410_v23, %v1001_v16 }
 0x14e   : > { %v1012_v20 = vor.u32 %v1011_v38, %v1010_v46  ;;  %v5465_v28 = vshll.u32 %v995_v18, 8  ;;  %v5468_v30 = vmul.f32 -0.00019511016, %v5442_v56  ;;  %vm1299_vm14 = vcmp.lt.s32.totalorder %v5014_v50, 0 }
 0x14f   : > { %v1419_v33 = vxor.u32 2147483648, %v5444_v27  ;;  %v1553_v63 = vshll.u32 %v5460_v0, 30  ;;  %vm1019_vm15 = vcmp.lt.s32.totalorder %v5448_v8, 1  ;;  %v952_v21 = vcvt.s32.f32 %v945_v51 }
 0x150   : > { %v1018_v60 = vor.u32 %v1017_v9, %v1016_v15  ;;  %vm1022_vm0 = vcmp.lt.s32.totalorder %v5448_v8, 4  ;;  %v1027_v16 = vsel %vm1019_vm15, %v1006_v49, %v1009_v58  ;;  %vm834_vm1 = vcmp.lt.s32.totalorder %v5092_v14, 0 }
 0x151   : > { %v5478_v59 = vsub.s32 %v1550_v31, %v1553_v63  ;;  %vm1021_vm2 = vcmp.lt.s32.totalorder %v5448_v8, 3  ;;  %v1028_v18 = vsel %vm1022_vm0, %v1015_v6, 920167782  ;;  %v1611_v2 = vshrl.u32 %v1610_v57, 23 }
 0x152   : > { %v953_v53 = vmul.f32 %v952_v21, %v950_v35  ;;  %vm1020_vm3 = vcmp.lt.s32.totalorder %v5448_v8, 2  ;;  %v1029_v61 = vsel %vm1021_vm2, %v1012_v20, %v1028_v18  ;;  %v1036_v38 = vand.u32 65535, %v5465_v28 }
 0x153   : > { %vm1555_vm4 = vcmp.lt.s32.totalorder %v5478_v59, 0  ;;  %v1556_v4 = vsub.s32 0, %v5478_v59  ;;  %v1030_v31 = vsel %vm1020_vm3, %v1027_v16, %v1029_v61  ;;  %v1037_v1 = vshrl.u32 %v5465_v28, 16 }
 0x154   : > { %v1003_v51 = vshrl.u32 %v6385_v39, %v1002_v34  ;;  %v1024_v46 = vsel %vm1022_vm0, %v1012_v20, 2102212464  ;;  %v1031_v9 = vsel %vm1019_vm15, %v1009_v58, %v1012_v20  ;;  %v1032_v57 = vsel %vm1022_vm0, %v1018_v60, 1326507024 }
 0x155   : > { %v1557_v35 = vsel %vm1555_vm4, %v1556_v4, %v5478_v59  ;;  %v1033_v15 = vsel %vm1021_vm2, %v1015_v6, %v1032_v57  ;;  %v1060_v63 = vand.u32 65535, %v1030_v31  ;;  %v1061_v21 = vshrl.u32 %v1030_v31, 16 }
 0x156   : > { %v954_v16 = vxor.u32 2147483648, %v953_v53  ;;  %v1558_v18 = vclz %v1557_v35  ;;  %v1023_v34 = vsel %vm1019_vm15, %v1003_v51, %v1006_v49  ;;  %v1034_v61 = vsel %vm1020_vm3, %v1031_v9, %v1033_v15 }
 0x157   : > { %v1025_v20 = vsel %vm1021_vm2, %v1009_v58, %v1024_v46  ;;  %v1038_v3 = vand.u32 65535, %v1034_v61  ;;  %v1039_v60 = vshrl.u32 %v1034_v61, 16  ;;  %v1063_v48 = vmul.u32 %v1061_v21, %v1036_v38 }
 0x158   : > { %v1420_v6 = vsel %vm1299_vm14, %v1419_v33, %v5444_v27  ;;  %v1546_v4 = vadd.s32 %v5410_v47, %v5419_v25  ;;  %v4196_v31 = vadd.s32 4294967294, %v1558_v18  ;;  %v1064_v35 = vmul.u32 %v1060_v63, %v1037_v1 }
 0x159   : > { %v1041_v49 = vmul.u32 %v1039_v60, %v1036_v38  ;;  %v1042_v51 = vmul.u32 %v1038_v3, %v1037_v1  ;;  %v4198_v9 = vadd.s32 4294967169, %v1611_v2  ;;  %v955_v58 = vsel %vm834_vm1, %v954_v16, %v953_v53 }
 0x15a   : > { %vm4197_vm5 = vcmp.lt.s32.totalorder %v4196_v31, 0  ;;  %v5518_v46 = vsel %vm1020_vm3, %v1023_v34, %v1025_v20  ;;  %v1066_v15 = vshll.u32 %v1063_v48, 16  ;;  %v6412_v27 = vand.u32 2147483647, %v5014_v50 }
 0x15b   : > { %v1561_v25 = vsel %vm4197_vm5, 0, %v4196_v31  ;;  %v1040_v33 = vmul.u32 %v1038_v3, %v1036_v38  ;;  %v1044_v18 = vshll.u32 %v1041_v49, 16  ;;  %v1062_v61 = vmul.u32 %v1060_v63, %v1036_v38 }
 0x15c   : > { %vm5522_vm7 = vcmp.le.f32.partialorder %v6412_v27, 0.7853982  ;;  %v1562_v2 = vsub.s32 32, %v1561_v25  ;;  %v1566_v45 = vsub.s32 4294967266, %v1561_v25  ;;  %v1043_v41 = vmul.u32 %v1039_v60, %v1037_v1 }
 0x15d   : > { %v1065_v53 = vmul.u32 %v1061_v21, %v1037_v1  ;;  %v6415_v16 = vand.u32 2147483647, %v5092_v14  ;;  %v1046_v34 = vshll.u32 %v1042_v51, 16  ;;  %vm1048_vm9 = vc.u32 %v1040_v33, %v1044_v18 }
 0x15e   : > { %v1050_v20 = vadd.s32 %v1044_v18, %v1040_v33  ;;  %v1068_v27 = vshll.u32 %v1064_v35, 16  ;;  %v1564_v39 = vshrl.u32 %v1546_v4, %v1562_v2  ;;  %v1567_v57 = vadd.s32 127, %v1566_v45 }
 0x15f   : > { %vm5528_vm8 = vcmp.le.f32.partialorder %v6415_v16, 0.7853982  ;;  %v1049_v3 = vsel %vm1048_vm9, 1, %v6390_v11  ;;  %vm1070_vm10 = vc.u32 %v1062_v61, %v1066_v15  ;;  %v1072_v1 = vadd.s32 %v1066_v15, %v1062_v61 }
 0x160   : > { %v1051_v38 = vadd.s32 %v1049_v3, %v1043_v41  ;;  %vm1052_vm11 = vc.u32 %v1050_v20, %v1046_v34  ;;  %v1071_v63 = vsel %vm1070_vm10, 1, %v6390_v11  ;;  %v1563_v21 = vshll.u32 %v5478_v59, %v1561_v25 }
 0x161   : > { %v1568_v60 = vshll.u32 %v1567_v57, 23  ;;  %v1053_v31 = vsel %vm1052_vm11, 1, %v6390_v11  ;;  %v1073_v16 = vadd.s32 %v1071_v63, %v1065_v53  ;;  %v1045_v13 = vshrl.u32 %v1041_v49, 16 }
 0x162   : > { %v1055_v32 = vadd.s32 %v1053_v31, %v1051_v38  ;;  %vm1074_vm12 = vc.u32 %v1072_v1, %v1068_v27  ;;  %v1617_v33 = vadd.s32 1, %v4198_v9  ;;  %v1565_v4 = vor.u32 %v1564_v39, %v1563_v21 }
 0x163   : > { %v1047_v45 = vshrl.u32 %v1042_v51, 16  ;;  %v1067_v18 = vshrl.u32 %v1063_v48, 16  ;;  %v1075_v2 = vsel %vm1074_vm12, 1, %v6390_v11  ;;  %v1569_v41 = vor.u32 4788187, %v1568_v60 }
 0x164   : > { %v1056_v34 = vadd.s32 %v1055_v32, %v1045_v13  ;;  %v1077_v20 = vadd.s32 %v1075_v2, %v1073_v16  ;;  %vm1618_vm13 = vcmp.gt.s32.totalorder %v1617_v33, 0  ;;  %v5540_v59 = vsel %vm5390_vm6, 0, %v5438_v24 }
 0x165   : > { %v814_v57 = vadd.f32 0.008332121, %v5468_v30  ;;  %v5546_v49 = vsel %vm5522_vm7, %v5014_v50, %v1420_v6  ;;  %v1619_v39 = vsel %vm1618_vm13, %v1617_v33, 0  ;;  %v1069_v51 = vshrl.u32 %v1064_v35, 16 }
 0x166   : > { %v5548_v48 = vadd.s32 %v1056_v34, %v1047_v45  ;;  %v1078_v9 = vadd.s32 %v1077_v20, %v1067_v18  ;;  %v1621_v13 = vand.u32 31, %v1619_v39  ;;  %v5553_v32 = vsel %vm5528_vm8, %v5092_v14, %v955_v58 }
 0x167   : > { %v5555_v29 = vadd.s32 %v1072_v1, %v1068_v27  ;;  %v1080_v24 = vmul.u32 %v5465_v28, %v5518_v46  ;;  %v6418_v30 = vand.u32 2147483647, %v5454_v7  ;;  %v1570_v15 = vand.u32 2147483647, %v1569_v41 }
 0x168   : > { %v1572_v25 = vcvt.s32.f32 %v1565_v4  ;;  %v1079_v61 = vadd.s32 %v1078_v9, %v1069_v51  ;;  %v1622_v53 = vsub.s32 32, %v1621_v13  ;;  %v5563_v35 = vshrl.u32 %v1619_v39, 5 }
 0x169   : > { %v1614_v6 = vand.u32 8388607, %v6418_v30  ;;  %vm1082_vm6 = vc.u32 %v5548_v48, %v5555_v29  ;;  %v6419_v3 = vmov 683565275   ;;  %v6420_v38 = vmov 2475754826  }
 0x16a   : > { %v1624_v58 = vshll.u32 %v6419_v3, %v1621_v13  ;;  %v1627_v27 = vshll.u32 %v6420_v38, %v1621_v13  ;;  %v1083_v63 = vadd.s32 1, %v1079_v61  ;;  %v1625_v1 = vshrl.u32 %v6420_v38, %v1622_v53 }
 0x16b   : > { %v6421_v28 = vmov 2131351028   ;;  %v1615_v60 = vor.u32 8388608, %v1614_v6  ;;  %v6422_v31 = vmov 2102212464   ;;  %v1634_v4 = vshrl.u32 %v6410_v23, %v1622_v53 }
 0x16c   : > { %v1628_v46 = vshrl.u32 %v6421_v28, %v1622_v53  ;;  %v1630_v21 = vshll.u32 %v6421_v28, %v1621_v13  ;;  %v1631_v16 = vshrl.u32 %v6422_v31, %v1622_v53  ;;  %v1633_v33 = vshll.u32 %v6422_v31, %v1621_v13 }
 0x16d   : > { %v1573_v45 = vmul.f32 %v1572_v25, %v1570_v15  ;;  %v1084_v18 = vsel %vm1082_vm6, %v1083_v63, %v1079_v61  ;;  %v1626_v2 = vor.u32 %v1625_v1, %v1624_v58  ;;  %v5577_v34 = vmul.f32 %v5546_v49, %v5546_v49 }
 0x16e   : > { %v5573_v41 = vor.u32 %v1628_v46, %v1627_v27  ;;  %v5581_v20 = vmul.f32 %v5553_v32, %v5553_v32  ;;  %v1085_v39 = vadd.s32 %v1084_v18, %v1080_v24  ;;  %v1635_v51 = vor.u32 %v1634_v4, %v1633_v33 }
 0x16f   : > { %v1632_v9 = vor.u32 %v1631_v16, %v1630_v21  ;;  %v1636_v30 = vshll.u32 %v6410_v23, %v1621_v13  ;;  %v1637_v6 = vshrl.u32 %v6411_v5, %v1622_v53  ;;  %vm1639_vm15 = vcmp.lt.s32.totalorder %v5563_v35, 1  ;;  %v4534_v21 = vld [vmem:[%s6360_s3] sm:$0xff] }
 0x170   : > { %v1086_v15 = vadd.s32 536870912, %v1085_v39  ;;  %vm1641_vm0 = vcmp.lt.s32.totalorder %v5563_v35, 3  ;;  %vm1642_vm2 = vcmp.lt.s32.totalorder %v5563_v35, 4  ;;  %v5588_v25 = vshll.u32 %v1615_v60, 8 }
 0x171   : > { %v1574_v61 = vxor.u32 2147483648, %v1573_v45  ;;  %v1638_v58 = vor.u32 %v1637_v6, %v1636_v30  ;;  %vm1640_vm3 = vcmp.lt.s32.totalorder %v5563_v35, 2  ;;  %v1647_v24 = vsel %vm1639_vm15, %v1626_v2, %v5573_v41  ;;  %v4538_v35 = vld [vmem:[%s6360_s3 + $0x20] sm:$0xff] }
 0x172   : > { %v1433_v23 = vmul.f32 -0.00019511016, %v5577_v34  ;;  %vm1454_vm4 = vcmp.lt.s32.totalorder %v5230_v55, 0  ;;  %v5596_v5 = vshrl.u32 %v1086_v15, 30  ;;  %v1648_v13 = vsel %vm1642_vm2, %v1635_v51, 920167782 }
 0x173   : > { %v968_v38 = vmul.f32 -0.00019511016, %v5581_v20  ;;  %v1649_v27 = vsel %vm1641_vm0, %v1632_v9, %v1648_v13  ;;  %v1651_v63 = vsel %vm1639_vm15, %v5573_v41, %v1632_v9  ;;  %v1652_v1 = vsel %vm1642_vm2, %v1638_v58, 1326507024 }
 0x174   : > { %v5609_v28 = vmul.f32 %v814_v57, %v5442_v56  ;;  %v6423_v46 = vand.u32 2147483647, %v5230_v55  ;;  %v1088_v60 = vshll.u32 %v5596_v5, 30  ;;  %v1650_v31 = vsel %vm1640_vm3, %v1647_v24, %v1649_v27 }
 0x175   : > { %v1575_v16 = vsel %vm1454_vm4, %v1574_v61, %v1573_v45  ;;  %v1653_v33 = vsel %vm1641_vm0, %v1635_v51, %v1652_v1  ;;  %v1656_v57 = vand.u32 65535, %v5588_v25  ;;  %v1657_v4 = vshrl.u32 %v5588_v25, 16 }
 0x176   : > { %vm5613_vm5 = vcmp.le.f32.partialorder %v6423_v46, 0.7853982  ;;  %v5626_v18 = vsub.s32 %v1085_v39, %v1088_v60  ;;  %v1654_v30 = vsel %vm1640_vm3, %v1651_v63, %v1653_v33  ;;  %v1680_v6 = vand.u32 65535, %v1650_v31 }
 0x177   : > { %v1681_v15 = vshrl.u32 %v1650_v31, 16  ;;  %v1434_v58 = vadd.f32 0.008332121, %v1433_v23  ;;  %v969_v13 = vadd.f32 0.008332121, %v968_v38  ;;  %v1658_v24 = vand.u32 65535, %v1654_v30 }
 0x178   : > { %v1659_v27 = vshrl.u32 %v1654_v30, 16  ;;  %v1081_v45 = vadd.s32 %v5555_v29, %v5548_v48  ;;  %vm1090_vm9 = vcmp.lt.s32.totalorder %v5626_v18, 0  ;;  %v1091_v51 = vsub.s32 0, %v5626_v18 }
 0x179   : > { %v1623_v61 = vshrl.u32 %v6419_v3, %v1622_v53  ;;  %v5638_v39 = vsel %vm5613_vm5, %v5230_v55, %v1575_v16  ;;  %v1660_v63 = vmul.u32 %v1658_v24, %v1656_v57  ;;  %v1662_v23 = vmul.u32 %v1658_v24, %v1657_v4  ;;  %v4541_v24 = vld [vmem:[%s6360_s3 + $0x38] sm:$0xff] }
 0x17a   : > { %6426 = vst [vmem:[#allocation8_spill] sm:$0xff] %v5638_v39  ;;  %v1661_v1 = vmul.u32 %v1659_v27, %v1656_v57  ;;  %v1092_v38 = vsel %vm1090_vm9, %v1091_v51, %v5626_v18  ;;  %v1682_v46 = vmul.u32 %v1680_v6, %v1656_v57  ;;  %v1683_v60 = vmul.u32 %v1681_v15, %v1656_v57 }
 0x17b   : > { %v5641_v31 = vmul.u32 %v1680_v6, %v1657_v4  ;;  %v1093_v48 = vclz %v1092_v38  ;;  %v1663_v29 = vmul.u32 %v1659_v27, %v1657_v4  ;;  %v1666_v30 = vshll.u32 %v1662_v23, 16  ;;  %3119 = vmatpush.bf16.msrb.mxu1 %v4541_v24 }
 0x17c   : > { %v1664_v33 = vshll.u32 %v1661_v1, 16  ;;  %v5645_v53 = vmul.f32 %v5638_v39, %v5638_v39  ;;  %v1643_v3 = vsel %vm1639_vm15, %v1623_v61, %v1626_v2  ;;  %v1685_v16 = vmul.u32 %v1681_v15, %v1657_v4 }
 0x17d   : > { %v1686_v11 = vshll.u32 %v1683_v60, 16  ;;  %v4187_v57 = vadd.s32 4294967294, %v1093_v48  ;;  %v1644_v6 = vsel %vm1642_vm2, %v1632_v9, 2102212464  ;;  %v1665_v51 = vshrl.u32 %v1661_v1, 16  ;;  %v4540_v9 = vld [vmem:[%s6360_s3 + $0x30] sm:$0xff] }
 0x17e   : > { %vm1668_vm10 = vc.u32 %v1660_v63, %v1664_v33  ;;  %v1670_v27 = vadd.s32 %v1664_v33, %v1660_v63  ;;  %v6427_v38 = vmov 0   ;;  %v1688_v39 = vshll.u32 %v5641_v31, 16 }
 0x17f   : > { %v1669_v7 = vsel %vm1668_vm10, 1, %v6427_v38  ;;  %vm1690_vm11 = vc.u32 %v1682_v46, %v1686_v11  ;;  %vm4188_vm12 = vcmp.lt.s32.totalorder %v4187_v57, 0  ;;  %v1692_v48 = vadd.s32 %v1686_v11, %v1682_v46  ;;  %3120 = vmatpush.bf16.msrb.mxu1 %v4540_v9 }
 0x180   : > { %v1671_v2 = vadd.s32 %v1669_v7, %v1663_v29  ;;  %vm1672_vm13 = vc.u32 %v1670_v27, %v1666_v30  ;;  %v1691_v4 = vsel %vm1690_vm11, 1, %v6427_v38  ;;  %v1096_v15 = vsel %vm4188_vm12, 0, %v4187_v57 }
 0x181   : > { %v1673_v61 = vsel %vm1672_vm13, 1, %v6427_v38  ;;  %v1693_v42 = vadd.s32 %v1691_v4, %v1685_v16  ;;  %v1097_v63 = vsub.s32 32, %v1096_v15  ;;  %v1101_v1 = vsub.s32 4294967266, %v1096_v15 }
 0x182   : > { %v1667_v33 = vshrl.u32 %v1662_v23, 16  ;;  %v1675_v37 = vadd.s32 %v1673_v61, %v1671_v2  ;;  %v1098_v24 = vshll.u32 %v5626_v18, %v1096_v15  ;;  %v1645_v7 = vsel %vm1641_vm0, %v5573_v41, %v1644_v6  ;;  %v4539_v18 = vld [vmem:[%s6360_s3 + $0x28] sm:$0xff] }
 0x183   : > { %v1687_v29 = vshrl.u32 %v1683_v60, 16  ;;  %vm1694_vm6 = vc.u32 %v1692_v48, %v1688_v39  ;;  %v1099_v30 = vshrl.u32 %v1081_v45, %v1097_v63  ;;  %v1102_v11 = vadd.s32 127, %v1101_v1  ;;  %3121 = vmatpush.bf16.msrb.mxu1 %v4539_v18 }
 0x184   : > { %v1676_v46 = vadd.s32 %v1675_v37, %v1665_v51  ;;  %v1695_v16 = vsel %vm1694_vm6, 1, %v6427_v38  ;;  %v1435_v57 = vmul.f32 %v1434_v58, %v5577_v34  ;;  %v970_v27 = vmul.f32 %v969_v13, %v5581_v20 }
 0x185   : > { %v1689_v23 = vshrl.u32 %v5641_v31, 16  ;;  %v1697_v2 = vadd.s32 %v1695_v16, %v1693_v42  ;;  %v1100_v41 = vor.u32 %v1099_v30, %v1098_v24  ;;  %v1103_v60 = vshll.u32 %v1102_v11, 23 }
 0x186   : > { %v5672_v6 = vadd.s32 %v1676_v46, %v1667_v33  ;;  %v5674_v45 = vadd.s32 %v1692_v48, %v1688_v39  ;;  %v1588_v37 = vmul.f32 -0.00019511016, %v5645_v53  ;;  %v1646_v58 = vsel %vm1640_vm3, %v1643_v3, %v1645_v7 }
 0x187   : > { %v1698_v51 = vadd.s32 %v1697_v2, %v1687_v29  ;;  %v651_v13 = vmul.f32 -0.001358992, %v5212_v52  ;;  %v1283_v42 = vadd.f32 1.0, %v5433_v62  ;;  %v816_v31 = vadd.f32 -0.16666654, %v5609_v28  ;;  %3122 = vmatpush.bf16.msrb.mxu1 %v4538_v35 }
 0x188   : > { %v1421_v4 = vsub.s32 4, %v5232_v22  ;;  %v1104_v15 = vor.u32 4788187, %v1103_v60  ;;  %v1436_v61 = vadd.f32 -0.16666654, %v1435_v57  ;;  %v956_v39 = vsub.s32 4, %v5339_v17 }
 0x189   : > { %v971_v48 = vadd.f32 -0.16666654, %v970_v27  ;;  %v1699_v9 = vadd.s32 %v1698_v51, %v1689_v23  ;;  %v1107_v63 = vcvt.s32.f32 %v1100_v41  ;;  %v1700_v1 = vmul.u32 %v5588_v25, %v1646_v58 }
 0x18a   : > { %v1105_v3 = vand.u32 2147483647, %v1104_v15  ;;  %vm1702_vm15 = vc.u32 %v5672_v6, %v5674_v45  ;;  %v5692_v62 = vmul.f32 %v5428_v19, %v5187_v26  ;;  %v1589_v28 = vadd.f32 0.008332121, %v1588_v37 }
 0x18b   : > { %v1703_v33 = vadd.s32 1, %v1699_v9  ;;  %v652_v24 = vadd.f32 0.041655596, %v651_v13  ;;  %v5695_v7 = vmul.f32 %v1283_v42, %v5272_v43  ;;  %v821_v29 = vadd.s32 3, %v5540_v59  ;;  %v4537_v43 = vld [vmem:[%s6360_s3 + $0x18] sm:$0xff] }
 0x18c   : > { %v5699_v30 = vand.u32 3, %v5540_v59  ;;  %v1108_v25 = vmul.f32 %v1107_v63, %v1105_v3  ;;  %v817_v11 = vmul.f32 %v816_v31, %v5442_v56  ;;  %v1422_v26 = vsel %vm1299_vm14, %v1421_v4, %v5232_v22  ;;  %3123 = vmatpush.bf16.msrb.mxu1 %v4537_v43  ;;  %v4536_v31 = vld [vmem:[%s6360_s3 + $0x10] sm:$0xff] }
 0x18d   : > { %v957_v19 = vsel %vm834_vm1, %v956_v39, %v5339_v17  ;;  %v1704_v46 = vsel %vm1702_vm15, %v1703_v33, %v1699_v9  ;;  %v1437_v16 = vmul.f32 %v1436_v61, %v5577_v34  ;;  %v972_v59 = vmul.f32 %v971_v48, %v5581_v20 }
 0x18e   : > { %v1109_v57 = vxor.u32 2147483648, %v1108_v25  ;;  %v1705_v27 = vadd.s32 %v1704_v46, %v1700_v1  ;;  %v1590_v23 = vmul.f32 %v1589_v28, %v5645_v53  ;;  %vm989_vm0 = vcmp.lt.s32.totalorder %v5379_v36, 0 }
 0x18f   : > { %v1111_v22 = vsub.s32 4, %v5596_v5  ;;  %v653_v17 = vmul.f32 %v652_v24, %v5212_v52  ;;  %v1576_v2 = vsub.s32 4, %v5460_v0  ;;  %v6428_v18 = vand.u32 2147483647, %v5379_v36  ;;  %v4535_v24 = vld [vmem:[%s6360_s3 + $0x8] sm:$0xff] }
 0x190   : > { %v1110_v60 = vsel %vm989_vm0, %v1109_v57, %v1108_v25  ;;  %v1706_v37 = vadd.s32 536870912, %v1705_v27  ;;  %v818_v58 = vadd.f32 1.0, %v817_v11  ;;  %v1424_v51 = vsel %vm5522_vm7, 0, %v1422_v26  ;;  %3124 = vmatpush.bf16.msrb.mxu1 %v4536_v31 }
 0x191   : > { %vm5720_vm14 = vcmp.le.f32.partialorder %v6428_v18, 0.7853982  ;;  %v959_v13 = vsel %vm5528_vm8, 0, %v957_v19  ;;  %v1438_v4 = vadd.f32 1.0, %v1437_v16  ;;  %v973_v15 = vadd.f32 1.0, %v972_v59 }
 0x192   : > { %v5733_v42 = vsel %vm5720_vm14, %v5379_v36, %v1110_v60  ;;  %v5742_v47 = vshrl.u32 %v1706_v37, 30  ;;  %v1591_v39 = vadd.f32 -0.16666654, %v1590_v23  ;;  %v1112_v8 = vsel %vm989_vm0, %v1111_v22, %v5596_v5  ;;  %v6431_v37 = vld [vmem:[#allocation5_spill] sm:$0xff] }
 0x193   : > { %v5740_v61 = vmul.f32 %v5733_v42, %v5733_v42  ;;  %v654_v48 = vadd.f32 -0.4999988, %v653_v17  ;;  %v1271_v9 = vmul.f32 -0.001358992, %v5291_v10  ;;  %v5748_v35 = vand.u32 3, %v821_v29 }
 0x194   : > { %v1577_v3 = vsel %vm1454_vm4, %v1576_v2, %v5460_v0  ;;  %v1708_v1 = vshll.u32 %v5742_v47, 30  ;;  %v5756_v28 = vmul.f32 %v818_v58, %v5416_v54  ;;  %v5758_v33 = vand.u32 3, %v1424_v51  ;;  %3125 = vmatpush.bf16.msrb.mxu1 %v4535_v24 }
 0x195   : > { %v1123_v63 = vmul.f32 -0.00019511016, %v5740_v61  ;;  %v5760_v5 = vand.u32 3, %v959_v13  ;;  %v1272_v29 = vadd.f32 0.041655596, %v1271_v9  ;;  %v5766_v25 = vmul.f32 %v1438_v4, %v5546_v49 }
 0x196   : > { %v1114_v0 = vsel %vm5720_vm14, 0, %v1112_v8  ;;  %v5770_v26 = vsub.s32 %v1705_v27, %v1708_v1  ;;  %v5773_v54 = vmul.f32 %v973_v15, %v5553_v32  ;;  %v5777_v19 = vsel %vm5613_vm5, 0, %v1577_v3  ;;  %v2994_v9 = vld [vmem:[%s6359_s2] sm:$0x1] }
 0x197   : > { %v1124_v11 = vadd.f32 0.008332121, %v1123_v63  ;;  %v5780_v46 = vmul.f32 %v1591_v39, %v5645_v53  ;;  %v655_v49 = vmul.f32 %v654_v48, %v5212_v52  ;;  %v1273_v59 = vmul.f32 %v1272_v29, %v5291_v10 }
 0x198   : > { %vm1710_vm1 = vcmp.lt.s32.totalorder %v5770_v26, 0  ;;  %v1711_v16 = vsub.s32 0, %v5770_v26  ;;  %v5787_v32 = vand.u32 3, %v1114_v0  ;;  %vm669_vm7 = vcmp.eq.s32.totalorder %v5296_v44, 0  ;;  %3126 = vmatpush.bf16.msrb.mxu1 %v4534_v21 }
 0x199   : > { %v1125_v43 = vmul.f32 %v1124_v11, %v5740_v61  ;;  %v976_v57 = vadd.s32 3, %v959_v13  ;;  %v1286_v27 = vadd.s32 3, %v5256_v40  ;;  %vm672_vm8 = vcmp.eq.s32.totalorder %v5296_v44, 2 }
 0x19a   : > { %v1712_v23 = vsel %vm1710_vm1, %v1711_v16, %v5770_v26  ;;  %v1131_v22 = vadd.s32 3, %v1114_v0  ;;  %v1441_v17 = vadd.s32 3, %v1424_v51  ;;  %v1701_v2 = vadd.s32 %v5674_v45, %v5672_v6 }
 0x19b   : > { %v1126_v52 = vadd.f32 -0.16666654, %v1125_v43  ;;  %v1713_v18 = vclz %v1712_v23  ;;  %v656_v41 = vadd.f32 1.0, %v655_v49  ;;  %vm665_vm2 = vweird.f32 %v4780_v12 }
 0x19c   : > { %vm668_vm3 = vcmp.lt.s32.totalorder %v5296_v44, 2  ;;  %v806_v60 = vmul.f32 -0.001358992, %v5442_v56  ;;  %vm1907_vm4 = vcmp.lt.s32.totalorder %v6431_v37, 2  ;;  %vm1908_vm5 = vcmp.eq.s32.totalorder %v6431_v37, 0 }
 0x19d   : > { %v1127_v40 = vmul.f32 %v1126_v52, %v5740_v61  ;;  %v1274_v58 = vadd.f32 -0.4999988, %v1273_v59  ;;  %v4199_v51 = vadd.s32 4294967294, %v1713_v18  ;;  %vm1911_vm9 = vcmp.eq.s32.totalorder %v6431_v37, 2 }
 0x19e   : > { %v807_v13 = vadd.f32 0.041655596, %v806_v60  ;;  %v5805_v6 = vand.u32 3, %v976_v57  ;;  %v1731_v45 = vsub.s32 4, %v5742_v47  ;;  %v5808_v31 = vand.u32 3, %v1131_v22 }
 0x19f   : > { %v5810_v4 = vand.u32 3, %v1286_v27  ;;  %v5812_v15 = vand.u32 3, %v1441_v17  ;;  %vm4200_vm10 = vcmp.lt.s32.totalorder %v4199_v51, 0  ;;  %v670_v39 = vxor.u32 2147483648, %v5692_v62  ;;  %v6432_v27 = vld [vmem:[#allocation4_spill] sm:$0xff] }
 0x1a0   : > { %v673_v8 = vxor.u32 2147483648, %v656_v41  ;;  %v808_v48 = vmul.f32 %v807_v13, %v5442_v56  ;;  %vm824_vm11 = vcmp.eq.s32.totalorder %v5748_v35, 0  ;;  %vm2062_vm12 = vcmp.eq.s32.totalorder %v5699_v30, 0 }
 0x1a1   : > { %v1128_v3 = vadd.f32 1.0, %v1127_v40  ;;  %v1716_v63 = vsel %vm4200_vm10, 0, %v4199_v51  ;;  %v825_v1 = vxor.u32 2147483648, %v5756_v28  ;;  %v5823_v24 = vmul.f32 %v1274_v58, %v5291_v10 }
 0x1a2   : > { %v1717_v29 = vsub.s32 32, %v1716_v63  ;;  %v1721_v0 = vsub.s32 4294967266, %v1716_v63  ;;  %v671_v11 = vsel %vm669_vm7, %v656_v41, %v670_v39  ;;  %vm827_vm13 = vcmp.eq.s32.totalorder %v5748_v35, 2 }
 0x1a3   : > { %vm2065_vm6 = vcmp.eq.s32.totalorder %v5699_v30, 2  ;;  %vm2995_vm15 = vcmp.eq.f32.partialorder %v2994_v9, 1.0  ;;  %v1718_v49 = vshll.u32 %v5770_v26, %v1716_v63  ;;  %v809_v43 = vadd.f32 -0.4999988, %v808_v48  ;;  %v4543_v63 = vld [vmem:[%s6360_s3 + $0x48] sm:$0xff] }
 0x1a4   : > { %vm823_vm0 = vcmp.lt.s32.totalorder %v5748_v35, 2  ;;  %v1910_v16 = vsel %vm1908_vm5, %v656_v41, %v670_v39  ;;  %v1913_v10 = vsel %vm1911_vm9, %v673_v8, %v5692_v62  ;;  %vm2061_vm14 = vcmp.lt.s32.totalorder %v5699_v30, 2  ;;  %v6433_v41 = vld [vmem:[#allocation7_spill] sm:$0xff] }
 0x1a5   : > { %v1719_v59 = vshrl.u32 %v1701_v2, %v1717_v29  ;;  %v1722_v21 = vadd.s32 127, %v1721_v0  ;;  %v674_v57 = vsel %vm672_vm8, %v673_v8, %v5692_v62  ;;  %vm820_vm1 = vweird.f32 %v6432_v27 }
 0x1a6   : > { %v1914_v26 = vsel %vm1907_vm4, %v1910_v16, %v1913_v10  ;;  %v675_v52 = vsel %vm668_vm3, %v671_v11, %v674_v57  ;;  %v810_v23 = vmul.f32 %v809_v43, %v5442_v56  ;;  %vm2996_vm7 = vcmp.eq.f32.partialorder %v2994_v9, 2.0  ;;  %v4542_v11 = vld [vmem:[%s6360_s3 + $0x40] sm:$0xff] }
 0x1a7   : > { %v1915_v22 = vsel %vm665_vm2, nan, %v1914_v26  ;;  %v1720_v17 = vor.u32 %v1719_v59, %v1718_v49  ;;  %v1723_v2 = vshll.u32 %v1722_v21, 23  ;;  %v2997_v18 = vsel %vm2996_vm7, 1, %v6427_v38 }
 0x1a8   : > { %v3008_v62 = vsel %vm2995_vm15, 1, %v6427_v38  ;;  %vm6398_vm8 = vcmp.lt.s32.totalorder %v6433_v41, 0  ;;  %v811_v60 = vadd.f32 1.0, %v810_v23  ;;  %v2998_v40 = vperm.slane %v2997_v18, 0 }
 0x1a9   : > { %v3009_v37 = vperm.slane %v3008_v62, 0  ;;  %v961_v44 = vmul.f32 -0.001358992, %v5581_v20  ;;  %v6434_v56 = vand.u32 2147483647, %v6433_v41  ;;  %v1727_v13 = vcvt.s32.f32 %v1720_v17 }
 0x1aa   : > { %v1724_v51 = vor.u32 4788187, %v1723_v2  ;;  %v676_v39 = vsel %vm665_vm2, nan, %v675_v52  ;;  %v1116_v38 = vmul.f32 -0.001358992, %v5740_v61  ;;  %v826_v8 = vsel %vm824_vm11, %v811_v60, %v825_v1 }
 0x1ab   : > { %vm5855_vm3 = vcmp.le.f32.partialorder %v6434_v56, 0.7853982  ;;  %v828_v48 = vxor.u32 2147483648, %v811_v60  ;;  %v2064_v9 = vsel %vm2062_vm12, %v811_v60, %v825_v1  ;;  %vm5866_vm4 = vcmp.eq.s32.totalorder %v2998_v40, 1 }
 0x1ac   : > { %v1725_v29 = vand.u32 2147483647, %v1724_v51  ;;  %v3000_v0 = vsel %vm5866_vm4, %v1915_v22, %v4780_v12  ;;  %vm5873_vm5 = vcmp.eq.s32.totalorder %v3009_v37, 1  ;;  %v962_v49 = vadd.f32 0.041655596, %v961_v44 }
 0x1ad   : > { %v829_v43 = vsel %vm827_vm13, %v828_v48, %v5756_v28  ;;  %v2067_v1 = vsel %vm2065_vm6, %v828_v48, %v5756_v28  ;;  %v3011_v16 = vsel %vm5873_vm5, %v676_v39, %v3000_v0  ;;  %v1117_v10 = vadd.f32 0.041655596, %v1116_v38 }
 0x1ae   : > { %vm1289_vm2 = vcmp.eq.s32.totalorder %v5810_v4, 0  ;;  %v5887_v12 = vmul.f32 %v1128_v3, %v5733_v42  ;;  %v1728_v59 = vmul.f32 %v1727_v13, %v1725_v29  ;;  %v830_v21 = vsel %vm823_vm0, %v826_v8, %v829_v43  ;;  %v6441_v8 = vld [vmem:[#allocation6_spill] sm:$0xff] }
 0x1af   : > { %v2068_v57 = vsel %vm2061_vm14, %v2064_v9, %v2067_v1  ;;  %vm979_vm9 = vcmp.eq.s32.totalorder %v5805_v6, 0  ;;  %vm1134_vm10 = vcmp.eq.s32.totalorder %v5808_v31, 0  ;;  %v831_v28 = vsel %vm820_vm1, nan, %v830_v21 }
 0x1b0   : > { %v2069_v26 = vsel %vm820_vm1, nan, %v2068_v57  ;;  %v963_v42 = vmul.f32 %v962_v49, %v5581_v20  ;;  %v1118_v3 = vmul.f32 %v1117_v10, %v5740_v61  ;;  %vm2216_vm11 = vcmp.eq.s32.totalorder %v5760_v5, 0 }
 0x1b1   : > { %vm2370_vm12 = vcmp.eq.s32.totalorder %v5787_v32, 0  ;;  %v1729_v30 = vxor.u32 2147483648, %v1728_v59  ;;  %v3001_v35 = vsel %vm5866_vm4, %v2069_v26, %v6432_v27  ;;  %v3019_v52 = vpack.c.bf16 %v3011_v16, %v3011_v16 }
 0x1b2   : > { %vm982_vm13 = vcmp.eq.s32.totalorder %v5805_v6, 2  ;;  %v5911_v23 = vadd.f32 1.0, %v5823_v24  ;;  %v3012_v22 = vsel %vm5873_vm5, %v831_v28, %v3001_v35  ;;  %v964_v17 = vadd.f32 -0.4999988, %v963_v42  ;;  %v6445_v35 = vld [vmem:[#allocation3_spill] sm:$0xff] }
 0x1b3   : > { %vm978_vm14 = vcmp.lt.s32.totalorder %v5805_v6, 2  ;;  %v980_v27 = vxor.u32 2147483648, %v5773_v54  ;;  %v1119_v2 = vadd.f32 -0.4999988, %v1118_v3  ;;  %vm1133_vm1 = vcmp.lt.s32.totalorder %v5808_v31, 2 }
 0x1b4   : > { %vm2215_vm7 = vcmp.lt.s32.totalorder %v5760_v5, 2  ;;  %v1730_v18 = vsel %vm6398_vm8, %v1729_v30, %v1728_v59  ;;  %v3020_v62 = vpack.c.bf16 %v3012_v22, %v3012_v22  ;;  %vm975_vm0 = vweird.f32 %v5092_v14 }
 0x1b5   : > { %v1290_v24 = vxor.u32 2147483648, %v5695_v7  ;;  %v1426_v60 = vmul.f32 -0.001358992, %v5577_v34  ;;  %v5929_v40 = vsel %vm5855_vm3, %v6433_v41, %v1730_v18  ;;  %v965_v37 = vmul.f32 %v964_v17, %v5581_v20 }
 0x1b6   : > { %v1120_v44 = vmul.f32 %v1119_v2, %v5740_v61  ;;  %v1135_v56 = vxor.u32 2147483648, %v5887_v12  ;;  %v5936_v51 = vmul.f32 %v5929_v40, %v5929_v40  ;;  %v3055_v13 = vunpack.c.l.b16 %v3019_v52 }
 0x1b7   : > { %v3056_v39 = vunpack.c.l.b16 %v3020_v62  ;;  %v1427_v38 = vadd.f32 0.041655596, %v1426_v60  ;;  %v966_v48 = vadd.f32 1.0, %v965_v37  ;;  %v1293_v29 = vxor.u32 2147483648, %v5911_v23 }
 0x1b8   : > { %v1121_v9 = vadd.f32 1.0, %v1120_v44  ;;  %v1743_v20 = vmul.f32 -0.00019511016, %v5936_v51  ;;  %v1291_v0 = vsel %vm1289_vm2, %v5911_v23, %v1290_v24  ;;  %vm1292_vm15 = vcmp.eq.s32.totalorder %v5810_v4, 2 }
 0x1b9   : > { %v5942_v61 = vpack.c.b16 %v3056_v39, %v3055_v13  ;;  %v1428_v49 = vmul.f32 %v1427_v38, %v5577_v34  ;;  %vm2523_vm8 = vcmp.lt.s32.totalorder %v6441_v8, 2  ;;  %v981_v43 = vsel %vm979_vm9, %v966_v48, %v980_v27 }
 0x1ba   : > { %v983_v1 = vxor.u32 2147483648, %v966_v48  ;;  %v1136_v16 = vsel %vm1134_vm10, %v1121_v9, %v1135_v56  ;;  %v1138_v10 = vxor.u32 2147483648, %v1121_v9  ;;  %vm1288_vm6 = vcmp.lt.s32.totalorder %v5810_v4, 2 }
 0x1bb   : > { %v1744_v59 = vadd.f32 0.008332121, %v1743_v20  ;;  %3127 = vmatmul.bf16.vlgmr.msrb.gmra.mxu1 %v5942_v61  ;;  %v2218_v21 = vsel %vm2216_vm11, %v966_v48, %v980_v27  ;;  %v2372_v57 = vsel %vm2370_vm12, %v1121_v9, %v1135_v56  ;;  %v1429_v28 = vadd.f32 -0.4999988, %v1428_v49 }
 0x1bc   : > { %vm1444_vm2 = vcmp.eq.s32.totalorder %v5812_v15, 0  ;;  %v984_v26 = vsel %vm982_vm13, %v983_v1, %v5773_v54  ;;  %vm6442_vm9 = vcmp.eq.s32.totalorder %v5808_v31, 2  ;;  %vm6443_vm10 = vcmp.eq.s32.totalorder %v5760_v5, 2 }
 0x1bd   : > { %v1139_v42 = vsel %vm6442_vm9, %v1138_v10, %v5887_v12  ;;  %v2221_v3 = vsel %vm6443_vm10, %v983_v1, %v5773_v54  ;;  %vm6444_vm11 = vcmp.eq.s32.totalorder %v5787_v32, 2  ;;  %vm1285_vm12 = vweird.f32 %v6445_v35 }
 0x1be   : > { %v2375_v30 = vsel %vm6444_vm11, %v1138_v10, %v5887_v12  ;;  %v1745_v52 = vmul.f32 %v1744_v59, %v5936_v51  ;;  %v985_v22 = vsel %vm978_vm14, %v981_v43, %v984_v26  ;;  %v1140_v17 = vsel %vm1133_vm1, %v1136_v16, %v1139_v42 }
 0x1bf   : > { %v2222_v27 = vsel %vm2215_vm7, %v2218_v21, %v2221_v3  ;;  %vm1447_vm13 = vcmp.eq.s32.totalorder %v5812_v15, 2  ;;  %vm2677_vm9 = vcmp.lt.s32.totalorder %v5758_v33, 2  ;;  %v986_v54 = vsel %vm975_vm0, nan, %v985_v22  ;;  %v6452_v22 = vld [vmem:[#allocation8_spill] sm:$0xff] }
 0x1c0   : > { %vm6446_vm10 = vweird.f32 %v5379_v36  ;;  %v2223_v6 = vsel %vm975_vm0, nan, %v2222_v27  ;;  %vm6447_vm14 = vcmp.lt.s32.totalorder %v5787_v32, 2  ;;  %vm1440_vm1 = vweird.f32 %v5014_v50 }
 0x1c1   : > { %v1141_v12 = vsel %vm6446_vm10, nan, %v1140_v17  ;;  %v2376_v31 = vsel %vm6447_vm14, %v2372_v57, %v2375_v30  ;;  %vm6448_vm7 = vmmov %vm6446_vm10  ;;  %v3002_v2 = vsel %vm5866_vm4, %v2223_v6, %v5092_v14  ;;  %v1430_v18 = vmul.f32 %v1429_v28, %v5577_v34 }
 0x1c2   : > { %v2377_v5 = vsel %vm6448_vm7, nan, %v2376_v31  ;;  %v1445_v62 = vxor.u32 2147483648, %v5766_v25  ;;  %v1746_v60 = vadd.f32 -0.16666654, %v1745_v52  ;;  %v3013_v32 = vsel %vm5873_vm5, %v986_v54, %v3002_v2  ;;  %v4549_v52 = vld [vmem:[%s6360_s3 + $0x78] sm:$0xff] }
 0x1c3   : > { %v3003_v37 = vsel %vm5866_vm4, %v2377_v5, %v5379_v36  ;;  %vm6449_vm0 = vcmp.eq.s32.totalorder %v6441_v8, 0  ;;  %v3021_v14 = vpack.c.bf16 %v3013_v32, %v3013_v32  ;;  %v1431_v13 = vadd.f32 1.0, %v1430_v18  ;;  %3230 = vmatpush.bf16.msra.mxu2 %v4549_v52 }
 0x1c4   : > { %v2526_v44 = vsel %vm6449_vm0, %v5911_v23, %v1290_v24  ;;  %v3014_v56 = vsel %vm5873_vm5, %v1141_v12, %v3003_v37  ;;  %vm6450_vm11 = vcmp.eq.s32.totalorder %v6441_v8, 2  ;;  %v1294_v36 = vsel %vm1292_vm15, %v1293_v29, %v5695_v7 }
 0x1c5   : > { %v2529_v34 = vsel %vm6450_vm11, %v1293_v29, %v5695_v7  ;;  %v3022_v39 = vpack.c.bf16 %v3014_v56, %v3014_v56  ;;  %v1581_v48 = vmul.f32 -0.001358992, %v5645_v53  ;;  %v1295_v23 = vsel %vm1288_vm6, %v1291_v0, %v1294_v36  ;;  %v4547_v56 = vld [vmem:[%s6360_s3 + $0x68] sm:$0xff] }
 0x1c6   : > { %v2530_v38 = vsel %vm2523_vm8, %v2526_v44, %v2529_v34  ;;  %v1448_v24 = vxor.u32 2147483648, %v1431_v13  ;;  %vm2678_vm10 = vcmp.eq.s32.totalorder %v5758_v33, 0  ;;  %vm2681_vm14 = vcmp.eq.s32.totalorder %v5758_v33, 2 }
 0x1c7   : > { %v3058_v9 = vunpack.c.l.b16 %v3022_v39  ;;  %v1446_v20 = vsel %vm1444_vm2, %v1431_v13, %v1445_v62  ;;  %v2680_v49 = vsel %vm2678_vm10, %v1431_v13, %v1445_v62  ;;  %v1582_v43 = vadd.f32 0.041655596, %v1581_v48  ;;  %v4546_v48 = vld [vmem:[%s6360_s3 + $0x60] sm:$0xff] }
 0x1c8   : > { %v1747_v7 = vmul.f32 %v1746_v60, %v5936_v51  ;;  %v3057_v8 = vunpack.c.l.b16 %v3021_v14  ;;  %v2531_v29 = vsel %vm1285_vm12, nan, %v2530_v38  ;;  %v2683_v4 = vsel %vm2681_vm14, %v1448_v24, %v5766_v25 }
 0x1c9   : > { %vm6451_vm8 = vcmp.lt.s32.totalorder %v6433_v41, 0  ;;  %vm1443_vm6 = vcmp.lt.s32.totalorder %v5812_v15, 2  ;;  %v1449_v1 = vsel %vm1447_vm13, %v1448_v24, %v5766_v25  ;;  %v2684_v16 = vsel %vm2677_vm9, %v2680_v49, %v2683_v4 }
 0x1ca   : > { %v1732_v0 = vsel %vm6451_vm8, %v1731_v45, %v5742_v47  ;;  %v6039_v10 = vpack.c.b16 %v3058_v9, %v3057_v8  ;;  %v1450_v59 = vsel %vm1443_vm6, %v1446_v20, %v1449_v1  ;;  %v2685_v21 = vsel %vm1440_vm1, nan, %v2684_v16 }
 0x1cb   : > { %v1583_v57 = vmul.f32 %v1582_v43, %v5645_v53  ;;  %v1593_v28 = vadd.f32 1.0, %v5780_v46  ;;  %v1296_v47 = vsel %vm1285_vm12, nan, %v1295_v23  ;;  %v3004_v25 = vsel %vm5866_vm4, %v2531_v29, %v6445_v35 }
 0x1cc   : > { %v1734_v33 = vsel %vm5855_vm3, 0, %v1732_v0  ;;  %v1748_v45 = vadd.f32 1.0, %v1747_v7  ;;  %v1736_v26 = vmul.f32 -0.001358992, %v5936_v51  ;;  %v1451_v42 = vsel %vm1440_vm1, nan, %v1450_v59  ;;  %3132 = vmatmul.bf16.gmra.mxu1 %v6039_v10 }
 0x1cd   : > { %v1584_v15 = vadd.f32 -0.4999988, %v1583_v57  ;;  %v3005_v46 = vsel %vm5866_vm4, %v2685_v21, %v5014_v50  ;;  %v1596_v3 = vadd.s32 3, %v5777_v19  ;;  %v3015_v30 = vsel %vm5873_vm5, %v1296_v47, %v3004_v25 }
 0x1ce   : > { %v1737_v35 = vadd.f32 0.041655596, %v1736_v26  ;;  %v1594_v17 = vmul.f32 %v1593_v28, %v6452_v22  ;;  %v1751_v27 = vadd.s32 3, %v1734_v33  ;;  %v1749_v54 = vmul.f32 %v1748_v45, %v5929_v40 }
 0x1cf   : > { %v1585_v58 = vmul.f32 %v1584_v15, %v5645_v53  ;;  %v3016_v50 = vsel %vm5873_vm5, %v1451_v42, %v3005_v46  ;;  %v4548_v53 = vld [vmem:[%s6360_s3 + $0x70] sm:$0xff]  ;;  %v3023_v6 = vpack.c.bf16 %v3015_v30, %v3015_v30  ;;  %v1597_v5 = vand.u32 3, %v1596_v3  ;;  %v4618_v46 = vld [vmem:[%s6361_s4] ss:$0 sm:$0xff] }
 0x1d0   : > { %v1738_v12 = vmul.f32 %v1737_v35, %v5936_v51  ;;  %v2830_v2 = vand.u32 3, %v5777_v19  ;;  %v2984_v62 = vand.u32 3, %v1734_v33  ;;  %v3024_v60 = vpack.c.bf16 %v3016_v50, %v3016_v50  ;;  %3231 = vmatpush.bf16.msra.mxu2 %v4548_v53 }
 0x1d1   : > { %v1586_v31 = vadd.f32 1.0, %v1585_v58  ;;  %v1600_v37 = vxor.u32 2147483648, %v1594_v17  ;;  %v1752_v40 = vand.u32 3, %v1751_v27  ;;  %v1755_v44 = vxor.u32 2147483648, %v1749_v54 }
 0x1d2   : > { %v1739_v18 = vadd.f32 -0.4999988, %v1738_v12  ;;  %v3059_v14 = vunpack.c.l.b16 %v3023_v6  ;;  %vm1595_vm3 = vweird.f32 %v5230_v55  ;;  %vm1599_vm15 = vcmp.eq.s32.totalorder %v1597_v5, 0 }
 0x1d3   : > { %v1603_v13 = vxor.u32 2147483648, %v1586_v31  ;;  %vm2831_vm2 = vcmp.lt.s32.totalorder %v2830_v2, 2  ;;  %vm2832_vm12 = vcmp.eq.s32.totalorder %v2830_v2, 0  ;;  %vm2835_vm13 = vcmp.eq.s32.totalorder %v2830_v2, 2  ;;  %v4556_v2 = vld [vmem:[%s6360_s3 + $0xb0] sm:$0xff] }
 0x1d4   : > { %v1740_v32 = vmul.f32 %v1739_v18, %v5936_v51  ;;  %v3060_v19 = vunpack.c.l.b16 %v3024_v60  ;;  %vm1754_vm9 = vcmp.eq.s32.totalorder %v1752_v40, 0  ;;  %v2834_v39 = vsel %vm2832_vm12, %v1586_v31, %v1600_v37  ;;  %3232 = vmatpush.bf16.msra.mxu2 %v4547_v56  ;;  %v4555_v18 = vld [vmem:[%s6360_s3 + $0xa8] sm:$0xff] }
 0x1d5   : > { %vm2986_vm1 = vcmp.eq.s32.totalorder %v2984_v62, 0  ;;  %vm2985_vm7 = vcmp.lt.s32.totalorder %v2984_v62, 2  ;;  %vm1753_vm0 = vcmp.lt.s32.totalorder %v1752_v40, 2  ;;  %vm1757_vm11 = vcmp.eq.s32.totalorder %v1752_v40, 2  ;;  %v4554_v40 = vld [vmem:[%s6360_s3 + $0xa0] sm:$0xff] }
 0x1d6   : > { %v1741_v34 = vadd.f32 1.0, %v1740_v32  ;;  %v2837_v23 = vsel %vm2835_vm13, %v1603_v13, %v1594_v17  ;;  %vm2989_vm10 = vcmp.eq.s32.totalorder %v2984_v62, 2  ;;  %v1601_v24 = vsel %vm1599_vm15, %v1586_v31, %v1600_v37  ;;  %v4557_v31 = vld [vmem:[%s6360_s3 + $0xb8] sm:$0xff] }
 0x1d7   : > { %v2838_v20 = vsel %vm2831_vm2, %v2834_v39, %v2837_v23  ;;  %vm1602_vm14 = vcmp.eq.s32.totalorder %v1597_v5, 2  ;;  %vm1750_vm8 = vweird.f32 %v6433_v41  ;;  %v6086_v8 = vpack.c.b16 %v3060_v19, %v3059_v14  ;;  %3341 = vmatpush.bf16.msra.mxu3 %v4557_v31  ;;  %v4551_v23 = vld [vmem:[%s6360_s3 + $0x88] sm:$0xff]  ;;  %v4564_v31 = vld [vmem:[%s6360_s3 + $0xf0] sm:$0xff] }
 0x1d8   : > { %v1756_v51 = vsel %vm1754_vm9, %v1741_v34, %v1755_v44  ;;  %v1758_v36 = vxor.u32 2147483648, %v1741_v34  ;;  %v2988_v38 = vsel %vm2986_vm1, %v1741_v34, %v1755_v44  ;;  %vm1598_vm6 = vcmp.lt.s32.totalorder %v1597_v5, 2  ;;  %3233 = vmatpush.bf16.msra.mxu2 %v4546_v48  ;;  %v4552_v48 = vld [vmem:[%s6360_s3 + $0x90] sm:$0xff] }
 0x1d9   : > { %v1604_v29 = vsel %vm1602_vm14, %v1603_v13, %v1594_v17  ;;  %v2839_v1 = vsel %vm1595_vm3, nan, %v2838_v20  ;;  %v4619_v20 = vld [vmem:[%s6361_s4 + $0x1] ss:$0 sm:$0xff] }
 0x1da   : > { %v1759_v9 = vsel %vm1757_vm11, %v1758_v36, %v1749_v54  ;;  %v2991_v49 = vsel %vm2989_vm10, %v1758_v36, %v1749_v54  ;;  %v1605_v0 = vsel %vm1598_vm6, %v1601_v24, %v1604_v29  ;;  %v3006_v57 = vsel %vm5866_vm4, %v2839_v1, %v5230_v55  ;;  %v4544_v55 = vld [vmem:[%s6360_s3 + $0x50] sm:$0xff]  ;;  %v4550_v24 = vld [vmem:[%s6360_s3 + $0x80] sm:$0xff] }
 0x1db   : > { %v1760_v43 = vsel %vm1753_vm0, %v1756_v51, %v1759_v9  ;;  %v2992_v7 = vsel %vm2985_vm7, %v2988_v38, %v2991_v49  ;;  %v1606_v21 = vsel %vm1595_vm3, nan, %v1605_v0  ;;  %3342 = vmatpush.bf16.msra.mxu3 %v4556_v2  ;;  %v4553_v38 = vld [vmem:[%s6360_s3 + $0x98] sm:$0xff]  ;;  %v4560_v2 = vld [vmem:[%s6360_s3 + $0xd0] sm:$0xff] }
 0x1dc   : > { %v2993_v4 = vsel %vm1750_vm8, nan, %v2992_v7  ;;  %3137 = vmatmul.bf16.gmra.mxu1 %v6086_v8  ;;  %v1761_v16 = vsel %vm1750_vm8, nan, %v1760_v43  ;;  %v3017_v47 = vsel %vm5873_vm5, %v1606_v21, %v3006_v57 }
 0x1dd   : > { %v3007_v59 = vsel %vm5866_vm4, %v2993_v4, %v6433_v41  ;;  %v3025_v33 = vpack.c.bf16 %v3017_v47, %v3017_v47  ;;  %v4545_v41 = vld [vmem:[%s6360_s3 + $0x58] sm:$0xff] }
 0x1de   : > { %v3018_v28 = vsel %vm5873_vm5, %v1761_v16, %v3007_v59  ;;  %3234 = vmatpush.bf16.msra.mxu2 %v4545_v41  ;;  %v4589_v16 = vld [vmem:[%s6366_s9 + $0x78] sm:$0xff]  ;;  %v4588_v59 = vld [vmem:[%s6366_s9 + $0x70] sm:$0xff] }
 0x1df   : > { %v3026_v25 = vpack.c.bf16 %v3018_v28, %v3018_v28  ;;  %v3061_v15 = vunpack.c.l.b16 %v3025_v33  ;;  %3343 = vmatpush.bf16.msra.mxu3 %v4555_v18  ;;  %v4587_v33 = vld [vmem:[%s6366_s9 + $0x68] sm:$0xff] }
 0x1e0   : > { %v4559_v18 = vld [vmem:[%s6360_s3 + $0xc8] sm:$0xff] }
 0x1e1   : > { %v3062_v45 = vunpack.c.l.b16 %v3026_v25 }
 0x1e2   : > { %3235 = vmatpush.bf16.msra.mxu2 %v4544_v55  ;;  %v4585_v55 = vld [vmem:[%s6366_s9 + $0x58] sm:$0xff] }
 0x1e3   : > { %v6103_v26 = vpack.c.b16 %v3062_v45, %v3061_v15  ;;  %3344 = vmatpush.bf16.msra.mxu3 %v4554_v40  ;;  %v4586_v15 = vld [vmem:[%s6366_s9 + $0x60] sm:$0xff] }
 0x1e6   : > { %3236 = vmatpush.bf16.msra.mxu2 %v4543_v63  ;;  %v4584_v63 = vld [vmem:[%s6366_s9 + $0x50] sm:$0xff] }
 0x1e7   : > { %3345 = vmatpush.bf16.msra.mxu3 %v4553_v38 }
 0x1ea   : > { %3237 = vmatpush.bf16.msra.mxu2 %v4542_v11 }
 0x1eb   : > { %3346 = vmatpush.bf16.msra.mxu3 %v4552_v48 }
 0x1ec   : > { %3142 = vmatmul.bf16.gmra.mxu1 %v6103_v26 }
 0x1ef   : > { %3347 = vmatpush.bf16.msra.mxu3 %v4551_v23 }
 0x1f3   : > { %3348 = vmatpush.bf16.msra.mxu3 %v4550_v24 }
 0x1f7   : > { %3867 = vmatpush.bf16.msrb.mxu3 %v4589_v16 }
 0x1fb   : > { %3868 = vmatpush.bf16.msrb.mxu3 %v4588_v59 }
 0x1ff   : > { %3869 = vmatpush.bf16.msrb.mxu3 %v4587_v33  ;;  %v4567_v33 = vld [vmem:[%s6362_s5 + $0x8] sm:$0xff] }
 0x203   : > { %3870 = vmatpush.bf16.msrb.mxu3 %v4586_v15  ;;  %v6230_v15 = vld [vmem:[%s6361_s4 + $0x3] ss:$0 sm:$0xff] }
 0x207   : > { %3871 = vmatpush.bf16.msrb.mxu3 %v4585_v55 }
 0x20b   : > { %3872 = vmatpush.bf16.msrb.mxu3 %v4584_v63 }
 0x238   : > { %v3128_v42 = vpop.f32.mrf.mxu1 }
 0x239   : > { %v3129_v3 = vadd.f32 %v4618_v46, %v3128_v42 }
 0x23b   : > { %v3148_v35 = vmax.f32 %v3129_v3, 0.0  ;;  %v4583_v3 = vld [vmem:[%s6366_s9 + $0x48] sm:$0xff] }
 0x23c   : > { %3873 = vmatpush.bf16.msrb.mxu3 %v4583_v3 }
 0x240   : > { %v3130_v30 = vpop.f32.mrf.mxu1 }
 0x241   : > { %v3131_v58 = vadd.f32 %v4618_v46, %v3130_v30 }
 0x243   : > { %v3149_v52 = vmax.f32 %v3131_v58, 0.0 }
 0x245   : > { %v3156_v22 = vpack.c.bf16 %v3149_v52, %v3148_v35  ;;  %v4582_v52 = vld [vmem:[%s6366_s9 + $0x40] sm:$0xff] }
 0x246   : > { %3874 = vmatpush.bf16.msrb.mxu3 %v4582_v52 }
 0x247   : > { %3238 = vmatmul.bf16.vlgmr.msra.gmra.mxu2 %v3156_v22 }
 0x249   : > { %v3133_v17 = vpop.f32.mrf.mxu1 }
 0x24a   : > { %v3134_v27 = vadd.f32 %v4618_v46, %v3133_v17 }
 0x24c   : > { %v3150_v12 = vmax.f32 %v3134_v27, 0.0 }
 0x251   : > { %v3135_v54 = vpop.f32.mrf.mxu1 }
 0x252   : > { %v3136_v50 = vadd.f32 %v4618_v46, %v3135_v54 }
 0x254   : > { %v3151_v53 = vmax.f32 %v3136_v50, 0.0 }
 0x256   : > { %v3157_v6 = vpack.c.bf16 %v3151_v53, %v3150_v12 }
 0x258   : > { %3243 = vmatmul.bf16.gmra.mxu2 %v3157_v6  ;;  %v4565_v6 = vld [vmem:[%s6360_s3 + $0xf8] sm:$0xff] }
 0x259   : > { %v3138_v5 = vpop.f32.mrf.mxu1  ;;  %3452 = vmatpush.bf16.msrb.mxu0 %v4565_v6 }
 0x25a   : > { %v3139_v62 = vadd.f32 %v4618_v46, %v3138_v5  ;;  %v4563_v5 = vld [vmem:[%s6360_s3 + $0xe8] sm:$0xff] }
 0x25c   : > { %v3152_v32 = vmax.f32 %v3139_v62, 0.0  ;;  %v4558_v62 = vld [vmem:[%s6360_s3 + $0xc0] sm:$0xff] }
 0x25d   : > { %3453 = vmatpush.bf16.msrb.mxu0 %v4564_v31 }
 0x261   : > { %v3140_v60 = vpop.f32.mrf.mxu1  ;;  %3454 = vmatpush.bf16.msrb.mxu0 %v4563_v5 }
 0x262   : > { %v3141_v37 = vadd.f32 %v4618_v46, %v3140_v60 }
 0x264   : > { %v3153_v44 = vmax.f32 %v3141_v37, 0.0 }
 0x266   : > { %v3158_v56 = vpack.c.bf16 %v3153_v44, %v3152_v32 }
 0x268   : > { %3248 = vmatmul.bf16.gmra.mxu2 %v3158_v56 }
 0x269   : > { %v3143_v14 = vpop.f32.mrf.mxu1 }
 0x26a   : > { %v3144_v13 = vadd.f32 %v4618_v46, %v3143_v14 }
 0x26c   : > { %v3154_v39 = vmax.f32 %v3144_v13, 0.0 }
 0x271   : > { %v3145_v34 = vpop.f32.mrf.mxu1 }
 0x272   : > { %v3146_v19 = vadd.f32 %v4618_v46, %v3145_v34 }
 0x274   : > { %v3155_v51 = vmax.f32 %v3146_v19, 0.0 }
 0x276   : > { %v3159_v36 = vpack.c.bf16 %v3155_v51, %v3154_v39 }
 0x278   : > { %3253 = vmatmul.bf16.gmra.mxu2 %v3159_v36 }
 0x2ca   : > { %v3239_v9 = vpop.f32.mrf.mxu2 }
 0x2cb   : > { %v3240_v49 = vadd.f32 %v4619_v20, %v3239_v9 }
 0x2cd   : > { %v3259_v29 = vmax.f32 %v3240_v49, 0.0 }
 0x2d2   : > { %v3241_v43 = vpop.f32.mrf.mxu2 }
 0x2d3   : > { %v3242_v7 = vadd.f32 %v4619_v20, %v3241_v43 }
 0x2d5   : > { %v3260_v4 = vmax.f32 %v3242_v7, 0.0 }
 0x2d7   : > { %v3267_v0 = vpack.c.bf16 %v3260_v4, %v3259_v29  ;;  %v4573_v4 = vld [vmem:[%s6362_s5 + $0x38] sm:$0xff] }
 0x2d8   : > { %3645 = vmatpush.bf16.msra.mxu1 %v4573_v4 }
 0x2d9   : > { %3349 = vmatmul.bf16.vlgmr.msra.gmra.mxu3 %v3267_v0 }
 0x2db   : > { %v3244_v1 = vpop.f32.mrf.mxu2 }
 0x2dc   : > { %v3245_v21 = vadd.f32 %v4619_v20, %v3244_v1 }
 0x2de   : > { %v3261_v47 = vmax.f32 %v3245_v21, 0.0  ;;  %v4572_v21 = vld [vmem:[%s6362_s5 + $0x30] sm:$0xff] }
 0x2df   : > { %3646 = vmatpush.bf16.msra.mxu1 %v4572_v21 }
 0x2e3   : > { %v3246_v57 = vpop.f32.mrf.mxu2 }
 0x2e4   : > { %v3247_v28 = vadd.f32 %v4619_v20, %v3246_v57  ;;  %v4571_v57 = vld [vmem:[%s6362_s5 + $0x28] sm:$0xff] }
 0x2e5   : > { %3647 = vmatpush.bf16.msra.mxu1 %v4571_v57 }
 0x2e6   : > { %v3262_v25 = vmax.f32 %v3247_v28, 0.0  ;;  %v4570_v28 = vld [vmem:[%s6362_s5 + $0x20] sm:$0xff] }
 0x2e8   : > { %v3268_v45 = vpack.c.bf16 %v3262_v25, %v3261_v47  ;;  %v4569_v47 = vld [vmem:[%s6362_s5 + $0x18] sm:$0xff]  ;;  %v4568_v25 = vld [vmem:[%s6362_s5 + $0x10] sm:$0xff] }
 0x2e9   : > { %3648 = vmatpush.bf16.msra.mxu1 %v4570_v28 }
 0x2ea   : > { %3354 = vmatmul.bf16.gmra.mxu3 %v3268_v45  ;;  %v4566_v45 = vld [vmem:[%s6362_s5] sm:$0xff] }
 0x2eb   : > { %v3249_v41 = vpop.f32.mrf.mxu2 }
 0x2ec   : > { %v3250_v11 = vadd.f32 %v4619_v20, %v3249_v41 }
 0x2ed   : > { %3649 = vmatpush.bf16.msra.mxu1 %v4569_v47 }
 0x2ee   : > { %v3263_v30 = vmax.f32 %v3250_v11, 0.0 }
 0x2f1   : > { %3650 = vmatpush.bf16.msra.mxu1 %v4568_v25 }
 0x2f3   : > { %v3251_v42 = vpop.f32.mrf.mxu2 }
 0x2f4   : > { %v3252_v46 = vadd.f32 %v4619_v20, %v3251_v42  ;;  %v6236_v42 = vld [vmem:[%s6364_s7] ss:$0 sm:$0xff] }
 0x2f5   : > { %3651 = vmatpush.bf16.msra.mxu1 %v4567_v33 }
 0x2f6   : > { %v3264_v58 = vmax.f32 %v3252_v46, 0.0 }
 0x2f8   : > { %v3269_v35 = vpack.c.bf16 %v3264_v58, %v3263_v30 }
 0x2f9   : > { %3652 = vmatpush.bf16.msra.mxu1 %v4566_v45 }
 0x2fa   : > { %3359 = vmatmul.bf16.gmra.mxu3 %v3269_v35 }
 0x2fb   : > { %v3254_v22 = vpop.f32.mrf.mxu2 }
 0x2fc   : > { %v3255_v17 = vadd.f32 %v4619_v20, %v3254_v22 }
 0x2fe   : > { %v3265_v50 = vmax.f32 %v3255_v17, 0.0 }
 0x303   : > { %v3256_v27 = vpop.f32.mrf.mxu2 }
 0x304   : > { %v3257_v54 = vadd.f32 %v4619_v20, %v3256_v27 }
 0x306   : > { %v3266_v12 = vmax.f32 %v3257_v54, 0.0 }
 0x308   : > { %v3270_v53 = vpack.c.bf16 %v3266_v12, %v3265_v50 }
 0x30a   : > { %3364 = vmatmul.bf16.gmra.mxu3 %v3270_v53 }
 0x31a   : > { %3875 = vmatmul.bf16.vlgmr.msrb.gmra.mxu3 %v5942_v61  ;;  %v4562_v61 = vld [vmem:[%s6360_s3 + $0xe0] sm:$0xff] }
 0x31b   : > { %3455 = vmatpush.bf16.msrb.mxu0 %v4562_v61 }
 0x32a   : > { %3880 = vmatmul.bf16.gmra.mxu3 %v6039_v10  ;;  %v4561_v10 = vld [vmem:[%s6360_s3 + $0xd8] sm:$0xff] }
 0x32b   : > { %3456 = vmatpush.bf16.msrb.mxu0 %v4561_v10 }
 0x32f   : > { %3457 = vmatpush.bf16.msrb.mxu0 %v4560_v2 }
 0x333   : > { %3458 = vmatpush.bf16.msrb.mxu0 %v4559_v18 }
 0x337   : > { %3459 = vmatpush.bf16.msrb.mxu0 %v4558_v62 }
 0x33a   : > { %3885 = vmatmul.bf16.gmra.mxu3 %v6086_v8  ;;  %v4620_v8 = vld [vmem:[%s6361_s4 + $0x2] ss:$0 sm:$0xff] }
 0x34a   : > { %3890 = vmatmul.bf16.gmra.mxu3 %v6103_v26 }
 0x35c   : > { %v3350_v60 = vpop.f32.mrf.mxu3 }
 0x35d   : > { %v3351_v37 = vadd.f32 %v4620_v8, %v3350_v60 }
 0x35f   : > { %v3370_v44 = vmax.f32 %v3351_v37, 0.0 }
 0x364   : > { %v3352_v40 = vpop.f32.mrf.mxu3 }
 0x365   : > { %v3353_v32 = vadd.f32 %v4620_v8, %v3352_v40 }
 0x367   : > { %v3371_v56 = vmax.f32 %v3353_v32, 0.0 }
 0x369   : > { %v3378_v14 = vpack.c.bf16 %v3371_v56, %v3370_v44 }
 0x36b   : > { %3460 = vmatmul.bf16.vlgmr.msrb.gmra.mxu0 %v3378_v14 }
 0x36d   : > { %v3355_v13 = vpop.f32.mrf.mxu3 }
 0x36e   : > { %v3356_v34 = vadd.f32 %v4620_v8, %v3355_v13  ;;  %v4581_v13 = vld [vmem:[%s6366_s9 + $0x38] sm:$0xff] }
 0x36f   : > { %3838 = vmatpush.bf16.msrb.mxu2 %v4581_v13 }
 0x370   : > { %v3372_v39 = vmax.f32 %v3356_v34, 0.0 }
 0x375   : > { %v3357_v26 = vpop.f32.mrf.mxu3 }
 0x376   : > { %v3358_v19 = vadd.f32 %v4620_v8, %v3357_v26  ;;  %v4580_v26 = vld [vmem:[%s6366_s9 + $0x30] sm:$0xff] }
 0x377   : > { %3839 = vmatpush.bf16.msrb.mxu2 %v4580_v26 }
 0x378   : > { %v3373_v51 = vmax.f32 %v3358_v19, 0.0 }
 0x37a   : > { %v3379_v36 = vpack.c.bf16 %v3373_v51, %v3372_v39 }
 0x37c   : > { %3465 = vmatmul.bf16.gmra.mxu0 %v3379_v36 }
 0x37d   : > { %v3360_v38 = vpop.f32.mrf.mxu3 }
 0x37e   : > { %v3361_v48 = vadd.f32 %v4620_v8, %v3360_v38  ;;  %v4579_v38 = vld [vmem:[%s6366_s9 + $0x28] sm:$0xff] }
 0x37f   : > { %3840 = vmatpush.bf16.msrb.mxu2 %v4579_v38 }
 0x380   : > { %v3374_v9 = vmax.f32 %v3361_v48, 0.0 }
 0x385   : > { %v3362_v23 = vpop.f32.mrf.mxu3 }
 0x386   : > { %v3363_v24 = vadd.f32 %v4620_v8, %v3362_v23 }
 0x388   : > { %v3375_v20 = vmax.f32 %v3363_v24, 0.0  ;;  %v4578_v24 = vld [vmem:[%s6366_s9 + $0x20] sm:$0xff] }
 0x389   : > { %3841 = vmatpush.bf16.msrb.mxu2 %v4578_v24 }
 0x38a   : > { %v3380_v49 = vpack.c.bf16 %v3375_v20, %v3374_v9 }
 0x38c   : > { %3470 = vmatmul.bf16.gmra.mxu0 %v3380_v49 }
 0x38d   : > { %v3365_v43 = vpop.f32.mrf.mxu3 }
 0x38e   : > { %v3366_v7 = vadd.f32 %v4620_v8, %v3365_v43 }
 0x390   : > { %v3376_v1 = vmax.f32 %v3366_v7, 0.0 }
 0x395   : > { %v3367_v29 = vpop.f32.mrf.mxu3 }
 0x396   : > { %v3368_v0 = vadd.f32 %v4620_v8, %v3367_v29 }
 0x398   : > { %v3377_v16 = vmax.f32 %v3368_v0, 0.0 }
 0x39a   : > { %v3381_v59 = vpack.c.bf16 %v3377_v16, %v3376_v1 }
 0x39c   : > { %3475 = vmatmul.bf16.gmra.mxu0 %v3381_v59 }
 0x3e8   : > { %v3461_v41 = vpop.f32.mrf.mxu0 }
 0x3e9   : > { %v3462_v55 = vadd.f32 %v6230_v15, %v3461_v41 }
 0x3eb   : > { %v3481_v63 = vmax.f32 %v3462_v55, 0.0 }
 0x3ed   : > { %v3489_v11 = vpack.c.bf16 %v3481_v63, %v3481_v63  ;;  %v4577_v63 = vld [vmem:[%s6366_s9 + $0x18] sm:$0xff] }
 0x3ee   : > { %3842 = vmatpush.bf16.msrb.mxu2 %v4577_v63 }
 0x3ef   : > { %v3498_v46 = vunpack.c.l.bf16 %v3489_v11  ;;  %v3581_v22 = vunpack.c.l.b16 %v3489_v11  ;;  %v4575_v11 = vld [vmem:[%s6366_s9 + $0x8] sm:$0xff] }
 0x3f0   : > { %v3463_v3 = vpop.f32.mrf.mxu0 }
 0x3f1   : > { %v3464_v30 = vadd.f32 %v6230_v15, %v3463_v3  ;;  %v3509_v58 = vmul.f32 %v6236_v42, %v3498_v46  ;;  %v4623_v46 = vld [vmem:[#allocation2] ss:$0 sm:$0xff] }
 0x3f3   : > { %v3482_v35 = vmax.f32 %v3464_v30, 0.0  ;;  %3517 = vadd.xlane.f32.xlu0 %v3509_v58  ;;  %v4574_v30 = vld [vmem:[%s6366_s9] sm:$0xff] }
 0x3f5   : > { %v3490_v52 = vpack.c.bf16 %v3482_v35, %v3482_v35 }
 0x3f7   : > { %v3582_v17 = vunpack.c.l.b16 %v3490_v52  ;;  %v3499_v27 = vunpack.c.l.bf16 %v3490_v52 }
 0x3f9   : > { %v3466_v54 = vpop.f32.mrf.mxu0  ;;  %v3589_v50 = vpack.c.b16 %v3582_v17, %v3581_v22  ;;  %v3510_v53 = vmul.f32 %v6236_v42, %v3499_v27 }
 0x3fa   : > { %v3467_v12 = vadd.f32 %v6230_v15, %v3466_v54 }
 0x3fb   : > { %3519 = vadd.xlane.f32.xlu0 %v3510_v53  ;;  %3653 = vmatmul.bf16.vlgmr.msra.gmra.mxu1 %v3589_v50 }
 0x3fc   : > { %v3483_v6 = vmax.f32 %v3467_v12, 0.0  ;;  %v4624_v12 = vld [vmem:[%s6363_s6] ss:$0 sm:$0xff] }
 0x3fe   : > { %v3491_v31 = vpack.c.bf16 %v3483_v6, %v3483_v6 }
 0x400   : > { %v3500_v5 = vunpack.c.l.bf16 %v3491_v31  ;;  %v3583_v60 = vunpack.c.l.b16 %v3491_v31 }
 0x401   : > { %v3468_v61 = vpop.f32.mrf.mxu0 }
 0x402   : > { %v3469_v10 = vadd.f32 %v6230_v15, %v3468_v61  ;;  %v3511_v2 = vmul.f32 %v6236_v42, %v3500_v5 }
 0x404   : > { %v3484_v18 = vmax.f32 %v3469_v10, 0.0  ;;  %3521 = vadd.xlane.f32.xlu1 %v3511_v2 }
 0x406   : > { %v3492_v62 = vpack.c.bf16 %v3484_v18, %v3484_v18 }
 0x408   : > { %v3584_v8 = vunpack.c.l.b16 %v3492_v62  ;;  %v3501_v37 = vunpack.c.l.bf16 %v3492_v62 }
 0x409   : > { %v3471_v40 = vpop.f32.mrf.mxu0 }
 0x40a   : > { %v3472_v32 = vadd.f32 %v6230_v15, %v3471_v40  ;;  %v3590_v44 = vpack.c.b16 %v3584_v8, %v3583_v60  ;;  %v3512_v56 = vmul.f32 %v6236_v42, %v3501_v37 }
 0x40c   : > { %v3485_v14 = vmax.f32 %v3472_v32, 0.0  ;;  %3658 = vmatmul.bf16.gmra.mxu1 %v3590_v44  ;;  %3523 = vadd.xlane.f32.xlu1 %v3512_v56 }
 0x40e   : > { %v3493_v34 = vpack.c.bf16 %v3485_v14, %v3485_v14 }
 0x410   : > { %v3502_v19 = vunpack.c.l.bf16 %v3493_v34  ;;  %v3585_v20 = vunpack.c.l.b16 %v3493_v34 }
 0x411   : > { %v3473_v39 = vpop.f32.mrf.mxu0 }
 0x412   : > { %v3474_v51 = vadd.f32 %v6230_v15, %v3473_v39  ;;  %v3513_v36 = vmul.f32 %v6236_v42, %v3502_v19 }
 0x414   : > { %v3486_v48 = vmax.f32 %v3474_v51, 0.0  ;;  %3525 = vadd.xlane.f32.xlu2 %v3513_v36 }
 0x416   : > { %v3494_v23 = vpack.c.bf16 %v3486_v48, %v3486_v48 }
 0x418   : > { %v3503_v9 = vunpack.c.l.bf16 %v3494_v23  ;;  %v3586_v49 = vunpack.c.l.b16 %v3494_v23 }
 0x419   : > { %v3476_v43 = vpop.f32.mrf.mxu0 }
 0x41a   : > { %v3477_v7 = vadd.f32 %v6230_v15, %v3476_v43  ;;  %v3514_v29 = vmul.f32 %v6236_v42, %v3503_v9  ;;  %v3591_v4 = vpack.c.b16 %v3586_v49, %v3585_v20 }
 0x41c   : > { %v3487_v0 = vmax.f32 %v3477_v7, 0.0  ;;  %3527 = vadd.xlane.f32.xlu2 %v3514_v29  ;;  %3663 = vmatmul.bf16.gmra.mxu1 %v3591_v4 }
 0x41e   : > { %v3495_v1 = vpack.c.bf16 %v3487_v0, %v3487_v0 }
 0x420   : > { %v3504_v16 = vunpack.c.l.bf16 %v3495_v1  ;;  %v3587_v25 = vunpack.c.l.b16 %v3495_v1 }
 0x421   : > { %v3478_v59 = vpop.f32.mrf.mxu0 }
 0x422   : > { %v3479_v21 = vadd.f32 %v6230_v15, %v3478_v59  ;;  %v3515_v57 = vmul.f32 %v6236_v42, %v3504_v16  ;;  %v4576_v15 = vld [vmem:[%s6366_s9 + $0x10] sm:$0xff] }
 0x423   : > { %3843 = vmatpush.bf16.msrb.mxu2 %v4576_v15 }
 0x424   : > { %v3488_v28 = vmax.f32 %v3479_v21, 0.0  ;;  %3529 = vadd.xlane.f32.xlu0 %v3515_v57  ;;  %v4597_v57 = vld [vmem:[%s6368_s11 + $0x38] sm:$0xff] }
 0x425   : > { %3976 = vmatpush.bf16.msra.mxu0 %v4597_v57 }
 0x426   : > { %v3496_v47 = vpack.c.bf16 %v3488_v28, %v3488_v28 }
 0x427   : > { %3844 = vmatpush.bf16.msrb.mxu2 %v4575_v11 }
 0x428   : > { %v3588_v33 = vunpack.c.l.b16 %v3496_v47  ;;  %v3505_v45 = vunpack.c.l.bf16 %v3496_v47 }
 0x42a   : > { %v3592_v41 = vpack.c.b16 %v3588_v33, %v3587_v25  ;;  %v3516_v55 = vmul.f32 %v6236_v42, %v3505_v45 }
 0x42b   : > { %3845 = vmatpush.bf16.msrb.mxu2 %v4574_v30  ;;  %v4593_v30 = vld [vmem:[%s6368_s11 + $0x18] sm:$0xff] }
 0x42c   : > { %3668 = vmatmul.bf16.gmra.mxu1 %v3592_v41  ;;  %3531 = vadd.xlane.f32.xlu1 %v3516_v55 }
 0x466   : > { %v3518_v3 = vpop.xlane.xlu0 %3517 }
 0x467   : > { %v3537_v42 = vadd.f32 %v4623_v46, %v3518_v3  ;;  %v4595_v3 = vld [vmem:[%s6368_s11 + $0x28] sm:$0xff] }
 0x469   : > { %v3545_v58 = vand.u32 2147483647, %v3537_v42  ;;  %v4594_v42 = vld [vmem:[%s6368_s11 + $0x20] sm:$0xff] }
 0x46b   : > { %4050 = vperm.xlu2 %4615, %v3545_v58   ;;  %v4592_v58 = vld [vmem:[%s6368_s11 + $0x10] sm:$0xff] }
 0x46e   : > { %v3520_v35 = vpop.xlane.xlu0 %3519 }
 0x46f   : > { %v3538_v52 = vadd.f32 %v4623_v46, %v3520_v35  ;;  %v4591_v35 = vld [vmem:[%s6368_s11 + $0x8] sm:$0xff] }
 0x471   : > { %v3546_v22 = vand.u32 2147483647, %v3538_v52  ;;  %v4590_v52 = vld [vmem:[%s6368_s11] sm:$0xff] }
 0x473   : > { %4055 = vperm.xlu0 %4616, %v3546_v22   ;;  %v3876_v22 = vpop.f32.mrf.mxu3 }
 0x477   : > { %v3522_v17 = vpop.xlane.xlu1 %3521 }
 0x478   : > { %v3539_v27 = vadd.f32 %v4623_v46, %v3522_v17  ;;  %v3654_v54 = vpop.f32.mrf.mxu1 }
 0x479   : > { %v3655_v53 = vadd.f32 %v4624_v12, %v3654_v54  ;;  %v4625_v54 = vld [vmem:[%s6367_s10] ss:$0 sm:$0xff] }
 0x47a   : > { %v3547_v50 = vand.u32 2147483647, %v3539_v27 }
 0x47b   : > { %v3674_v61 = vpack.c.bf16 %v3655_v53, %v3655_v53  ;;  %v3878_v17 = vpop.f32.mrf.mxu3 }
 0x47c   : > { %4060 = vperm.xlu1 %4617, %v3547_v50  }
 0x47d   : > { %v3690_v62 = vunpack.c.l.b16 %v3674_v61 }
 0x47f   : > { %v3524_v6 = vpop.xlane.xlu1 %3523 }
 0x480   : > { %v3540_v31 = vadd.f32 %v4623_v46, %v3524_v6  ;;  %v3656_v5 = vpop.f32.mrf.mxu1 }
 0x481   : > { %v3657_v2 = vadd.f32 %v4624_v12, %v3656_v5 }
 0x482   : > { %v3548_v10 = vand.u32 2147483647, %v3540_v31 }
 0x483   : > { %v3675_v18 = vpack.c.bf16 %v3657_v2, %v3657_v2 }
 0x484   : > { %4065 = vperm.xlu2 %4615, %v3548_v10  }
 0x485   : > { %v3691_v60 = vunpack.c.l.b16 %v3675_v18 }
 0x487   : > { %v3526_v8 = vpop.xlane.xlu2 %3525  ;;  %v3698_v37 = vpack.c.b16 %v3691_v60, %v3690_v62 }
 0x488   : > { %v3541_v40 = vadd.f32 %v4623_v46, %v3526_v8 }
 0x489   : > { %v3659_v32 = vpop.f32.mrf.mxu1  ;;  %3846 = vmatmul.bf16.vlgmr.msrb.gmra.mxu2 %v3698_v37 }
 0x48a   : > { %v3549_v44 = vand.u32 2147483647, %v3541_v40  ;;  %v3660_v56 = vadd.f32 %v4624_v12, %v3659_v32 }
 0x48c   : > { %4070 = vperm.xlu2 %4615, %v3549_v44   ;;  %v3676_v26 = vpack.c.bf16 %v3660_v56, %v3660_v56 }
 0x48e   : > { %v3692_v36 = vunpack.c.l.b16 %v3676_v26 }
 0x48f   : > { %v3528_v14 = vpop.xlane.xlu2 %3527 }
 0x490   : > { %v3542_v13 = vadd.f32 %v4623_v46, %v3528_v14 }
 0x491   : > { %v3661_v34 = vpop.f32.mrf.mxu1 }
 0x492   : > { %v3550_v19 = vand.u32 2147483647, %v3542_v13  ;;  %v3662_v39 = vadd.f32 %v4624_v12, %v3661_v34 }
 0x494   : > { %v3677_v51 = vpack.c.bf16 %v3662_v39, %v3662_v39  ;;  %4075 = vperm.xlu1 %4617, %v3550_v19  }
 0x496   : > { %v3693_v38 = vunpack.c.l.b16 %v3677_v51 }
 0x497   : > { %v3530_v48 = vpop.xlane.xlu0 %3529 }
 0x498   : > { %v3543_v23 = vadd.f32 %v4623_v46, %v3530_v48  ;;  %v3699_v24 = vpack.c.b16 %v3693_v38, %v3692_v36 }
 0x499   : > { %v3664_v9 = vpop.f32.mrf.mxu1 }
 0x49a   : > { %v3551_v20 = vand.u32 2147483647, %v3543_v23  ;;  %3851 = vmatmul.bf16.gmra.mxu2 %v3699_v24  ;;  %v3665_v49 = vadd.f32 %v4624_v12, %v3664_v9 }
 0x49c   : > { %4080 = vperm.xlu2 %4615, %v3551_v20   ;;  %v3678_v4 = vpack.c.bf16 %v3665_v49, %v3665_v49 }
 0x49e   : > { %v3694_v59 = vunpack.c.l.b16 %v3678_v4 }
 0x49f   : > { %v3532_v43 = vpop.xlane.xlu1 %3531 }
 0x4a0   : > { %v3544_v7 = vadd.f32 %v4623_v46, %v3532_v43  ;;  %v4596_v46 = vld [vmem:[%s6368_s11 + $0x30] sm:$0xff] }
 0x4a1   : > { %v3666_v29 = vpop.f32.mrf.mxu1  ;;  %3977 = vmatpush.bf16.msra.mxu0 %v4596_v46 }
 0x4a2   : > { %v3552_v0 = vand.u32 2147483647, %v3544_v7  ;;  %v3667_v1 = vadd.f32 %v4624_v12, %v3666_v29 }
 0x4a4   : > { %v3679_v16 = vpack.c.bf16 %v3667_v1, %v3667_v1  ;;  %4085 = vperm.xlu1 %4617, %v3552_v0  }
 0x4a5   : > { %3978 = vmatpush.bf16.msra.mxu0 %v4595_v3 }
 0x4a6   : > { %v3695_v21 = vunpack.c.l.b16 %v3679_v16 }
 0x4a8   : > { %v3700_v28 = vpack.c.b16 %v3695_v21, %v3694_v59  ;;  %v6310_v21 = vld [vmem:[%s6369_s12] ss:$0 sm:$0xff] }
 0x4a9   : > { %v3669_v47 = vpop.f32.mrf.mxu1  ;;  %3979 = vmatpush.bf16.msra.mxu0 %v4594_v42 }
 0x4aa   : > { %3856 = vmatmul.bf16.gmra.mxu2 %v3700_v28  ;;  %v3670_v25 = vadd.f32 %v4624_v12, %v3669_v47 }
 0x4ac   : > { %v3680_v45 = vpack.c.bf16 %v3670_v25, %v3670_v25 }
 0x4ad   : > { %3980 = vmatpush.bf16.msra.mxu0 %v4593_v30 }
 0x4ae   : > { %v3696_v63 = vunpack.c.l.b16 %v3680_v45 }
 0x4b1   : > { %v3671_v33 = vpop.f32.mrf.mxu1  ;;  %3981 = vmatpush.bf16.msra.mxu0 %v4592_v58 }
 0x4b2   : > { %v3672_v41 = vadd.f32 %v4624_v12, %v3671_v33  ;;  %v3881_v12 = vpop.f32.mrf.mxu3 }
 0x4b4   : > { %v3681_v55 = vpack.c.bf16 %v3672_v41, %v3672_v41 }
 0x4b5   : > { %3982 = vmatpush.bf16.msra.mxu0 %v4591_v35 }
 0x4b6   : > { %v3697_v15 = vunpack.c.l.b16 %v3681_v55  ;;  %v4045_v55 = vlaneseq }
 0x4b8   : > { %v3701_v11 = vpack.c.b16 %v3697_v15, %v3696_v63  ;;  %v6314_v46 = vand.u32 127, %v4045_v55 }
 0x4b9   : > { %3983 = vmatpush.bf16.msra.mxu0 %v4590_v52 }
 0x4ba   : > { %3861 = vmatmul.bf16.gmra.mxu2 %v3701_v11  ;;  %v3883_v62 = vpop.f32.mrf.mxu3  ;;  %vm4047_vm4 = vcmp.eq.s32.totalorder %v6314_v46, 0 }
 0x4c2   : > { %v3886_v44 = vpop.f32.mrf.mxu3 }
 0x4ca   : > { %v3888_v19 = vpop.f32.mrf.mxu3 }
 0x4d2   : > { %v3891_v9 = vpop.f32.mrf.mxu3 }
 0x4da   : > { %v3893_v4 = vpop.f32.mrf.mxu3 }
 0x50c   : > { %v3847_v27 = vpop.f32.mrf.mxu2 }
 0x50d   : > { %v3848_v50 = vadd.f32 %v4625_v54, %v3847_v27 }
 0x50f   : > { %v3877_v6 = vadd.f32 %v3876_v22, %v3848_v50  ;;  %v4051_v22 = vpop.permute.xlu2 %4050 }
 0x511   : > { %v3896_v61 = vmax.f32 %v3877_v6, 0.0 }
 0x514   : > { %v3849_v53 = vpop.f32.mrf.mxu2 }
 0x515   : > { %v3850_v31 = vadd.f32 %v4625_v54, %v3849_v53 }
 0x517   : > { %v3879_v5 = vadd.f32 %v3878_v17, %v3850_v31 }
 0x519   : > { %v3897_v10 = vmax.f32 %v3879_v5, 0.0  ;;  %v4056_v5 = vpop.permute.xlu0 %4055 }
 0x51b   : > { %v3904_v2 = vpack.c.bf16 %v3897_v10, %v3896_v61 }
 0x51d   : > { %v3852_v18 = vpop.f32.mrf.mxu2  ;;  %3984 = vmatmul.bf16.vlgmr.msra.gmra.mxu0 %v3904_v2 }
 0x51e   : > { %v3853_v60 = vadd.f32 %v4625_v54, %v3852_v18 }
 0x520   : > { %v3882_v37 = vadd.f32 %v3881_v12, %v3853_v60 }
 0x522   : > { %v3898_v56 = vmax.f32 %v3882_v37, 0.0 }
 0x525   : > { %v3854_v8 = vpop.f32.mrf.mxu2 }
 0x526   : > { %v3855_v40 = vadd.f32 %v4625_v54, %v3854_v8 }
 0x528   : > { %v3884_v32 = vadd.f32 %v3883_v62, %v3855_v40  ;;  %v4061_v40 = vpop.permute.xlu1 %4060 }
 0x52a   : > { %v3899_v14 = vmax.f32 %v3884_v32, 0.0 }
 0x52c   : > { %v3905_v13 = vpack.c.bf16 %v3899_v14, %v3898_v56 }
 0x52d   : > { %v3857_v34 = vpop.f32.mrf.mxu2 }
 0x52e   : > { %3989 = vmatmul.bf16.gmra.mxu0 %v3905_v13  ;;  %v3858_v26 = vadd.f32 %v4625_v54, %v3857_v34  ;;  %v4066_v34 = vpop.permute.xlu2 %4065 }
 0x530   : > { %v3887_v51 = vadd.f32 %v3886_v44, %v3858_v26 }
 0x532   : > { %v3900_v48 = vmax.f32 %v3887_v51, 0.0 }
 0x535   : > { %v3859_v39 = vpop.f32.mrf.mxu2 }
 0x536   : > { %v3860_v36 = vadd.f32 %v4625_v54, %v3859_v39 }
 0x538   : > { %v3889_v38 = vadd.f32 %v3888_v19, %v3860_v36 }
 0x53a   : > { %v3901_v23 = vmax.f32 %v3889_v38, 0.0 }
 0x53c   : > { %v3906_v24 = vpack.c.bf16 %v3901_v23, %v3900_v48 }
 0x53d   : > { %v3862_v20 = vpop.f32.mrf.mxu2 }
 0x53e   : > { %3994 = vmatmul.bf16.gmra.mxu0 %v3906_v24  ;;  %v3863_v49 = vadd.f32 %v4625_v54, %v3862_v20 }
 0x540   : > { %v3892_v7 = vadd.f32 %v3891_v9, %v3863_v49  ;;  %v4071_v49 = vpop.permute.xlu2 %4070 }
 0x542   : > { %v3902_v1 = vmax.f32 %v3892_v7, 0.0 }
 0x545   : > { %v3864_v43 = vpop.f32.mrf.mxu2 }
 0x546   : > { %v3865_v29 = vadd.f32 %v4625_v54, %v3864_v43 }
 0x548   : > { %v3894_v0 = vadd.f32 %v3893_v4, %v3865_v29 }
 0x54a   : > { %v3903_v16 = vmax.f32 %v3894_v0, 0.0 }
 0x54c   : > { %v3907_v59 = vpack.c.bf16 %v3903_v16, %v3902_v1 }
 0x54e   : > { %3999 = vmatmul.bf16.gmra.mxu0 %v3907_v59 }
 0x59a   : > { %v3985_v57 = vpop.f32.mrf.mxu0 }
 0x59b   : > { %v3986_v28 = vadd.f32 %v6310_v21, %v3985_v57  ;;  %v4076_v57 = vpop.permute.xlu1 %4075 }
 0x59d   : > { %v4005_v47 = vsub.f32 0.0, %v3986_v28 }
 0x59f   : > { %v4013_v25 = vmul.f32 1.442695, %v4005_v47 }
 0x5a1   : > { %4627 = vpow2.f32 %v4013_v25 }
 0x5a2   : > { %v3987_v33 = vpop.f32.mrf.mxu0 }
 0x5a3   : > { %v3988_v45 = vadd.f32 %v6310_v21, %v3987_v33 }
 0x5a5   : > { %v4006_v41 = vsub.f32 0.0, %v3988_v45  ;;  %v4081_v45 = vpop.permute.xlu2 %4080 }
 0x5a7   : > { %v4628_v63 = vpop.eup %4627  ;;  %v4015_v15 = vmul.f32 1.442695, %v4006_v41 }
 0x5a8   : > { %v4029_v11 = vadd.f32 1.0, %v4628_v63  ;;  %v4086_v63 = vpop.permute.xlu1 %4085 }
 0x5a9   : > { %4629 = vpow2.f32 %v4015_v15 }
 0x5aa   : > { %4631 = vrcp.f32 %v4029_v11 }
 0x5ab   : > { %v3990_v3 = vpop.f32.mrf.mxu0 }
 0x5ac   : > { %v3991_v42 = vadd.f32 %v6310_v21, %v3990_v3 }
 0x5ae   : > { %v4007_v30 = vsub.f32 0.0, %v3991_v42 }
 0x5af   : > { %v4630_v58 = vpop.eup %4629 }
 0x5b0   : > { %v4017_v35 = vmul.f32 1.442695, %v4007_v30  ;;  %v4632_v52 = vpop.eup %4631  ;;  %v4030_v17 = vadd.f32 1.0, %v4630_v58 }
 0x5b1   : > { %v4088_v27 = vsel %vm4047_vm4, %v4051_v22, %v4632_v52 }
 0x5b2   : > { %4633 = vpow2.f32 %v4017_v35  ;;  %4096 = vst [vmem:[%s6323_s18] sm:$0xff] %v4088_v27 }
 0x5b3   : > { %4635 = vrcp.f32 %v4030_v17  ;;  %v3992_v54 = vpop.f32.mrf.mxu0 }
 0x5b4   : > { %v3993_v50 = vadd.f32 %v6310_v21, %v3992_v54 }
 0x5b6   : > { %v4008_v12 = vsub.f32 0.0, %v3993_v50 }
 0x5b8   : > { %v4634_v53 = vpop.eup %4633  ;;  %v4019_v6 = vmul.f32 1.442695, %v4008_v12 }
 0x5b9   : > { %v4636_v31 = vpop.eup %4635  ;;  %v4031_v61 = vadd.f32 1.0, %v4634_v53 }
 0x5ba   : > { %v4089_v10 = vsel %vm4047_vm4, %v4056_v5, %v4636_v31  ;;  %4637 = vpow2.f32 %v4019_v6 }
 0x5bb   : > { %4097 = vst [vmem:[%s6323_s18 + $0x8] sm:$0xff] %v4089_v10  ;;  %4639 = vrcp.f32 %v4031_v61  ;;  %v3995_v2 = vpop.f32.mrf.mxu0 }
 0x5bc   : > { %v3996_v18 = vadd.f32 %v6310_v21, %v3995_v2 }
 0x5be   : > { %v4009_v62 = vsub.f32 0.0, %v3996_v18 }
 0x5c0   : > { %v4638_v60 = vpop.eup %4637  ;;  %v4021_v8 = vmul.f32 1.442695, %v4009_v62 }
 0x5c1   : > { %v4640_v37 = vpop.eup %4639  ;;  %v4032_v32 = vadd.f32 1.0, %v4638_v60 }
 0x5c2   : > { %v4090_v44 = vsel %vm4047_vm4, %v4061_v40, %v4640_v37  ;;  %4641 = vpow2.f32 %v4021_v8 }
 0x5c3   : > { %4098 = vst [vmem:[%s6323_s18 + $0x10] sm:$0xff] %v4090_v44  ;;  %4643 = vrcp.f32 %v4032_v32  ;;  %v3997_v56 = vpop.f32.mrf.mxu0 }
 0x5c4   : > { %v3998_v14 = vadd.f32 %v6310_v21, %v3997_v56 }
 0x5c6   : > { %v4010_v13 = vsub.f32 0.0, %v3998_v14 }
 0x5c8   : > { %v4642_v26 = vpop.eup %4641  ;;  %v4023_v19 = vmul.f32 1.442695, %v4010_v13 }
 0x5c9   : > { %v4644_v39 = vpop.eup %4643  ;;  %v4033_v51 = vadd.f32 1.0, %v4642_v26 }
 0x5ca   : > { %v4091_v36 = vsel %vm4047_vm4, %v4066_v34, %v4644_v39  ;;  %4645 = vpow2.f32 %v4023_v19 }
 0x5cb   : > { %4099 = vst [vmem:[%s6323_s18 + $0x18] sm:$0xff] %v4091_v36  ;;  %4647 = vrcp.f32 %v4033_v51  ;;  %v4000_v38 = vpop.f32.mrf.mxu0 }
 0x5cc   : > { %v4001_v48 = vadd.f32 %v6310_v21, %v4000_v38 }
 0x5ce   : > { %v4011_v23 = vsub.f32 0.0, %v4001_v48 }
 0x5d0   : > { %v4646_v24 = vpop.eup %4645  ;;  %v4025_v9 = vmul.f32 1.442695, %v4011_v23 }
 0x5d1   : > { %v4648_v20 = vpop.eup %4647  ;;  %v4034_v43 = vadd.f32 1.0, %v4646_v24 }
 0x5d2   : > { %v4092_v7 = vsel %vm4047_vm4, %v4071_v49, %v4648_v20  ;;  %4649 = vpow2.f32 %v4025_v9 }
 0x5d3   : > { %4100 = vst [vmem:[%s6323_s18 + $0x20] sm:$0xff] %v4092_v7  ;;  %4651 = vrcp.f32 %v4034_v43  ;;  %v4002_v29 = vpop.f32.mrf.mxu0 }
 0x5d4   : > { %v4003_v4 = vadd.f32 %v6310_v21, %v4002_v29 }
 0x5d6   : > { %v4012_v0 = vsub.f32 0.0, %v4003_v4 }
 0x5d8   : > { %v4650_v1 = vpop.eup %4649  ;;  %v4027_v16 = vmul.f32 1.442695, %v4012_v0 }
 0x5d9   : > { %v4652_v59 = vpop.eup %4651  ;;  %v4035_v28 = vadd.f32 1.0, %v4650_v1 }
 0x5da   : > { %v4093_v47 = vsel %vm4047_vm4, %v4076_v57, %v4652_v59  ;;  %4653 = vpow2.f32 %v4027_v16 }
 0x5db   : > { %4101 = vst [vmem:[%s6323_s18 + $0x28] sm:$0xff] %v4093_v47  ;;  %4655 = vrcp.f32 %v4035_v28 }
 0x5e0   : > { %v4654_v25 = vpop.eup %4653 }
 0x5e1   : > { %v4656_v33 = vpop.eup %4655  ;;  %v4036_v41 = vadd.f32 1.0, %v4654_v25 }
 0x5e2   : > { %v4094_v21 = vsel %vm4047_vm4, %v4081_v45, %v4656_v33 }
 0x5e3   : > { %4102 = vst [vmem:[%s6323_s18 + $0x30] sm:$0xff] %v4094_v21  ;;  %4657 = vrcp.f32 %v4036_v41 }
 0x5e9   : > { %v4658_v55 = vpop.eup %4657 }
 0x5ea   : > { %v4095_v15 = vsel %vm4047_vm4, %v4086_v63, %v4658_v55 }
 0x5eb   : > { %4103 = vst [vmem:[%s6323_s18 + $0x38] sm:$0xff] %v4095_v15 }
 0x5ec PF: > { %s25_s27 = sadd.s32 1, %s4665_s27  }
 0x5ed   : > { %p22_p4 = scmp.ge.s32.totalorder %s25_s27, 4  }
 0x5ef   :  { %24 = sbr.rel (!%p22_p4) target bundleno = 3 (0x3), region = 108 }

// kernel: nerf_net_forward.2
= control target key start
LH: loop header
LB: loop body
LE: loop exit
PB: predicated region body
PF: predicated region fallthrough
CT: control target
= control target key end

     0   :  { %s5928_s15 = smov 0   ;;  %s8277_s0 = inlined_call_operand.vmem [shape: f32[128,16], index: 0, kind: input, shape index: {}]   ;;  %s8278_s1 = inlined_call_operand.vmem [shape: f32[16,128], index: 1, kind: input, shape index: {}]   ;;  %s8279_s2 = inlined_call_operand.vmem [shape: f32[1,128], index: 2, kind: input, shape index: {}]   ;;  %s8280_s3 = inlined_call_operand.vmem [shape: bf16[4,128,128], index: 3, kind: input, shape index: {}]   ;;  %s8281_s4 = inlined_call_operand.vmem [shape: f32[4,1,128], index: 4, kind: input, shape index: {}]   ;;  %s8282_s5 = inlined_call_operand.vmem [shape: bf16[4,128,128], index: 5, kind: input, shape index: {}]   ;;  %s8283_s6 = inlined_call_operand.vmem [shape: bf16[128,128], index: 6, kind: input, shape index: {}]   ;;  %s8284_s7 = inlined_call_operand.vmem [shape: f32[1,128], index: 7, kind: input, shape index: {}]   ;;  %s8285_s8 = inlined_call_operand.vmem [shape: f32[1,128], index: 8, kind: input, shape index: {}]   ;;  %s8286_s9 = inlined_call_operand.<no memory space> [shape: f32[1,1], index: 9, kind: input, shape index: {}]   ;;  %s8287_s10 = inlined_call_operand.vmem [shape: bf16[256,128], index: 10, kind: input, shape index: {}]   ;;  %s8288_s11 = inlined_call_operand.vmem [shape: f32[1,128], index: 11, kind: input, shape index: {}]   ;;  %s8289_s12 = inlined_call_operand.vmem [shape: bf16[256,128], index: 12, kind: input, shape index: {}]   ;;  %s8290_s13 = inlined_call_operand.vmem [shape: f32[1,128], index: 13, kind: input, shape index: {}]   ;;  %s8291_s14 = inlined_call_operand.vmem [shape: f32[128,128], index: 14, kind: output, shape index: {}]  }
   0x1   :  { %v19_v0 = vstv %s8286_s9 }
   0x2   :  { %20 = vst [vmem:[#allocation2] sm:$0x1] %v19_v0 }
   0x3 LB: > { %s5010_s16 = sadd.s32 4294967295, %s5840_s15   ;;  %p5014_p0 = scmp.ge.s32.totalorder %s5840_s15, 1  ;;  %s5840_s15 = sphi %s5928_s15, %s26_s15  }
   0x4   : > { %p415_p1 = scmp.lt.s32.totalorder %s5840_s15, 3 }
   0x6   : > { %p416_p2 = pnand %p5014_p0, %p415_p1 }
   0x8   : > { %419 = sbr.rel (%p416_p2) target bundleno = 2057 (0x809), region = 76 }
   0xd   : > { %v482_v1 = vld [vmem:[%s8278_s1 + $0x8] sm:$0xff]  ;;  %v481_v2 = vld [vmem:[%s8278_s1] sm:$0xff]  ;;  %s5015_s20 = sshll.u32 %s5010_s16, 3  ;;  %vm483_vm0 = vcmask 130048   ;;  %v8305_v11 = vmov 0  }
   0xe   : > { %522 = vmatpush.msra.mxu0 %v482_v1  ;;  %5744 = vmatpush.msra.mxu3 %v482_v1  ;;  %p462_p3 = scmp.lt.s32.totalorder %s5015_s20, 15  ;;  %v8308_v32 = vmov 683565275   ;;  %v8299_v34 = vmov 2475754826  }
   0xf   : > { %5770 = vset.pattern.permute.xlu0 %v8305_v11  ;;  %5776 = vset.pattern.permute.xlu1 %v8305_v11  ;;  %v8297_v36 = vmov 2131351028   ;;  %v8301_v41 = vmov 2102212464   ;;  %v8303_v44 = vmov 920167782  }
  0x10   : > { %523 = vmatpush.msra.mxu0 %v481_v2  ;;  %5745 = vmatpush.msra.mxu3 %v481_v2  ;;  %s8602_s20 = smov (!%p462_p3, %s5015_s20), 15  ;;  %v8295_v47 = vmov 1326507024  }
  0x11   : > { %s5016_s21 = sshll.u32 %s8602_s20, 3  ;;  %5782 = vset.pattern.permute.xlu2 %v8305_v11 }
  0x12   : > { %s465_s24 = scalar_lea.vmem %s8277_s0, %s5016_s21  ;;  %s8226_s29 = scalar_lea.vmem %s8291_s14, %s5016_s21 }
  0x13   : > { %v473_v3 = vld [vmem:[%s465_s24] sm:$0xff]  ;;  %v474_v5 = vld [vmem:[%s465_s24 + $0x8] sm:$0xff]  ;;  %v475_v7 = vld [vmem:[%s465_s24 + $0x10] sm:$0xff] }
  0x14   : > { %v477_v4 = vld [vmem:[%s465_s24 + $0x20] sm:$0xff]  ;;  %5019 = vmatmul.msk.f32.vlgmr.msra.gmra.mxu0 %vm483_vm0, %v473_v3  ;;  %v478_v6 = vld [vmem:[%s465_s24 + $0x28] sm:$0xff]  ;;  %v479_v8 = vld [vmem:[%s465_s24 + $0x30] sm:$0xff] }
  0x15   : > { %5023 = vmatmul.msk.f32.vlgmr.msra.gmra.mxu3 %vm483_vm0, %v477_v4  ;;  %v476_v9 = vld [vmem:[%s465_s24 + $0x18] sm:$0xff] }
  0x16   : > { %v480_v10 = vld [vmem:[%s465_s24 + $0x38] sm:$0xff] }
  0x1c   : > { %5020 = vmatmul.msk.f32.gmra.mxu0 %vm483_vm0, %v474_v5 }
  0x1d   : > { %5024 = vmatmul.msk.f32.gmra.mxu3 %vm483_vm0, %v478_v6 }
  0x24   : > { %5021 = vmatmul.msk.f32.gmra.mxu0 %vm483_vm0, %v475_v7 }
  0x25   : > { %5025 = vmatmul.msk.f32.gmra.mxu3 %vm483_vm0, %v479_v8 }
  0x2c   : > { %5022 = vmatmul.msk.f32.gmra.mxu0 %vm483_vm0, %v476_v9 }
  0x2d   : > { %5026 = vmatmul.msk.f32.gmra.mxu3 %vm483_vm0, %v480_v10 }
  0x91   : > { %v5961_v12 = vpop.f32.mrf.mxu0 }
  0x92   : > { %8373 = vst [vmem:[#allocation3_spill] sm:$0xff] %v5961_v12  ;;  %v549_v13 = vand.u32 2147483647, %v5961_v12  ;;  %v552_v14 = vand.u32 2139095040, %v5961_v12 }
  0x94   : > { %v553_v15 = vshrl.u32 %v552_v14, 23  ;;  %v556_v16 = vand.u32 8388607, %v549_v13 }
  0x96   : > { %v5027_v17 = vadd.s32 4294967169, %v553_v15  ;;  %v557_v18 = vor.u32 8388608, %v556_v16 }
  0x98   : > { %v5967_v19 = vpop.f32.mrf.mxu3  ;;  %v559_v20 = vadd.s32 1, %v5027_v17  ;;  %v5971_v23 = vshll.u32 %v557_v18, 8 }
  0x99   : > { %8374 = vst [vmem:[#allocation4_spill] sm:$0xff] %v5967_v19  ;;  %v1169_v21 = vand.u32 2147483647, %v5967_v19  ;;  %v1172_v22 = vand.u32 2139095040, %v5967_v19 }
  0x9a   : > { %vm560_vm1 = vcmp.gt.s32.totalorder %v559_v20, 0  ;;  %v598_v30 = vand.u32 65535, %v5971_v23  ;;  %v599_v3 = vshrl.u32 %v5971_v23, 16 }
  0x9b   : > { %v1173_v24 = vshrl.u32 %v1172_v22, 23  ;;  %v561_v25 = vsel %vm560_vm1, %v559_v20, 0  ;;  %v1176_v26 = vand.u32 8388607, %v1169_v21 }
  0x9c   : > { %v563_v27 = vand.u32 31, %v561_v25  ;;  %v562_v28 = vshrl.u32 %v561_v25, 5 }
  0x9d   : > { %v5039_v31 = vadd.s32 4294967169, %v1173_v24  ;;  %v1177_v38 = vor.u32 8388608, %v1176_v26 }
  0x9e   : > { %v564_v29 = vsub.s32 32, %v563_v27  ;;  %v566_v33 = vshll.u32 %v8308_v32, %v563_v27  ;;  %v569_v35 = vshll.u32 %v8299_v34, %v563_v27  ;;  %v572_v37 = vshll.u32 %v8297_v36, %v563_v27 }
  0x9f   : > { %v575_v43 = vshll.u32 %v8301_v41, %v563_v27  ;;  %v578_v46 = vshll.u32 %v8303_v44, %v563_v27  ;;  %vm581_vm2 = vcmp.lt.s32.totalorder %v562_v28, 1  ;;  %v1179_v52 = vadd.s32 1, %v5039_v31 }
  0xa0   : > { %v567_v39 = vshrl.u32 %v8299_v34, %v564_v29  ;;  %v570_v40 = vshrl.u32 %v8297_v36, %v564_v29  ;;  %v573_v42 = vshrl.u32 %v8301_v41, %v564_v29  ;;  %v576_v45 = vshrl.u32 %v8303_v44, %v564_v29 }
  0xa1   : > { %v579_v48 = vshrl.u32 %v8295_v47, %v564_v29  ;;  %vm582_vm3 = vcmp.lt.s32.totalorder %v562_v28, 2  ;;  %vm584_vm4 = vcmp.lt.s32.totalorder %v562_v28, 4  ;;  %v565_v55 = vshrl.u32 %v8308_v32, %v564_v29 }
  0xa2   : > { %v568_v49 = vor.u32 %v567_v39, %v566_v33  ;;  %v571_v50 = vor.u32 %v570_v40, %v569_v35  ;;  %v574_v51 = vor.u32 %v573_v42, %v572_v37  ;;  %v577_v53 = vor.u32 %v576_v45, %v575_v43 }
  0xa3   : > { %v580_v54 = vor.u32 %v579_v48, %v578_v46  ;;  %vm583_vm5 = vcmp.lt.s32.totalorder %v562_v28, 3  ;;  %vm1180_vm6 = vcmp.gt.s32.totalorder %v1179_v52, 0  ;;  %v5996_v10 = vshll.u32 %v1177_v38, 8 }
  0xa4   : > { %v586_v56 = vsel %vm584_vm4, %v574_v51, 2102212464  ;;  %v589_v57 = vsel %vm581_vm2, %v568_v49, %v571_v50  ;;  %v593_v58 = vsel %vm581_vm2, %v571_v50, %v574_v51  ;;  %v590_v59 = vsel %vm584_vm4, %v577_v53, 920167782 }
  0xa5   : > { %v594_v60 = vsel %vm584_vm4, %v580_v54, 1326507024  ;;  %v585_v61 = vsel %vm581_vm2, %v565_v55, %v568_v49  ;;  %v587_v62 = vsel %vm583_vm5, %v571_v50, %v586_v56  ;;  %v591_v63 = vsel %vm583_vm5, %v574_v51, %v590_v59 }
  0xa6   : > { %v595_v0 = vsel %vm583_vm5, %v577_v53, %v594_v60  ;;  %v592_v1 = vsel %vm582_vm3, %v589_v57, %v591_v63  ;;  %v1181_v4 = vsel %vm1180_vm6, %v1179_v52, 0  ;;  %v5994_v9 = vsel %vm582_vm3, %v585_v61, %v587_v62 }
  0xa7   : > { %v596_v2 = vsel %vm582_vm3, %v593_v58, %v595_v0  ;;  %v622_v7 = vand.u32 65535, %v592_v1  ;;  %v623_v8 = vshrl.u32 %v592_v1, 16  ;;  %v5998_v16 = vshrl.u32 %v1181_v4, 5 }
  0xa8   : > { %v600_v5 = vand.u32 65535, %v596_v2  ;;  %v601_v6 = vshrl.u32 %v596_v2, 16  ;;  %v1183_v17 = vand.u32 31, %v1181_v4 }
  0xa9   : > { %v625_v22 = vmul.u32 %v623_v8, %v598_v30  ;;  %v626_v24 = vmul.u32 %v622_v7, %v599_v3  ;;  %v624_v27 = vmul.u32 %v622_v7, %v598_v30  ;;  %v627_v29 = vmul.u32 %v623_v8, %v599_v3 }
  0xaa   : > { %v603_v14 = vmul.u32 %v601_v6, %v598_v30  ;;  %v604_v15 = vmul.u32 %v600_v5, %v599_v3  ;;  %v602_v18 = vmul.u32 %v600_v5, %v598_v30  ;;  %v605_v20 = vmul.u32 %v601_v6, %v599_v3 }
  0xab   : > { %v628_v28 = vshll.u32 %v625_v22, 16  ;;  %v629_v35 = vshrl.u32 %v625_v22, 16  ;;  %v630_v38 = vshll.u32 %v626_v24, 16  ;;  %v6000_v39 = vsub.s32 32, %v1183_v17 }
  0xac   : > { %v606_v25 = vshll.u32 %v603_v14, 16  ;;  %v607_v26 = vshrl.u32 %v603_v14, 16  ;;  %v608_v31 = vshll.u32 %v604_v15, 16  ;;  %v609_v33 = vshrl.u32 %v604_v15, 16 }
  0xad   : > { %v631_v42 = vshrl.u32 %v626_v24, 16  ;;  %vm632_vm8 = vc.u32 %v624_v27, %v628_v28  ;;  %v634_v43 = vadd.s32 %v628_v28, %v624_v27  ;;  %v1186_v30 = vshll.u32 %v8308_v32, %v1183_v17  ;;  %v6056_v27 = vpop.f32.mrf.mxu0 }
  0xae   : > { %vm610_vm7 = vc.u32 %v602_v18, %v606_v25  ;;  %v612_v37 = vadd.s32 %v606_v25, %v602_v18  ;;  %v633_v46 = vsel %vm632_vm8, 1, %v8305_v11  ;;  %v1189_v50 = vshll.u32 %v8299_v34, %v1183_v17  ;;  %8375 = vst [vmem:[#allocation5_spill] sm:$0xff] %v6056_v27 }
  0xaf   : > { %v611_v40 = vsel %vm610_vm7, 1, %v8305_v11  ;;  %v635_v49 = vadd.s32 %v633_v46, %v627_v29  ;;  %vm636_vm10 = vc.u32 %v634_v43, %v630_v38  ;;  %v1187_v53 = vshrl.u32 %v8299_v34, %v6000_v39 }
  0xb0   : > { %v613_v45 = vadd.s32 %v611_v40, %v605_v20  ;;  %vm614_vm9 = vc.u32 %v612_v37, %v608_v31  ;;  %v637_v52 = vsel %vm636_vm10, 1, %v8305_v11  ;;  %v1190_v54 = vshrl.u32 %v8297_v36, %v6000_v39 }
  0xb1   : > { %v615_v48 = vsel %vm614_vm9, 1, %v8305_v11  ;;  %v639_v55 = vadd.s32 %v637_v52, %v635_v49  ;;  %v1192_v56 = vshll.u32 %v8297_v36, %v1183_v17  ;;  %v1193_v57 = vshrl.u32 %v8301_v41, %v6000_v39 }
  0xb2   : > { %v617_v51 = vadd.s32 %v615_v48, %v613_v45  ;;  %v1195_v58 = vshll.u32 %v8301_v41, %v1183_v17  ;;  %v6016_v60 = vadd.s32 %v634_v43, %v630_v38  ;;  %v6018_v61 = vor.u32 %v1187_v53, %v1186_v30 }
  0xb3   : > { %v1196_v62 = vshrl.u32 %v8303_v44, %v6000_v39  ;;  %v640_v63 = vadd.s32 %v639_v55, %v629_v35  ;;  %v6022_v0 = vor.u32 %v1190_v54, %v1189_v50  ;;  %v1198_v1 = vshll.u32 %v8303_v44, %v1183_v17 }
  0xb4   : > { %v618_v59 = vadd.s32 %v617_v51, %v607_v26  ;;  %v1199_v2 = vshrl.u32 %v8295_v47, %v6000_v39  ;;  %v1194_v4 = vor.u32 %v1193_v57, %v1192_v56  ;;  %vm1201_vm11 = vcmp.lt.s32.totalorder %v5998_v16, 1 }
  0xb5   : > { %v1197_v5 = vor.u32 %v1196_v62, %v1195_v58  ;;  %v641_v6 = vadd.s32 %v640_v63, %v631_v42  ;;  %vm1203_vm12 = vcmp.lt.s32.totalorder %v5998_v16, 3  ;;  %vm1204_vm13 = vcmp.lt.s32.totalorder %v5998_v16, 4 }
  0xb6   : > { %v6027_v3 = vadd.s32 %v618_v59, %v609_v33  ;;  %v1200_v7 = vor.u32 %v1199_v2, %v1198_v1  ;;  %vm1202_vm15 = vcmp.lt.s32.totalorder %v5998_v16, 2  ;;  %v642_v8 = vmul.u32 %v5971_v23, %v5994_v9 }
  0xb7   : > { %v645_v14 = vadd.s32 1, %v641_v6  ;;  %v1209_v15 = vsel %vm1201_vm11, %v6018_v61, %v6022_v0  ;;  %v1210_v17 = vsel %vm1204_vm13, %v1197_v5, 920167782  ;;  %v1213_v20 = vsel %vm1201_vm11, %v6022_v0, %v1194_v4 }
  0xb8   : > { %vm644_vm14 = vc.u32 %v6027_v3, %v6016_v60  ;;  %v1211_v18 = vsel %vm1203_vm12, %v1194_v4, %v1210_v17  ;;  %v1214_v22 = vsel %vm1204_vm13, %v1200_v7, 1326507024  ;;  %v1218_v23 = vand.u32 65535, %v5996_v10 }
  0xb9   : > { %v646_v9 = vsel %vm644_vm14, %v645_v14, %v641_v6  ;;  %v1212_v24 = vsel %vm1202_vm15, %v1209_v15, %v1211_v18  ;;  %v1215_v25 = vsel %vm1203_vm12, %v1197_v5, %v1214_v22  ;;  %v1219_v26 = vshrl.u32 %v5996_v10, 16 }
  0xba   : > { %v647_v29 = vadd.s32 %v646_v9, %v642_v8  ;;  %v1216_v31 = vsel %vm1202_vm15, %v1213_v20, %v1215_v25  ;;  %v1242_v33 = vand.u32 65535, %v1212_v24  ;;  %v1243_v28 = vshrl.u32 %v1212_v24, 16 }
  0xbb   : > { %v1220_v35 = vand.u32 65535, %v1216_v31  ;;  %v1221_v37 = vshrl.u32 %v1216_v31, 16  ;;  %v707_v43 = vand.u32 2139095040, %v6056_v27  ;;  %v1185_v56 = vshrl.u32 %v8308_v32, %v6000_v39 }
  0xbc   : > { %v648_v38 = vadd.s32 536870912, %v647_v29  ;;  %v1245_v40 = vmul.u32 %v1243_v28, %v1218_v23  ;;  %v1246_v42 = vmul.u32 %v1242_v33, %v1219_v26  ;;  %v1244_v48 = vmul.u32 %v1242_v33, %v1218_v23 }
  0xbd   : > { %v1222_v45 = vmul.u32 %v1220_v35, %v1218_v23  ;;  %v1223_v46 = vmul.u32 %v1221_v37, %v1218_v23  ;;  %v1224_v30 = vmul.u32 %v1220_v35, %v1219_v26  ;;  %v1225_v51 = vmul.u32 %v1221_v37, %v1219_v26 }
  0xbe   : > { %v6061_v49 = vshrl.u32 %v648_v38, 30  ;;  %v1248_v50 = vshll.u32 %v1245_v40, 16  ;;  %v1247_v54 = vmul.u32 %v1243_v28, %v1219_v26  ;;  %v1250_v57 = vshll.u32 %v1246_v42, 16 }
  0xbf   : > { %v1226_v52 = vshll.u32 %v1223_v46, 16  ;;  %v1228_v53 = vshll.u32 %v1224_v30, 16  ;;  %v708_v58 = vshrl.u32 %v707_v43, 23  ;;  %v1206_v1 = vsel %vm1204_vm13, %v1194_v4, 2102212464 }
  0xc0   : > { %v650_v55 = vshll.u32 %v6061_v49, 30  ;;  %vm1252_vm1 = vc.u32 %v1244_v48, %v1248_v50  ;;  %v1254_v62 = vadd.s32 %v1248_v50, %v1244_v48  ;;  %v1227_v6 = vshrl.u32 %v1223_v46, 16 }
  0xc1   : > { %vm1230_vm0 = vc.u32 %v1222_v45, %v1226_v52  ;;  %v1232_v59 = vadd.s32 %v1226_v52, %v1222_v45  ;;  %v1253_v5 = vsel %vm1252_vm1, 1, %v8305_v11  ;;  %v1205_v14 = vsel %vm1201_vm11, %v1185_v56, %v6018_v61 }
  0xc2   : > { %v651_v63 = vsub.s32 %v647_v29, %v650_v55  ;;  %v1231_v2 = vsel %vm1230_vm0, 1, %v8305_v11  ;;  %v1255_v8 = vadd.s32 %v1253_v5, %v1247_v54  ;;  %v1229_v17 = vshrl.u32 %v1224_v30, 16 }
  0xc3   : > { %v1233_v7 = vadd.s32 %v1231_v2, %v1225_v51  ;;  %vm1234_vm2 = vc.u32 %v1232_v59, %v1228_v53  ;;  %v1249_v20 = vshrl.u32 %v1245_v40, 16  ;;  %vm1256_vm4 = vc.u32 %v1254_v62, %v1250_v57 }
  0xc4   : > { %vm652_vm3 = vcmp.lt.s32.totalorder %v651_v63, 0  ;;  %v653_v39 = vsub.s32 0, %v651_v63  ;;  %v1235_v15 = vsel %vm1234_vm2, 1, %v8305_v11  ;;  %v1207_v22 = vsel %vm1203_vm12, %v6022_v0, %v1206_v1 }
  0xc5   : > { %v1237_v18 = vadd.s32 %v1235_v15, %v1233_v7  ;;  %v1257_v23 = vsel %vm1256_vm4, 1, %v8305_v11  ;;  %v5030_v9 = vadd.s32 4294967169, %v708_v58  ;;  %v1251_v26 = vshrl.u32 %v1246_v42, 16 }
  0xc6   : > { %v654_v4 = vsel %vm652_vm3, %v653_v39, %v651_v63  ;;  %v1259_v29 = vadd.s32 %v1257_v23, %v1255_v8  ;;  %v6078_v31 = vadd.s32 %v1254_v62, %v1250_v57  ;;  %v1208_v33 = vsel %vm1202_vm15, %v1205_v14, %v1207_v22  ;;  %v6114_v22 = vpop.f32.mrf.mxu3 }
  0xc7   : > { %v655_v24 = vclz %v654_v4  ;;  %v1238_v25 = vadd.s32 %v1237_v18, %v1227_v6  ;;  %v714_v37 = vadd.s32 1, %v5030_v9  ;;  %v1262_v40 = vmul.u32 %v5996_v10, %v1208_v33  ;;  %8376 = vst [vmem:[#allocation6_spill] sm:$0xff] %v6114_v22 }
  0xc8   : > { %v1260_v35 = vadd.s32 %v1259_v29, %v1249_v20  ;;  %v643_v53 = vadd.s32 %v6016_v60, %v6027_v3  ;;  %v8293_v5 = vand.u32 2147483647, %v6056_v27  ;;  %vm551_vm13 = vcmp.lt.s32.totalorder %v5961_v12, 0 }
  0xc9   : > { %v5028_v61 = vadd.s32 4294967294, %v655_v24  ;;  %v6082_v28 = vadd.s32 %v1238_v25, %v1229_v17  ;;  %vm715_vm7 = vcmp.gt.s32.totalorder %v714_v37, 0  ;;  %vm550_vm15 = vcmp.le.f32.partialorder %v549_v13, 0.7853982 }
  0xca   : > { %v1261_v38 = vadd.s32 %v1260_v35, %v1251_v26  ;;  %v716_v30 = vsel %vm715_vm7, %v714_v37, 0  ;;  %v711_v9 = vand.u32 8388607, %v8293_v5  ;;  %v1327_v35 = vand.u32 2139095040, %v6114_v22 }
  0xcb   : > { %vm5029_vm5 = vcmp.lt.s32.totalorder %v5028_v61, 0  ;;  %vm1264_vm6 = vc.u32 %v6082_v28, %v6078_v31  ;;  %v718_v52 = vand.u32 31, %v716_v30  ;;  %v6105_v8 = vshrl.u32 %v716_v30, 5 }
  0xcc   : > { %v658_v0 = vsel %vm5029_vm5, 0, %v5028_v61  ;;  %v1265_v42 = vadd.s32 1, %v1261_v38  ;;  %v673_v37 = vsub.s32 4, %v6061_v49  ;;  %v1328_v30 = vshrl.u32 %v1327_v35, 23 }
  0xcd   : > { %v663_v43 = vsub.s32 4294967266, %v658_v0  ;;  %v659_v50 = vsub.s32 32, %v658_v0  ;;  %v6094_v57 = vsub.s32 32, %v718_v52  ;;  %v660_v58 = vshll.u32 %v651_v63, %v658_v0 }
  0xce   : > { %v1266_v45 = vsel %vm1264_vm6, %v1265_v42, %v1261_v38  ;;  %v733_v7 = vshll.u32 %v8303_v44, %v718_v52  ;;  %v724_v17 = vshll.u32 %v8299_v34, %v718_v52  ;;  %v727_v20 = vshll.u32 %v8297_v36, %v718_v52  ;;  %v6125_v38 = vpop.f32.mrf.mxu0 }
  0xcf   : > { %v1267_v46 = vadd.s32 %v1266_v45, %v1262_v40  ;;  %v664_v16 = vadd.s32 127, %v663_v43  ;;  %v661_v55 = vshrl.u32 %v643_v53, %v659_v50  ;;  %v734_v60 = vshrl.u32 %v8295_v47, %v6094_v57  ;;  %8377 = vst [vmem:[#allocation7_spill] sm:$0xff] %v6125_v38 }
  0xd0   : > { %v725_v6 = vshrl.u32 %v8297_v36, %v6094_v57  ;;  %v728_v39 = vshrl.u32 %v8301_v41, %v6094_v57  ;;  %v731_v14 = vshrl.u32 %v8303_v44, %v6094_v57  ;;  %v730_v4 = vshll.u32 %v8301_v41, %v718_v52 }
  0xd1   : > { %v1268_v48 = vadd.s32 536870912, %v1267_v46  ;;  %v665_v54 = vshll.u32 %v664_v16, 23  ;;  %v662_v1 = vor.u32 %v661_v55, %v660_v58  ;;  %v735_v18 = vor.u32 %v734_v60, %v733_v7 }
  0xd2   : > { %v726_v24 = vor.u32 %v725_v6, %v724_v17  ;;  %v729_v26 = vor.u32 %v728_v39, %v727_v20  ;;  %v732_v29 = vor.u32 %v731_v14, %v730_v4  ;;  %vm739_vm9 = vcmp.lt.s32.totalorder %v6105_v8, 4 }
  0xd3   : > { %v6087_v51 = vshrl.u32 %v1268_v48, 30  ;;  %v666_v59 = vor.u32 4788187, %v665_v54  ;;  %v669_v15 = vcvt.s32.f32 %v662_v1  ;;  %v722_v61 = vshrl.u32 %v8299_v34, %v6094_v57 }
  0xd4   : > { %v749_v33 = vsel %vm739_vm9, %v735_v18, 1326507024  ;;  %v721_v40 = vshll.u32 %v8308_v32, %v718_v52  ;;  %vm736_vm10 = vcmp.lt.s32.totalorder %v6105_v8, 1  ;;  %vm738_vm11 = vcmp.lt.s32.totalorder %v6105_v8, 3 }
  0xd5   : > { %v1270_v10 = vshll.u32 %v6087_v51, 30  ;;  %v667_v3 = vand.u32 2147483647, %v666_v59  ;;  %v712_v42 = vor.u32 8388608, %v711_v9  ;;  %v748_v43 = vsel %vm736_vm10, %v726_v24, %v729_v26 }
  0xd6   : > { %v750_v45 = vsel %vm738_vm11, %v732_v29, %v749_v33  ;;  %v862_v16 = vand.u32 2139095040, %v6125_v38  ;;  %vm737_vm14 = vcmp.lt.s32.totalorder %v6105_v8, 2  ;;  %v745_v52 = vsel %vm739_vm9, %v732_v29, 920167782 }
  0xd7   : > { %v6092_v56 = vsub.s32 %v1267_v46, %v1270_v10  ;;  %v670_v23 = vmul.f32 %v669_v15, %v667_v3  ;;  %v723_v46 = vor.u32 %v722_v61, %v721_v40  ;;  %v751_v53 = vsel %vm737_vm14, %v748_v43, %v750_v45 }
  0xd8   : > { %v674_v54 = vsel %vm551_vm13, %v673_v37, %v6061_v49  ;;  %v1293_v10 = vsub.s32 4, %v6087_v51  ;;  %v6143_v55 = vshll.u32 %v712_v42, 8  ;;  %v5042_v59 = vadd.s32 4294967169, %v1328_v30 }
  0xd9   : > { %vm1272_vm8 = vcmp.lt.s32.totalorder %v6092_v56, 0  ;;  %v1273_v62 = vsub.s32 0, %v6092_v56  ;;  %v671_v0 = vxor.u32 2147483648, %v670_v23  ;;  %v744_v58 = vsel %vm736_vm10, %v723_v46, %v726_v24 }
  0xda   : > { %8378 = vst [vmem:[#allocation8_spill] sm:$0xff] %v6143_v55  ;;  %v746_v60 = vsel %vm738_vm11, %v729_v26, %v745_v52  ;;  %v756_v49 = vshrl.u32 %v751_v53, 16  ;;  %v6154_v3 = vsel %vm550_vm15, 0, %v674_v54  ;;  %vm6158_vm0 = vcmp.le.f32.partialorder %v1169_v21, 0.7853982 }
  0xdb   : > { %v1274_v2 = vsel %vm1272_vm8, %v1273_v62, %v6092_v56  ;;  %v672_v48 = vsel %vm551_vm13, %v671_v0, %v670_v23  ;;  %v863_v62 = vshrl.u32 %v862_v16, 23  ;;  %vm1171_vm1 = vcmp.lt.s32.totalorder %v5967_v19, 0 }
  0xdc   : > { %v1275_v63 = vclz %v1274_v2  ;;  %v6150_v1 = vsel %vm550_vm15, %v5961_v12, %v672_v48  ;;  %v1263_v13 = vadd.s32 %v6078_v31, %v6082_v28  ;;  %v1294_v7 = vsel %vm1171_vm1, %v1293_v10, %v6087_v51 }
  0xdd   : > { %v753_v39 = vand.u32 65535, %v6143_v55  ;;  %v6173_v21 = vmul.f32 %v6150_v1, %v6150_v1  ;;  %v747_v14 = vsel %vm737_vm14, %v744_v58, %v746_v60  ;;  %v1334_v15 = vadd.s32 1, %v5042_v59 }
  0xde   : > { %v5040_v25 = vadd.s32 4294967294, %v1275_v63  ;;  %v741_v63 = vsel %vm739_vm9, %v729_v26, 2102212464  ;;  %v5033_v17 = vadd.s32 4294967169, %v863_v62  ;;  %v720_v28 = vshrl.u32 %v8308_v32, %v6094_v57  ;;  %v6215_v62 = vpop.f32.mrf.mxu3 }
  0xdf   : > { %v6179_v51 = vmul.u32 %v756_v49, %v753_v39  ;;  %v6182_v20 = vand.u32 3, %v6154_v3  ;;  %v755_v4 = vand.u32 65535, %v751_v53  ;;  %v8292_v23 = vand.u32 2147483647, %v6114_v22 }
  0xe0   : > { %vm5041_vm12 = vcmp.lt.s32.totalorder %v5040_v25, 0  ;;  %v8294_v9 = vand.u32 2147483647, %v6125_v38  ;;  %v740_v26 = vsel %vm736_vm10, %v720_v28, %v723_v46  ;;  %v742_v57 = vsel %vm738_vm11, %v726_v24, %v741_v63 }
  0xe1   : > { %v1278_v50 = vsel %vm5041_vm12, 0, %v5040_v25  ;;  %8381 = vst [vmem:[#allocation9_spill] sm:$0xff] %v6179_v51  ;;  %v6188_v25 = vsel %vm6158_vm0, 0, %v1294_v7  ;;  %v778_v29 = vshrl.u32 %v747_v14, 16  ;;  %v685_v61 = vmul.f32 -0.00019511016, %v6173_v21 }
  0xe2   : > { %v1283_v2 = vsub.s32 4294967266, %v1278_v50  ;;  %v1279_v18 = vsub.s32 32, %v1278_v50  ;;  %8382 = vst [vmem:[#allocation10_spill] sm:$0xff] %v6182_v20  ;;  %v777_v33 = vand.u32 65535, %v747_v14  ;;  %vm1335_vm2 = vcmp.gt.s32.totalorder %v1334_v15, 0 }
  0xe3   : > { %8383 = vst [vmem:[#allocation11_spill] sm:$0xff] %v6188_v25  ;;  %v869_v35 = vadd.s32 1, %v5033_v17  ;;  %v754_v40 = vshrl.u32 %v6143_v55, 16  ;;  %v761_v42 = vshll.u32 %v6179_v51, 16  ;;  %v6198_v43 = vand.u32 3, %v6188_v25 }
  0xe4   : > { %v1284_v31 = vadd.s32 127, %v1283_v2  ;;  %v1281_v37 = vshrl.u32 %v1263_v13, %v1279_v18  ;;  %v6202_v45 = vsel %vm737_vm14, %v740_v26, %v742_v57  ;;  %v757_v24 = vmul.u32 %v755_v4, %v753_v39 }
  0xe5   : > { %8384 = vst [vmem:[#allocation12_spill] sm:$0xff] %v6198_v43  ;;  %vm870_vm3 = vcmp.gt.s32.totalorder %v869_v35, 0  ;;  %v1280_v46 = vshll.u32 %v6092_v56, %v1278_v50  ;;  %v6205_v30 = vmul.u32 %v755_v4, %v754_v40  ;;  %v6207_v16 = vmul.u32 %v778_v29, %v753_v39 }
  0xe6   : > { %v1285_v0 = vshll.u32 %v1284_v31, 23  ;;  %8385 = vst [vmem:[#allocation13_spill] sm:$0xff] %v6202_v45  ;;  %v1336_v48 = vsel %vm1335_vm2, %v1334_v15, 0  ;;  %v686_v52 = vadd.f32 0.008332121, %v685_v61  ;;  %v6209_v53 = vmul.u32 %v777_v33, %v753_v39 }
  0xe7   : > { %8386 = vst [vmem:[#allocation14_spill] sm:$0xff] %v6205_v30  ;;  %v6211_v54 = vmul.u32 %v777_v33, %v754_v40  ;;  %v871_v10 = vsel %vm870_vm3, %v869_v35, 0  ;;  %v1282_v58 = vor.u32 %v1281_v37, %v1280_v46  ;;  %vm765_vm4 = vc.u32 %v757_v24, %v761_v42 }
  0xe8   : > { %v1286_v59 = vor.u32 4788187, %v1285_v0  ;;  %v866_v8 = vand.u32 8388607, %v8294_v9  ;;  %v6217_v56 = vmul.u32 %v756_v49, %v754_v40  ;;  %v6219_v50 = vmul.u32 %v778_v29, %v754_v40 }
  0xe9   : > { %8387 = vst [vmem:[#allocation15_spill] sm:$0xff] %v6211_v54  ;;  %v1338_v60 = vand.u32 31, %v1336_v48  ;;  %v6224_v7 = vadd.s32 %v761_v42, %v757_v24  ;;  %v873_v39 = vand.u32 31, %v871_v10  ;;  %v6228_v14 = vmul.f32 %v686_v52, %v6173_v21 }
  0xea   : > { %v6231_v15 = vsel %vm765_vm4, 1, %v8305_v11  ;;  %v6235_v49 = vand.u32 8388607, %v8292_v23  ;;  %v1482_v17 = vand.u32 2139095040, %v6215_v62  ;;  %v1287_v18 = vand.u32 2147483647, %v1286_v59 }
  0xeb   : > { %8388 = vst [vmem:[#allocation16_spill] sm:$0xff] %v6224_v7  ;;  %v1289_v31 = vcvt.s32.f32 %v1282_v58  ;;  %v6238_v28 = vshrl.u32 %v1336_v48, 5  ;;  %v867_v4 = vor.u32 8388608, %v866_v8  ;;  %v6240_v26 = vsub.s32 32, %v1338_v60 }
  0xec   : > { %v6243_v57 = vshll.u32 %v8308_v32, %v1338_v60  ;;  %v6246_v29 = vshll.u32 %v8299_v34, %v1338_v60  ;;  %v874_v61 = vsub.s32 32, %v873_v39  ;;  %v6249_v33 = vshll.u32 %v8297_v36, %v1338_v60 }
  0xed   : > { %v6251_v35 = vshrl.u32 %v871_v10, 5  ;;  %v876_v37 = vshll.u32 %v8308_v32, %v873_v39  ;;  %v879_v0 = vshll.u32 %v8299_v34, %v873_v39  ;;  %v882_v24 = vshll.u32 %v8297_v36, %v873_v39 }
  0xee   : > { %v877_v40 = vshrl.u32 %v8299_v34, %v874_v61  ;;  %v880_v42 = vshrl.u32 %v8297_v36, %v874_v61  ;;  %v883_v46 = vshrl.u32 %v8301_v41, %v874_v61  ;;  %v6259_v48 = vmul.f32 %v1289_v31, %v1287_v18 }
  0xef   : > { %v885_v52 = vshll.u32 %v8301_v41, %v873_v39  ;;  %v886_v58 = vshrl.u32 %v8303_v44, %v874_v61  ;;  %v888_v10 = vshll.u32 %v8303_v44, %v873_v39  ;;  %v889_v5 = vshrl.u32 %v8295_v47, %v874_v61 }
  0xf0   : > { %v878_v59 = vor.u32 %v877_v40, %v876_v37  ;;  %v881_v8 = vor.u32 %v880_v42, %v879_v0  ;;  %v884_v23 = vor.u32 %v883_v46, %v882_v24  ;;  %v6266_v2 = vshll.u32 %v8301_v41, %v1338_v60 }
  0xf1   : > { %v887_v13 = vor.u32 %v886_v58, %v885_v52  ;;  %vm891_vm5 = vcmp.lt.s32.totalorder %v6251_v35, 1  ;;  %v6269_v9 = vshll.u32 %v867_v4, 8  ;;  %v6272_v18 = vshll.u32 %v8303_v44, %v1338_v60 }
  0xf2   : > { %v890_v31 = vor.u32 %v889_v5, %v888_v10  ;;  %vm894_vm6 = vcmp.lt.s32.totalorder %v6251_v35, 4  ;;  %v899_v39 = vsel %vm891_vm5, %v878_v59, %v881_v8  ;;  %v6279_v37 = vshrl.u32 %v8299_v34, %v6240_v26 }
  0xf3   : > { %vm893_vm7 = vcmp.lt.s32.totalorder %v6251_v35, 3  ;;  %v900_v0 = vsel %vm894_vm6, %v887_v13, 920167782  ;;  %v903_v4 = vsel %vm891_vm5, %v881_v8, %v884_v23  ;;  %v6288_v5 = vshrl.u32 %v8297_v36, %v6240_v26 }
  0xf4   : > { %vm892_vm8 = vcmp.lt.s32.totalorder %v6251_v35, 2  ;;  %v901_v60 = vsel %vm893_vm7, %v884_v23, %v900_v0  ;;  %v904_v40 = vsel %vm894_vm6, %v890_v31, 1326507024  ;;  %v908_v46 = vand.u32 65535, %v6269_v9 }
  0xf5   : > { %v902_v42 = vsel %vm892_vm8, %v899_v39, %v901_v60  ;;  %v905_v24 = vsel %vm893_vm7, %v887_v13, %v904_v40  ;;  %v1483_v52 = vshrl.u32 %v1482_v17, 23  ;;  %v909_v10 = vshrl.u32 %v6269_v9, 16 }
  0xf6   : > { %v906_v58 = vsel %vm892_vm8, %v903_v4, %v905_v24  ;;  %v932_v63 = vand.u32 65535, %v902_v42  ;;  %v933_v47 = vshrl.u32 %v902_v42, 16  ;;  %v6305_v0 = vshrl.u32 %v8301_v41, %v6240_v26 }
  0xf7   : > { %v896_v31 = vsel %vm894_vm6, %v884_v23, 2102212464  ;;  %v910_v39 = vand.u32 65535, %v906_v58  ;;  %v911_v60 = vshrl.u32 %v906_v58, 16  ;;  %v875_v13 = vshrl.u32 %v8308_v32, %v874_v61 }
  0xf8   : > { %v935_v40 = vmul.u32 %v933_v47, %v908_v46  ;;  %v936_v17 = vmul.u32 %v932_v63, %v909_v10  ;;  %v5045_v36 = vadd.s32 4294967169, %v1483_v52  ;;  %v897_v44 = vsel %vm893_vm7, %v881_v8, %v896_v31 }
  0xf9   : > { %v913_v24 = vmul.u32 %v911_v60, %v908_v46  ;;  %v914_v34 = vmul.u32 %v910_v39, %v909_v10  ;;  %v895_v41 = vsel %vm891_vm5, %v875_v13, %v878_v59  ;;  %v934_v23 = vmul.u32 %v932_v63, %v908_v46 }
  0xfa   : > { %v938_v11 = vshll.u32 %v935_v40, 16  ;;  %v912_v58 = vmul.u32 %v910_v39, %v908_v46  ;;  %v915_v43 = vmul.u32 %v911_v60, %v909_v10  ;;  %v937_v32 = vmul.u32 %v933_v47, %v909_v10 }
  0xfb   : > { %v916_v61 = vshll.u32 %v913_v24, 16  ;;  %v940_v20 = vshll.u32 %v936_v17, 16  ;;  %v1489_v4 = vadd.s32 1, %v5045_v36  ;;  %v918_v25 = vshll.u32 %v914_v34, 16 }
  0xfc   : > { %vm942_vm9 = vc.u32 %v934_v23, %v938_v11  ;;  %v944_v52 = vadd.s32 %v938_v11, %v934_v23  ;;  %v8389_v42 = vmov 0   ;;  %v898_v59 = vsel %vm892_vm8, %v895_v41, %v897_v44 }
  0xfd   : > { %vm920_vm10 = vc.u32 %v912_v58, %v916_v61  ;;  %v922_v22 = vadd.s32 %v916_v61, %v912_v58  ;;  %v943_v12 = vsel %vm942_vm9, 1, %v8389_v42  ;;  %v8390_v10 = vand.u32 2147483647, %v6215_v62 }
  0xfe   : > { %v921_v8 = vsel %vm920_vm10, 1, %v8389_v42  ;;  %v945_v63 = vadd.s32 %v943_v12, %v937_v32  ;;  %vm946_vm11 = vc.u32 %v944_v52, %v940_v20  ;;  %v939_v31 = vshrl.u32 %v935_v40, 16 }
  0xff   : > { %v923_v46 = vadd.s32 %v921_v8, %v915_v43  ;;  %vm924_vm12 = vc.u32 %v922_v22, %v918_v25  ;;  %v947_v47 = vsel %vm946_vm11, 1, %v8389_v42  ;;  %v1486_v11 = vand.u32 8388607, %v8390_v10 }
 0x100   : > { %v925_v36 = vsel %vm924_vm12, 1, %v8389_v42  ;;  %v949_v39 = vadd.s32 %v947_v47, %v945_v63  ;;  %vm1490_vm13 = vcmp.gt.s32.totalorder %v1489_v4, 0  ;;  %v8391_v60 = vmov 920167782  }
 0x101   : > { %v6326_v35 = vshrl.u32 %v8391_v60, %v6240_v26  ;;  %v917_v41 = vshrl.u32 %v913_v24, 16  ;;  %v927_v44 = vadd.s32 %v925_v36, %v923_v46  ;;  %v1491_v12 = vsel %vm1490_vm13, %v1489_v4, 0 }
 0x102   : > { %v941_v32 = vshrl.u32 %v936_v17, 16  ;;  %v950_v43 = vadd.s32 %v949_v39, %v939_v31  ;;  %v952_v22 = vmul.u32 %v6269_v9, %v898_v59  ;;  %v1493_v25 = vand.u32 31, %v1491_v12 }
 0x103   : > { %v919_v13 = vshrl.u32 %v914_v34, 16  ;;  %v928_v23 = vadd.s32 %v927_v44, %v917_v41  ;;  %v6329_v58 = vadd.s32 %v944_v52, %v940_v20  ;;  %v1487_v61 = vor.u32 8388608, %v1486_v11 }
 0x104   : > { %v951_v40 = vadd.s32 %v950_v43, %v941_v32  ;;  %v1494_v8 = vsub.s32 32, %v1493_v25  ;;  %v8392_v63 = vmov 683565275   ;;  %v8393_v10 = vmov 2475754826  }
 0x105   : > { %v1496_v47 = vshll.u32 %v8392_v63, %v1493_v25  ;;  %v1499_v27 = vshll.u32 %v8393_v10, %v1493_v25  ;;  %v6333_v45 = vadd.s32 %v928_v23, %v919_v13  ;;  %v6335_v24 = vshrl.u32 %v1491_v12, 5  ;;  %v6356_v23 = vpop.f32.mrf.mxu0 }
 0x106   : > { %v8394_v17 = vmov 2131351028   ;;  %v8395_v46 = vmov 2102212464   ;;  %v955_v59 = vadd.s32 1, %v951_v40  ;;  %v1497_v34 = vshrl.u32 %v8393_v10, %v1494_v8  ;;  %8397 = vst [vmem:[#allocation17_spill] sm:$0xff] %v6356_v23 }
 0x107   : > { %v1502_v4 = vshll.u32 %v8394_v17, %v1493_v25  ;;  %v1505_v9 = vshll.u32 %v8395_v46, %v1493_v25  ;;  %v1500_v20 = vshrl.u32 %v8394_v17, %v1494_v8  ;;  %v1508_v52 = vshll.u32 %v8391_v60, %v1493_v25 }
 0x108   : > { %vm954_vm14 = vc.u32 %v6333_v45, %v6329_v58  ;;  %v1503_v11 = vshrl.u32 %v8395_v46, %v1494_v8  ;;  %v1506_v36 = vshrl.u32 %v8391_v60, %v1494_v8  ;;  %v6346_v31 = vshll.u32 %v1487_v61, 8 }
 0x109   : > { %v956_v39 = vsel %vm954_vm14, %v955_v59, %v951_v40  ;;  %v6348_v41 = vor.u32 %v1497_v34, %v1496_v47  ;;  %v6350_v44 = vor.u32 %v1500_v20, %v1499_v27  ;;  %v8396_v12 = vmov 1326507024  }
 0x10a   : > { %v1509_v32 = vshrl.u32 %v8396_v12, %v1494_v8  ;;  %v957_v43 = vadd.s32 %v956_v39, %v952_v22  ;;  %v6353_v13 = vor.u32 %v1503_v11, %v1502_v4  ;;  %v1507_v25 = vor.u32 %v1506_v36, %v1505_v9 }
 0x10b   : > { %vm1511_vm15 = vcmp.lt.s32.totalorder %v6335_v24, 1  ;;  %v6360_v55 = vshrl.u32 %v8396_v12, %v6240_v26  ;;  %vm1513_vm2 = vcmp.lt.s32.totalorder %v6335_v24, 3  ;;  %vm1514_vm3 = vcmp.lt.s32.totalorder %v6335_v24, 4 }
 0x10c   : > { %v1510_v61 = vor.u32 %v1509_v32, %v1508_v52  ;;  %v6366_v27 = vor.u32 %v6279_v37, %v6243_v57  ;;  %v958_v22 = vadd.s32 536870912, %v957_v43  ;;  %vm1512_vm4 = vcmp.lt.s32.totalorder %v6335_v24, 2 }
 0x10d   : > { %v1519_v40 = vsel %vm1511_vm15, %v6348_v41, %v6350_v44  ;;  %v1520_v47 = vsel %vm1514_vm3, %v1507_v25, 920167782  ;;  %v1523_v4 = vsel %vm1511_vm15, %v6350_v44, %v6353_v13  ;;  %v1017_v37 = vand.u32 2139095040, %v6356_v23 }
 0x10e   : > { %v1524_v57 = vsel %vm1514_vm3, %v1510_v61, 1326507024  ;;  %v6382_v9 = vshrl.u32 %v958_v22, 30  ;;  %v1521_v59 = vsel %vm1513_vm2, %v6353_v13, %v1520_v47  ;;  %v1528_v20 = vand.u32 65535, %v6346_v31 }
 0x10f   : > { %v1525_v34 = vsel %vm1513_vm2, %v1507_v25, %v1524_v57  ;;  %v6392_v52 = vor.u32 %v6288_v5, %v6246_v29  ;;  %v1522_v11 = vsel %vm1512_vm4, %v1519_v40, %v1521_v59  ;;  %v1529_v39 = vshrl.u32 %v6346_v31, 16 }
 0x110   : > { %v1526_v36 = vsel %vm1512_vm4, %v1523_v4, %v1525_v34  ;;  %v8398_v32 = vxor.u32 2147483648, %v6259_v48  ;;  %v960_v61 = vshll.u32 %v6382_v9, 30  ;;  %v6407_v29 = vor.u32 %v6305_v0, %v6249_v33 }
 0x111   : > { %v1530_v22 = vand.u32 65535, %v1526_v36  ;;  %v1531_v47 = vshrl.u32 %v1526_v36, 16  ;;  %v1552_v5 = vand.u32 65535, %v1522_v11  ;;  %v1553_v40 = vshrl.u32 %v1522_v11, 16 }
 0x112   : > { %v1292_v25 = vsel %vm1171_vm1, %v8398_v32, %v6259_v48  ;;  %v1018_v57 = vshrl.u32 %v1017_v37, 23  ;;  %v6411_v4 = vor.u32 %v6326_v35, %v6266_v2  ;;  %v6413_v59 = vsub.s32 %v957_v43, %v960_v61 }
 0x113   : > { %v1532_v34 = vmul.u32 %v1530_v22, %v1528_v20  ;;  %v1533_v54 = vmul.u32 %v1531_v47, %v1528_v20  ;;  %v6418_v48 = vsel %vm6158_vm0, %v5967_v19, %v1292_v25  ;;  %v1495_v0 = vshrl.u32 %v8392_v63, %v1494_v8 }
 0x114   : > { %v1534_v11 = vmul.u32 %v1530_v22, %v1529_v39  ;;  %vm1359_vm1 = vcmp.lt.s32.totalorder %v6238_v28, 4  ;;  %vm962_vm5 = vcmp.lt.s32.totalorder %v6413_v59, 0  ;;  %v963_v2 = vsub.s32 0, %v6413_v59 }
 0x115   : > { %v1535_v35 = vmul.u32 %v1531_v47, %v1529_v39  ;;  %v1536_v43 = vshll.u32 %v1533_v54, 16  ;;  %v1554_v36 = vmul.u32 %v1552_v5, %v1528_v20  ;;  %v1555_v32 = vmul.u32 %v1553_v40, %v1528_v20 }
 0x116   : > { %v1538_v37 = vshll.u32 %v1534_v11, 16  ;;  %v5036_v6 = vadd.s32 4294967169, %v1018_v57  ;;  %vm1356_vm0 = vcmp.lt.s32.totalorder %v6238_v28, 1  ;;  %v964_v25 = vsel %vm962_vm5, %v963_v2, %v6413_v59 }
 0x117   : > { %vm1540_vm6 = vc.u32 %v1532_v34, %v1536_v43  ;;  %v1542_v61 = vadd.s32 %v1536_v43, %v1532_v34  ;;  %v1556_v8 = vmul.u32 %v1552_v5, %v1529_v39  ;;  %vm1358_vm7 = vcmp.lt.s32.totalorder %v6238_v28, 3 }
 0x118   : > { %v965_v22 = vclz %v964_v25  ;;  %v1541_v33 = vsel %vm1540_vm6, 1, %v8389_v42  ;;  %v1557_v19 = vmul.u32 %v1553_v40, %v1529_v39  ;;  %v1558_v51 = vshll.u32 %v1555_v32, 16 }
 0x119   : > { %v1537_v47 = vshrl.u32 %v1533_v54, 16  ;;  %v1543_v7 = vadd.s32 %v1541_v33, %v1535_v35  ;;  %vm1544_vm8 = vc.u32 %v1542_v61, %v1538_v37  ;;  %v1560_v30 = vshll.u32 %v1556_v8, 16 }
 0x11a   : > { %v5034_v20 = vadd.s32 4294967294, %v965_v22  ;;  %v1516_v57 = vsel %vm1514_vm3, %v6353_v13, 2102212464  ;;  %v1545_v2 = vsel %vm1544_vm8, 1, %v8389_v42  ;;  %vm1562_vm9 = vc.u32 %v1554_v36, %v1558_v51 }
 0x11b   : > { %v1547_v5 = vadd.s32 %v1545_v2, %v1543_v7  ;;  %v1563_v34 = vsel %vm1562_vm9, 1, %v8389_v42  ;;  %v1564_v43 = vadd.s32 %v1558_v51, %v1554_v36  ;;  %v1024_v25 = vadd.s32 1, %v5036_v6 }
 0x11c   : > { %vm5035_vm10 = vcmp.lt.s32.totalorder %v5034_v20, 0  ;;  %v1515_v54 = vsel %vm1511_vm15, %v1495_v0, %v6348_v41  ;;  %v1539_v39 = vshrl.u32 %v1534_v11, 16  ;;  %v1565_v40 = vadd.s32 %v1563_v34, %v1557_v19 }
 0x11d   : > { %v968_v33 = vsel %vm5035_vm10, 0, %v5034_v20  ;;  %v1548_v35 = vadd.s32 %v1547_v5, %v1537_v47  ;;  %v1559_v37 = vshrl.u32 %v1555_v32, 16  ;;  %vm1566_vm11 = vc.u32 %v1564_v43, %v1560_v30 }
 0x11e   : > { %v969_v13 = vsub.s32 32, %v968_v33  ;;  %v973_v61 = vsub.s32 4294967266, %v968_v33  ;;  %v1517_v7 = vsel %vm1513_vm2, %v6350_v44, %v1516_v57  ;;  %v1567_v51 = vsel %vm1566_vm11, 1, %v8389_v42 }
 0x11f   : > { %v953_v36 = vadd.s32 %v6329_v58, %v6333_v45  ;;  %v1561_v6 = vshrl.u32 %v1556_v8, 16  ;;  %v1569_v22 = vadd.s32 %v1567_v51, %v1565_v40  ;;  %vm1025_vm12 = vcmp.gt.s32.totalorder %v1024_v25, 0 }
 0x120   : > { %v1365_v19 = vsel %vm1359_vm1, %v6411_v4, 920167782  ;;  %v974_v41 = vadd.s32 127, %v973_v61  ;;  %v6447_v0 = vadd.s32 %v1548_v35, %v1539_v39  ;;  %v6449_v11 = vadd.s32 %v1564_v43, %v1560_v30 }
 0x121   : > { %v1332_v32 = vor.u32 8388608, %v6235_v49  ;;  %v971_v44 = vshrl.u32 %v953_v36, %v969_v13  ;;  %v1518_v47 = vsel %vm1512_vm4, %v1515_v54, %v1517_v7  ;;  %v1570_v20 = vadd.s32 %v1569_v22, %v1559_v37 }
 0x122   : > { %vm1357_vm13 = vcmp.lt.s32.totalorder %v6238_v28, 2  ;;  %v1364_v45 = vsel %vm1356_vm0, %v6366_v27, %v6392_v52  ;;  %v975_v58 = vshll.u32 %v974_v41, 23  ;;  %v1026_v8 = vsel %vm1025_vm12, %v1024_v25, 0 }
 0x123   : > { %v6461_v30 = vmul.f32 %v6418_v48, %v6418_v48  ;;  %v1366_v49 = vsel %vm1358_vm7, %v6407_v29, %v1365_v19  ;;  %v970_v24 = vshll.u32 %v6413_v59, %v968_v33  ;;  %v1571_v57 = vadd.s32 %v1570_v20, %v1561_v6 }
 0x124   : > { %v8400_v2 = vor.u32 %v6360_v55, %v6272_v18  ;;  %v976_v34 = vor.u32 4788187, %v975_v58  ;;  %v1572_v43 = vmul.u32 %v6346_v31, %v1518_v47  ;;  %vm1574_vm14 = vc.u32 %v6447_v0, %v6449_v11 }
 0x125   : > { %8399 = vst [vmem:[#allocation18_spill] sm:$0xff] %v6461_v30  ;;  %v8401_v25 = vshll.u32 %v6207_v16, 16  ;;  %v972_v54 = vor.u32 %v971_v44, %v970_v24  ;;  %v1575_v39 = vadd.s32 1, %v1571_v57  ;;  %v1028_v59 = vand.u32 31, %v1026_v8 }
 0x126   : > { %v1369_v5 = vsel %vm1359_vm1, %v8400_v2, 1326507024  ;;  %v688_v40 = vadd.f32 -0.16666654, %v6228_v14  ;;  %v1340_v55 = vshrl.u32 %v8392_v63, %v6240_v26  ;;  %v1368_v18 = vsel %vm1356_vm0, %v6392_v52, %v6407_v29 }
 0x127   : > { %vm787_vm15 = vc.u32 %v6209_v53, %v8401_v25  ;;  %v6485_v31 = vshll.u32 %v1332_v32, 8  ;;  %v6489_v33 = vsel %vm1357_vm13, %v1364_v45, %v1366_v49  ;;  %v1370_v35 = vsel %vm1358_vm7, %v6411_v4, %v1369_v5 }
 0x128   : > { %v977_v37 = vand.u32 2147483647, %v976_v34  ;;  %v1576_v14 = vsel %vm1574_vm14, %v1575_v39, %v1571_v57  ;;  %v1305_v13 = vmul.f32 -0.00019511016, %v6461_v30  ;;  %v6497_v26 = vadd.s32 %v6231_v15, %v6217_v56 }
 0x129   : > { %8402 = vst [vmem:[#allocation19_spill] sm:$0xff] %v6485_v31  ;;  %v788_v61 = vsel %vm787_vm15, 1, %v8389_v42  ;;  %v1577_v7 = vadd.s32 %v1576_v14, %v1572_v43  ;;  %v1361_v51 = vsel %vm1359_vm1, %v6407_v29, 2102212464  ;;  %v8327_v36 = vand.u32 65535, %v6489_v33 }
 0x12a   : > { %v979_v6 = vcvt.s32.f32 %v972_v54  ;;  %v6504_v22 = vsub.s32 32, %v1028_v59  ;;  %v6508_v4 = vsel %vm1357_vm13, %v1368_v18, %v1370_v35  ;;  %v1373_v19 = vand.u32 65535, %v6485_v31 }
 0x12b   : > { %v8329_v56 = vshrl.u32 %v6489_v33, 16  ;;  %vm861_vm2 = vcmp.lt.s32.totalorder %v6125_v38, 0  ;;  %v1578_v15 = vadd.s32 536870912, %v1577_v7  ;;  %v689_v41 = vmul.f32 %v688_v40, %v6173_v21 }
 0x12c   : > { %v6515_v29 = vadd.s32 %v788_v61, %v6219_v50  ;;  %v6520_v32 = vsel %vm1356_vm0, %v1340_v55, %v6366_v27  ;;  %v980_v44 = vmul.f32 %v979_v6, %v977_v37  ;;  %v1306_v47 = vadd.f32 0.008332121, %v1305_v13 }
 0x12d   : > { %v1362_v20 = vsel %vm1358_vm7, %v6392_v52, %v1361_v51  ;;  %v1375_v45 = vand.u32 65535, %v6508_v4  ;;  %v6526_v58 = vshrl.u32 %v1578_v15, 30  ;;  %v1376_v49 = vshrl.u32 %v6508_v4, 16  ;;  %v5645_v4 = vld [vmem:[%s8280_s3 + $0x28] sm:$0xff] }
 0x12e   : > { %v6531_v50 = vmul.u32 %v8327_v36, %v1373_v19  ;;  %v8403_v24 = vand.u32 2147483647, %v6125_v38  ;;  %v1041_v57 = vshrl.u32 %v8391_v60, %v6504_v22  ;;  %v1044_v52 = vshrl.u32 %v8396_v12, %v6504_v22 }
 0x12f   : > { %v6545_v2 = vmul.u32 %v8329_v56, %v1373_v19  ;;  %v1580_v5 = vshll.u32 %v6526_v58, 30  ;;  %v8326_v34 = vand.u32 2147483647, %v6356_v23  ;;  %v1032_v43 = vshrl.u32 %v8393_v10, %v6504_v22 }
 0x130   : > { %vm6535_vm3 = vcmp.le.f32.partialorder %v8403_v24, 0.7853982  ;;  %v981_v25 = vxor.u32 2147483648, %v980_v44  ;;  %v1035_v54 = vshrl.u32 %v8394_v17, %v6504_v22  ;;  %v1040_v39 = vshll.u32 %v8395_v46, %v1028_v59 }
 0x131   : > { %v1043_v40 = vshll.u32 %v8391_v60, %v1028_v59  ;;  %v1307_v55 = vmul.f32 %v1306_v47, %v6461_v30  ;;  %v6556_v18 = vsub.s32 %v1577_v7, %v1580_v5  ;;  %v6558_v35 = vshrl.u32 %v1026_v8, 5 }
 0x132   : > { %v1038_v37 = vshrl.u32 %v8395_v46, %v6504_v22  ;;  %v1031_v14 = vshll.u32 %v8392_v63, %v1028_v59  ;;  %v1034_v13 = vshll.u32 %v8393_v10, %v1028_v59  ;;  %v1042_v61 = vor.u32 %v1041_v57, %v1040_v39 }
 0x133   : > { %v1045_v51 = vor.u32 %v1044_v52, %v1043_v40  ;;  %v6566_v6 = vmul.u32 %v1376_v49, %v1373_v19  ;;  %vm1582_vm4 = vcmp.lt.s32.totalorder %v6556_v18, 0  ;;  %v1583_v7 = vsub.s32 0, %v6556_v18 }
 0x134   : > { %v1037_v8 = vshll.u32 %v8394_v17, %v1028_v59  ;;  %v982_v15 = vsel %vm861_vm2, %v981_v25, %v980_v44  ;;  %v1021_v47 = vand.u32 8388607, %v8326_v34  ;;  %v6575_v24 = vor.u32 %v1032_v43, %v1031_v14  ;;  %v6590_v25 = vpop.f32.mrf.mxu3 }
 0x135   : > { %v6577_v57 = vor.u32 %v1035_v54, %v1034_v13  ;;  %v1377_v52 = vmul.u32 %v1375_v45, %v1373_v19  ;;  %v1584_v5 = vsel %vm1582_vm4, %v1583_v7, %v6556_v18  ;;  %vm1049_vm1 = vcmp.lt.s32.totalorder %v6558_v35, 4  ;;  %8406 = vst [vmem:[#allocation20_spill] sm:$0xff] %v6590_v25 }
 0x136   : > { %v6582_v39 = vor.u32 %v1038_v37, %v1037_v8  ;;  %v8328_v59 = vshll.u32 %v6545_v2, 16  ;;  %v1585_v40 = vclz %v1584_v5  ;;  %v1055_v44 = vsel %vm1049_vm1, %v1042_v61, 920167782 }
 0x137   : > { %v1059_v43 = vsel %vm1049_vm1, %v1045_v51, 1326507024  ;;  %v1308_v54 = vadd.f32 -0.16666654, %v1307_v55  ;;  %v1381_v19 = vshll.u32 %v6566_v6, 16  ;;  %v6596_v37 = vsel %vm6535_vm3, %v6125_v38, %v982_v15 }
 0x138   : > { %vm1046_vm5 = vcmp.lt.s32.totalorder %v6558_v35, 1  ;;  %v5046_v14 = vadd.s32 4294967294, %v1585_v40  ;;  %v1022_v13 = vor.u32 8388608, %v1021_v47  ;;  %vm1048_vm0 = vcmp.lt.s32.totalorder %v6558_v35, 3 }
 0x139   : > { %v1054_v51 = vsel %vm1046_vm5, %v6575_v24, %v6577_v57  ;;  %v1056_v55 = vsel %vm1048_vm0, %v6582_v39, %v1055_v44  ;;  %v1058_v7 = vsel %vm1046_vm5, %v6577_v57, %v6582_v39  ;;  %v1060_v8 = vsel %vm1048_vm0, %v1042_v61, %v1059_v43  ;;  %v5647_v44 = vld [vmem:[%s8280_s3 + $0x38] sm:$0xff] }
 0x13a   : > { %v1637_v15 = vand.u32 2139095040, %v6590_v25  ;;  %v690_v47 = vadd.f32 1.0, %v689_v41  ;;  %v1374_v5 = vshrl.u32 %v6485_v31, 16  ;;  %v6617_v40 = vmul.f32 %v6596_v37, %v6596_v37  ;;  %3146 = vmatpush.bf16.msra.mxu1 %v5647_v44  ;;  %5746 = vmatpush.bf16.msra.mxu2 %v5647_v44 }
 0x13b   : > { %vm5047_vm6 = vcmp.lt.s32.totalorder %v5046_v14, 0  ;;  %v1309_v34 = vmul.f32 %v1308_v54, %v6461_v30  ;;  %v6626_v61 = vsel %vm1357_vm13, %v6520_v32, %v1362_v20  ;;  %vm6631_vm7 = vc.u32 %v6531_v50, %v8328_v59  ;;  %v5646_v20 = vld [vmem:[%s8280_s3 + $0x30] sm:$0xff] }
 0x13c   : > { %8407 = vst [vmem:[#allocation21_spill] sm:$0xff] %v6617_v40  ;;  %vm1047_vm8 = vcmp.lt.s32.totalorder %v6558_v35, 2  ;;  %vm6637_vm9 = vc.u32 %v1377_v52, %v1381_v19  ;;  %v983_v54 = vsub.s32 4, %v6382_v9  ;;  %v6653_v43 = vsel %vm5047_vm6, 0, %v5046_v14 }
 0x13d   : > { %8408 = vst [vmem:[#allocation22_spill] sm:$0xff] %v6626_v61  ;;  %v6643_v28 = vsel %vm1047_vm8, %v1054_v51, %v1056_v55  ;;  %v6647_v32 = vsel %vm1047_vm8, %v1058_v7, %v1060_v8  ;;  %v6655_v59 = vshll.u32 %v1022_v13, 8  ;;  %v1638_v56 = vshrl.u32 %v1637_v15, 23 }
 0x13e   : > { %v6658_v51 = vmul.f32 %v690_v47, %v6150_v1  ;;  %v6662_v55 = vmul.u32 %v1375_v45, %v1374_v5  ;;  %v995_v8 = vmul.f32 -0.00019511016, %v6617_v40  ;;  %v1380_v44 = vmul.u32 %v1376_v49, %v1374_v5  ;;  %3147 = vmatpush.bf16.msra.mxu1 %v5646_v20  ;;  %5747 = vmatpush.bf16.msra.mxu2 %v5646_v20 }
 0x13f   : > { %v8413_v14 = vshrl.u32 %v6489_v33, 16  ;;  %v1310_v47 = vadd.f32 1.0, %v1309_v34  ;;  %v1386_v45 = vsel %vm6637_vm9, 1, %v8389_v42  ;;  %v1408_v7 = vsel %vm6631_vm7, 1, %v8389_v42 }
 0x140   : > { %v1593_v23 = vsub.s32 4294967266, %v6653_v43  ;;  %v8414_v49 = vand.u32 65535, %v6489_v33  ;;  %v984_v36 = vsel %vm861_vm2, %v983_v54, %v6382_v9  ;;  %v1063_v34 = vand.u32 65535, %v6655_v59 }
 0x141   : > { %v1402_v13 = vmul.u32 %v8413_v14, %v1374_v5  ;;  %v5048_v41 = vadd.s32 4294967169, %v1638_v56  ;;  %v6692_v15 = vadd.s32 %v1381_v19, %v1377_v52  ;;  %v996_v61 = vadd.f32 0.008332121, %v995_v8 }
 0x142   : > { %v6685_v14 = vmul.u32 %v8414_v49, %v1374_v5  ;;  %v6695_v31 = vadd.s32 %v1386_v45, %v1380_v44  ;;  %v8415_v33 = vshrl.u32 %v6647_v32, 16  ;;  %v8416_v9 = vshrl.u32 %v6643_v28, 16  ;;  %3148 = vmatpush.bf16.msra.mxu1 %v5645_v4  ;;  %v5644_v44 = vld [vmem:[%s8280_s3 + $0x20] sm:$0xff]  ;;  %5748 = vmatpush.bf16.msra.mxu2 %v5645_v4 }
 0x143   : > { %v6697_v20 = vadd.s32 %v1408_v7, %v1402_v13  ;;  %v6708_v56 = vmul.f32 %v1310_v47, %v6418_v48  ;;  %v6712_v52 = vsel %vm6535_vm3, 0, %v984_v36  ;;  %v8418_v19 = vand.u32 2147483647, %v6215_v62  ;;  %v8441_v7 = vld [vmem:[#allocation8_spill] sm:$0xff] }
 0x144   : > { %v6701_v5 = vmul.u32 %v8415_v33, %v1063_v34  ;;  %v6705_v54 = vmul.u32 %v8416_v9, %v1063_v34  ;;  %8417 = vst [vmem:[#allocation23_spill] sm:$0xff] %v6712_v52  ;;  %v1594_v8 = vadd.s32 127, %v1593_v23  ;;  %v1573_v48 = vadd.s32 %v6449_v11, %v6447_v0 }
 0x145   : > { %vm6716_vm10 = vcmp.le.f32.partialorder %v8418_v19, 0.7853982  ;;  %v1065_v27 = vand.u32 65535, %v6647_v32  ;;  %v1087_v13 = vand.u32 65535, %v6643_v28  ;;  %v1644_v47 = vadd.s32 1, %v5048_v41 }
 0x146   : > { %v997_v45 = vmul.f32 %v996_v61, %v6617_v40  ;;  %v1589_v49 = vsub.s32 32, %v6653_v43  ;;  %v1603_v23 = vsub.s32 4, %v6526_v58  ;;  %v1030_v36 = vshrl.u32 %v8392_v63, %v6504_v22  ;;  %3149 = vmatpush.bf16.msra.mxu1 %v5644_v44  ;;  %v5643_v22 = vld [vmem:[%s8280_s3 + $0x18] sm:$0xff]  ;;  %5749 = vmatpush.bf16.msra.mxu2 %v5644_v44 }
 0x147   : > { %v1051_v4 = vsel %vm1049_vm1, %v6582_v39, 2102212464  ;;  %v1071_v0 = vshll.u32 %v6701_v5, 16  ;;  %v6739_v41 = vand.u32 3, %v6712_v52  ;;  %vm1481_vm11 = vcmp.lt.s32.totalorder %v6215_v62, 0 }
 0x148   : > { %v1595_v61 = vshll.u32 %v1594_v8, 23  ;;  %v678_v39 = vmul.f32 -0.001358992, %v6173_v21  ;;  %v1050_v9 = vsel %vm1046_vm5, %v1030_v36, %v6575_v24  ;;  %v1067_v19 = vmul.u32 %v1065_v27, %v1063_v34 }
 0x149   : > { %8421 = vst [vmem:[#allocation24_spill] sm:$0xff] %v6739_v41  ;;  %v6749_v30 = vmul.u32 %v1087_v13, %v1063_v34  ;;  %vm1645_vm12 = vcmp.gt.s32.totalorder %v1644_v47, 0  ;;  %v998_v1 = vadd.f32 -0.16666654, %v997_v45  ;;  %v1591_v33 = vshrl.u32 %v1573_v48, %v1589_v49  ;;  %v5641_v34 = vld [vmem:[%s8280_s3 + $0x8] sm:$0xff] }
 0x14a   : > { %v1604_v8 = vsel %vm1481_vm11, %v1603_v23, %v6526_v58  ;;  %v1052_v44 = vsel %vm1048_vm0, %v6577_v57, %v1051_v4  ;;  %v1064_v11 = vshrl.u32 %v6655_v59, 16  ;;  %vm6758_vm13 = vc.u32 %v1067_v19, %v1071_v0  ;;  %3150 = vmatpush.bf16.msra.mxu1 %v5643_v22  ;;  %v5642_v23 = vld [vmem:[%s8280_s3 + $0x10] sm:$0xff]  ;;  %5750 = vmatpush.bf16.msra.mxu2 %v5643_v22 }
 0x14b   : > { %v8424_v24 = vshll.u32 %v6705_v54, 16  ;;  %v8427_v48 = vand.u32 2147483647, %v6590_v25  ;;  %v1590_v45 = vshll.u32 %v6556_v18, %v6653_v43  ;;  %v1596_v57 = vor.u32 4788187, %v1595_v61 }
 0x14c   : > { %v1646_v49 = vsel %vm1645_vm12, %v1644_v47, 0  ;;  %v679_v36 = vadd.f32 0.041655596, %v678_v39  ;;  %v6778_v4 = vsel %vm6716_vm10, 0, %v1604_v8  ;;  %v6786_v18 = vmul.u32 %v1087_v13, %v1064_v11 }
 0x14d   : > { %vm6765_vm14 = vc.u32 %v6749_v30, %v8424_v24  ;;  %v1641_v58 = vand.u32 8388607, %v8427_v48  ;;  %8428 = vst [vmem:[#allocation25_spill] sm:$0xff] %v6778_v4  ;;  %v6782_v24 = vsel %vm1047_vm8, %v1050_v9, %v1052_v44  ;;  %v6784_v48 = vmul.u32 %v1065_v27, %v1064_v11  ;;  %v8429_v9 = vld [vmem:[#allocation14_spill] sm:$0xff]  ;;  %v8431_v44 = vld [vmem:[#allocation16_spill] sm:$0xff] }
 0x14e   : > { %v999_v43 = vmul.f32 %v998_v1, %v6617_v40  ;;  %v1592_v47 = vor.u32 %v1591_v33, %v1590_v45  ;;  %v1076_v61 = vsel %vm6758_vm13, 1, %v8389_v42  ;;  %v1098_v22 = vsel %vm6765_vm14, 1, %v8389_v42  ;;  %3151 = vmatpush.bf16.msra.mxu1 %v5642_v23  ;;  %5751 = vmatpush.bf16.msra.mxu2 %v5642_v23 }
 0x14f   : > { %v1642_v39 = vor.u32 8388608, %v1641_v58  ;;  %v1648_v8 = vand.u32 31, %v1646_v49  ;;  %v693_v35 = vadd.s32 3, %v6154_v3  ;;  %v8430_v27 = vshll.u32 %v8429_v9, 16 }
 0x150   : > { %v1597_v13 = vand.u32 2147483647, %v1596_v57  ;;  %v8432_v1 = vshrl.u32 %v6647_v32, 16  ;;  %v8433_v45 = vshrl.u32 %v6643_v28, 16  ;;  %v680_v58 = vmul.f32 %v679_v36, %v6173_v21 }
 0x151   : > { %vm769_vm15 = vc.u32 %v8431_v44, %v8430_v27  ;;  %v6808_v25 = vadd.s32 %v1071_v0, %v1067_v19  ;;  %v1599_v27 = vcvt.s32.f32 %v1592_v47  ;;  %v1649_v23 = vsub.s32 32, %v1648_v8  ;;  %v5640_v47 = vld [vmem:[%s8280_s3] sm:$0xff] }
 0x152   : > { %v1070_v33 = vmul.u32 %v8432_v1, %v1064_v11  ;;  %v1092_v41 = vmul.u32 %v8433_v45, %v1064_v11  ;;  %v770_v44 = vsel %vm769_vm15, 1, %v8389_v42  ;;  %v6818_v1 = vadd.f32 1.0, %v999_v43  ;;  %3152 = vmatpush.bf16.msra.mxu1 %v5641_v34  ;;  %5752 = vmatpush.bf16.msra.mxu2 %v5641_v34 }
 0x153   : > { %v6820_v36 = vshll.u32 %v1642_v39, 8  ;;  %v6822_v45 = vand.u32 3, %v693_v35  ;;  %v1600_v0 = vmul.f32 %v1599_v27, %v1597_v13  ;;  %v6824_v19 = vshrl.u32 %v1646_v49, 5 }
 0x154   : > { %v6813_v28 = vadd.s32 %v1076_v61, %v1070_v33  ;;  %v6815_v11 = vadd.s32 %v1098_v22, %v1092_v41  ;;  %v6829_v61 = vadd.f32 -0.4999988, %v680_v58  ;;  %v8434_v22 = vld [vmem:[#allocation9_spill] sm:$0xff]  ;;  %v764_v43 = vshrl.u32 %v8429_v9, 16  ;;  %v8435_v41 = vld [vmem:[#allocation15_spill] sm:$0xff] }
 0x155   : > { %v762_v33 = vshrl.u32 %v8434_v22, 16  ;;  %v772_v39 = vadd.s32 %v770_v44, %v6497_v26  ;;  %v785_v35 = vshll.u32 %v8435_v41, 16  ;;  %v8436_v49 = vshll.u32 %v6207_v16, 16 }
 0x156   : > { %v1651_v27 = vshll.u32 %v8392_v63, %v1648_v8  ;;  %v1654_v32 = vshll.u32 %v8393_v10, %v1648_v8  ;;  %v1657_v34 = vshll.u32 %v8394_v17, %v1648_v8  ;;  %v786_v58 = vshrl.u32 %v8435_v41, 16  ;;  %3153 = vmatpush.bf16.msra.mxu1 %v5640_v47  ;;  %5753 = vmatpush.bf16.msra.mxu2 %v5640_v47 }
 0x157   : > { %v789_v13 = vadd.s32 %v8436_v49, %v6209_v53  ;;  %v1652_v22 = vshrl.u32 %v8393_v10, %v1649_v23  ;;  %v1655_v9 = vshrl.u32 %v8394_v17, %v1649_v23  ;;  %v773_v57 = vadd.s32 %v772_v39, %v762_v33 }
 0x158   : > { %v1601_v26 = vxor.u32 2147483648, %v1600_v0  ;;  %v1660_v44 = vshll.u32 %v8395_v46, %v1648_v8  ;;  %v1661_v3 = vshrl.u32 %v8391_v60, %v1649_v23  ;;  %v1663_v49 = vshll.u32 %v8391_v60, %v1648_v8 }
 0x159   : > { %vm791_vm2 = vc.u32 %v789_v13, %v785_v35  ;;  %v1664_v4 = vshrl.u32 %v8396_v12, %v1649_v23  ;;  %vm1666_vm3 = vcmp.lt.s32.totalorder %v6824_v19, 1  ;;  %v1650_v17 = vshrl.u32 %v8392_v63, %v1649_v23 }
 0x15a   : > { %v792_v53 = vsel %vm791_vm2, 1, %v8389_v42  ;;  %v6852_v33 = vadd.s32 %v773_v57, %v764_v43  ;;  %v1405_v39 = vshll.u32 %v6685_v14, 16  ;;  %v8437_v41 = vshll.u32 %v6545_v2, 16 }
 0x15b   : > { %v794_v10 = vadd.s32 %v792_v53, %v6515_v29  ;;  %v1653_v52 = vor.u32 %v1652_v22, %v1651_v27  ;;  %v1656_v47 = vor.u32 %v1655_v9, %v1654_v32  ;;  %v1658_v60 = vshrl.u32 %v8395_v46, %v1649_v23 }
 0x15c   : > { %v1409_v38 = vadd.s32 %v8437_v41, %v6531_v50  ;;  %v8438_v12 = vshrl.u32 %v6207_v16, 16  ;;  %v1602_v29 = vsel %vm1481_vm11, %v1601_v26, %v1600_v0  ;;  %v1662_v53 = vor.u32 %v1661_v3, %v1660_v44 }
 0x15d   : > { %v6863_v63 = vadd.s32 %v789_v13, %v785_v35  ;;  %v1665_v57 = vor.u32 %v1664_v4, %v1663_v49  ;;  %v8439_v40 = vshll.u32 %v6662_v55, 16  ;;  %vm1669_vm5 = vcmp.lt.s32.totalorder %v6824_v19, 4 }
 0x15e   : > { %v795_v8 = vadd.s32 %v794_v10, %v8438_v12  ;;  %vm1411_vm4 = vc.u32 %v1409_v38, %v1405_v39  ;;  %v1659_v3 = vor.u32 %v1658_v60, %v1657_v34  ;;  %v1382_v4 = vshrl.u32 %v6566_v6, 16  ;;  %v8442_v34 = vld [vmem:[#allocation13_spill] sm:$0xff] }
 0x15f   : > { %vm1389_vm1 = vc.u32 %v6692_v15, %v8439_v40  ;;  %v1412_v50 = vsel %vm1411_vm4, 1, %v8389_v42  ;;  %vm799_vm0 = vc.u32 %v6852_v33, %v6863_v63  ;;  %v6879_v40 = vsel %vm6716_vm10, %v6215_v62, %v1602_v29 }
 0x160   : > { %v796_v43 = vadd.s32 %v795_v8, %v786_v58  ;;  %v1390_v16 = vsel %vm1389_vm1, 1, %v8389_v42  ;;  %v1414_v46 = vadd.s32 %v1412_v50, %v6697_v20  ;;  %vm1668_vm6 = vcmp.lt.s32.totalorder %v6824_v19, 3  ;;  %v8445_v50 = vld [vmem:[#allocation22_spill] sm:$0xff] }
 0x161   : > { %v1392_v23 = vadd.s32 %v1390_v16, %v6695_v31  ;;  %v1406_v15 = vshrl.u32 %v6685_v14, 16  ;;  %v8440_v0 = vshrl.u32 %v6545_v2, 16  ;;  %v1675_v20 = vsel %vm1669_vm5, %v1662_v53, 920167782 }
 0x162   : > { %v800_v32 = vadd.s32 1, %v796_v43  ;;  %v1384_v6 = vshrl.u32 %v6662_v55, 16  ;;  %vm1667_vm7 = vcmp.lt.s32.totalorder %v6824_v19, 2  ;;  %v1679_v31 = vsel %vm1669_vm5, %v1665_v57, 1326507024 }
 0x163   : > { %v1415_v35 = vadd.s32 %v1414_v46, %v8440_v0  ;;  %v1393_v27 = vadd.s32 %v1392_v23, %v1382_v4  ;;  %v8443_v58 = vmul.u32 %v8441_v7, %v8442_v34  ;;  %v1671_v2 = vsel %vm1669_vm5, %v1659_v3, 2102212464 }
 0x164   : > { %v801_v13 = vsel %vm799_vm0, %v800_v32, %v796_v43  ;;  %v1674_v9 = vsel %vm1666_vm3, %v1653_v52, %v1656_v47  ;;  %v6900_v55 = vadd.s32 %v1409_v38, %v1405_v39  ;;  %v6904_v44 = vmul.f32 %v6879_v40, %v6879_v40 }
 0x165   : > { %v802_v22 = vadd.s32 %v801_v13, %v8443_v58  ;;  %v1416_v14 = vadd.s32 %v1415_v35, %v1406_v15  ;;  %v6898_v26 = vadd.s32 %v1393_v27, %v1384_v6  ;;  %v1676_v49 = vsel %vm1668_vm6, %v1659_v3, %v1675_v20 }
 0x166   : > { %v1678_v60 = vsel %vm1666_vm3, %v1656_v47, %v1659_v3  ;;  %v1680_v12 = vsel %vm1668_vm6, %v1662_v53, %v1679_v31  ;;  %v682_v8 = vmul.f32 %v6829_v61, %v6173_v21  ;;  %v6918_v38 = vmul.f32 %v6818_v1, %v6596_v37  ;;  %v8444_v61 = vld [vmem:[#allocation19_spill] sm:$0xff] }
 0x167   : > { %v803_v10 = vadd.s32 536870912, %v802_v22  ;;  %v1420_v41 = vadd.s32 1, %v1416_v14  ;;  %vm1419_vm8 = vc.u32 %v6898_v26, %v6900_v55  ;;  %v697_v39 = vxor.u32 2147483648, %v6658_v51 }
 0x168   : > { %v1670_v43 = vsel %vm1666_vm3, %v1650_v17, %v1653_v52  ;;  %v1672_v53 = vsel %vm1668_vm6, %v1656_v47, %v1671_v2  ;;  %v1677_v21 = vsel %vm1667_vm7, %v1674_v9, %v1676_v49  ;;  %v8446_v16 = vmul.u32 %v8444_v61, %v8445_v50 }
 0x169   : > { %v6921_v29 = vshrl.u32 %v803_v10, 30  ;;  %v1421_v57 = vsel %vm1419_vm8, %v1420_v41, %v1416_v14  ;;  %v1615_v37 = vmul.f32 -0.00019511016, %v6904_v44  ;;  %v1681_v1 = vsel %vm1667_vm7, %v1678_v60, %v1680_v12  ;;  %v8449_v60 = vld [vmem:[#allocation5_spill] sm:$0xff] }
 0x16a   : > { %v1422_v46 = vadd.s32 %v1421_v57, %v8446_v16  ;;  %v1683_v3 = vand.u32 65535, %v6820_v36  ;;  %v1684_v52 = vshrl.u32 %v6820_v36, 16  ;;  %v6938_v17 = vadd.f32 1.0, %v682_v8 }
 0x16b   : > { %v805_v32 = vshll.u32 %v6921_v29, 30  ;;  %vm696_vm9 = vcmp.eq.s32.totalorder %v6822_v45, 0  ;;  %v6943_v4 = vsel %vm1667_vm7, %v1670_v43, %v1672_v53  ;;  %v1707_v23 = vand.u32 65535, %v1677_v21 }
 0x16c   : > { %v1423_v47 = vadd.s32 536870912, %v1422_v46  ;;  %v1708_v15 = vshrl.u32 %v1677_v21, 16  ;;  %v1686_v35 = vshrl.u32 %v1681_v1, 16  ;;  %vm699_vm10 = vcmp.eq.s32.totalorder %v6822_v45, 2 }
 0x16d   : > { %v806_v0 = vsub.s32 %v802_v22, %v805_v32  ;;  %v8447_v13 = vshll.u32 %v6705_v54, 16  ;;  %v1616_v27 = vadd.f32 0.008332121, %v1615_v37  ;;  %v1685_v31 = vand.u32 65535, %v1681_v1 }
 0x16e   : > { %v6946_v20 = vshrl.u32 %v1423_v47, 30  ;;  %v1727_v19 = vmul.u32 %v6820_v36, %v6943_v4  ;;  %vm695_vm12 = vcmp.lt.s32.totalorder %v6822_v45, 2  ;;  %v698_v34 = vsel %vm696_vm9, %v6938_v17, %v697_v39 }
 0x16f   : > { %v6951_v6 = vadd.s32 %v8447_v13, %v6749_v30  ;;  %vm807_vm11 = vcmp.lt.s32.totalorder %v806_v0, 0  ;;  %v808_v7 = vsub.s32 0, %v806_v0  ;;  %v700_v58 = vxor.u32 2147483648, %v6938_v17 }
 0x170   : > { %v1095_v30 = vshll.u32 %v6786_v18, 16  ;;  %v6963_v22 = vmul.u32 %v1707_v23, %v1683_v3  ;;  %v6965_v14 = vmul.u32 %v1708_v15, %v1683_v3  ;;  %v8448_v9 = vshll.u32 %v6784_v48, 16 }
 0x171   : > { %v809_v2 = vsel %vm807_vm11, %v808_v7, %v806_v0  ;;  %v6970_v49 = vmul.u32 %v1686_v35, %v1683_v3  ;;  %v1425_v41 = vshll.u32 %v6946_v20, 30  ;;  %vm706_vm15 = vcmp.lt.s32.totalorder %v8449_v60, 0 }
 0x172   : > { %vm1079_vm13 = vc.u32 %v6808_v25, %v8448_v9  ;;  %v810_v10 = vclz %v809_v2  ;;  %vm1101_vm14 = vc.u32 %v6951_v6, %v1095_v30  ;;  %v1617_v12 = vmul.f32 %v1616_v27, %v6904_v44  ;;  %v8450_v25 = vld [vmem:[#allocation3_spill] sm:$0xff] }
 0x173   : > { %v1687_v8 = vmul.u32 %v1685_v31, %v1683_v3  ;;  %v6978_v57 = vmul.u32 %v1707_v23, %v1684_v52  ;;  %v6980_v43 = vmul.u32 %v1708_v15, %v1684_v52  ;;  %v6982_v53 = vmul.u32 %v1685_v31, %v1684_v52 }
 0x174   : > { %vm692_vm2 = vweird.f32 %v8450_v25  ;;  %v5031_v21 = vadd.s32 4294967294, %v810_v10  ;;  %v6985_v61 = vsub.s32 %v1422_v46, %v1425_v41  ;;  %v1080_v50 = vsel %vm1079_vm13, 1, %v8389_v42 }
 0x175   : > { %v6988_v16 = vmul.u32 %v1686_v35, %v1684_v52  ;;  %v1713_v37 = vshll.u32 %v6965_v14, 16  ;;  %v701_v1 = vsel %vm699_vm10, %v700_v58, %v6658_v51  ;;  %v1102_v3 = vsel %vm1101_vm14, 1, %v8389_v42 }
 0x176   : > { %v1691_v32 = vshll.u32 %v6970_v49, 16  ;;  %v8451_v47 = vand.u32 2147483647, %v8449_v60  ;;  %vm5032_vm4 = vcmp.lt.s32.totalorder %v5031_v21, 0  ;;  %vm1427_vm1 = vcmp.lt.s32.totalorder %v6985_v61, 0 }
 0x177   : > { %v1428_v52 = vsub.s32 0, %v6985_v61  ;;  %v798_v23 = vadd.s32 %v6863_v63, %v6852_v33  ;;  %v813_v15 = vsel %vm5032_vm4, 0, %v5031_v21  ;;  %v828_v35 = vsub.s32 4, %v6921_v29 }
 0x178   : > { %vm7000_vm3 = vcmp.le.f32.partialorder %v8451_v47, 0.7853982  ;;  %v1082_v13 = vadd.s32 %v1080_v50, %v6813_v28  ;;  %v814_v27 = vsub.s32 32, %v813_v15  ;;  %v818_v31 = vsub.s32 4294967266, %v813_v15 }
 0x179   : > { %v1429_v7 = vsel %vm1427_vm1, %v1428_v52, %v6985_v61  ;;  %v1104_v2 = vadd.s32 %v1102_v3, %v6815_v11  ;;  %v7012_v9 = vadd.f32 -0.16666654, %v1617_v12  ;;  %v702_v10 = vsel %vm695_vm12, %v698_v34, %v701_v1 }
 0x17a   : > { %v1430_v41 = vclz %v1429_v7  ;;  %v1072_v47 = vshrl.u32 %v6701_v5, 16  ;;  %vm1717_vm5 = vc.u32 %v6963_v22, %v1713_v37  ;;  %v815_v33 = vshll.u32 %v806_v0, %v813_v15  ;;  %v8455_v15 = vld [vmem:[#allocation6_spill] sm:$0xff] }
 0x17b   : > { %v816_v28 = vshrl.u32 %v798_v23, %v814_v27  ;;  %v819_v63 = vadd.s32 127, %v818_v31  ;;  %v1693_v21 = vshll.u32 %v6982_v53, 16  ;;  %vm1695_vm0 = vc.u32 %v1687_v8, %v1691_v32 }
 0x17c   : > { %v5043_v50 = vadd.s32 4294967294, %v1430_v41  ;;  %v1083_v11 = vadd.s32 %v1082_v13, %v1072_v47  ;;  %v829_v45 = vsel %vm706_vm15, %v828_v35, %v6921_v29  ;;  %v8454_v5 = vshrl.u32 %v6705_v54, 16  ;;  %v8456_v35 = vld [vmem:[#allocation11_spill] sm:$0xff]  ;;  %v8457_v41 = vld [vmem:[#allocation10_spill] sm:$0xff] }
 0x17d   : > { %v817_v12 = vor.u32 %v816_v28, %v815_v33  ;;  %v820_v3 = vshll.u32 %v819_v63, 23  ;;  %v7026_v1 = vadd.s32 %v1691_v32, %v1687_v8  ;;  %v7029_v0 = vsel %vm1717_vm5, 1, %v8389_v42 }
 0x17e   : > { %v1105_v34 = vadd.s32 %v1104_v2, %v8454_v5  ;;  %v7033_v52 = vsel %vm692_vm2, nan, %v702_v10  ;;  %v1074_v23 = vshrl.u32 %v6784_v48, 16  ;;  %vm1326_vm6 = vcmp.lt.s32.totalorder %v8455_v15, 0  ;;  %v8458_v5 = vld [vmem:[#allocation18_spill] sm:$0xff] }
 0x17f   : > { %v7038_v13 = vsel %vm1695_vm0, 1, %v8389_v42  ;;  %v821_v29 = vor.u32 4788187, %v820_v3  ;;  %v1313_v54 = vadd.s32 3, %v8456_v35  ;;  %v1096_v8 = vshrl.u32 %v6786_v18, 16 }
 0x180   : > { %v831_v32 = vsel %vm7000_vm3, 0, %v829_v45  ;;  %v1418_v27 = vadd.s32 %v6900_v55, %v6898_v26  ;;  %vm5044_vm7 = vcmp.lt.s32.totalorder %v5043_v50, 0  ;;  %v7046_v31 = vadd.s32 %v1083_v11, %v1074_v23  ;;  %v3021_v55 = vld [vmem:[%s8279_s2] sm:$0x1] }
 0x181   : > { %v822_v48 = vand.u32 2147483647, %v821_v29  ;;  %v824_v7 = vcvt.s32.f32 %v817_v12  ;;  %v1433_v2 = vsel %vm5044_vm7, 0, %v5043_v50  ;;  %v1106_v10 = vadd.s32 %v1105_v34, %v1096_v8 }
 0x182   : > { %vm1935_vm8 = vcmp.eq.s32.totalorder %v8457_v41, 0  ;;  %v1434_v47 = vsub.s32 32, %v1433_v2  ;;  %v1438_v33 = vsub.s32 4294967266, %v1433_v2  ;;  %v7052_v28 = vadd.s32 %v6951_v6, %v1095_v30 }
 0x183   : > { %v825_v63 = vmul.f32 %v824_v7, %v822_v48  ;;  %v848_v3 = vadd.s32 3, %v831_v32  ;;  %vm1938_vm9 = vcmp.eq.s32.totalorder %v8457_v41, 2  ;;  %v1448_v26 = vsub.s32 4, %v6946_v20 }
 0x184   : > { %vm1934_vm10 = vcmp.lt.s32.totalorder %v8457_v41, 2  ;;  %v1435_v50 = vshll.u32 %v6985_v61, %v1433_v2  ;;  %v1436_v11 = vshrl.u32 %v1418_v27, %v1434_v47  ;;  %v1439_v12 = vadd.s32 127, %v1438_v33 }
 0x185   : > { %vm1109_vm11 = vc.u32 %v7046_v31, %v7052_v28  ;;  %v826_v18 = vxor.u32 2147483648, %v825_v63  ;;  %v7063_v6 = vand.u32 3, %v831_v32  ;;  %v7065_v30 = vand.u32 3, %v1313_v54 }
 0x186   : > { %v1110_v45 = vadd.s32 1, %v1106_v10  ;;  %v1298_v34 = vmul.f32 -0.001358992, %v8458_v5  ;;  %v8459_v23 = vand.u32 2147483647, %v8455_v15  ;;  %v1437_v61 = vor.u32 %v1436_v11, %v1435_v50 }
 0x187   : > { %v1440_v35 = vshll.u32 %v1439_v12, 23  ;;  %v827_v8 = vsel %vm706_vm15, %v826_v18, %v825_v63  ;;  %v7076_v27 = vand.u32 3, %v848_v3  ;;  %vm3023_vm13 = vcmp.eq.f32.partialorder %v3021_v55, 2.0  ;;  %v8463_v12 = vld [vmem:[#allocation12_spill] sm:$0xff] }
 0x188   : > { %vm7070_vm12 = vcmp.le.f32.partialorder %v8459_v23, 0.7853982  ;;  %v1111_v32 = vsel %vm1109_vm11, %v1110_v45, %v1106_v10  ;;  %v7081_v54 = vsel %vm7000_vm3, %v8449_v60, %v827_v8  ;;  %v1299_v48 = vadd.f32 0.041655596, %v1298_v34 }
 0x189   : > { %v1441_v7 = vor.u32 4788187, %v1440_v35  ;;  %v1449_v2 = vsel %vm1326_vm6, %v1448_v26, %v6946_v20  ;;  %v832_v47 = vmul.f32 %v7081_v54, %v7081_v54  ;;  %v1937_v10 = vsel %vm1935_vm8, %v6938_v17, %v697_v39 }
 0x18a   : > { %vm3022_vm14 = vcmp.eq.f32.partialorder %v3021_v55, 1.0  ;;  %v8462_v46 = vmul.u32 %v6655_v59, %v6782_v24  ;;  %v3024_v63 = vsel %vm3023_vm13, 1, %v8389_v42  ;;  %v1300_v3 = vmul.f32 %v1299_v48, %v8458_v5 }
 0x18b   : > { %v1442_v20 = vand.u32 2147483647, %v1441_v7  ;;  %v1444_v26 = vcvt.s32.f32 %v1437_v61  ;;  %v833_v50 = vmul.f32 -0.001358992, %v832_v47  ;;  %v840_v11 = vmul.f32 -0.00019511016, %v832_v47 }
 0x18c   : > { %v7096_v33 = vadd.s32 %v1111_v32, %v8462_v46  ;;  %vm2551_vm15 = vcmp.eq.s32.totalorder %v8463_v12, 0  ;;  %v1940_v59 = vsel %vm1938_vm9, %v700_v58, %v6658_v51  ;;  %v3035_v24 = vsel %vm3022_vm14, 1, %v8389_v42  ;;  %v8464_v46 = vld [vmem:[#allocation4_spill] sm:$0xff] }
 0x18d   : > { %v1301_v39 = vadd.f32 -0.4999988, %v1300_v3  ;;  %vm1316_vm3 = vcmp.eq.s32.totalorder %v7065_v30, 0  ;;  %v1445_v55 = vmul.f32 %v1444_v26, %v1442_v20  ;;  %v834_v45 = vadd.f32 0.041655596, %v833_v50  ;;  %v5650_v3 = vld [vmem:[%s8280_s3 + $0x50] sm:$0xff] }
 0x18e   : > { %v1113_v18 = vadd.s32 536870912, %v7096_v33  ;;  %v841_v34 = vadd.f32 0.008332121, %v840_v11  ;;  %v1941_v23 = vsel %vm1934_vm10, %v1937_v10, %v1940_v59  ;;  %v3025_v61 = vperm.slane %v3024_v63, 0 }
 0x18f   : > { %vm2550_vm4 = vcmp.lt.s32.totalorder %v8463_v12, 2  ;;  %v1302_v35 = vmul.f32 %v1301_v39, %v8458_v5  ;;  %v1446_v17 = vxor.u32 2147483648, %v1445_v55  ;;  %v1451_v51 = vsel %vm7070_vm12, 0, %v1449_v2 }
 0x190   : > { %v7115_v58 = vshrl.u32 %v1113_v18, 30  ;;  %v835_v8 = vmul.f32 %v834_v45, %v832_v47  ;;  %v842_v32 = vmul.f32 %v841_v34, %v832_v47  ;;  %v3036_v48 = vperm.slane %v3035_v24, 0  ;;  %v8469_v34 = vld [vmem:[#allocation21_spill] sm:$0xff] }
 0x191   : > { %v1317_v7 = vxor.u32 2147483648, %v6708_v56  ;;  %vm1319_vm1 = vcmp.eq.s32.totalorder %v7065_v30, 2  ;;  %v7121_v41 = vsel %vm692_vm2, nan, %v1941_v23  ;;  %v1303_v10 = vadd.f32 1.0, %v1302_v35 }
 0x192   : > { %vm1312_vm5 = vweird.f32 %v8464_v46  ;;  %vm1315_vm0 = vcmp.lt.s32.totalorder %v7065_v30, 2  ;;  %v1447_v5 = vsel %vm1326_vm6, %v1446_v17, %v1445_v55  ;;  %vm2554_vm7 = vcmp.eq.s32.totalorder %v8463_v12, 2 }
 0x193   : > { %v836_v2 = vadd.f32 -0.4999988, %v835_v8  ;;  %v843_v63 = vadd.f32 -0.16666654, %v842_v32  ;;  %vm7128_vm8 = vcmp.eq.s32.totalorder %v3025_v61, 1  ;;  %v7135_v20 = vsel %vm7070_vm12, %v8455_v15, %v1447_v5 }
 0x194   : > { %vm851_vm2 = vcmp.eq.s32.totalorder %v7076_v27, 0  ;;  %vm854_vm9 = vcmp.eq.s32.totalorder %v7076_v27, 2  ;;  %vm2089_vm10 = vcmp.eq.s32.totalorder %v7063_v6, 0  ;;  %vm2092_vm6 = vcmp.eq.s32.totalorder %v7063_v6, 2 }
 0x195   : > { %v1320_v26 = vxor.u32 2147483648, %v1303_v10  ;;  %v1452_v50 = vmul.f32 %v7135_v20, %v7135_v20  ;;  %v1468_v11 = vadd.s32 3, %v1451_v51  ;;  %v1115_v18 = vshll.u32 %v7115_v58, 30 }
 0x196   : > { %v837_v59 = vmul.f32 %v836_v2, %v832_v47  ;;  %v844_v24 = vmul.f32 %v843_v63, %v832_v47  ;;  %vm850_vm11 = vcmp.lt.s32.totalorder %v7076_v27, 2  ;;  %vm2088_vm12 = vcmp.lt.s32.totalorder %v7063_v6, 2 }
 0x197   : > { %vm7146_vm13 = vcmp.eq.s32.totalorder %v3036_v48, 1  ;;  %v8467_v29 = vmov 0  ;;  %v2553_v39 = vsel %vm2551_vm15, %v1303_v10, %v1317_v7  ;;  %vm847_vm14 = vweird.f32 %v8449_v60 }
 0x198   : > { %v8468_v29 = vsel %vm7146_vm13, 4294967295, %v8467_v29  ;;  %v3027_v55 = vsel %vm7128_vm8, %v7121_v41, %v8450_v25  ;;  %v1453_v45 = vmul.f32 -0.001358992, %v1452_v50  ;;  %v1460_v47 = vmul.f32 -0.00019511016, %v1452_v50 }
 0x199   : > { %v988_v23 = vmul.f32 -0.001358992, %v8469_v34  ;;  %v838_v61 = vadd.f32 1.0, %v837_v59  ;;  %v845_v35 = vadd.f32 1.0, %v844_v24  ;;  %v1318_v17 = vsel %vm1316_vm3, %v1303_v10, %v1317_v7 }
 0x19a   : > { %v2556_v8 = vsel %vm2554_vm7, %v1320_v26, %v6708_v56  ;;  %v1454_v32 = vadd.f32 0.041655596, %v1453_v45  ;;  %v1461_v48 = vadd.f32 0.008332121, %v1460_v47  ;;  %v7166_v25 = vsub.s32 %v7096_v33, %v1115_v18 }
 0x19b   : > { %v2557_v5 = vsel %vm2550_vm4, %v2553_v39, %v2556_v8  ;;  %v846_v2 = vmul.f32 %v845_v35, %v7081_v54  ;;  %v855_v63 = vxor.u32 2147483648, %v838_v61  ;;  %v1469_v59 = vand.u32 3, %v1468_v11 }
 0x19c   : > { %v2703_v24 = vand.u32 3, %v1451_v51  ;;  %v3038_v7 = vsel %vm7146_vm13, %v7033_v52, %v3027_v55  ;;  %v1321_v10 = vsel %vm1319_vm1, %v1320_v26, %v6708_v56  ;;  %v1455_v45 = vmul.f32 %v1454_v32, %v1452_v50 }
 0x19d   : > { %v1462_v47 = vmul.f32 %v1461_v48, %v1452_v50  ;;  %v852_v12 = vxor.u32 2147483648, %v846_v2  ;;  %v1322_v33 = vsel %vm1315_vm0, %v1318_v17, %v1321_v10  ;;  %v7179_v54 = vsel %vm1312_vm5, nan, %v2557_v5 }
 0x19e   : > { %v989_v11 = vadd.f32 0.041655596, %v988_v23  ;;  %v1456_v51 = vadd.f32 -0.4999988, %v1455_v45  ;;  %vm1117_vm15 = vcmp.lt.s32.totalorder %v7166_v25, 0  ;;  %v1118_v39 = vsub.s32 0, %v7166_v25 }
 0x19f   : > { %v1463_v18 = vadd.f32 -0.16666654, %v1462_v47  ;;  %v853_v56 = vsel %vm851_vm2, %v838_v61, %v852_v12  ;;  %v856_v26 = vsel %vm854_vm9, %v855_v63, %v846_v2  ;;  %v2091_v30 = vsel %vm2089_vm10, %v838_v61, %v852_v12 }
 0x1a0   : > { %v2094_v55 = vsel %vm2092_vm6, %v855_v63, %v846_v2  ;;  %v857_v23 = vsel %vm850_vm11, %v853_v56, %v856_v26  ;;  %v1457_v17 = vmul.f32 %v1456_v51, %v1452_v50  ;;  %vm2704_vm3 = vcmp.lt.s32.totalorder %v2703_v24, 2 }
 0x1a1   : > { %v2095_v35 = vsel %vm2088_vm12, %v2091_v30, %v2094_v55  ;;  %v1464_v8 = vmul.f32 %v1463_v18, %v1452_v50  ;;  %v7197_v32 = vsel %vm847_vm14, nan, %v857_v23  ;;  %v3046_v61 = vpack.c.bf16 %v3038_v7, %v3038_v7 }
 0x1a2   : > { %v7201_v48 = vsel %vm847_vm14, nan, %v2095_v35  ;;  %v1119_v5 = vsel %vm1117_vm15, %v1118_v39, %v7166_v25  ;;  %v1458_v27 = vadd.f32 1.0, %v1457_v17  ;;  %v7213_v10 = vsel %vm1312_vm5, nan, %v1322_v33 }
 0x1a3   : > { %v3028_v6 = vsel %vm7128_vm8, %v7201_v48, %v8449_v60  ;;  %v1465_v2 = vadd.f32 1.0, %v1464_v8  ;;  %v1120_v50 = vclz %v1119_v5  ;;  %v3031_v7 = vsel %vm7128_vm8, %v7179_v54, %v8464_v46 }
 0x1a4   : > { %v3039_v63 = vsel %vm7146_vm13, %v7197_v32, %v3028_v6  ;;  %v990_v45 = vmul.f32 %v989_v11, %v8469_v34  ;;  %v1475_v12 = vxor.u32 2147483648, %v1458_v27  ;;  %vm1470_vm4 = vcmp.lt.s32.totalorder %v1469_v59, 2 }
 0x1a5   : > { %v3047_v47 = vpack.c.bf16 %v3039_v63, %v3039_v63  ;;  %v1466_v60 = vmul.f32 %v1465_v2, %v7135_v20  ;;  %v5037_v51 = vadd.s32 4294967294, %v1120_v50  ;;  %vm1471_vm1 = vcmp.eq.s32.totalorder %v1469_v59, 0 }
 0x1a6   : > { %vm2705_vm0 = vcmp.eq.s32.totalorder %v2703_v24, 0  ;;  %vm2708_vm7 = vcmp.eq.s32.totalorder %v2703_v24, 2  ;;  %v3082_v18 = vunpack.c.l.b16 %v3046_v61  ;;  %vm1474_vm5 = vcmp.eq.s32.totalorder %v1469_v59, 2 }
 0x1a7   : > { %v3083_v39 = vunpack.c.l.b16 %v3047_v47  ;;  %v1472_v33 = vxor.u32 2147483648, %v1466_v60  ;;  %v1476_v56 = vsel %vm1474_vm5, %v1475_v12, %v1466_v60  ;;  %v3042_v46 = vsel %vm7146_vm13, %v7213_v10, %v3031_v7  ;;  %v8470_v7 = vld [vmem:[#allocation23_spill] sm:$0xff] }
 0x1a8   : > { %v991_v26 = vadd.f32 -0.4999988, %v990_v45  ;;  %vm5038_vm2 = vcmp.lt.s32.totalorder %v5037_v51, 0  ;;  %v2710_v55 = vsel %vm2708_vm7, %v1475_v12, %v1466_v60  ;;  %vm1467_vm9 = vweird.f32 %v8455_v15 }
 0x1a9   : > { %v7224_v11 = vpack.c.b16 %v3083_v39, %v3082_v18  ;;  %v1473_v20 = vsel %vm1471_vm1, %v1458_v27, %v1472_v33  ;;  %v2707_v30 = vsel %vm2705_vm0, %v1458_v27, %v1472_v33  ;;  %v1123_v17 = vsel %vm5038_vm2, 0, %v5037_v51 }
 0x1aa   : > { %v1477_v23 = vsel %vm1470_vm4, %v1473_v20, %v1476_v56  ;;  %v2711_v35 = vsel %vm2704_vm3, %v2707_v30, %v2710_v55  ;;  %v1108_v5 = vadd.s32 %v7052_v28, %v7046_v31  ;;  %v1124_v6 = vsub.s32 32, %v1123_v17 }
 0x1ab   : > { %3154 = vmatmul.bf16.vlgmr.msra.gmra.mxu1 %v7224_v11  ;;  %v7230_v8 = vsel %vm1467_vm9, nan, %v1477_v23  ;;  %v7232_v61 = vsel %vm1467_vm9, nan, %v2711_v35  ;;  %v1698_v27 = vadd.s32 %v7038_v13, %v6988_v16  ;;  %v3050_v24 = vpack.c.bf16 %v3042_v46, %v3042_v46  ;;  %v8471_v13 = vld [vmem:[#allocation17_spill] sm:$0xff]  ;;  %v8475_v23 = vld [vmem:[#allocation7_spill] sm:$0xff] }
 0x1ac   : > { %v3032_v59 = vsel %vm7128_vm8, %v7232_v61, %v8455_v15  ;;  %v1128_v2 = vsub.s32 4294967266, %v1123_v17  ;;  %v992_v63 = vmul.f32 %v991_v26, %v8469_v34  ;;  %v1003_v45 = vadd.s32 3, %v8470_v7 }
 0x1ad   : > { %v3043_v50 = vsel %vm7146_vm13, %v7230_v8, %v3032_v59  ;;  %v1126_v31 = vshrl.u32 %v1108_v5, %v1124_v6  ;;  %v1125_v47 = vshll.u32 %v7166_v25, %v1123_v17  ;;  %vm1699_vm10 = vc.u32 %v7026_v1, %v1693_v21 }
 0x1ae   : > { %v3051_v28 = vpack.c.bf16 %v3043_v50, %v3043_v50  ;;  %v1129_v16 = vadd.s32 127, %v1128_v2  ;;  %v1619_v15 = vmul.f32 %v7012_v9, %v6904_v44  ;;  %vm1016_vm6 = vcmp.lt.s32.totalorder %v8471_v13, 0 }
 0x1af   : > { %v1714_v60 = vshrl.u32 %v6965_v14, 16  ;;  %v1720_v34 = vadd.s32 %v7029_v0, %v6980_v43  ;;  %v1692_v12 = vshrl.u32 %v6970_v49, 16  ;;  %v3086_v51 = vunpack.c.l.b16 %v3050_v24  ;;  %v8476_v24 = vld [vmem:[#allocation24_spill] sm:$0xff] }
 0x1b0   : > { %v3087_v18 = vunpack.c.l.b16 %v3051_v28  ;;  %v1127_v25 = vor.u32 %v1126_v31, %v1125_v47  ;;  %v1130_v39 = vshll.u32 %v1129_v16, 23  ;;  %v993_v33 = vadd.f32 1.0, %v992_v63 }
 0x1b1   : > { %v1004_v56 = vand.u32 3, %v1003_v45  ;;  %v1608_v21 = vmul.f32 -0.001358992, %v6904_v44  ;;  %v1700_v1 = vsel %vm1699_vm10, 1, %v8389_v42  ;;  %v8472_v46 = vand.u32 2147483647, %v8471_v13 }
 0x1b2   : > { %v7260_v9 = vpack.c.b16 %v3087_v18, %v3086_v51  ;;  %v1131_v43 = vor.u32 4788187, %v1130_v39  ;;  %v1702_v49 = vadd.s32 %v1700_v1, %v1698_v27  ;;  %v1007_v0 = vxor.u32 2147483648, %v6918_v38 }
 0x1b3   : > { %vm7264_vm11 = vcmp.le.f32.partialorder %v8472_v46, 0.7853982  ;;  %v1694_v20 = vshrl.u32 %v6982_v53, 16  ;;  %v1715_v30 = vshll.u32 %v6978_v57, 16  ;;  %v1719_v55 = vadd.s32 %v1713_v37, %v6963_v22 }
 0x1b4   : > { %3164 = vmatmul.bf16.vlgmr.msra.gmra.mxu2 %v7260_v9  ;;  %vm1002_vm12 = vweird.f32 %v8475_v23  ;;  %v1132_v35 = vand.u32 2147483647, %v1131_v43  ;;  %v1134_v17 = vcvt.s32.f32 %v1127_v25  ;;  %v1138_v5 = vsub.s32 4, %v7115_v58 }
 0x1b5   : > { %v1703_v6 = vadd.s32 %v1702_v49, %v1692_v12  ;;  %vm1006_vm14 = vcmp.eq.s32.totalorder %v1004_v56, 0  ;;  %v1010_v27 = vxor.u32 2147483648, %v993_v33  ;;  %v1609_v59 = vadd.f32 0.041655596, %v1608_v21 }
 0x1b6   : > { %vm1721_vm15 = vc.u32 %v1719_v55, %v1715_v30  ;;  %v1135_v53 = vmul.f32 %v1134_v17, %v1132_v35  ;;  %vm2242_vm3 = vcmp.lt.s32.totalorder %v8476_v24, 2  ;;  %vm2243_vm4 = vcmp.eq.s32.totalorder %v8476_v24, 0 }
 0x1b7   : > { %v1722_v22 = vsel %vm1721_vm15, 1, %v8389_v42  ;;  %v2245_v14 = vsel %vm2243_vm4, %v993_v33, %v1007_v0  ;;  %vm2246_vm1 = vcmp.eq.s32.totalorder %v8476_v24, 2  ;;  %v1716_v37 = vshrl.u32 %v6978_v57, 16 }
 0x1b8   : > { %v1724_v2 = vadd.s32 %v1722_v22, %v1720_v34  ;;  %v1136_v50 = vxor.u32 2147483648, %v1135_v53  ;;  %v1139_v63 = vsel %vm1016_vm6, %v1138_v5, %v7115_v58  ;;  %v7285_v7 = vadd.s32 %v1703_v6, %v1694_v20 }
 0x1b9   : > { %v7287_v45 = vadd.s32 %v1719_v55, %v1715_v30  ;;  %v1008_v31 = vsel %vm1006_vm14, %v993_v33, %v1007_v0  ;;  %v2248_v28 = vsel %vm2246_vm1, %v1010_v27, %v6918_v38  ;;  %v1610_v42 = vmul.f32 %v1609_v59, %v6904_v44  ;;  %v8477_v33 = vld [vmem:[#allocation25_spill] sm:$0xff] }
 0x1ba   : > { %v1725_v47 = vadd.s32 %v1724_v2, %v1714_v60  ;;  %vm1005_vm0 = vcmp.lt.s32.totalorder %v1004_v56, 2  ;;  %vm1009_vm7 = vcmp.eq.s32.totalorder %v1004_v56, 2  ;;  %v1137_v57 = vsel %vm1016_vm6, %v1136_v50, %v1135_v53 }
 0x1bb   : > { %v2249_v16 = vsel %vm2242_vm3, %v2245_v14, %v2248_v28  ;;  %v1011_v58 = vsel %vm1009_vm7, %v1010_v27, %v6918_v38  ;;  %v1140_v34 = vsel %vm7264_vm11, %v8471_v13, %v1137_v57  ;;  %v1141_v12 = vsel %vm7264_vm11, 0, %v1139_v63 }
 0x1bc   : > { %v1726_v51 = vadd.s32 %v1725_v47, %v1716_v37  ;;  %v1012_v18 = vsel %vm1005_vm0, %v1008_v31, %v1011_v58  ;;  %v1142_v60 = vmul.f32 %v1140_v34, %v1140_v34  ;;  %vm1729_vm5 = vc.u32 %v7285_v7, %v7287_v45 }
 0x1bd   : > { %v4558_v25 = vsub.f32 0.0, %v7033_v52  ;;  %v7307_v39 = vsel %vm1002_vm12, nan, %v2249_v16  ;;  %v1611_v38 = vadd.f32 -0.4999988, %v1610_v42  ;;  %v1623_v56 = vadd.s32 3, %v8477_v33 }
 0x1be   : > { %v1730_v21 = vadd.s32 1, %v1726_v51  ;;  %v1620_v1 = vadd.f32 1.0, %v1619_v15  ;;  %v1143_v46 = vmul.f32 -0.001358992, %v1142_v60  ;;  %v1150_v26 = vmul.f32 -0.00019511016, %v1142_v60 }
 0x1bf   : > { %v7312_v43 = vsel %vm7128_vm8, %v4558_v25, 1.0  ;;  %v7316_v49 = vsel %vm1002_vm12, nan, %v1012_v18  ;;  %v1158_v52 = vadd.s32 3, %v1141_v12  ;;  %v3029_v15 = vsel %vm7128_vm8, %v7307_v39, %v8475_v23 }
 0x1c0   : > { %v1731_v0 = vsel %vm1729_vm5, %v1730_v21, %v1726_v51  ;;  %v1144_v30 = vadd.f32 0.041655596, %v1143_v46  ;;  %v1151_v55 = vadd.f32 0.008332121, %v1150_v26  ;;  %v2395_v17 = vand.u32 3, %v1141_v12 }
 0x1c1   : > { %v1732_v35 = vadd.s32 %v1731_v0, %v1727_v19  ;;  %v1612_v5 = vmul.f32 %v1611_v38, %v6904_v44  ;;  %v1624_v6 = vand.u32 3, %v1623_v56  ;;  %v4562_v24 = vsub.f32 0.0, %v7213_v10 }
 0x1c2   : > { %v1145_v27 = vmul.f32 %v1144_v30, %v1142_v60  ;;  %v1152_v59 = vmul.f32 %v1151_v55, %v1142_v60  ;;  %v7332_v22 = vmul.f32 %v1620_v1, %v6879_v40  ;;  %v1159_v14 = vand.u32 3, %v1158_v52 }
 0x1c3   : > { %v1733_v53 = vadd.s32 536870912, %v1732_v35  ;;  %v3040_v23 = vsel %vm7146_vm13, %v7316_v49, %v3029_v15  ;;  %v4559_v44 = vsub.f32 0.0, %v7197_v32  ;;  %v7341_v19 = vand.u32 3, %v8477_v33 }
 0x1c4   : > { %v1146_v37 = vadd.f32 -0.4999988, %v1145_v27  ;;  %v1153_v36 = vadd.f32 -0.16666654, %v1152_v59  ;;  %v7343_v2 = vadd.f32 1.0, %v1612_v5  ;;  %vm1626_vm2 = vcmp.eq.s32.totalorder %v1624_v6, 0 }
 0x1c5   : > { %v7337_v4 = vshrl.u32 %v1733_v53, 30  ;;  %v7347_v40 = vsel %vm7128_vm8, %v4562_v24, 1.0  ;;  %vm2396_vm9 = vcmp.lt.s32.totalorder %v2395_v17, 2  ;;  %vm1625_vm10 = vcmp.lt.s32.totalorder %v1624_v6, 2 }
 0x1c6   : > { %v1147_v10 = vmul.f32 %v1146_v37, %v1142_v60  ;;  %v1154_v50 = vmul.f32 %v1153_v36, %v1142_v60  ;;  %vm1157_vm6 = vweird.f32 %v8471_v13  ;;  %vm1160_vm11 = vcmp.lt.s32.totalorder %v1159_v14, 2 }
 0x1c7   : > { %v1735_v63 = vshll.u32 %v7337_v4, 30  ;;  %v3048_v32 = vpack.c.bf16 %v3040_v23, %v3040_v23  ;;  %v7353_v31 = vsel %vm7128_vm8, %v4559_v44, 1.0  ;;  %v1627_v57 = vxor.u32 2147483648, %v7332_v22 }
 0x1c8   : > { %v1148_v42 = vadd.f32 1.0, %v1147_v10  ;;  %v1155_v47 = vadd.f32 1.0, %v1154_v50  ;;  %vm1161_vm12 = vcmp.eq.s32.totalorder %v1159_v14, 0  ;;  %vm1164_vm14 = vcmp.eq.s32.totalorder %v1159_v14, 2 }
 0x1c9   : > { %v1736_v16 = vsub.s32 %v1732_v35, %v1735_v63  ;;  %vm1622_vm15 = vweird.f32 %v6215_v62  ;;  %v1630_v58 = vxor.u32 2147483648, %v7343_v2  ;;  %vm2397_vm4 = vcmp.eq.s32.totalorder %v2395_v17, 0 }
 0x1ca   : > { %v1156_v51 = vmul.f32 %v1155_v47, %v1140_v34  ;;  %v1165_v18 = vxor.u32 2147483648, %v1148_v42  ;;  %vm2400_vm1 = vcmp.eq.s32.totalorder %v2395_v17, 2  ;;  %v3084_v25 = vunpack.c.l.b16 %v3048_v32 }
 0x1cb   : > { %vm1737_vm3 = vcmp.lt.s32.totalorder %v1736_v16, 0  ;;  %v1738_v60 = vsub.s32 0, %v1736_v16  ;;  %vm1629_vm0 = vcmp.eq.s32.totalorder %v1624_v6, 2  ;;  %v1628_v33 = vsel %vm1626_vm2, %v7343_v2, %v1627_v57 }
 0x1cc   : > { %v1162_v38 = vxor.u32 2147483648, %v1156_v51  ;;  %vm2858_vm7 = vcmp.lt.s32.totalorder %v7341_v19, 2  ;;  %v1631_v21 = vsel %vm1629_vm0, %v1630_v58, %v7332_v22  ;;  %vm2859_vm5 = vcmp.eq.s32.totalorder %v7341_v19, 0 }
 0x1cd   : > { %v1739_v56 = vsel %vm1737_vm3, %v1738_v60, %v1736_v16  ;;  %v4563_v34 = vsub.f32 0.0, %v7230_v8  ;;  %v1166_v26 = vsel %vm1164_vm14, %v1165_v18, %v1156_v51  ;;  %v2402_v0 = vsel %vm2400_vm1, %v1165_v18, %v1156_v51 }
 0x1ce   : > { %v1740_v1 = vclz %v1739_v56  ;;  %v1163_v46 = vsel %vm1161_vm12, %v1148_v42, %v1162_v38  ;;  %v2399_v52 = vsel %vm2397_vm4, %v1148_v42, %v1162_v38  ;;  %v1632_v15 = vsel %vm1625_vm10, %v1628_v33, %v1631_v21 }
 0x1cf   : > { %v1167_v30 = vsel %vm1160_vm11, %v1163_v46, %v1166_v26  ;;  %v2403_v55 = vsel %vm2396_vm9, %v2399_v52, %v2402_v0  ;;  %v1728_v8 = vadd.s32 %v7287_v45, %v7285_v7  ;;  %vm2862_vm2 = vcmp.eq.s32.totalorder %v7341_v19, 2 }
 0x1d0   : > { %v5049_v35 = vadd.s32 4294967294, %v1740_v1  ;;  %v1168_v5 = vsel %vm1157_vm6, nan, %v1167_v30  ;;  %v7381_v27 = vsel %vm1157_vm6, nan, %v2403_v55  ;;  %v2861_v6 = vsel %vm2859_vm5, %v7343_v2, %v1627_v57  ;;  %v8481_v1 = vld [vmem:[#allocation20_spill] sm:$0xff] }
 0x1d1   : > { %v3030_v17 = vsel %vm7128_vm8, %v7381_v27, %v8471_v13  ;;  %v4560_v59 = vsub.f32 0.0, %v7316_v49  ;;  %v7398_v7 = vsel %vm1622_vm15, nan, %v1632_v15  ;;  %v7402_v24 = vsel %vm7128_vm8, %v4563_v34, 1.0  ;;  %v5655_v34 = vld [vmem:[%s8280_s3 + $0x78] sm:$0xff]  ;;  %v5654_v30 = vld [vmem:[%s8280_s3 + $0x70] sm:$0xff] }
 0x1d2   : > { %vm5050_vm9 = vcmp.lt.s32.totalorder %v5049_v35, 0  ;;  %v3041_v53 = vsel %vm7146_vm13, %v1168_v5, %v3030_v17  ;;  %8478 = vst [vmem:[#allocation14_spill] sm:$0xff] %v7402_v24  ;;  %v2864_v37 = vsel %vm2862_vm2, %v1630_v58, %v7332_v22  ;;  %v4561_v44 = vsub.f32 0.0, %v1168_v5  ;;  %3285 = vmatpush.bf16.msrb.mxu2 %v5655_v34 }
 0x1d3   : > { %v1743_v45 = vsel %vm5050_vm9, 0, %v5049_v35  ;;  %v3049_v13 = vpack.c.bf16 %v3041_v53, %v3041_v53  ;;  %v2865_v49 = vsel %vm2858_vm7, %v2861_v6, %v2864_v37  ;;  %v7409_v36 = vsel %vm7128_vm8, %v4560_v59, 1.0 }
 0x1d4   : > { %v1744_v14 = vsub.s32 32, %v1743_v45  ;;  %v1748_v23 = vsub.s32 4294967266, %v1743_v45  ;;  %v1745_v50 = vshll.u32 %v1736_v16, %v1743_v45  ;;  %v7421_v19 = vsel %vm7128_vm8, %v4561_v44, 1.0 }
 0x1d5   : > { %v3085_v10 = vunpack.c.l.b16 %v3049_v13  ;;  %v4564_v42 = vsub.f32 0.0, %v7398_v7  ;;  %v7428_v16 = vsel %vm1622_vm15, nan, %v2865_v49  ;;  %vm1636_vm10 = vcmp.lt.s32.totalorder %v8481_v1, 0  ;;  %v5652_v13 = vld [vmem:[%s8280_s3 + $0x60] sm:$0xff] }
 0x1d6   : > { %v1746_v63 = vshrl.u32 %v1728_v8, %v1744_v14  ;;  %v1749_v32 = vadd.s32 127, %v1748_v23  ;;  %8479 = vst [vmem:[#allocation16_spill] sm:$0xff] %v7428_v16  ;;  %v8482_v46 = vand.u32 2147483647, %v8481_v1  ;;  %v1758_v52 = vsub.s32 4, %v7337_v4  ;;  %3286 = vmatpush.bf16.msrb.mxu2 %v5654_v30  ;;  %v5653_v8 = vld [vmem:[%s8280_s3 + $0x68] sm:$0xff] }
 0x1d7   : > { %v7424_v47 = vpack.c.b16 %v3085_v10, %v3084_v25  ;;  %v7436_v18 = vsel %vm7128_vm8, %v4564_v42, 1.0  ;;  %vm1777_vm1 = vweird.f32 %v8481_v1 }
 0x1d8   : > { %v1747_v57 = vor.u32 %v1746_v63, %v1745_v50  ;;  %v1750_v58 = vshll.u32 %v1749_v32, 23  ;;  %8480 = vst [vmem:[#allocation9_spill] sm:$0xff] %v7436_v18  ;;  %vm1635_vm6 = vcmp.le.f32.partialorder %v8482_v46, 0.7853982  ;;  %v1759_v5 = vsel %vm1636_vm10, %v1758_v52, %v7337_v4 }
 0x1d9   : > { %3159 = vmatmul.bf16.gmra.mxu1 %v7424_v47  ;;  %v1761_v59 = vsel %vm1635_vm6, 0, %v1759_v5  ;;  %v8549_v18 = vmov -1.0  }
 0x1da   : > { %v1751_v60 = vor.u32 4788187, %v1750_v58  ;;  %v1754_v33 = vcvt.s32.f32 %v1747_v57  ;;  %3287 = vmatpush.bf16.msrb.mxu2 %v5653_v8  ;;  %v1778_v37 = vadd.s32 3, %v1761_v59  ;;  %v3011_v50 = vand.u32 3, %v1761_v59  ;;  %v5648_v59 = vld [vmem:[%s8280_s3 + $0x40] sm:$0xff] }
 0x1db   : > { %v3033_v57 = vsel %vm7128_vm8, %v7428_v16, %v6215_v62 }
 0x1dc   : > { %v1752_v38 = vand.u32 2147483647, %v1751_v60  ;;  %v1779_v63 = vand.u32 3, %v1778_v37  ;;  %vm3012_vm11 = vcmp.lt.s32.totalorder %v3011_v50, 2  ;;  %vm3013_vm12 = vcmp.eq.s32.totalorder %v3011_v50, 0 }
 0x1dd   : > { %vm3016_vm14 = vcmp.eq.s32.totalorder %v3011_v50, 2  ;;  %v3044_v60 = vsel %vm7146_vm13, %v7398_v7, %v3033_v57 }
 0x1de   : > { %v1755_v56 = vmul.f32 %v1754_v33, %v1752_v38  ;;  %3288 = vmatpush.bf16.msrb.mxu2 %v5652_v13  ;;  %vm1780_vm15 = vcmp.lt.s32.totalorder %v1779_v63, 2  ;;  %vm1781_vm3 = vcmp.eq.s32.totalorder %v1779_v63, 0  ;;  %vm1784_vm4 = vcmp.eq.s32.totalorder %v1779_v63, 2 }
 0x1e0   : > { %v1756_v21 = vxor.u32 2147483648, %v1755_v56 }
 0x1e2   : > { %v1757_v26 = vsel %vm1636_vm10, %v1756_v21, %v1755_v56 }
 0x1e3   : > { %v1760_v0 = vsel %vm1635_vm6, %v8481_v1, %v1757_v26 }
 0x1e4   : > { %v1762_v55 = vmul.f32 %v1760_v0, %v1760_v0 }
 0x1e6   : > { %v1763_v15 = vmul.f32 -0.001358992, %v1762_v55  ;;  %v1770_v35 = vmul.f32 -0.00019511016, %v1762_v55 }
 0x1e8   : > { %v1764_v17 = vadd.f32 0.041655596, %v1763_v15  ;;  %v1771_v6 = vadd.f32 0.008332121, %v1770_v35 }
 0x1ea   : > { %v1765_v53 = vmul.f32 %v1764_v17, %v1762_v55  ;;  %v1772_v45 = vmul.f32 %v1771_v6, %v1762_v55  ;;  %v5649_v6 = vld [vmem:[%s8280_s3 + $0x48] sm:$0xff] }
 0x1ec   : > { %v1766_v14 = vadd.f32 -0.4999988, %v1765_v53  ;;  %v1773_v23 = vadd.f32 -0.16666654, %v1772_v45  ;;  %v7503_v45 = vld [vmem:[%s8281_s4] ss:$0 sm:$0xff] }
 0x1ee   : > { %v1767_v49 = vmul.f32 %v1766_v14, %v1762_v55  ;;  %v1774_v4 = vmul.f32 %v1773_v23, %v1762_v55 }
 0x1f0   : > { %v1768_v44 = vadd.f32 1.0, %v1767_v49  ;;  %v1775_v10 = vadd.f32 1.0, %v1774_v4 }
 0x1f2   : > { %v1776_v32 = vmul.f32 %v1775_v10, %v1760_v0  ;;  %v1785_v42 = vxor.u32 2147483648, %v1768_v44  ;;  %v3052_v0 = vpack.c.bf16 %v3044_v60, %v3044_v60 }
 0x1f4   : > { %v1782_v58 = vxor.u32 2147483648, %v1776_v32  ;;  %v1786_v33 = vsel %vm1784_vm4, %v1785_v42, %v1776_v32  ;;  %v3018_v21 = vsel %vm3016_vm14, %v1785_v42, %v1776_v32  ;;  %v3088_v5 = vunpack.c.l.b16 %v3052_v0 }
 0x1f6   : > { %v1783_v38 = vsel %vm1781_vm3, %v1768_v44, %v1782_v58  ;;  %v3015_v56 = vsel %vm3013_vm12, %v1768_v44, %v1782_v58 }
 0x1f7   : > { %v1787_v34 = vsel %vm1780_vm15, %v1783_v38, %v1786_v33  ;;  %v3019_v46 = vsel %vm3012_vm11, %v3015_v56, %v3018_v21  ;;  %v8485_v56 = vmov 0  ;;  %v8487_v21 = vmov 0 }
 0x1f8   : > { %v1788_v62 = vsel %vm1777_vm1, nan, %v1787_v34  ;;  %v7469_v26 = vsel %vm1777_vm1, nan, %v3019_v46 }
 0x1f9   : > { %8483 = vst [vmem:[#allocation15_spill] sm:$0xff] %v7469_v26  ;;  %v3034_v52 = vsel %vm7128_vm8, %v7469_v26, %v8481_v1  ;;  %v4565_v30 = vsub.f32 0.0, %v1788_v62  ;;  %v5651_v1 = vld [vmem:[%s8280_s3 + $0x58] sm:$0xff] }
 0x1fa   : > { %v3045_v7 = vsel %vm7146_vm13, %v1788_v62, %v3034_v52  ;;  %3289 = vmatpush.bf16.msrb.mxu2 %v5651_v1 }
 0x1fb   : > { %v3053_v55 = vpack.c.bf16 %v3045_v7, %v3045_v7  ;;  %v7479_v15 = vsel %vm7128_vm8, %v4565_v30, 1.0 }
 0x1fc   : > { %8484 = vst [vmem:[#allocation8_spill] sm:$0xff] %v7479_v15 }
 0x1fd   : > { %v3089_v8 = vunpack.c.l.b16 %v3053_v55 }
 0x1fe   : > { %3290 = vmatpush.bf16.msrb.mxu2 %v5650_v3 }
 0x1ff   : > { %v7485_v17 = vpack.c.b16 %v3089_v8, %v3088_v5 }
 0x201   : > { %3169 = vmatmul.bf16.gmra.mxu2 %v7485_v17 }
 0x202   : > { %3291 = vmatpush.bf16.msrb.mxu2 %v5649_v6 }
 0x206   : > { %3292 = vmatpush.bf16.msrb.mxu2 %v5648_v59  ;;  %v8489_v59 = vmov 0 }
 0x228   : > { %v3155_v53 = vpop.f32.mrf.mxu1 }
 0x229   : > { %v3156_v13 = vadd.f32 %v7503_v45, %v3155_v53 }
 0x22b   : > { %v3175_v23 = vmax.f32 %v3156_v13, 0.0  ;;  %v8491_v13 = vmov 0 }
 0x22d   : > { %v3183_v4 = vpack.c.bf16 %v3175_v23, %v3175_v23 }
 0x22f   : > { %v3221_v50 = vunpack.c.l.b16 %v3183_v4  ;;  %v4437_v58 = vunpack.c.l.bf16 %v3183_v4  ;;  %v8493_v4 = vmov 0 }
 0x230   : > { %v3157_v14 = vpop.f32.mrf.mxu1 }
 0x231   : > { %v3158_v37 = vadd.f32 %v7503_v45, %v3157_v14  ;;  %vm7513_vm0 = vcmp.gt.f32.partialorder %v4437_v58, 0.0  ;;  %v5660_v58 = vld [vmem:[%s8280_s3 + $0xa0] sm:$0xff] }
 0x232   : > { %v8488_v21 = vsel %vm7513_vm0, 4294967295, %v8487_v21 }
 0x233   : > { %v3176_v49 = vmax.f32 %v3158_v37, 0.0 }
 0x235   : > { %v3184_v44 = vpack.c.bf16 %v3176_v49, %v3176_v49 }
 0x237   : > { %v3222_v10 = vunpack.c.l.b16 %v3184_v44  ;;  %v3165_v32 = vpop.f32.mrf.mxu2  ;;  %v4438_v57 = vunpack.c.l.bf16 %v3184_v44  ;;  %v8495_v44 = vmov 0 }
 0x238   : > { %v3166_v60 = vadd.f32 %v7503_v45, %v3165_v32  ;;  %v5662_v32 = vld [vmem:[%s8280_s3 + $0xb0] sm:$0xff] }
 0x239   : > { %v3229_v63 = vpack.c.b16 %v3222_v10, %v3221_v50  ;;  %vm7509_vm8 = vcmp.gt.f32.partialorder %v4438_v57, 0.0  ;;  %v5663_v50 = vld [vmem:[%s8280_s3 + $0xb8] sm:$0xff]  ;;  %v5661_v57 = vld [vmem:[%s8280_s3 + $0xa8] sm:$0xff] }
 0x23a   : > { %v8486_v56 = vsel %vm7509_vm8, 4294967295, %v8485_v56  ;;  %v3179_v34 = vmax.f32 %v3166_v60, 0.0  ;;  %3424 = vmatpush.bf16.msrb.mxu3 %v5663_v50 }
 0x23b   : > { %3293 = vmatmul.bf16.vlgmr.msrb.gmra.mxu2 %v3229_v63 }
 0x23c   : > { %v3187_v52 = vpack.c.bf16 %v3179_v34, %v3179_v34 }
 0x23e   : > { %v4441_v8 = vunpack.c.l.bf16 %v3187_v52  ;;  %v3225_v63 = vunpack.c.l.b16 %v3187_v52  ;;  %3425 = vmatpush.bf16.msrb.mxu3 %v5662_v32 }
 0x23f   : > { %v3167_v42 = vpop.f32.mrf.mxu2 }
 0x240   : > { %v3168_v33 = vadd.f32 %v7503_v45, %v3167_v42  ;;  %vm7523_vm5 = vcmp.gt.f32.partialorder %v4441_v8, 0.0  ;;  %v8497_v8 = vmov 0 }
 0x241   : > { %v8490_v59 = vsel %vm7523_vm5, 4294967295, %v8489_v59 }
 0x242   : > { %v3180_v62 = vmax.f32 %v3168_v33, 0.0  ;;  %3426 = vmatpush.bf16.msrb.mxu3 %v5661_v57 }
 0x244   : > { %v3188_v30 = vpack.c.bf16 %v3180_v62, %v3180_v62 }
 0x246   : > { %v4442_v3 = vunpack.c.l.bf16 %v3188_v30  ;;  %v3226_v10 = vunpack.c.l.b16 %v3188_v30  ;;  %3427 = vmatpush.bf16.msrb.mxu3 %v5660_v58 }
 0x248   : > { %vm7527_vm2 = vcmp.gt.f32.partialorder %v4442_v3, 0.0  ;;  %v3231_v42 = vpack.c.b16 %v3226_v10, %v3225_v63  ;;  %v8499_v3 = vmov 0 }
 0x249   : > { %v8492_v13 = vsel %vm7527_vm2, 4294967295, %v8491_v13 }
 0x256   : > { %v3160_v38 = vpop.f32.mrf.mxu1 }
 0x257   : > { %v3161_v46 = vadd.f32 %v7503_v45, %v3160_v38 }
 0x259   : > { %v3177_v0 = vmax.f32 %v3161_v46, 0.0 }
 0x25b   : > { %v3185_v1 = vpack.c.bf16 %v3177_v0, %v3177_v0 }
 0x25d   : > { %v4439_v53 = vunpack.c.l.bf16 %v3185_v1  ;;  %v3223_v14 = vunpack.c.l.b16 %v3185_v1 }
 0x25e   : > { %v3162_v7 = vpop.f32.mrf.mxu1 }
 0x25f   : > { %v3163_v55 = vadd.f32 %v7503_v45, %v3162_v7  ;;  %vm7535_vm10 = vcmp.gt.f32.partialorder %v4439_v53, 0.0  ;;  %v5657_v53 = vld [vmem:[%s8280_s3 + $0x88] sm:$0xff] }
 0x260   : > { %v8494_v4 = vsel %vm7535_vm10, 4294967295, %v8493_v4 }
 0x261   : > { %v3178_v5 = vmax.f32 %v3163_v55, 0.0 }
 0x263   : > { %v3186_v6 = vpack.c.bf16 %v3178_v5, %v3178_v5 }
 0x265   : > { %v3224_v23 = vunpack.c.l.b16 %v3186_v6  ;;  %v4440_v37 = vunpack.c.l.bf16 %v3186_v6  ;;  %v5658_v6 = vld [vmem:[%s8280_s3 + $0x90] sm:$0xff] }
 0x267   : > { %v3230_v49 = vpack.c.b16 %v3224_v23, %v3223_v14  ;;  %vm7539_vm6 = vcmp.gt.f32.partialorder %v4440_v37, 0.0  ;;  %v5656_v14 = vld [vmem:[%s8280_s3 + $0x80] sm:$0xff] }
 0x268   : > { %v8496_v44 = vsel %vm7539_vm6, 4294967295, %v8495_v44  ;;  %v7588_v23 = vld [vmem:[%s8281_s4 + $0x1] ss:$0 sm:$0xff] }
 0x269   : > { %3298 = vmatmul.bf16.gmra.mxu2 %v3230_v49 }
 0x279   : > { %3303 = vmatmul.bf16.gmra.mxu2 %v3231_v42 }
 0x284   : > { %v3170_v60 = vpop.f32.mrf.mxu2 }
 0x285   : > { %v3171_v38 = vadd.f32 %v7503_v45, %v3170_v60 }
 0x287   : > { %v3181_v33 = vmax.f32 %v3171_v38, 0.0 }
 0x289   : > { %v3189_v46 = vpack.c.bf16 %v3181_v33, %v3181_v33  ;;  %v8501_v33 = vmov 0 }
 0x28b   : > { %v4443_v0 = vunpack.c.l.bf16 %v3189_v46  ;;  %v3227_v55 = vunpack.c.l.b16 %v3189_v46 }
 0x28c   : > { %v3172_v34 = vpop.f32.mrf.mxu2 }
 0x28d   : > { %v3173_v62 = vadd.f32 %v7503_v45, %v3172_v34  ;;  %vm7561_vm12 = vcmp.gt.f32.partialorder %v4443_v0, 0.0  ;;  %v5659_v45 = vld [vmem:[%s8280_s3 + $0x98] sm:$0xff]  ;;  %v8503_v34 = vmov 0 }
 0x28e   : > { %v8498_v8 = vsel %vm7561_vm12, 4294967295, %v8497_v8  ;;  %3428 = vmatpush.bf16.msrb.mxu3 %v5659_v45 }
 0x28f   : > { %v3182_v52 = vmax.f32 %v3173_v62, 0.0 }
 0x291   : > { %v3190_v30 = vpack.c.bf16 %v3182_v52, %v3182_v52 }
 0x292   : > { %3429 = vmatpush.bf16.msrb.mxu3 %v5658_v6 }
 0x293   : > { %v4444_v7 = vunpack.c.l.bf16 %v3190_v30  ;;  %v3228_v5 = vunpack.c.l.b16 %v3190_v30 }
 0x295   : > { %v3232_v1 = vpack.c.b16 %v3228_v5, %v3227_v55  ;;  %vm7565_vm14 = vcmp.gt.f32.partialorder %v4444_v7, 0.0 }
 0x296   : > { %v8500_v3 = vsel %vm7565_vm14, 4294967295, %v8499_v3  ;;  %3430 = vmatpush.bf16.msrb.mxu3 %v5657_v53 }
 0x297   : > { %3308 = vmatmul.bf16.gmra.mxu2 %v3232_v1 }
 0x29a   : > { %3431 = vmatpush.bf16.msrb.mxu3 %v5656_v14 }
 0x2be   : > { %v3294_v37 = vpop.f32.mrf.mxu2 }
 0x2bf   : > { %v3295_v49 = vadd.f32 %v7588_v23, %v3294_v37 }
 0x2c1   : > { %v3314_v10 = vmax.f32 %v3295_v49, 0.0 }
 0x2c3   : > { %v3322_v63 = vpack.c.bf16 %v3314_v10, %v3314_v10 }
 0x2c5   : > { %v4315_v57 = vunpack.c.l.bf16 %v3322_v63  ;;  %v3360_v46 = vunpack.c.l.b16 %v3322_v63  ;;  %v8505_v63 = vmov 0 }
 0x2c6   : > { %v3296_v50 = vpop.f32.mrf.mxu2 }
 0x2c7   : > { %v3297_v32 = vadd.f32 %v7588_v23, %v3296_v50  ;;  %vm7592_vm3 = vcmp.gt.f32.partialorder %v4315_v57, 0.0 }
 0x2c8   : > { %v8502_v33 = vsel %vm7592_vm3, 4294967295, %v8501_v33 }
 0x2c9   : > { %v3315_v42 = vmax.f32 %v3297_v32, 0.0  ;;  %v8507_v32 = vmov 0 }
 0x2cb   : > { %v3323_v58 = vpack.c.bf16 %v3315_v42, %v3315_v42  ;;  %v5695_v42 = vld [vmem:[%s8287_s10 + $0x78] sm:$0xff] }
 0x2cc   : > { %3978 = vmatpush.bf16.msra.mxu3 %v5695_v42 }
 0x2cd   : > { %v4316_v60 = vunpack.c.l.bf16 %v3323_v58  ;;  %v3361_v38 = vunpack.c.l.b16 %v3323_v58 }
 0x2cf   : > { %vm7596_vm4 = vcmp.gt.f32.partialorder %v4316_v60, 0.0  ;;  %v3368_v62 = vpack.c.b16 %v3361_v38, %v3360_v46 }
 0x2d0   : > { %v8504_v34 = vsel %vm7596_vm4, 4294967295, %v8503_v34 }
 0x2d1   : > { %3432 = vmatmul.bf16.vlgmr.msrb.gmra.mxu3 %v3368_v62  ;;  %v5694_v62 = vld [vmem:[%s8287_s10 + $0x70] sm:$0xff] }
 0x2d2   : > { %3979 = vmatpush.bf16.msra.mxu3 %v5694_v62 }
 0x2ec   : > { %v3299_v52 = vpop.f32.mrf.mxu2 }
 0x2ed   : > { %v3300_v0 = vadd.f32 %v7588_v23, %v3299_v52 }
 0x2ef   : > { %v3316_v30 = vmax.f32 %v3300_v0, 0.0 }
 0x2f1   : > { %v3324_v55 = vpack.c.bf16 %v3316_v30, %v3316_v30  ;;  %v5693_v30 = vld [vmem:[%s8287_s10 + $0x68] sm:$0xff] }
 0x2f2   : > { %3980 = vmatpush.bf16.msra.mxu3 %v5693_v30 }
 0x2f3   : > { %v4317_v6 = vunpack.c.l.bf16 %v3324_v55  ;;  %v3362_v53 = vunpack.c.l.b16 %v3324_v55 }
 0x2f4   : > { %v3301_v7 = vpop.f32.mrf.mxu2 }
 0x2f5   : > { %v3302_v5 = vadd.f32 %v7588_v23, %v3301_v7  ;;  %vm7607_vm15 = vcmp.gt.f32.partialorder %v4317_v6, 0.0 }
 0x2f6   : > { %v8506_v63 = vsel %vm7607_vm15, 4294967295, %v8505_v63 }
 0x2f7   : > { %v3317_v1 = vmax.f32 %v3302_v5, 0.0 }
 0x2f9   : > { %v3325_v45 = vpack.c.bf16 %v3317_v1, %v3317_v1  ;;  %v8509_v1 = vmov 0 }
 0x2fb   : > { %v3363_v14 = vunpack.c.l.b16 %v3325_v45  ;;  %v4318_v37 = vunpack.c.l.bf16 %v3325_v45  ;;  %v8511_v45 = vmov 0 }
 0x2fc   : > { %v3304_v49 = vpop.f32.mrf.mxu2 }
 0x2fd   : > { %v3305_v10 = vadd.f32 %v7588_v23, %v3304_v49  ;;  %v3369_v50 = vpack.c.b16 %v3363_v14, %v3362_v53  ;;  %vm7611_vm9 = vcmp.gt.f32.partialorder %v4318_v37, 0.0  ;;  %v5692_v53 = vld [vmem:[%s8287_s10 + $0x60] sm:$0xff]  ;;  %v5691_v14 = vld [vmem:[%s8287_s10 + $0x58] sm:$0xff]  ;;  %v5690_v37 = vld [vmem:[%s8287_s10 + $0x50] sm:$0xff] }
 0x2fe   : > { %v8508_v32 = vsel %vm7611_vm9, 4294967295, %v8507_v32  ;;  %3981 = vmatpush.bf16.msra.mxu3 %v5692_v53  ;;  %v5670_v53 = vld [vmem:[%s8280_s3 + $0xf0] sm:$0xff] }
 0x2ff   : > { %3437 = vmatmul.bf16.gmra.mxu3 %v3369_v50  ;;  %v3318_v57 = vmax.f32 %v3305_v10, 0.0  ;;  %v5689_v50 = vld [vmem:[%s8287_s10 + $0x48] sm:$0xff] }
 0x301   : > { %v3326_v60 = vpack.c.bf16 %v3318_v57, %v3318_v57  ;;  %v5688_v57 = vld [vmem:[%s8287_s10 + $0x40] sm:$0xff] }
 0x302   : > { %3982 = vmatpush.bf16.msra.mxu3 %v5691_v14  ;;  %v5669_v14 = vld [vmem:[%s8280_s3 + $0xe8] sm:$0xff] }
 0x303   : > { %v4319_v52 = vunpack.c.l.bf16 %v3326_v60  ;;  %v3364_v55 = vunpack.c.l.b16 %v3326_v60 }
 0x304   : > { %v3306_v58 = vpop.f32.mrf.mxu2 }
 0x305   : > { %v3307_v38 = vadd.f32 %v7588_v23, %v3306_v58  ;;  %vm7629_vm7 = vcmp.gt.f32.partialorder %v4319_v52, 0.0 }
 0x306   : > { %v8510_v1 = vsel %vm7629_vm7, 4294967295, %v8509_v1  ;;  %3983 = vmatpush.bf16.msra.mxu3 %v5690_v37 }
 0x307   : > { %v3319_v46 = vmax.f32 %v3307_v38, 0.0 }
 0x309   : > { %v3327_v0 = vpack.c.bf16 %v3319_v46, %v3319_v46 }
 0x30a   : > { %3984 = vmatpush.bf16.msra.mxu3 %v5689_v50 }
 0x30b   : > { %v4320_v7 = vunpack.c.l.bf16 %v3327_v0  ;;  %v3365_v5 = vunpack.c.l.b16 %v3327_v0 }
 0x30d   : > { %vm7633_vm11 = vcmp.gt.f32.partialorder %v4320_v7, 0.0  ;;  %v3370_v6 = vpack.c.b16 %v3365_v5, %v3364_v55  ;;  %v8513_v55 = vmov 0  ;;  %v8515_v5 = vmov 0 }
 0x30e   : > { %v8512_v45 = vsel %vm7633_vm11, 4294967295, %v8511_v45  ;;  %3985 = vmatpush.bf16.msra.mxu3 %v5688_v57 }
 0x30f   : > { %3442 = vmatmul.bf16.gmra.mxu3 %v3370_v6 }
 0x31a   : > { %v3309_v49 = vpop.f32.mrf.mxu2 }
 0x31b   : > { %v3310_v10 = vadd.f32 %v7588_v23, %v3309_v49 }
 0x31d   : > { %v3320_v42 = vmax.f32 %v3310_v10, 0.0  ;;  %v5667_v10 = vld [vmem:[%s8280_s3 + $0xd8] sm:$0xff] }
 0x31f   : > { %v3328_v60 = vpack.c.bf16 %v3320_v42, %v3320_v42  ;;  %v5666_v42 = vld [vmem:[%s8280_s3 + $0xd0] sm:$0xff] }
 0x321   : > { %v4321_v62 = vunpack.c.l.bf16 %v3328_v60  ;;  %v3366_v30 = vunpack.c.l.b16 %v3328_v60 }
 0x322   : > { %v3311_v58 = vpop.f32.mrf.mxu2 }
 0x323   : > { %v3312_v38 = vadd.f32 %v7588_v23, %v3311_v58  ;;  %vm7658_vm1 = vcmp.gt.f32.partialorder %v4321_v62, 0.0  ;;  %v5671_v23 = vld [vmem:[%s8280_s3 + $0xf8] sm:$0xff] }
 0x324   : > { %v8514_v55 = vsel %vm7658_vm1, 4294967295, %v8513_v55  ;;  %3563 = vmatpush.bf16.msrb.mxu0 %v5671_v23  ;;  %v5719_v23 = vld [vmem:[%s8282_s5 + $0x78] sm:$0xff] }
 0x325   : > { %v3321_v46 = vmax.f32 %v3312_v38, 0.0  ;;  %v5665_v38 = vld [vmem:[%s8280_s3 + $0xc8] sm:$0xff] }
 0x327   : > { %v3329_v52 = vpack.c.bf16 %v3321_v46, %v3321_v46 }
 0x328   : > { %3564 = vmatpush.bf16.msrb.mxu0 %v5670_v53 }
 0x329   : > { %v4322_v0 = vunpack.c.l.bf16 %v3329_v52  ;;  %v3367_v7 = vunpack.c.l.b16 %v3329_v52 }
 0x32b   : > { %vm7662_vm13 = vcmp.gt.f32.partialorder %v4322_v0, 0.0  ;;  %v3371_v6 = vpack.c.b16 %v3367_v7, %v3366_v30 }
 0x32c   : > { %v8516_v5 = vsel %vm7662_vm13, 4294967295, %v8515_v5  ;;  %3565 = vmatpush.bf16.msrb.mxu0 %v5669_v14 }
 0x32d   : > { %3447 = vmatmul.bf16.gmra.mxu3 %v3371_v6 }
 0x33d   : > { %3986 = vmatmul.bf16.vlgmr.msra.gmra.mxu3 %v7224_v11  ;;  %v5668_v11 = vld [vmem:[%s8280_s3 + $0xe0] sm:$0xff] }
 0x33e   : > { %3566 = vmatpush.bf16.msrb.mxu0 %v5668_v11 }
 0x342   : > { %3567 = vmatpush.bf16.msrb.mxu0 %v5667_v10 }
 0x346   : > { %3568 = vmatpush.bf16.msrb.mxu0 %v5666_v42 }
 0x34a   : > { %3569 = vmatpush.bf16.msrb.mxu0 %v5665_v38 }
 0x34d   : > { %3991 = vmatmul.bf16.gmra.mxu3 %v7424_v47  ;;  %v7687_v47 = vld [vmem:[%s8281_s4 + $0x2] ss:$0 sm:$0xff] }
 0x354   : > { %v3433_v37 = vpop.f32.mrf.mxu3 }
 0x355   : > { %v3434_v49 = vadd.f32 %v7687_v47, %v3433_v37 }
 0x357   : > { %v3453_v50 = vmax.f32 %v3434_v49, 0.0 }
 0x359   : > { %v3461_v58 = vpack.c.bf16 %v3453_v50, %v3453_v50 }
 0x35b   : > { %v4193_v62 = vunpack.c.l.bf16 %v3461_v58  ;;  %v3499_v0 = vunpack.c.l.b16 %v3461_v58 }
 0x35c   : > { %v3435_v57 = vpop.f32.mrf.mxu3 }
 0x35d   : > { %3996 = vmatmul.bf16.gmra.mxu3 %v7260_v9  ;;  %v3436_v60 = vadd.f32 %v7687_v47, %v3435_v57  ;;  %v5664_v9 = vld [vmem:[%s8280_s3 + $0xc0] sm:$0xff]  ;;  %vm7704_vm12 = vcmp.gt.f32.partialorder %v4193_v62, 0.0 }
 0x35e   : > { %3570 = vmatpush.bf16.msrb.mxu0 %v5664_v9 }
 0x35f   : > { %v3454_v46 = vmax.f32 %v3436_v60, 0.0 }
 0x361   : > { %v3462_v52 = vpack.c.bf16 %v3454_v46, %v3454_v46 }
 0x363   : > { %v3500_v30 = vunpack.c.l.b16 %v3462_v52  ;;  %v4194_v7 = vunpack.c.l.bf16 %v3462_v52 }
 0x365   : > { %vm7708_vm14 = vcmp.gt.f32.partialorder %v4194_v7, 0.0  ;;  %v3507_v53 = vpack.c.b16 %v3500_v30, %v3499_v0 }
 0x367   : > { %3571 = vmatmul.bf16.vlgmr.msrb.gmra.mxu0 %v3507_v53 }
 0x36d   : > { %4001 = vmatmul.bf16.gmra.mxu3 %v7485_v17  ;;  %v5718_v17 = vld [vmem:[%s8282_s5 + $0x70] sm:$0xff] }
 0x382   : > { %v3438_v14 = vpop.f32.mrf.mxu3 }
 0x383   : > { %v3439_v11 = vadd.f32 %v7687_v47, %v3438_v14 }
 0x385   : > { %v3455_v37 = vmax.f32 %v3439_v11, 0.0 }
 0x387   : > { %v3463_v10 = vpack.c.bf16 %v3455_v37, %v3455_v37 }
 0x389   : > { %v4195_v58 = vunpack.c.l.bf16 %v3463_v10  ;;  %v3501_v60 = vunpack.c.l.b16 %v3463_v10 }
 0x38a   : > { %v3440_v49 = vpop.f32.mrf.mxu3 }
 0x38b   : > { %v3441_v50 = vadd.f32 %v7687_v47, %v3440_v49  ;;  %vm7720_vm5 = vcmp.gt.f32.partialorder %v4195_v58, 0.0  ;;  %v8525_v58 = vmov 0 }
 0x38d   : > { %v3456_v42 = vmax.f32 %v3441_v50, 0.0 }
 0x38f   : > { %v3464_v57 = vpack.c.bf16 %v3456_v42, %v3456_v42 }
 0x391   : > { %v3502_v38 = vunpack.c.l.b16 %v3464_v57  ;;  %v4196_v46 = vunpack.c.l.bf16 %v3464_v57 }
 0x392   : > { %v3443_v62 = vpop.f32.mrf.mxu3 }
 0x393   : > { %v3444_v52 = vadd.f32 %v7687_v47, %v3443_v62  ;;  %v3508_v9 = vpack.c.b16 %v3502_v38, %v3501_v60  ;;  %vm7724_vm2 = vcmp.gt.f32.partialorder %v4196_v46, 0.0  ;;  %v5716_v60 = vld [vmem:[%s8282_s5 + $0x60] sm:$0xff] }
 0x395   : > { %3576 = vmatmul.bf16.gmra.mxu0 %v3508_v9  ;;  %v3457_v30 = vmax.f32 %v3444_v52, 0.0 }
 0x397   : > { %v3465_v53 = vpack.c.bf16 %v3457_v30, %v3457_v30 }
 0x399   : > { %v4197_v49 = vunpack.c.l.bf16 %v3465_v53  ;;  %v3503_v10 = vunpack.c.l.b16 %v3465_v53 }
 0x39a   : > { %v3445_v7 = vpop.f32.mrf.mxu3 }
 0x39b   : > { %v3446_v14 = vadd.f32 %v7687_v47, %v3445_v7  ;;  %vm7733_vm6 = vcmp.gt.f32.partialorder %v4197_v49, 0.0 }
 0x39c   : > { %v8526_v58 = vsel %vm7733_vm6, 4294967295, %v8525_v58 }
 0x39d   : > { %v3458_v11 = vmax.f32 %v3446_v14, 0.0 }
 0x39f   : > { %v3466_v37 = vpack.c.bf16 %v3458_v11, %v3458_v11 }
 0x3a1   : > { %v3504_v50 = vunpack.c.l.b16 %v3466_v37  ;;  %v4198_v42 = vunpack.c.l.bf16 %v3466_v37 }
 0x3a3   : > { %v3509_v57 = vpack.c.b16 %v3504_v50, %v3503_v10  ;;  %vm7737_vm0 = vcmp.gt.f32.partialorder %v4198_v42, 0.0  ;;  %v8529_v50 = vmov 0  ;;  %v8531_v42 = vmov 0 }
 0x3a5   : > { %3581 = vmatmul.bf16.gmra.mxu0 %v3509_v57  ;;  %v5678_v57 = vld [vmem:[%s8283_s6 + $0x30] sm:$0xff] }
 0x3b0   : > { %v3448_v38 = vpop.f32.mrf.mxu3 }
 0x3b1   : > { %v3449_v46 = vadd.f32 %v7687_v47, %v3448_v38  ;;  %v5677_v38 = vld [vmem:[%s8283_s6 + $0x28] sm:$0xff] }
 0x3b3   : > { %v3459_v62 = vmax.f32 %v3449_v46, 0.0  ;;  %v5676_v46 = vld [vmem:[%s8283_s6 + $0x20] sm:$0xff] }
 0x3b5   : > { %v3467_v9 = vpack.c.bf16 %v3459_v62, %v3459_v62  ;;  %v5675_v62 = vld [vmem:[%s8283_s6 + $0x18] sm:$0xff] }
 0x3b7   : > { %v4199_v14 = vunpack.c.l.bf16 %v3467_v9  ;;  %v3505_v11 = vunpack.c.l.b16 %v3467_v9  ;;  %v5674_v9 = vld [vmem:[%s8283_s6 + $0x10] sm:$0xff] }
 0x3b8   : > { %v3450_v52 = vpop.f32.mrf.mxu3 }
 0x3b9   : > { %v3451_v30 = vadd.f32 %v7687_v47, %v3450_v52  ;;  %vm7747_vm8 = vcmp.gt.f32.partialorder %v4199_v14, 0.0  ;;  %v5679_v47 = vld [vmem:[%s8283_s6 + $0x38] sm:$0xff]  ;;  %v7777_v52 = vld [vmem:[%s8281_s4 + $0x3] ss:$0 sm:$0xff]  ;;  %v5673_v14 = vld [vmem:[%s8283_s6 + $0x8] sm:$0xff] }
 0x3ba   : > { %v8530_v50 = vsel %vm7747_vm8, 4294967295, %v8529_v50  ;;  %3756 = vmatpush.bf16.msrb.mxu1 %v5679_v47 }
 0x3bb   : > { %v3460_v7 = vmax.f32 %v3451_v30, 0.0 }
 0x3bd   : > { %v3468_v53 = vpack.c.bf16 %v3460_v7, %v3460_v7 }
 0x3be   : > { %3757 = vmatpush.bf16.msrb.mxu1 %v5678_v57 }
 0x3bf   : > { %v3506_v37 = vunpack.c.l.b16 %v3468_v53  ;;  %v4200_v49 = vunpack.c.l.bf16 %v3468_v53 }
 0x3c1   : > { %v3510_v10 = vpack.c.b16 %v3506_v37, %v3505_v11  ;;  %vm7751_vm10 = vcmp.gt.f32.partialorder %v4200_v49, 0.0  ;;  %v7789_v37 = vld [vmem:[%s8285_s8] ss:$0 sm:$0xff] }
 0x3c2   : > { %v8532_v42 = vsel %vm7751_vm10, 4294967295, %v8531_v42  ;;  %3758 = vmatpush.bf16.msrb.mxu1 %v5677_v38 }
 0x3c3   : > { %3586 = vmatmul.bf16.gmra.mxu0 %v3510_v10 }
 0x3c6   : > { %3759 = vmatpush.bf16.msrb.mxu1 %v5676_v46 }
 0x3ca   : > { %3760 = vmatpush.bf16.msrb.mxu1 %v5675_v62 }
 0x3ce   : > { %3761 = vmatpush.bf16.msrb.mxu1 %v5674_v9 }
 0x3d2   : > { %3762 = vmatpush.bf16.msrb.mxu1 %v5673_v14 }
 0x3e4   : > { %v3572_v30 = vpop.f32.mrf.mxu0 }
 0x3e5   : > { %v3573_v7 = vadd.f32 %v7777_v52, %v3572_v30  ;;  %v5672_v30 = vld [vmem:[%s8283_s6] sm:$0xff] }
 0x3e6   : > { %3763 = vmatpush.bf16.msrb.mxu1 %v5672_v30 }
 0x3e7   : > { %v3592_v53 = vmax.f32 %v3573_v7, 0.0 }
 0x3e9   : > { %v3600_v11 = vpack.c.bf16 %v3592_v53, %v3592_v53 }
 0x3eb   : > { %v3609_v49 = vunpack.c.l.bf16 %v3600_v11  ;;  %v3692_v62 = vunpack.c.l.b16 %v3600_v11 }
 0x3ec   : > { %v3574_v10 = vpop.f32.mrf.mxu0 }
 0x3ed   : > { %v3575_v47 = vadd.f32 %v7777_v52, %v3574_v10  ;;  %v3620_v57 = vmul.f32 %v7789_v37, %v3609_v49  ;;  %vm7801_vm13 = vcmp.gt.f32.partialorder %v3609_v49, 0.0 }
 0x3ef   : > { %v3593_v38 = vmax.f32 %v3575_v47, 0.0  ;;  %3628 = vadd.xlane.f32.xlu0 %v3620_v57 }
 0x3f1   : > { %v3601_v46 = vpack.c.bf16 %v3593_v38, %v3593_v38 }
 0x3f3   : > { %v3693_v9 = vunpack.c.l.b16 %v3601_v46  ;;  %v3610_v7 = vunpack.c.l.bf16 %v3601_v46 }
 0x3f5   : > { %v3700_v53 = vpack.c.b16 %v3693_v9, %v3692_v62  ;;  %v3621_v35 = vmul.f32 %v7789_v37, %v3610_v7  ;;  %vm7797_vm1 = vcmp.gt.f32.partialorder %v3610_v7, 0.0 }
 0x3f7   : > { %3630 = vadd.xlane.f32.xlu0 %v3621_v35  ;;  %3764 = vmatmul.bf16.vlgmr.msrb.gmra.mxu1 %v3700_v53 }
 0x412   : > { %v3577_v10 = vpop.f32.mrf.mxu0 }
 0x413   : > { %v3578_v11 = vadd.f32 %v7777_v52, %v3577_v10 }
 0x415   : > { %v3594_v57 = vmax.f32 %v3578_v11, 0.0 }
 0x417   : > { %v3602_v38 = vpack.c.bf16 %v3594_v57, %v3594_v57 }
 0x419   : > { %v3611_v35 = vunpack.c.l.bf16 %v3602_v38  ;;  %v3694_v7 = vunpack.c.l.b16 %v3602_v38 }
 0x41a   : > { %v3579_v46 = vpop.f32.mrf.mxu0 }
 0x41b   : > { %v3580_v62 = vadd.f32 %v7777_v52, %v3579_v46  ;;  %v3622_v9 = vmul.f32 %v7789_v37, %v3611_v35  ;;  %vm7812_vm11 = vcmp.gt.f32.partialorder %v3611_v35, 0.0  ;;  %v5731_v46 = vld [vmem:[%s8289_s12 + $0x18] sm:$0xff] }
 0x41d   : > { %v3595_v30 = vmax.f32 %v3580_v62, 0.0  ;;  %3632 = vadd.xlane.f32.xlu1 %v3622_v9 }
 0x41f   : > { %v3603_v49 = vpack.c.bf16 %v3595_v30, %v3595_v30 }
 0x421   : > { %v3695_v53 = vunpack.c.l.b16 %v3603_v49  ;;  %v3612_v25 = vunpack.c.l.bf16 %v3603_v49 }
 0x422   : > { %v3582_v10 = vpop.f32.mrf.mxu0 }
 0x423   : > { %v3583_v11 = vadd.f32 %v7777_v52, %v3582_v10  ;;  %v3701_v57 = vpack.c.b16 %v3695_v53, %v3694_v7  ;;  %v3623_v28 = vmul.f32 %v7789_v37, %v3612_v25  ;;  %vm7818_vm7 = vcmp.gt.f32.partialorder %v3612_v25, 0.0 }
 0x425   : > { %v3596_v38 = vmax.f32 %v3583_v11, 0.0  ;;  %3769 = vmatmul.bf16.gmra.mxu1 %v3701_v57  ;;  %3634 = vadd.xlane.f32.xlu1 %v3623_v28 }
 0x427   : > { %v3604_v35 = vpack.c.bf16 %v3596_v38, %v3596_v38 }
 0x429   : > { %v3613_v62 = vunpack.c.l.bf16 %v3604_v35  ;;  %v3696_v10 = vunpack.c.l.b16 %v3604_v35 }
 0x42a   : > { %v3584_v9 = vpop.f32.mrf.mxu0 }
 0x42b   : > { %v3585_v30 = vadd.f32 %v7777_v52, %v3584_v9  ;;  %v3624_v49 = vmul.f32 %v7789_v37, %v3613_v62  ;;  %vm7829_vm15 = vcmp.gt.f32.partialorder %v3613_v62, 0.0 }
 0x42d   : > { %v3597_v7 = vmax.f32 %v3585_v30, 0.0  ;;  %3636 = vadd.xlane.f32.xlu2 %v3624_v49 }
 0x42f   : > { %v3605_v25 = vpack.c.bf16 %v3597_v7, %v3597_v7 }
 0x431   : > { %v3614_v53 = vunpack.c.l.bf16 %v3605_v25  ;;  %v3697_v51 = vunpack.c.l.b16 %v3605_v25 }
 0x433   : > { %v3625_v22 = vmul.f32 %v7789_v37, %v3614_v53  ;;  %v3702_v12 = vpack.c.b16 %v3697_v51, %v3696_v10  ;;  %vm7833_vm9 = vcmp.gt.f32.partialorder %v3614_v53, 0.0  ;;  %v5687_v53 = vld [vmem:[%s8287_s10 + $0x38] sm:$0xff] }
 0x434   : > { %3949 = vmatpush.bf16.msra.mxu2 %v5687_v53 }
 0x435   : > { %3638 = vadd.xlane.f32.xlu2 %v3625_v22  ;;  %3774 = vmatmul.bf16.gmra.mxu1 %v3702_v12 }
 0x440   : > { %v3587_v57 = vpop.f32.mrf.mxu0 }
 0x441   : > { %v3588_v38 = vadd.f32 %v7777_v52, %v3587_v57  ;;  %v5686_v57 = vld [vmem:[%s8287_s10 + $0x30] sm:$0xff] }
 0x442   : > { %3950 = vmatpush.bf16.msra.mxu2 %v5686_v57 }
 0x443   : > { %v3598_v35 = vmax.f32 %v3588_v38, 0.0 }
 0x445   : > { %v3606_v51 = vpack.c.bf16 %v3598_v35, %v3598_v35  ;;  %v5710_v35 = vld [vmem:[%s8282_s5 + $0xb0] sm:$0xff] }
 0x447   : > { %v3615_v62 = vunpack.c.l.bf16 %v3606_v51  ;;  %v3698_v12 = vunpack.c.l.b16 %v3606_v51  ;;  %v5685_v51 = vld [vmem:[%s8287_s10 + $0x28] sm:$0xff] }
 0x448   : > { %v3589_v9 = vpop.f32.mrf.mxu0  ;;  %3951 = vmatpush.bf16.msra.mxu2 %v5685_v51 }
 0x449   : > { %v3590_v30 = vadd.f32 %v7777_v52, %v3589_v9  ;;  %v3626_v49 = vmul.f32 %v7789_v37, %v3615_v62  ;;  %vm7851_vm3 = vcmp.gt.f32.partialorder %v3615_v62, 0.0  ;;  %v5684_v62 = vld [vmem:[%s8287_s10 + $0x20] sm:$0xff] }
 0x44b   : > { %v3599_v7 = vmax.f32 %v3590_v30, 0.0  ;;  %3640 = vadd.xlane.f32.xlu1 %v3626_v49  ;;  %v7869_v49 = vld [vmem:[#allocation2] ss:$0 sm:$0xff] }
 0x44c   : > { %3952 = vmatpush.bf16.msra.mxu2 %v5684_v62  ;;  %v7884_v62 = vld [vmem:[%s8284_s7] ss:$0 sm:$0xff] }
 0x44d   : > { %v3607_v25 = vpack.c.bf16 %v3599_v7, %v3599_v7 }
 0x44f   : > { %v3616_v22 = vunpack.c.l.bf16 %v3607_v25  ;;  %v3699_v10 = vunpack.c.l.b16 %v3607_v25 }
 0x451   : > { %v3627_v38 = vmul.f32 %v7789_v37, %v3616_v22  ;;  %v3703_v52 = vpack.c.b16 %v3699_v10, %v3698_v12  ;;  %vm7855_vm4 = vcmp.gt.f32.partialorder %v3616_v22, 0.0  ;;  %v8365_v22 = vmov -1.0  }
 0x453   : > { %3642 = vadd.xlane.f32.xlu2 %v3627_v38  ;;  %3779 = vmatmul.bf16.gmra.mxu1 %v3703_v52  ;;  %v5683_v38 = vld [vmem:[%s8287_s10 + $0x18] sm:$0xff]  ;;  %v5682_v52 = vld [vmem:[%s8287_s10 + $0x10] sm:$0xff] }
 0x454   : > { %3953 = vmatpush.bf16.msra.mxu2 %v5683_v38 }
 0x458   : > { %3954 = vmatpush.bf16.msra.mxu2 %v5682_v52 }
 0x462   : > { %v3629_v30 = vpop.xlane.xlu0 %3628 }
 0x463   : > { %v3648_v7 = vadd.f32 %v7869_v49, %v3629_v30 }
 0x465   : > { %vm4015_vm8 = vcmp.ge.f32.partialorder %v3648_v7, 0.0 }
 0x466   : > { %v4023_v12 = vsel %vm4015_vm8, 1.0, %v8365_v22 }
 0x46a   : > { %v3631_v25 = vpop.xlane.xlu0 %3630 }
 0x46b   : > { %v3649_v53 = vadd.f32 %v7869_v49, %v3631_v25  ;;  %v5681_v25 = vld [vmem:[%s8287_s10 + $0x8] sm:$0xff] }
 0x46c   : > { %3955 = vmatpush.bf16.msra.mxu2 %v5681_v25 }
 0x46d   : > { %vm4016_vm10 = vcmp.ge.f32.partialorder %v3649_v53, 0.0  ;;  %v3657_v30 = vand.u32 2147483647, %v3649_v53 }
 0x46e   : > { %v4024_v10 = vsel %vm4016_vm10, 1.0, %v8365_v22 }
 0x46f   : > { %v5771_v57 = vpack.i.bf16 %v4024_v10, %v4023_v12  ;;  %v5680_v10 = vld [vmem:[%s8287_s10] sm:$0xff] }
 0x470   : > { %3956 = vmatpush.bf16.msra.mxu2 %v5680_v10 }
 0x471   : > { %5772 = vperm.xlu0 %5770, %v5771_v57  }
 0x474   : > { %v3765_v51 = vpop.f32.mrf.mxu1  ;;  %4408 = vmatpush.bf16.msrb.mxu2 %v5719_v23 }
 0x475   : > { %v3766_v12 = vadd.f32 %v7884_v62, %v3765_v51 }
 0x477   : > { %v3785_v38 = vpack.c.bf16 %v3766_v12, %v3766_v12 }
 0x478   : > { %4409 = vmatpush.bf16.msrb.mxu2 %v5718_v17 }
 0x479   : > { %4894 = vperm.xlu0 %5770, %v3657_v30   ;;  %v3801_v52 = vunpack.c.l.b16 %v3785_v38 }
 0x47c   : > { %v3767_v57 = vpop.f32.mrf.mxu1 }
 0x47d   : > { %v3768_v20 = vadd.f32 %v7884_v62, %v3767_v57 }
 0x47f   : > { %v3786_v22 = vpack.c.bf16 %v3768_v20, %v3768_v20 }
 0x481   : > { %v3802_v53 = vunpack.c.l.b16 %v3786_v22 }
 0x483   : > { %v3809_v15 = vpack.c.b16 %v3802_v53, %v3801_v52  ;;  %v3656_v52 = vand.u32 2147483647, %v3648_v7 }
 0x485   : > { %3957 = vmatmul.bf16.vlgmr.msra.gmra.mxu2 %v3809_v15 }
 0x490   : > { %v3633_v26 = vpop.xlane.xlu1 %3632 }
 0x491   : > { %v7895_v30 = vadd.f32 %v7869_v49, %v3633_v26 }
 0x493   : > { %vm4017_vm8 = vcmp.ge.f32.partialorder %v7895_v30, 0.0 }
 0x494   : > { %v4025_v12 = vsel %vm4017_vm8, 1.0, %v8549_v18 }
 0x498   : > { %v3635_v51 = vpop.xlane.xlu1 %3634 }
 0x499   : > { %v3651_v25 = vadd.f32 %v7869_v49, %v3635_v51 }
 0x49b   : > { %vm4018_vm10 = vcmp.ge.f32.partialorder %v3651_v25, 0.0  ;;  %v3659_v7 = vand.u32 2147483647, %v3651_v25  ;;  %v5702_v25 = vld [vmem:[%s8282_s5 + $0xf0] sm:$0xff] }
 0x49c   : > { %v4026_v57 = vsel %vm4018_vm10, 1.0, %v8549_v18 }
 0x49d   : > { %v5777_v10 = vpack.i.bf16 %v4026_v57, %v4025_v12 }
 0x49f   : > { %5778 = vperm.xlu1 %5776, %v5777_v10  }
 0x4a0   : > { %v3637_v20 = vpop.xlane.xlu2 %3636 }
 0x4a1   : > { %v3652_v22 = vadd.f32 %v7869_v49, %v3637_v20 }
 0x4a2   : > { %v3770_v15 = vpop.f32.mrf.mxu1 }
 0x4a3   : > { %v3660_v38 = vand.u32 2147483647, %v3652_v22  ;;  %v3771_v26 = vadd.f32 %v7884_v62, %v3770_v15  ;;  %vm4019_vm6 = vcmp.ge.f32.partialorder %v3652_v22, 0.0 }
 0x4a4   : > { %v4027_v57 = vsel %vm4019_vm6, 1.0, %v8549_v18 }
 0x4a5   : > { %4909 = vperm.xlu0 %5770, %v3660_v38   ;;  %v3787_v24 = vpack.c.bf16 %v3771_v26, %v3771_v26  ;;  %v5703_v26 = vld [vmem:[%s8282_s5 + $0xf8] sm:$0xff] }
 0x4a6   : > { %4164 = vmatpush.bf16.msra.mxu0 %v5703_v26  ;;  %v5700_v26 = vld [vmem:[%s8282_s5 + $0xe0] sm:$0xff] }
 0x4a7   : > { %4889 = vperm.xlu1 %5776, %v3656_v52   ;;  %v3803_v15 = vunpack.c.l.b16 %v3787_v24 }
 0x4a8   : > { %v3639_v53 = vpop.xlane.xlu2 %3638 }
 0x4a9   : > { %v7904_v51 = vadd.f32 %v7869_v49, %v3639_v53 }
 0x4aa   : > { %v3772_v16 = vpop.f32.mrf.mxu1  ;;  %4165 = vmatpush.bf16.msra.mxu0 %v5702_v25  ;;  %v5699_v25 = vld [vmem:[%s8282_s5 + $0xd8] sm:$0xff] }
 0x4ab   : > { %vm4020_vm8 = vcmp.ge.f32.partialorder %v7904_v51, 0.0  ;;  %v3773_v12 = vadd.f32 %v7884_v62, %v3772_v16 }
 0x4ac   : > { %v4028_v10 = vsel %vm4020_vm8, 1.0, %v8549_v18  ;;  %vm8550_vm8 = vmpackc.low %vm7797_vm1, %vm7801_vm13 }
 0x4ad   : > { %v3788_v20 = vpack.c.bf16 %v3773_v12, %v3773_v12  ;;  %v5783_v38 = vpack.i.bf16 %v4028_v10, %v4027_v57  ;;  %vm8551_vm13 = vmpackc.low %vm7818_vm7, %vm7812_vm11 }
 0x4ae   : > { %vm8552_vm7 = vmpackc.low %vm7833_vm9, %vm7829_vm15 }
 0x4af   : > { %v3804_v52 = vunpack.c.l.b16 %v3788_v20  ;;  %5784 = vperm.xlu2 %5782, %v5783_v38   ;;  %4904 = vperm.xlu1 %5776, %v3659_v7   ;;  %vm8553_vm9 = vmpackc.low %vm7855_vm4, %vm7851_vm3  ;;  %vm8556_vm3 = vnez %v8526_v58  ;;  %v5717_v58 = vld [vmem:[%s8282_s5 + $0x68] sm:$0xff] }
 0x4b0   : > { %vm8554_vm11 = vmpackc.low %vm7708_vm14, %vm7704_vm12  ;;  %4410 = vmatpush.bf16.msrb.mxu2 %v5717_v58  ;;  %vm8562_vm14 = vnez %v8502_v33  ;;  %v5726_v33 = vld [vmem:[%s8282_s5 + $0x30] sm:$0xff] }
 0x4b1   : > { %v3810_v22 = vpack.c.b16 %v3804_v52, %v3803_v15  ;;  %v5701_v15 = vld [vmem:[%s8282_s5 + $0xe8] sm:$0xff]  ;;  %vm8555_vm15 = vmpackc.low %vm7724_vm2, %vm7720_vm5  ;;  %vm8558_vm5 = vnez %v8532_v42  ;;  %vm8559_vm2 = vnez %v8530_v50  ;;  %v5714_v50 = vld [vmem:[%s8282_s5 + $0x50] sm:$0xff] }
 0x4b2   : > { %v3775_v53 = vpop.f32.mrf.mxu1  ;;  %4166 = vmatpush.bf16.msra.mxu0 %v5701_v15  ;;  %v3658_v15 = vand.u32 2147483647, %v7895_v30  ;;  %vm8557_vm4 = vmpackc.low %vm7737_vm0, %vm8556_vm3  ;;  %v5713_v42 = vld [vmem:[%s8282_s5 + $0x48] sm:$0xff]  ;;  %vm8561_vm0 = vnez %v8504_v34 }
 0x4b3   : > { %3962 = vmatmul.bf16.gmra.mxu2 %v3810_v22  ;;  %v3776_v16 = vadd.f32 %v7884_v62, %v3775_v53  ;;  %vm8560_vm12 = vmpackc.low %vm8558_vm5, %vm8559_vm2  ;;  %vm8574_vm5 = vnez %v8488_v21 }
 0x4b4   : > { %4411 = vmatpush.bf16.msrb.mxu2 %v5716_v60  ;;  %vm8563_vm1 = vmpackc.low %vm8561_vm0, %vm8562_vm14  ;;  %vm8577_vm0 = vnez %v8494_v4  ;;  %v5740_v4 = vld [vmem:[%s8289_s12 + $0x60] sm:$0xff] }
 0x4b5   : > { %v3789_v10 = vpack.c.bf16 %v3776_v16, %v3776_v16 }
 0x4b6   : > { %4167 = vmatpush.bf16.msra.mxu0 %v5700_v26 }
 0x4b7   : > { %v3805_v52 = vunpack.c.l.b16 %v3789_v10 }
 0x4ba   : > { %v3777_v57 = vpop.f32.mrf.mxu1  ;;  %4168 = vmatpush.bf16.msra.mxu0 %v5699_v25 }
 0x4bb   : > { %v3778_v7 = vadd.f32 %v7884_v62, %v3777_v57 }
 0x4bd   : > { %v3790_v38 = vpack.c.bf16 %v3778_v7, %v3778_v7 }
 0x4be   : > { %v3641_v12 = vpop.xlane.xlu1 %3640 }
 0x4bf   : > { %v3654_v24 = vadd.f32 %v7869_v49, %v3641_v12  ;;  %v3806_v22 = vunpack.c.l.b16 %v3790_v38 }
 0x4c1   : > { %v3662_v20 = vand.u32 2147483647, %v3654_v24  ;;  %v3811_v53 = vpack.c.b16 %v3806_v22, %v3805_v52  ;;  %vm4021_vm6 = vcmp.ge.f32.partialorder %v3654_v24, 0.0  ;;  %v5698_v24 = vld [vmem:[%s8282_s5 + $0xd0] sm:$0xff] }
 0x4c2   : > { %v4029_v10 = vsel %vm4021_vm6, 1.0, %v8549_v18  ;;  %4169 = vmatpush.bf16.msra.mxu0 %v5698_v24  ;;  %vm8564_vm6 = vnez %v8508_v32 }
 0x4c3   : > { %4919 = vperm.xlu1 %5776, %v3662_v20   ;;  %3967 = vmatmul.bf16.gmra.mxu2 %v3811_v53 }
 0x4c6   : > { %v3643_v12 = vpop.xlane.xlu2 %3642 }
 0x4c7   : > { %v3655_v16 = vadd.f32 %v7869_v49, %v3643_v12  ;;  %v5697_v49 = vld [vmem:[%s8282_s5 + $0xc8] sm:$0xff]  ;;  %v3661_v12 = vand.u32 2147483647, %v7904_v51 }
 0x4c8   : > { %4170 = vmatpush.bf16.msra.mxu0 %v5697_v49 }
 0x4c9   : > { %v3663_v57 = vand.u32 2147483647, %v3655_v16  ;;  %vm4022_vm10 = vcmp.ge.f32.partialorder %v3655_v16, 0.0 }
 0x4ca   : > { %v4030_v7 = vsel %vm4022_vm10, 1.0, %v8549_v18  ;;  %v5696_v18 = vld [vmem:[%s8282_s5 + $0xc0] sm:$0xff]  ;;  %vm8565_vm10 = vnez %v8506_v63 }
 0x4cb   : > { %4924 = vperm.xlu0 %5770, %v3663_v57   ;;  %v5788_v20 = vpack.i.bf16 %v4030_v7, %v4029_v10  ;;  %v5724_v63 = vld [vmem:[%s8282_s5 + $0x20] sm:$0xff] }
 0x4cc   : > { %4171 = vmatpush.bf16.msra.mxu0 %v5696_v18 }
 0x4cd   : > { %5789 = vperm.xlu2 %5782, %v5788_v20  }
 0x4d0   : > { %v3780_v38 = vpop.f32.mrf.mxu1 }
 0x4d1   : > { %v3781_v52 = vadd.f32 %v7884_v62, %v3780_v38 }
 0x4d3   : > { %v3791_v26 = vpack.c.bf16 %v3781_v52, %v3781_v52  ;;  %v5734_v52 = vld [vmem:[%s8289_s12 + $0x30] sm:$0xff] }
 0x4d5   : > { %4899 = vperm.xlu2 %5782, %v3658_v15   ;;  %v3807_v25 = vunpack.c.l.b16 %v3791_v26  ;;  %v5733_v26 = vld [vmem:[%s8289_s12 + $0x28] sm:$0xff] }
 0x4d8   : > { %v3782_v22 = vpop.f32.mrf.mxu1 }
 0x4d9   : > { %v3783_v53 = vadd.f32 %v7884_v62, %v3782_v22  ;;  %v5735_v62 = vld [vmem:[%s8289_s12 + $0x38] sm:$0xff] }
 0x4da   : > { %4786 = vmatpush.bf16.msrb.mxu0 %v5735_v62 }
 0x4db   : > { %v3792_v16 = vpack.c.bf16 %v3783_v53, %v3783_v53 }
 0x4dd   : > { %v3808_v57 = vunpack.c.l.b16 %v3792_v16  ;;  %4914 = vperm.xlu2 %5782, %v3661_v12   ;;  %v5732_v12 = vld [vmem:[%s8289_s12 + $0x20] sm:$0xff] }
 0x4de   : > { %4787 = vmatpush.bf16.msrb.mxu0 %v5734_v52  ;;  %v7992_v52 = vld [vmem:[%s8288_s11] ss:$0 sm:$0xff] }
 0x4df   : > { %v3812_v30 = vpack.c.b16 %v3808_v57, %v3807_v25 }
 0x4e1   : > { %3972 = vmatmul.bf16.gmra.mxu2 %v3812_v30 }
 0x4e2   : > { %4788 = vmatpush.bf16.msrb.mxu0 %v5733_v26 }
 0x4e3   : > { %v5773_v10 = vpop.permute.xlu0 %5772 }
 0x4e4   : > { %v5775_v7 = vunpack.i.h.bf16 %v5773_v10  ;;  %v5774_v20 = vunpack.i.l.bf16 %v5773_v10  ;;  %v3987_v10 = vpop.f32.mrf.mxu3 }
 0x4e6   : > { %v4072_v24 = vmul.f32 %v7789_v37, %v5775_v7  ;;  %v4071_v49 = vmul.f32 %v7789_v37, %v5774_v20  ;;  %4789 = vmatpush.bf16.msrb.mxu0 %v5732_v12  ;;  %v5730_v7 = vld [vmem:[%s8289_s12 + $0x10] sm:$0xff] }
 0x4e8   : > { %v5399_v38 = vpack.c.bf16 %v4072_v24, %v4071_v49  ;;  %v5729_v24 = vld [vmem:[%s8289_s12 + $0x8] sm:$0xff] }
 0x4ea   : > { %5400 = vmatmul.msk.bf16.vlgmr.msra.gmra.mxu0 %vm8550_vm8, %v5399_v38  ;;  %v5728_v38 = vld [vmem:[%s8289_s12] sm:$0xff]  ;;  %vm8566_vm8 = vmpackc.low %vm8564_vm6, %vm8565_vm10  ;;  %vm8580_vm6 = vnez %v8490_v59  ;;  %v5737_v59 = vld [vmem:[%s8289_s12 + $0x48] sm:$0xff] }
 0x4eb   : > { %4790 = vmatpush.bf16.msrb.mxu0 %v5731_v46 }
 0x4ef   : > { %4791 = vmatpush.bf16.msrb.mxu0 %v5730_v7 }
 0x4f3   : > { %4792 = vmatpush.bf16.msrb.mxu0 %v5729_v24 }
 0x4f7   : > { %4793 = vmatpush.bf16.msrb.mxu0 %v5728_v38 }
 0x508   : > { %v3958_v30 = vpop.f32.mrf.mxu2 }
 0x509   : > { %v5785_v53 = vpop.permute.xlu2 %5784 }
 0x50a   : > { %v5787_v16 = vunpack.i.h.bf16 %v5785_v53  ;;  %v5786_v25 = vunpack.i.l.bf16 %v5785_v53 }
 0x50c   : > { %v4076_v2 = vmul.f32 %v7789_v37, %v5787_v16  ;;  %v4075_v57 = vmul.f32 %v7789_v37, %v5786_v25  ;;  %v5711_v16 = vld [vmem:[%s8282_s5 + $0xb8] sm:$0xff] }
 0x50d   : > { %4286 = vmatpush.bf16.msra.mxu1 %v5711_v16 }
 0x50e   : > { %v5405_v20 = vpack.c.bf16 %v4076_v2, %v4075_v57 }
 0x510   : > { %v3960_v62 = vpop.f32.mrf.mxu2 }
 0x511   : > { %v5779_v51 = vpop.permute.xlu1 %5778  ;;  %4287 = vmatpush.bf16.msra.mxu1 %v5710_v35  ;;  %v5704_v35 = vld [vmem:[%s8282_s5 + $0x80] sm:$0xff] }
 0x512   : > { %v5781_v15 = vunpack.i.h.bf16 %v5779_v51  ;;  %v5780_v18 = vunpack.i.l.bf16 %v5779_v51  ;;  %v3989_v51 = vpop.f32.mrf.mxu3 }
 0x514   : > { %v4074_v22 = vmul.f32 %v7789_v37, %v5781_v15  ;;  %v4073_v14 = vmul.f32 %v7789_v37, %v5780_v18 }
 0x516   : > { %v5402_v47 = vpack.c.bf16 %v4074_v22, %v4073_v14  ;;  %v3961_v22 = vadd.f32 %v7992_v52, %v3960_v62  ;;  %v3959_v14 = vadd.f32 %v7992_v52, %v3958_v30 }
 0x518   : > { %5403 = vmatmul.msk.bf16.gmra.mxu0 %vm8551_vm13, %v5402_v47  ;;  %v3990_v47 = vadd.f32 %v3989_v51, %v3961_v22  ;;  %v3988_v25 = vadd.f32 %v3987_v10, %v3959_v14  ;;  %vm8567_vm13 = vnez %v8512_v45 }
 0x51a   : > { %v3992_v12 = vpop.f32.mrf.mxu3  ;;  %v4007_v46 = vmax.f32 %v3988_v25, 0.0 }
 0x51c   : > { %v4598_v30 = vpack.c.bf16 %v4007_v46, %v4007_v46 }
 0x522   : > { %v3994_v7 = vpop.f32.mrf.mxu3 }
 0x527   : > { %v5790_v49 = vpop.permute.xlu2 %5789 }
 0x528   : > { %5406 = vmatmul.msk.bf16.gmra.mxu0 %vm8552_vm7, %v5405_v20  ;;  %v5792_v15 = vunpack.i.h.bf16 %v5790_v49  ;;  %v5791_v18 = vunpack.i.l.bf16 %v5790_v49  ;;  %v4614_v49 = vunpack.c.l.b16 %v4598_v30  ;;  %vm8568_vm7 = vnez %v8510_v1  ;;  %v5720_v1 = vld [vmem:[%s8282_s5] sm:$0xff] }
 0x52a   : > { %v4078_v11 = vmul.f32 %v7789_v37, %v5792_v15  ;;  %v4077_v28 = vmul.f32 %v7789_v37, %v5791_v18  ;;  %v4008_v37 = vmax.f32 %v3990_v47, 0.0  ;;  %v3997_v18 = vpop.f32.mrf.mxu3  ;;  %v5709_v47 = vld [vmem:[%s8282_s5 + $0xa8] sm:$0xff] }
 0x52b   : > { %4288 = vmatpush.bf16.msra.mxu1 %v5709_v47 }
 0x52c   : > { %v5408_v53 = vpack.c.bf16 %v4078_v11, %v4077_v28  ;;  %v4599_v2 = vpack.c.bf16 %v4008_v37, %v4008_v37 }
 0x52e   : > { %v4615_v20 = vunpack.c.l.b16 %v4599_v2 }
 0x530   : > { %v4622_v10 = vpack.c.b16 %v4615_v20, %v4614_v49  ;;  %v5706_v20 = vld [vmem:[%s8282_s5 + $0x90] sm:$0xff] }
 0x532   : > { %v3999_v37 = vpop.f32.mrf.mxu3 }
 0x536   : > { %v3963_v26 = vpop.f32.mrf.mxu2 }
 0x537   : > { %v3964_v38 = vadd.f32 %v7992_v52, %v3963_v26 }
 0x538   : > { %5409 = vmatmul.msk.bf16.gmra.mxu0 %vm8553_vm9, %v5408_v53  ;;  %vm8569_vm9 = vmpackc.low %vm8567_vm13, %vm8568_vm7  ;;  %vm8583_vm13 = vnez %v8498_v8 }
 0x539   : > { %v3993_v51 = vadd.f32 %v3992_v12, %v3964_v38  ;;  %v5708_v12 = vld [vmem:[%s8282_s5 + $0xa0] sm:$0xff]  ;;  %v5705_v38 = vld [vmem:[%s8282_s5 + $0x88] sm:$0xff] }
 0x53a   : > { %4289 = vmatpush.bf16.msra.mxu1 %v5708_v12 }
 0x53b   : > { %v4009_v11 = vmax.f32 %v3993_v51, 0.0 }
 0x53d   : > { %v4600_v14 = vpack.c.bf16 %v4009_v11, %v4009_v11 }
 0x53e   : > { %v3965_v57 = vpop.f32.mrf.mxu2 }
 0x53f   : > { %v3966_v24 = vadd.f32 %v7992_v52, %v3965_v57  ;;  %v4616_v25 = vunpack.c.l.b16 %v4600_v14  ;;  %v5707_v57 = vld [vmem:[%s8282_s5 + $0x98] sm:$0xff] }
 0x540   : > { %4290 = vmatpush.bf16.msra.mxu1 %v5707_v57 }
 0x541   : > { %v3995_v62 = vadd.f32 %v3994_v7, %v3966_v24 }
 0x543   : > { %v4010_v15 = vmax.f32 %v3995_v62, 0.0 }
 0x544   : > { %4291 = vmatpush.bf16.msra.mxu1 %v5706_v20 }
 0x545   : > { %v4601_v28 = vpack.c.bf16 %v4010_v15, %v4010_v15 }
 0x546   : > { %v3968_v9 = vpop.f32.mrf.mxu2 }
 0x547   : > { %v4617_v53 = vunpack.c.l.b16 %v4601_v28  ;;  %v3969_v16 = vadd.f32 %v7992_v52, %v3968_v9 }
 0x548   : > { %4794 = vmatmul.bf16.vlgmr.msrb.gmra.mxu0 %v4622_v10  ;;  %v4002_v10 = vpop.f32.mrf.mxu3  ;;  %4292 = vmatpush.bf16.msra.mxu1 %v5705_v38 }
 0x549   : > { %v4623_v2 = vpack.c.b16 %v4617_v53, %v4616_v25  ;;  %v3998_v30 = vadd.f32 %v3997_v18, %v3969_v16 }
 0x54b   : > { %v4011_v24 = vmax.f32 %v3998_v30, 0.0 }
 0x54c   : > { %4293 = vmatpush.bf16.msra.mxu1 %v5704_v35 }
 0x54d   : > { %v4602_v62 = vpack.c.bf16 %v4011_v24, %v4011_v24 }
 0x54e   : > { %v3970_v22 = vpop.f32.mrf.mxu2 }
 0x54f   : > { %v3971_v26 = vadd.f32 %v7992_v52, %v3970_v22  ;;  %v4618_v15 = vunpack.c.l.b16 %v4602_v62 }
 0x550   : > { %v4004_v47 = vpop.f32.mrf.mxu3 }
 0x551   : > { %v4000_v46 = vadd.f32 %v3999_v37, %v3971_v26 }
 0x553   : > { %v4012_v7 = vmax.f32 %v4000_v46, 0.0 }
 0x555   : > { %v4603_v49 = vpack.c.bf16 %v4012_v7, %v4012_v7 }
 0x557   : > { %v4619_v51 = vunpack.c.l.b16 %v4603_v49 }
 0x558   : > { %4799 = vmatmul.bf16.gmra.mxu0 %v4623_v2 }
 0x559   : > { %v4624_v11 = vpack.c.b16 %v4619_v51, %v4618_v15  ;;  %v5712_v51 = vld [vmem:[%s8282_s5 + $0x40] sm:$0xff] }
 0x564   : > { %v3973_v9 = vpop.f32.mrf.mxu2 }
 0x565   : > { %v3974_v18 = vadd.f32 %v7992_v52, %v3973_v9  ;;  %v5715_v9 = vld [vmem:[%s8282_s5 + $0x58] sm:$0xff] }
 0x566   : > { %4412 = vmatpush.bf16.msrb.mxu2 %v5715_v9 }
 0x567   : > { %v4003_v28 = vadd.f32 %v4002_v10, %v3974_v18  ;;  %v4173_v53 = vpop.f32.mrf.mxu0 }
 0x568   : > { %4804 = vmatmul.bf16.gmra.mxu0 %v4624_v11 }
 0x569   : > { %v4013_v12 = vmax.f32 %v4003_v28, 0.0 }
 0x56a   : > { %4413 = vmatpush.bf16.msrb.mxu2 %v5714_v50 }
 0x56b   : > { %v4604_v37 = vpack.c.bf16 %v4013_v12, %v4013_v12  ;;  %v5722_v12 = vld [vmem:[%s8282_s5 + $0x10] sm:$0xff] }
 0x56c   : > { %v3975_v22 = vpop.f32.mrf.mxu2 }
 0x56d   : > { %v3976_v14 = vadd.f32 %v7992_v52, %v3975_v22  ;;  %v4620_v57 = vunpack.c.l.b16 %v4604_v37 }
 0x56e   : > { %4414 = vmatpush.bf16.msrb.mxu2 %v5713_v42 }
 0x56f   : > { %v4005_v26 = vadd.f32 %v4004_v47, %v3976_v14  ;;  %v4175_v2 = vpop.f32.mrf.mxu0  ;;  %v5727_v14 = vld [vmem:[%s8282_s5 + $0x38] sm:$0xff]  ;;  %v5725_v47 = vld [vmem:[%s8282_s5 + $0x28] sm:$0xff] }
 0x570   : > { %v5459_v30 = vpack.c.bf16 %v4175_v2, %v4173_v53  ;;  %4529 = vmatpush.bf16.msrb.mxu3 %v5727_v14  ;;  %v5723_v53 = vld [vmem:[%s8282_s5 + $0x18] sm:$0xff] }
 0x571   : > { %v4014_v16 = vmax.f32 %v4005_v26, 0.0 }
 0x572   : > { %5460 = vmatmul.msk.bf16.vlgmr.msra.gmra.mxu1 %vm8554_vm11, %v5459_v30  ;;  %4415 = vmatpush.bf16.msrb.mxu2 %v5712_v51  ;;  %vm8570_vm11 = vnez %v8516_v5 }
 0x573   : > { %v4605_v25 = vpack.c.bf16 %v4014_v16, %v4014_v16 }
 0x574   : > { %4530 = vmatpush.bf16.msrb.mxu3 %v5726_v33 }
 0x575   : > { %v4621_v46 = vunpack.c.l.b16 %v4605_v25  ;;  %v5721_v25 = vld [vmem:[%s8282_s5 + $0x8] sm:$0xff] }
 0x577   : > { %v4625_v7 = vpack.c.b16 %v4621_v46, %v4620_v57 }
 0x578   : > { %4531 = vmatpush.bf16.msrb.mxu3 %v5725_v47  ;;  %v8591_v47 = vld [vmem:[#allocation14_spill] sm:$0xff] }
 0x579   : > { %4809 = vmatmul.bf16.gmra.mxu0 %v4625_v7 }
 0x57c   : > { %4532 = vmatpush.bf16.msrb.mxu3 %v5724_v63 }
 0x580   : > { %4533 = vmatpush.bf16.msrb.mxu3 %v5723_v53 }
 0x584   : > { %4534 = vmatpush.bf16.msrb.mxu3 %v5722_v12 }
 0x588   : > { %4535 = vmatpush.bf16.msrb.mxu3 %v5721_v25  ;;  %v8594_v25 = vld [vmem:[#allocation9_spill] sm:$0xff] }
 0x58c   : > { %4536 = vmatpush.bf16.msrb.mxu3 %v5720_v1  ;;  %v8596_v1 = vld [vmem:[#allocation15_spill] sm:$0xff] }
 0x595   : > { %v4178_v52 = vpop.f32.mrf.mxu0 }
 0x59d   : > { %v4180_v20 = vpop.f32.mrf.mxu0 }
 0x59e   : > { %v5462_v24 = vpack.c.bf16 %v4180_v20, %v4178_v52  ;;  %v5741_v52 = vld [vmem:[%s8289_s12 + $0x68] sm:$0xff] }
 0x5a0   : > { %5463 = vmatmul.msk.bf16.gmra.mxu1 %vm8555_vm15, %v5462_v24  ;;  %vm8571_vm15 = vnez %v8514_v55  ;;  %v5743_v55 = vld [vmem:[%s8289_s12 + $0x78] sm:$0xff] }
 0x5a1   : > { %vm8572_vm3 = vmpackc.low %vm8570_vm11, %vm8571_vm15  ;;  %4815 = vmatpush.bf16.msrb.mxu1 %v5743_v55  ;;  %v5739_v24 = vld [vmem:[%s8289_s12 + $0x58] sm:$0xff] }
 0x5a5   : > { %v4183_v49 = vpop.f32.mrf.mxu0 }
 0x5ad   : > { %v4185_v38 = vpop.f32.mrf.mxu0 }
 0x5ae   : > { %v5465_v10 = vpack.c.bf16 %v4185_v38, %v4183_v49  ;;  %v5738_v49 = vld [vmem:[%s8289_s12 + $0x50] sm:$0xff] }
 0x5b0   : > { %5466 = vmatmul.msk.bf16.gmra.mxu1 %vm8557_vm4, %v5465_v10  ;;  %vm8573_vm4 = vnez %v8486_v56  ;;  %v5742_v56 = vld [vmem:[%s8289_s12 + $0x70] sm:$0xff] }
 0x5b1   : > { %vm8575_vm2 = vmpackc.low %vm8573_vm4, %vm8574_vm5  ;;  %4816 = vmatpush.bf16.msrb.mxu1 %v5742_v56  ;;  %v8208_v56 = vld [vmem:[%s8290_s13] ss:$0 sm:$0xff] }
 0x5b5   : > { %v4188_v6 = vpop.f32.mrf.mxu0  ;;  %4817 = vmatpush.bf16.msrb.mxu1 %v5741_v52 }
 0x5b9   : > { %4818 = vmatpush.bf16.msrb.mxu1 %v5740_v4 }
 0x5bd   : > { %v4190_v0 = vpop.f32.mrf.mxu0  ;;  %4819 = vmatpush.bf16.msrb.mxu1 %v5739_v24 }
 0x5be   : > { %v5468_v62 = vpack.c.bf16 %v4190_v0, %v4188_v6 }
 0x5c0   : > { %5469 = vmatmul.msk.bf16.gmra.mxu1 %vm8560_vm12, %v5468_v62  ;;  %vm8576_vm12 = vnez %v8496_v44 }
 0x5c1   : > { %vm8578_vm14 = vmpackc.low %vm8576_vm12, %vm8577_vm0  ;;  %4820 = vmatpush.bf16.msrb.mxu1 %v5738_v49 }
 0x5c5   : > { %4821 = vmatpush.bf16.msrb.mxu1 %v5737_v59  ;;  %v4795_v55 = vpop.f32.mrf.mxu0 }
 0x5ef   : > { %v4295_v35 = vpop.f32.mrf.mxu1 }
 0x5f7   : > { %v4297_v15 = vpop.f32.mrf.mxu1 }
 0x5f8   : > { %v5519_v18 = vpack.c.bf16 %v4297_v15, %v4295_v35 }
 0x5fa   : > { %5520 = vmatmul.msk.bf16.vlgmr.msrb.gmra.mxu2 %vm8563_vm1, %v5519_v18  ;;  %vm8579_vm1 = vnez %v8492_v13  ;;  %v5736_v13 = vld [vmem:[%s8289_s12 + $0x40] sm:$0xff] }
 0x5fb   : > { %vm8581_vm10 = vmpackc.low %vm8579_vm1, %vm8580_vm6  ;;  %4822 = vmatpush.bf16.msrb.mxu1 %v5736_v13 }
 0x61d   : > { %v4300_v11 = vpop.f32.mrf.mxu1 }
 0x625   : > { %v4302_v28 = vpop.f32.mrf.mxu1 }
 0x626   : > { %v5522_v22 = vpack.c.bf16 %v4302_v28, %v4300_v11 }
 0x628   : > { %5523 = vmatmul.msk.bf16.gmra.mxu2 %vm8566_vm8, %v5522_v22  ;;  %vm8582_vm8 = vnez %v8500_v3 }
 0x629   : > { %vm8584_vm7 = vmpackc.low %vm8582_vm8, %vm8583_vm13 }
 0x62d   : > { %v4305_v34 = vpop.f32.mrf.mxu1 }
 0x635   : > { %v4307_v32 = vpop.f32.mrf.mxu1 }
 0x636   : > { %v5525_v26 = vpack.c.bf16 %v4307_v32, %v4305_v34 }
 0x638   : > { %5526 = vmatmul.msk.bf16.gmra.mxu2 %vm8569_vm9, %v5525_v26  ;;  %vm8585_vm9 = vnez %v8468_v29 }
 0x639   : > { %v8586_v3 = vsel %vm8585_vm9, %v7121_v41, %v7312_v43  ;;  %v8587_v17 = vsel %vm8585_vm9, %v7201_v48, %v7353_v31  ;;  %v8588_v41 = vsel %vm8585_vm9, %v7307_v39, %v7409_v36  ;;  %v8589_v48 = vsel %vm8585_vm9, %v7381_v27, %v7421_v19 }
 0x63a   : > { %v8590_v39 = vsel %vm8585_vm9, %v7179_v54, %v7347_v40  ;;  %v8592_v27 = vsel %vm8585_vm9, %v7232_v61, %v8591_v47 }
 0x63d   : > { %v4310_v16 = vpop.f32.mrf.mxu1 }
 0x645   : > { %v4312_v37 = vpop.f32.mrf.mxu1 }
 0x646   : > { %v5528_v46 = vpack.c.bf16 %v4312_v37, %v4310_v16  ;;  %v8593_v16 = vld [vmem:[#allocation16_spill] sm:$0xff] }
 0x647   : > { %v8595_v54 = vsel %vm8585_vm9, %v8593_v16, %v8594_v25  ;;  %v4900_v25 = vpop.permute.xlu2 %4899 }
 0x648   : > { %5529 = vmatmul.msk.bf16.gmra.mxu2 %vm8572_vm3, %v5528_v46 }
 0x67d   : > { %v4417_v45 = vpop.f32.mrf.mxu2 }
 0x685   : > { %v4419_v2 = vpop.f32.mrf.mxu2 }
 0x686   : > { %v5563_v57 = vpack.c.bf16 %v4419_v2, %v4417_v45  ;;  %v8597_v45 = vld [vmem:[#allocation8_spill] sm:$0xff] }
 0x687   : > { %v8598_v61 = vsel %vm8585_vm9, %v8596_v1, %v8597_v45 }
 0x688   : > { %5564 = vmatmul.msk.bf16.vlgmr.msrb.gmra.mxu3 %vm8575_vm2, %v5563_v57 }
 0x6ab   : > { %v4422_v30 = vpop.f32.mrf.mxu2 }
 0x6b3   : > { %v4424_v5 = vpop.f32.mrf.mxu2 }
 0x6b4   : > { %v5566_v7 = vpack.c.bf16 %v4424_v5, %v4422_v30 }
 0x6b6   : > { %5567 = vmatmul.msk.bf16.gmra.mxu3 %vm8578_vm14, %v5566_v7 }
 0x6bb   : > { %v4427_v21 = vpop.f32.mrf.mxu2 }
 0x6c3   : > { %v4429_v44 = vpop.f32.mrf.mxu2 }
 0x6c4   : > { %v5569_v20 = vpack.c.bf16 %v4429_v44, %v4427_v21  ;;  %v4796_v21 = vadd.f32 %v8208_v56, %v4795_v55  ;;  %v4797_v44 = vpop.f32.mrf.mxu0 }
 0x6c5   : > { %v4798_v24 = vadd.f32 %v8208_v56, %v4797_v44 }
 0x6c6   : > { %5570 = vmatmul.msk.bf16.gmra.mxu3 %vm8581_vm10, %v5569_v20 }
 0x6cb   : > { %v4432_v38 = vpop.f32.mrf.mxu2 }
 0x6d3   : > { %v4434_v10 = vpop.f32.mrf.mxu2 }
 0x6d4   : > { %v5572_v6 = vpack.c.bf16 %v4434_v10, %v4432_v38  ;;  %v4884_v10 = vlaneseq }
 0x6d6   : > { %5573 = vmatmul.msk.bf16.gmra.mxu3 %vm8584_vm7, %v5572_v6 }
 0x70b   : > { %v4538_v23 = vpop.f32.mrf.mxu3 }
 0x70c   : > { %v4582_v0 = vmul.f32 %v8586_v3, %v4538_v23  ;;  %v8212_v3 = vand.u32 127, %v4884_v10 }
 0x70e   : > { %v4590_v62 = vpack.c.bf16 %v4582_v0, %v4582_v0  ;;  %vm4935_vm11 = vcmp.ge.s32.totalorder %v8212_v3, 5  ;;  %vm4936_vm15 = vcmp.lt.s32.totalorder %v8212_v3, 8  ;;  %vm4886_vm3 = vcmp.eq.s32.totalorder %v8212_v3, 0 }
 0x70f   : > { %vm8217_vm4 = vmand %vm4935_vm11, %vm4936_vm15 }
 0x710   : > { %v4638_v9 = vunpack.c.l.b16 %v4590_v62 }
 0x713   : > { %v4540_v8 = vpop.f32.mrf.mxu3 }
 0x714   : > { %v4583_v58 = vmul.f32 %v8587_v17, %v4540_v8  ;;  %v4890_v17 = vpop.permute.xlu1 %4889 }
 0x716   : > { %v4591_v60 = vpack.c.bf16 %v4583_v58, %v4583_v58 }
 0x718   : > { %v4639_v50 = vunpack.c.l.b16 %v4591_v60 }
 0x71a   : > { %v4646_v42 = vpack.c.b16 %v4639_v50, %v4638_v9  ;;  %v4800_v50 = vpop.f32.mrf.mxu0 }
 0x71c   : > { %4823 = vmatmul.bf16.vlgmr.msrb.gmra.mxu1 %v4646_v42 }
 0x739   : > { %v4543_v51 = vpop.f32.mrf.mxu3 }
 0x73a   : > { %v4584_v43 = vmul.f32 %v8588_v41, %v4543_v51  ;;  %v4895_v51 = vpop.permute.xlu0 %4894 }
 0x73c   : > { %v4592_v15 = vpack.c.bf16 %v4584_v43, %v4584_v43 }
 0x73e   : > { %v4640_v11 = vunpack.c.l.b16 %v4592_v15  ;;  %v4801_v15 = vadd.f32 %v8208_v56, %v4800_v50 }
 0x741   : > { %v4545_v35 = vpop.f32.mrf.mxu3 }
 0x742   : > { %v4585_v31 = vmul.f32 %v8589_v48, %v4545_v35  ;;  %v4802_v35 = vpop.f32.mrf.mxu0 }
 0x744   : > { %v4593_v18 = vpack.c.bf16 %v4585_v31, %v4585_v31 }
 0x746   : > { %v4641_v28 = vunpack.c.l.b16 %v4593_v18 }
 0x748   : > { %v4647_v22 = vpack.c.b16 %v4641_v28, %v4640_v11 }
 0x749   : > { %v4548_v14 = vpop.f32.mrf.mxu3 }
 0x74a   : > { %4828 = vmatmul.bf16.gmra.mxu1 %v4647_v22  ;;  %v4586_v36 = vmul.f32 %v8590_v39, %v4548_v14  ;;  %v4805_v28 = vpop.f32.mrf.mxu0  ;;  %v4803_v22 = vadd.f32 %v8208_v56, %v4802_v35 }
 0x74c   : > { %v4594_v34 = vpack.c.bf16 %v4586_v36, %v4586_v36 }
 0x74e   : > { %v4642_v32 = vunpack.c.l.b16 %v4594_v34 }
 0x751   : > { %v4550_v33 = vpop.f32.mrf.mxu3 }
 0x752   : > { %v4587_v19 = vmul.f32 %v8592_v27, %v4550_v33  ;;  %v4806_v27 = vadd.f32 %v8208_v56, %v4805_v28 }
 0x754   : > { %v4595_v63 = vpack.c.bf16 %v4587_v19, %v4587_v19  ;;  %v4807_v19 = vpop.f32.mrf.mxu0 }
 0x756   : > { %v4643_v26 = vunpack.c.l.b16 %v4595_v63 }
 0x758   : > { %v4648_v53 = vpack.c.b16 %v4643_v26, %v4642_v32 }
 0x759   : > { %v4553_v12 = vpop.f32.mrf.mxu3 }
 0x75a   : > { %4833 = vmatmul.bf16.gmra.mxu1 %v4648_v53  ;;  %v4588_v40 = vmul.f32 %v8595_v54, %v4553_v12 }
 0x75c   : > { %v4596_v46 = vpack.c.bf16 %v4588_v40, %v4588_v40  ;;  %v4808_v40 = vadd.f32 %v8208_v56, %v4807_v19 }
 0x75e   : > { %v4644_v30 = vunpack.c.l.b16 %v4596_v46 }
 0x761   : > { %v4555_v37 = vpop.f32.mrf.mxu3 }
 0x762   : > { %v4589_v2 = vmul.f32 %v8598_v61, %v4555_v37  ;;  %v4810_v61 = vpop.f32.mrf.mxu0 }
 0x764   : > { %v4597_v57 = vpack.c.bf16 %v4589_v2, %v4589_v2 }
 0x766   : > { %v4645_v5 = vunpack.c.l.b16 %v4597_v57 }
 0x768   : > { %v4649_v7 = vpack.c.b16 %v4645_v5, %v4644_v30 }
 0x76a   : > { %4838 = vmatmul.bf16.gmra.mxu1 %v4649_v7  ;;  %v4905_v7 = vpop.permute.xlu1 %4904 }
 0x799   : > { %v4824_v52 = vpop.f32.mrf.mxu1 }
 0x79a   : > { %v4825_v4 = vadd.f32 %v4824_v52, %v4796_v21  ;;  %v4811_v21 = vadd.f32 %v8208_v56, %v4810_v61 }
 0x79c   : > { %v4844_v29 = vsub.f32 0.0, %v4825_v4 }
 0x79e   : > { %v4852_v20 = vmul.f32 1.442695, %v4844_v29 }
 0x7a0   : > { %5802 = vpow2.f32 %v4852_v20 }
 0x7a1   : > { %v4826_v49 = vpop.f32.mrf.mxu1 }
 0x7a2   : > { %v4827_v38 = vadd.f32 %v4826_v49, %v4798_v24  ;;  %v4812_v24 = vpop.f32.mrf.mxu0 }
 0x7a4   : > { %v4845_v6 = vsub.f32 0.0, %v4827_v38 }
 0x7a6   : > { %v5803_v59 = vpop.eup %5802  ;;  %v4854_v13 = vmul.f32 1.442695, %v4845_v6  ;;  %v4910_v6 = vpop.permute.xlu0 %4909 }
 0x7a7   : > { %v4868_v23 = vadd.f32 1.0, %v5803_v59 }
 0x7a8   : > { %5804 = vpow2.f32 %v4854_v13  ;;  %v4813_v13 = vadd.f32 %v8208_v56, %v4812_v24 }
 0x7a9   : > { %5806 = vrcp.f32 %v4868_v23 }
 0x7ae   : > { %v5805_v0 = vpop.eup %5804  ;;  %v4925_v28 = vpop.permute.xlu0 %4924 }
 0x7af   : > { %v5807_v62 = vpop.eup %5806  ;;  %v4869_v58 = vadd.f32 1.0, %v5805_v0 }
 0x7b0   : > { %v4927_v60 = vsel %vm4886_vm3, %v4890_v17, %v5807_v62 }
 0x7b1   : > { %v4938_v9 = vsel %vm8217_vm4, %v4825_v4, %v4927_v60  ;;  %5808 = vrcp.f32 %v4869_v58 }
 0x7b2   : > { %4946 = vst [vmem:[%s8226_s29] sm:$0xff] %v4938_v9 }
 0x7b7   : > { %v5809_v42 = vpop.eup %5808 }
 0x7b8   : > { %v4928_v41 = vsel %vm4886_vm3, %v4895_v51, %v5809_v42  ;;  %v4915_v42 = vpop.permute.xlu2 %4914 }
 0x7b9   : > { %v4939_v43 = vsel %vm8217_vm4, %v4827_v38, %v4928_v41 }
 0x7ba   : > { %4947 = vst [vmem:[%s8226_s29 + $0x8] sm:$0xff] %v4939_v43 }
 0x7c7   : > { %v4829_v48 = vpop.f32.mrf.mxu1 }
 0x7c8   : > { %v4830_v31 = vadd.f32 %v4829_v48, %v4801_v15  ;;  %v4920_v15 = vpop.permute.xlu1 %4919 }
 0x7ca   : > { %v4846_v18 = vsub.f32 0.0, %v4830_v31 }
 0x7cc   : > { %v4856_v11 = vmul.f32 1.442695, %v4846_v18 }
 0x7ce   : > { %5810 = vpow2.f32 %v4856_v11 }
 0x7cf   : > { %v4831_v14 = vpop.f32.mrf.mxu1 }
 0x7d0   : > { %v4832_v39 = vadd.f32 %v4831_v14, %v4803_v22 }
 0x7d2   : > { %v4847_v36 = vsub.f32 0.0, %v4832_v39 }
 0x7d4   : > { %v5811_v33 = vpop.eup %5810  ;;  %v4858_v34 = vmul.f32 1.442695, %v4847_v36 }
 0x7d5   : > { %v4870_v47 = vadd.f32 1.0, %v5811_v33 }
 0x7d6   : > { %5812 = vpow2.f32 %v4858_v34 }
 0x7d7   : > { %5814 = vrcp.f32 %v4870_v47  ;;  %v4834_v63 = vpop.f32.mrf.mxu1 }
 0x7d8   : > { %v4835_v32 = vadd.f32 %v4834_v63, %v4806_v27 }
 0x7da   : > { %v4848_v26 = vsub.f32 0.0, %v4835_v32 }
 0x7dc   : > { %v5813_v53 = vpop.eup %5812  ;;  %v4860_v12 = vmul.f32 1.442695, %v4848_v26 }
 0x7dd   : > { %v5815_v16 = vpop.eup %5814  ;;  %v4871_v54 = vadd.f32 1.0, %v5813_v53 }
 0x7de   : > { %v4929_v37 = vsel %vm4886_vm3, %v4900_v25, %v5815_v16  ;;  %5816 = vpow2.f32 %v4860_v12 }
 0x7df   : > { %v4940_v46 = vsel %vm8217_vm4, %v4830_v31, %v4929_v37  ;;  %5818 = vrcp.f32 %v4871_v54  ;;  %v4836_v1 = vpop.f32.mrf.mxu1 }
 0x7e0   : > { %4948 = vst [vmem:[%s8226_s29 + $0x10] sm:$0xff] %v4940_v46  ;;  %v4837_v45 = vadd.f32 %v4836_v1, %v4808_v40 }
 0x7e2   : > { %v4849_v2 = vsub.f32 0.0, %v4837_v45 }
 0x7e4   : > { %v5817_v57 = vpop.eup %5816  ;;  %v4862_v30 = vmul.f32 1.442695, %v4849_v2 }
 0x7e5   : > { %v5819_v5 = vpop.eup %5818  ;;  %v4872_v55 = vadd.f32 1.0, %v5817_v57 }
 0x7e6   : > { %v4930_v52 = vsel %vm4886_vm3, %v4905_v7, %v5819_v5  ;;  %5820 = vpow2.f32 %v4862_v30 }
 0x7e7   : > { %v4941_v4 = vsel %vm8217_vm4, %v4832_v39, %v4930_v52  ;;  %5822 = vrcp.f32 %v4872_v55  ;;  %v4839_v29 = vpop.f32.mrf.mxu1 }
 0x7e8   : > { %4949 = vst [vmem:[%s8226_s29 + $0x18] sm:$0xff] %v4941_v4  ;;  %v4840_v44 = vadd.f32 %v4839_v29, %v4811_v21 }
 0x7ea   : > { %v4850_v20 = vsub.f32 0.0, %v4840_v44 }
 0x7ec   : > { %v5821_v49 = vpop.eup %5820  ;;  %v4864_v38 = vmul.f32 1.442695, %v4850_v20 }
 0x7ed   : > { %v5823_v10 = vpop.eup %5822  ;;  %v4873_v59 = vadd.f32 1.0, %v5821_v49 }
 0x7ee   : > { %v4931_v23 = vsel %vm4886_vm3, %v4910_v6, %v5823_v10  ;;  %5824 = vpow2.f32 %v4864_v38 }
 0x7ef   : > { %v4942_v0 = vsel %vm8217_vm4, %v4835_v32, %v4931_v23  ;;  %5826 = vrcp.f32 %v4873_v59  ;;  %v4841_v62 = vpop.f32.mrf.mxu1 }
 0x7f0   : > { %4950 = vst [vmem:[%s8226_s29 + $0x20] sm:$0xff] %v4942_v0  ;;  %v4842_v17 = vadd.f32 %v4841_v62, %v4813_v13 }
 0x7f2   : > { %v4851_v58 = vsub.f32 0.0, %v4842_v17 }
 0x7f4   : > { %v5825_v60 = vpop.eup %5824  ;;  %v4866_v9 = vmul.f32 1.442695, %v4851_v58 }
 0x7f5   : > { %v5827_v50 = vpop.eup %5826  ;;  %v4874_v51 = vadd.f32 1.0, %v5825_v60 }
 0x7f6   : > { %v4932_v56 = vsel %vm4886_vm3, %v4915_v42, %v5827_v50  ;;  %5828 = vpow2.f32 %v4866_v9 }
 0x7f7   : > { %v4943_v41 = vsel %vm8217_vm4, %v4837_v45, %v4932_v56  ;;  %5830 = vrcp.f32 %v4874_v51 }
 0x7f8   : > { %4951 = vst [vmem:[%s8226_s29 + $0x28] sm:$0xff] %v4943_v41 }
 0x7fc   : > { %v5829_v43 = vpop.eup %5828 }
 0x7fd   : > { %v5831_v35 = vpop.eup %5830  ;;  %v4875_v48 = vadd.f32 1.0, %v5829_v43 }
 0x7fe   : > { %v4933_v31 = vsel %vm4886_vm3, %v4920_v15, %v5831_v35 }
 0x7ff   : > { %v4944_v18 = vsel %vm8217_vm4, %v4840_v44, %v4933_v31  ;;  %5832 = vrcp.f32 %v4875_v48 }
 0x800   : > { %4952 = vst [vmem:[%s8226_s29 + $0x30] sm:$0xff] %v4944_v18 }
 0x805   : > { %v5833_v11 = vpop.eup %5832 }
 0x806   : > { %v4934_v22 = vsel %vm4886_vm3, %v4925_v28, %v5833_v11 }
 0x807   : > { %v4945_v14 = vsel %vm8217_vm4, %v4842_v17, %v4934_v22 }
 0x808   : > { %4953 = vst [vmem:[%s8226_s29 + $0x38] sm:$0xff] %v4945_v14 }
 0x809 PF: > { %s26_s15 = sadd.s32 1, %s5840_s15  }
 0x80a   : > { %p23_p4 = scmp.ge.s32.totalorder %s26_s15, 4  }
 0x80c   :  { %25 = sbr.rel (!%p23_p4) target bundleno = 3 (0x3), region = 115 }

</bundles_post_ra>
